<compile_context>
chip_gen: v5e
topology: v5e:2x2
jax: 0.10.0
libtpu: 0.0.40
codegen_flags: <defaults>
</compile_context>

<pallas_src>
import math
from functools import partial

import jax
import jax.numpy as jnp
from jax.experimental import pallas as pl
from jax.experimental.pallas import tpu as pltpu


def _round_up(n, m):
    return ((n + m - 1) // m) * m


def _masked_instance_norm(y, n_valid_rows, eps):
    """InstanceNorm over the row (pixel) axis of a (rows_p, c_p) f32 tile, excluding
    zero-padded pixel rows from the statistics. Biased variance, no affine."""
    rows = y.shape[0]
    if n_valid_rows == rows:
        mean = jnp.mean(y, axis=0, keepdims=True)
        cen = y - mean
        var = jnp.mean(cen * cen, axis=0, keepdims=True)
    else:
        row = jax.lax.broadcasted_iota(jnp.int32, y.shape, 0)
        m = (row < n_valid_rows).astype(jnp.float32)
        inv_n = 1.0 / float(n_valid_rows)
        mean = jnp.sum(y * m, axis=0, keepdims=True) * inv_n
        cen = (y - mean) * m
        var = jnp.sum(cen * cen, axis=0, keepdims=True) * inv_n
    return (y - mean) * jax.lax.rsqrt(var + eps)


def conv_layer_kernel(x_ref, w_ref, b_ref, o_ref, *,
                      n_valid_rows, do_norm, neg_slope, eps):
    """One image: (rows_p, K) @ (K, Cp) + bias [+ InstanceNorm] [+ LeakyReLU]."""
    y = jnp.dot(x_ref[...], w_ref[...], preferred_element_type=jnp.float32)
    y = y + b_ref[...]
    if do_norm:
        y = _masked_instance_norm(y, n_valid_rows, eps)
    if neg_slope is not None:
        y = jnp.where(y >= 0, y, y * neg_slope)
    o_ref[...] = y.astype(o_ref.dtype)


def conv_final_fused_kernel(x_ref, w_ref, b_ref, m_ref, o_ref, *,
                            n_valid_rows, neg_slope, eps, inv_npix):
    """Layer 4 (conv + InstanceNorm + LeakyReLU) with the trailing Cout=1 conv and
    the global average pool folded into the epilogue: out = sum(y * M) / npix_final."""
    y = jnp.dot(x_ref[...], w_ref[...], preferred_element_type=jnp.float32)
    y = y + b_ref[...]
    y = _masked_instance_norm(y, n_valid_rows, eps)
    y = jnp.where(y >= 0, y, y * neg_slope)
    # M is zero on padded rows/channels, so padded garbage contributes nothing.
    s = jnp.sum(y * m_ref[...], axis=1, keepdims=True)   # lane reduce    -> (rows_p, 1)
    s = jnp.sum(s, axis=0, keepdims=True)                 # sublane reduce -> (1, 1)
    o_ref[...] = s * inv_npix


def _im2col_nhwc(x, kh, kw, stride, padding):
    """x: (B, H, W, C) -> patches (B, Ho*Wo, kh*kw*C) with K ordered (kh, kw, C)."""
    B, H, W, C = x.shape
    Ho = (H + 2 * padding - kh) // stride + 1
    Wo = (W + 2 * padding - kw) // stride + 1
    xpad = jnp.pad(x, ((0, 0), (padding, padding), (padding, padding), (0, 0)))
    cols = []
    for i in range(kh):
        for j in range(kw):
            cols.append(xpad[:, i:i + stride * (Ho - 1) + 1:stride,
                             j:j + stride * (Wo - 1) + 1:stride, :])
    patches = jnp.stack(cols, axis=3)                       # (B, Ho, Wo, kh*kw, C)
    return patches.reshape(B, Ho * Wo, kh * kw * C), Ho, Wo


def _fold_final_conv(wf, Hi, Wi, padding):
    """Effective per-input-position weight M (Hi, Wi, C): the sum of a stride-1, Cout=1
    conv (kernel wf (1,C,kh,kw), zero padding) over ALL of its output pixels equals
    sum(x * M). Returns (M, number_of_conv_output_pixels)."""
    _, C, kh, kw = wf.shape
    Ho = Hi + 2 * padding - kh + 1
    Wo = Wi + 2 * padding - kw + 1
    w = jnp.transpose(wf[0], (1, 2, 0)).astype(jnp.float32)   # (kh, kw, C)
    M = jnp.zeros((Hi, Wi, C), jnp.float32)
    for oi in range(Ho):
        for oj in range(Wo):
            p0, q0 = oi - padding, oj - padding
            i_lo, i_hi = max(0, -p0), min(kh, Hi - p0)
            j_lo, j_hi = max(0, -q0), min(kw, Wi - q0)
            M = M.at[p0 + i_lo:p0 + i_hi, q0 + j_lo:q0 + j_hi, :].add(
                w[i_lo:i_hi, j_lo:j_hi, :])
    return M, Ho * Wo


def conv_layer_pallas(x, w, b, *, stride, padding, do_norm, neg_slope,
                      final_fold=None):
    """Conv2d (PyTorch cross-correlation, weight (Cout,Cin,kh,kw)) as a fused im2col GEMM
    Pallas kernel. x: (B, H, W, Cin) NHWC (f32 or bf16). Returns (B, Ho, Wo, Cout) bf16,
    or (B, 1) f32 when final_fold=(w_final, b_final) fuses the trailing Cout=1 conv +
    global average pool into the epilogue."""
    B, H, W, Cin = x.shape
    Cout, _, kh, kw = w.shape
    K = Cin * kh * kw

    patches, Ho, Wo = _im2col_nhwc(x, kh, kw, stride, padding)
    n_pix = Ho * Wo

    rows_p = _round_up(n_pix, 8)
    k_p = _round_up(K, 128)
    c_p = _round_up(Cout, 128)

    patches_p = jnp.pad(patches, ((0, 0), (0, rows_p - n_pix), (0, k_p - K))
                        ).astype(jnp.bfloat16)
    wt = jnp.transpose(w, (2, 3, 1, 0)).reshape(K, Cout)      # (K, Cout), K=(kh,kw,Cin)
    wt_p = jnp.pad(wt, ((0, k_p - K), (0, c_p - Cout))).astype(jnp.bfloat16)
    b_p = jnp.pad(b.reshape(1, Cout), ((0, 0), (0, c_p - Cout))).astype(jnp.float32)

    if final_fold is None:
        kernel = partial(conv_layer_kernel, n_valid_rows=n_pix, do_norm=do_norm,
                         neg_slope=neg_slope, eps=1e-5)
        out = pl.pallas_call(
            kernel,
            out_shape=jax.ShapeDtypeStruct((B, rows_p, c_p), jnp.bfloat16),
            grid_spec=pltpu.PrefetchScalarGridSpec(
                num_scalar_prefetch=0,
                grid=(B,),
                in_specs=[
                    pl.BlockSpec((None, rows_p, k_p), lambda bi: (bi, 0, 0)),  # patches
                    pl.BlockSpec((k_p, c_p), lambda bi: (0, 0)),               # weights (resident)
                    pl.BlockSpec((1, c_p), lambda bi: (0, 0)),                 # bias
                ],
                out_specs=pl.BlockSpec((None, rows_p, c_p), lambda bi: (bi, 0, 0)),
            ),
            compiler_params=pltpu.CompilerParams(
                dimension_semantics=("parallel",)),
        )(patches_p, wt_p, b_p)
        return out[:, :n_pix, :Cout].reshape(B, Ho, Wo, Cout)

    # Fused tail: this layer's conv(+norm+relu), then Cout=1 final conv + global avg pool.
    wf, bf = final_fold
    M, npix_f = _fold_final_conv(wf, Ho, Wo, padding=1)
    M_p = jnp.pad(M.reshape(n_pix, Cout),
                  ((0, rows_p - n_pix), (0, c_p - Cout))).astype(jnp.float32)
    kernel = partial(conv_final_fused_kernel, n_valid_rows=n_pix,
                     neg_slope=neg_slope, eps=1e-5, inv_npix=1.0 / npix_f)
    out = pl.pallas_call(
        kernel,
        out_shape=jax.ShapeDtypeStruct((B, 1, 1), jnp.float32),
        grid_spec=pltpu.PrefetchScalarGridSpec(
            num_scalar_prefetch=0,
            grid=(B,),
            in_specs=[
                pl.BlockSpec((None, rows_p, k_p), lambda bi: (bi, 0, 0)),  # patches
                pl.BlockSpec((k_p, c_p), lambda bi: (0, 0)),               # layer-4 weights
                pl.BlockSpec((1, c_p), lambda bi: (0, 0)),                 # layer-4 bias
                pl.BlockSpec((rows_p, c_p), lambda bi: (0, 0)),            # folded final weight
            ],
            out_specs=pl.BlockSpec((None, 1, 1), lambda bi: (bi, 0, 0)),
        ),
        compiler_params=pltpu.CompilerParams(
            dimension_semantics=("parallel",)),
    )(patches_p, wt_p, b_p, M_p)
    return out.reshape(B, 1) + bf.reshape(1, 1).astype(jnp.float32)


@jax.jit
def discriminator_forward(params, x):
    (w1, b1), (w2, b2), (w3, b3), (w4, b4), (wf, bf) = params
    h = jnp.transpose(x, (0, 2, 3, 1))   # NCHW -> NHWC once; stays NHWC between layers
    h = conv_layer_pallas(h, w1, b1, stride=2, padding=1, do_norm=False, neg_slope=0.2)
    h = conv_layer_pallas(h, w2, b2, stride=2, padding=1, do_norm=True, neg_slope=0.2)
    h = conv_layer_pallas(h, w3, b3, stride=2, padding=1, do_norm=True, neg_slope=0.2)
    # Layer 4 conv+norm+relu with the final Cout=1 conv + global avg pool fused in.
    return conv_layer_pallas(h, w4, b4, stride=1, padding=1, do_norm=True,
                             neg_slope=0.2, final_fold=(wf, bf))


# ----------------------------- pure-JAX reference -----------------------------
def _conv_ref(x, w, b, stride, padding):
    y = jax.lax.conv_general_dilated(
        x, w, window_strides=(stride, stride),
        padding=((padding, padding), (padding, padding)),
        dimension_numbers=("NCHW", "OIHW", "NCHW"))
    return y + b.reshape(1, -1, 1, 1)


def _instance_norm_ref(x, eps=1e-5):
    mean = jnp.mean(x, axis=(2, 3), keepdims=True)
    var = jnp.mean((x - mean) ** 2, axis=(2, 3), keepdims=True)
    return (x - mean) * jax.lax.rsqrt(var + eps)


def _leaky_relu(x, s):
    return jnp.where(x >= 0, x, s * x)


def reference_forward(params, x):
    (w1, b1), (w2, b2), (w3, b3), (w4, b4), (wf, bf) = params
    h = _leaky_relu(_conv_ref(x, w1, b1, 2, 1), 0.2)
    h = _leaky_relu(_instance_norm_ref(_conv_ref(h, w2, b2, 2, 1)), 0.2)
    h = _leaky_relu(_instance_norm_ref(_conv_ref(h, w3, b3, 2, 1)), 0.2)
    h = _leaky_relu(_instance_norm_ref(_conv_ref(h, w4, b4, 1, 1)), 0.2)
    h = _conv_ref(h, wf, bf, 1, 1)
    return jnp.mean(h, axis=(2, 3))


# ------------------------------------ main ------------------------------------
if __name__ == "__main__":
    batch, input_nc, spatial = 2, 3, 32   # 32 -> 16 -> 8 -> 4 -> 3 -> (final conv 2x2) -> avgpool

    key = jax.random.PRNGKey(0)
    keys = jax.random.split(key, 11)
    x = jax.random.normal(keys[0], (batch, input_nc, spatial, spatial), jnp.float32)

    def conv_params(kw_key, kb_key, cin, cout, ksz=4):
        bound = 1.0 / math.sqrt(cin * ksz * ksz)
        w = jax.random.uniform(kw_key, (cout, cin, ksz, ksz), jnp.float32, -bound, bound)
        b = jax.random.uniform(kb_key, (cout,), jnp.float32, -bound, bound)
        return w, b

    params = (
        conv_params(keys[1], keys[2], input_nc, 64),
        conv_params(keys[3], keys[4], 64, 128),
        conv_params(keys[5], keys[6], 128, 256),
        conv_params(keys[7], keys[8], 256, 512),
        conv_params(keys[9], keys[10], 512, 1),
    )

    out = discriminator_forward(params, x)
    out = jax.block_until_ready(out)

    ref = reference_forward(params, x)
    assert out.shape == (batch, 1), out.shape
    # bf16 patches/weights with f32 accumulation -> looser tolerance vs the f32 reference.
    assert jnp.allclose(out, ref, atol=5e-2, rtol=5e-2), "mismatch vs reference"

    print("KERNEL_OK")
</pallas_src>

<mosaic_0001>
module attributes {stable_mosaic.version = 11 : i64} {
  func.func @conv_layer_kernel(%arg0: i32, %arg1: memref<1x256x128xbf16, #tpu.memory_space<vmem>>, %arg2: memref<128x128xbf16, #tpu.memory_space<vmem>>, %arg3: memref<1x128xf32, #tpu.memory_space<vmem>>, %arg4: memref<1x256x128xbf16, #tpu.memory_space<vmem>>) attributes {dimension_semantics = [#tpu.dimension_semantics<parallel>], iteration_bounds = array<i64: 2>, scalar_prefetch = 0 : i64, scratch_operands = 0 : i64, tpu.core_type = #tpu.core_type<tc>, window_params = [{transform_indices = @transform_0, window_bounds = array<i64: 1, 256, 128>}, {pipeline_mode = #tpu.pipeline_mode<synchronous>, transform_indices = @transform_1, window_bounds = array<i64: 128, 128>}, {pipeline_mode = #tpu.pipeline_mode<synchronous>, transform_indices = @transform_2, window_bounds = array<i64: 1, 128>}, {transform_indices = @transform_3, window_bounds = array<i64: 1, 256, 128>}]} {
    %c0 = arith.constant 0 : index
    %c0_0 = arith.constant 0 : index
    %c0_1 = arith.constant 0 : index
    %0 = vector.load %arg1[%c0, %c0_0, %c0_1] : memref<1x256x128xbf16, #tpu.memory_space<vmem>>, vector<1x256x128xbf16>
    %1 = vector.shape_cast %0 : vector<1x256x128xbf16> to vector<256x128xbf16>
    %c0_2 = arith.constant 0 : index
    %c0_3 = arith.constant 0 : index
    %2 = vector.load %arg2[%c0_2, %c0_3] : memref<128x128xbf16, #tpu.memory_space<vmem>>, vector<128x128xbf16>
    %cst = arith.constant dense<0.000000e+00> : vector<256x128xf32>
    %3 = tpu.matmul %1, %2, %cst {dimension_numbers = #tpu.dot_dimension_numbers<[1], [0], [0], [1], [0, 0, 1, 1], [], []>} : vector<256x128xbf16>, vector<128x128xbf16>, vector<256x128xf32> -> vector<256x128xf32>
    %c0_4 = arith.constant 0 : index
    %c0_5 = arith.constant 0 : index
    %4 = vector.load %arg3[%c0_4, %c0_5] : memref<1x128xf32, #tpu.memory_space<vmem>>, vector<1x128xf32>
    %5 = vector.broadcast %4 : vector<1x128xf32> to vector<256x128xf32>
    %6 = arith.addf %3, %5 : vector<256x128xf32>
    %cst_6 = arith.constant 0.000000e+00 : f32
    %7 = vector.broadcast %cst_6 : f32 to vector<256x128xf32>
    %8 = arith.cmpf oge, %6, %7 : vector<256x128xf32>
    %cst_7 = arith.constant 2.000000e-01 : f32
    %9 = vector.broadcast %cst_7 : f32 to vector<256x128xf32>
    %10 = arith.mulf %6, %9 : vector<256x128xf32>
    %11 = arith.select %8, %6, %10 : vector<256x128xi1>, vector<256x128xf32>
    %12 = arith.truncf %11 : vector<256x128xf32> to vector<256x128xbf16>
    %c0_8 = arith.constant 0 : index
    %c0_9 = arith.constant 0 : index
    %c0_10 = arith.constant 0 : index
    %13 = vector.load %arg4[%c0_8, %c0_9, %c0_10] : memref<1x256x128xbf16, #tpu.memory_space<vmem>>, vector<1x256x128xbf16>
    %14 = vector.shape_cast %13 : vector<1x256x128xbf16> to vector<256x128xbf16>
    %15 = vector.shape_cast %12 : vector<256x128xbf16> to vector<1x256x128xbf16>
    tpu.vector_store %arg4[%c0_8, %c0_9, %c0_10], %15 {strides = array<i32>} : memref<1x256x128xbf16, #tpu.memory_space<vmem>>, vector<1x256x128xbf16>,
    return
  }
  func.func @transform_0(%arg0: i32) -> (i32, i32, i32) {
    %c0_i32 = arith.constant 0 : i32
    %c0_i32_0 = arith.constant 0 : i32
    %c0_i32_1 = arith.constant 0 : i32
    return %arg0, %c0_i32, %c0_i32_0 : i32, i32, i32
  }
  func.func @transform_1(%arg0: i32) -> (i32, i32) {
    %c0_i32 = arith.constant 0 : i32
    %c0_i32_0 = arith.constant 0 : i32
    %c0_i32_1 = arith.constant 0 : i32
    return %c0_i32, %c0_i32_0 : i32, i32
  }
  func.func @transform_2(%arg0: i32) -> (i32, i32) {
    %c0_i32 = arith.constant 0 : i32
    %c0_i32_0 = arith.constant 0 : i32
    %c0_i32_1 = arith.constant 0 : i32
    return %c0_i32, %c0_i32_0 : i32, i32
  }
  func.func @transform_3(%arg0: i32) -> (i32, i32, i32) {
    %c0_i32 = arith.constant 0 : i32
    %c0_i32_0 = arith.constant 0 : i32
    %c0_i32_1 = arith.constant 0 : i32
    return %arg0, %c0_i32, %c0_i32_0 : i32, i32, i32
  }
}

module attributes {stable_mosaic.version = 11 : i64} {
  func.func @conv_layer_kernel(%arg0: i32, %arg1: memref<1x64x1024xbf16, #tpu.memory_space<vmem>>, %arg2: memref<1024x128xbf16, #tpu.memory_space<vmem>>, %arg3: memref<1x128xf32, #tpu.memory_space<vmem>>, %arg4: memref<1x64x128xbf16, #tpu.memory_space<vmem>>) attributes {dimension_semantics = [#tpu.dimension_semantics<parallel>], iteration_bounds = array<i64: 2>, scalar_prefetch = 0 : i64, scratch_operands = 0 : i64, tpu.core_type = #tpu.core_type<tc>, window_params = [{transform_indices = @transform_0, window_bounds = array<i64: 1, 64, 1024>}, {pipeline_mode = #tpu.pipeline_mode<synchronous>, transform_indices = @transform_1, window_bounds = array<i64: 1024, 128>}, {pipeline_mode = #tpu.pipeline_mode<synchronous>, transform_indices = @transform_2, window_bounds = array<i64: 1, 128>}, {transform_indices = @transform_3, window_bounds = array<i64: 1, 64, 128>}]} {
    %c0 = arith.constant 0 : index
    %c0_0 = arith.constant 0 : index
    %c0_1 = arith.constant 0 : index
    %0 = vector.load %arg1[%c0, %c0_0, %c0_1] : memref<1x64x1024xbf16, #tpu.memory_space<vmem>>, vector<1x64x1024xbf16>
    %1 = vector.shape_cast %0 : vector<1x64x1024xbf16> to vector<64x1024xbf16>
    %c0_2 = arith.constant 0 : index
    %c0_3 = arith.constant 0 : index
    %2 = vector.load %arg2[%c0_2, %c0_3] : memref<1024x128xbf16, #tpu.memory_space<vmem>>, vector<1024x128xbf16>
    %cst = arith.constant dense<0.000000e+00> : vector<64x128xf32>
    %3 = tpu.matmul %1, %2, %cst {dimension_numbers = #tpu.dot_dimension_numbers<[1], [0], [0], [1], [0, 0, 1, 1], [], []>} : vector<64x1024xbf16>, vector<1024x128xbf16>, vector<64x128xf32> -> vector<64x128xf32>
    %c0_4 = arith.constant 0 : index
    %c0_5 = arith.constant 0 : index
    %4 = vector.load %arg3[%c0_4, %c0_5] : memref<1x128xf32, #tpu.memory_space<vmem>>, vector<1x128xf32>
    %5 = vector.broadcast %4 : vector<1x128xf32> to vector<64x128xf32>
    %6 = arith.addf %3, %5 : vector<64x128xf32>
    %cst_6 = arith.constant dense<0.000000e+00> : vector<128xf32>
    %7 = vector.multi_reduction <add>, %6, %cst_6 [0] : vector<64x128xf32> to vector<128xf32>
    %8 = vector.shape_cast %7 : vector<128xf32> to vector<1x128xf32>
    %cst_7 = arith.constant 6.400000e+01 : f32
    %9 = vector.broadcast %cst_7 : f32 to vector<1x128xf32>
    %10 = arith.divf %8, %9 : vector<1x128xf32>
    %11 = vector.broadcast %10 : vector<1x128xf32> to vector<64x128xf32>
    %12 = arith.subf %6, %11 : vector<64x128xf32>
    %13 = arith.mulf %12, %12 : vector<64x128xf32>
    %cst_8 = arith.constant dense<0.000000e+00> : vector<128xf32>
    %14 = vector.multi_reduction <add>, %13, %cst_8 [0] : vector<64x128xf32> to vector<128xf32>
    %15 = vector.shape_cast %14 : vector<128xf32> to vector<1x128xf32>
    %cst_9 = arith.constant 6.400000e+01 : f32
    %16 = vector.broadcast %cst_9 : f32 to vector<1x128xf32>
    %17 = arith.divf %15, %16 : vector<1x128xf32>
    %18 = vector.broadcast %10 : vector<1x128xf32> to vector<64x128xf32>
    %19 = arith.subf %6, %18 : vector<64x128xf32>
    %cst_10 = arith.constant 9.99999974E-6 : f32
    %20 = vector.broadcast %cst_10 : f32 to vector<1x128xf32>
    %21 = arith.addf %17, %20 : vector<1x128xf32>
    %22 = math.rsqrt %21 : vector<1x128xf32>
    %23 = vector.broadcast %22 : vector<1x128xf32> to vector<64x128xf32>
    %24 = arith.mulf %19, %23 : vector<64x128xf32>
    %cst_11 = arith.constant 0.000000e+00 : f32
    %25 = vector.broadcast %cst_11 : f32 to vector<64x128xf32>
    %26 = arith.cmpf oge, %24, %25 : vector<64x128xf32>
    %cst_12 = arith.constant 2.000000e-01 : f32
    %27 = vector.broadcast %cst_12 : f32 to vector<64x128xf32>
    %28 = arith.mulf %24, %27 : vector<64x128xf32>
    %29 = arith.select %26, %24, %28 : vector<64x128xi1>, vector<64x128xf32>
    %30 = arith.truncf %29 : vector<64x128xf32> to vector<64x128xbf16>
    %c0_13 = arith.constant 0 : index
    %c0_14 = arith.constant 0 : index
    %c0_15 = arith.constant 0 : index
    %31 = vector.load %arg4[%c0_13, %c0_14, %c0_15] : memref<1x64x128xbf16, #tpu.memory_space<vmem>>, vector<1x64x128xbf16>
    %32 = vector.shape_cast %31 : vector<1x64x128xbf16> to vector<64x128xbf16>
    %33 = vector.shape_cast %30 : vector<64x128xbf16> to vector<1x64x128xbf16>
    tpu.vector_store %arg4[%c0_13, %c0_14, %c0_15], %33 {strides = array<i32>} : memref<1x64x128xbf16, #tpu.memory_space<vmem>>, vector<1x64x128xbf16>,
    return
  }
  func.func @transform_0(%arg0: i32) -> (i32, i32, i32) {
    %c0_i32 = arith.constant 0 : i32
    %c0_i32_0 = arith.constant 0 : i32
    %c0_i32_1 = arith.constant 0 : i32
    return %arg0, %c0_i32, %c0_i32_0 : i32, i32, i32
  }
  func.func @transform_1(%arg0: i32) -> (i32, i32) {
    %c0_i32 = arith.constant 0 : i32
    %c0_i32_0 = arith.constant 0 : i32
    %c0_i32_1 = arith.constant 0 : i32
    return %c0_i32, %c0_i32_0 : i32, i32
  }
  func.func @transform_2(%arg0: i32) -> (i32, i32) {
    %c0_i32 = arith.constant 0 : i32
    %c0_i32_0 = arith.constant 0 : i32
    %c0_i32_1 = arith.constant 0 : i32
    return %c0_i32, %c0_i32_0 : i32, i32
  }
  func.func @transform_3(%arg0: i32) -> (i32, i32, i32) {
    %c0_i32 = arith.constant 0 : i32
    %c0_i32_0 = arith.constant 0 : i32
    %c0_i32_1 = arith.constant 0 : i32
    return %arg0, %c0_i32, %c0_i32_0 : i32, i32, i32
  }
}

module attributes {stable_mosaic.version = 11 : i64} {
  func.func @conv_layer_kernel(%arg0: i32, %arg1: memref<1x16x2048xbf16, #tpu.memory_space<vmem>>, %arg2: memref<2048x256xbf16, #tpu.memory_space<vmem>>, %arg3: memref<1x256xf32, #tpu.memory_space<vmem>>, %arg4: memref<1x16x256xbf16, #tpu.memory_space<vmem>>) attributes {dimension_semantics = [#tpu.dimension_semantics<parallel>], iteration_bounds = array<i64: 2>, scalar_prefetch = 0 : i64, scratch_operands = 0 : i64, tpu.core_type = #tpu.core_type<tc>, window_params = [{transform_indices = @transform_0, window_bounds = array<i64: 1, 16, 2048>}, {pipeline_mode = #tpu.pipeline_mode<synchronous>, transform_indices = @transform_1, window_bounds = array<i64: 2048, 256>}, {pipeline_mode = #tpu.pipeline_mode<synchronous>, transform_indices = @transform_2, window_bounds = array<i64: 1, 256>}, {transform_indices = @transform_3, window_bounds = array<i64: 1, 16, 256>}]} {
    %c0 = arith.constant 0 : index
    %c0_0 = arith.constant 0 : index
    %c0_1 = arith.constant 0 : index
    %0 = vector.load %arg1[%c0, %c0_0, %c0_1] : memref<1x16x2048xbf16, #tpu.memory_space<vmem>>, vector<1x16x2048xbf16>
    %1 = vector.shape_cast %0 : vector<1x16x2048xbf16> to vector<16x2048xbf16>
    %c0_2 = arith.constant 0 : index
    %c0_3 = arith.constant 0 : index
    %2 = vector.load %arg2[%c0_2, %c0_3] : memref<2048x256xbf16, #tpu.memory_space<vmem>>, vector<2048x256xbf16>
    %cst = arith.constant dense<0.000000e+00> : vector<16x256xf32>
    %3 = tpu.matmul %1, %2, %cst {dimension_numbers = #tpu.dot_dimension_numbers<[1], [0], [0], [1], [0, 0, 1, 1], [], []>} : vector<16x2048xbf16>, vector<2048x256xbf16>, vector<16x256xf32> -> vector<16x256xf32>
    %c0_4 = arith.constant 0 : index
    %c0_5 = arith.constant 0 : index
    %4 = vector.load %arg3[%c0_4, %c0_5] : memref<1x256xf32, #tpu.memory_space<vmem>>, vector<1x256xf32>
    %5 = vector.broadcast %4 : vector<1x256xf32> to vector<16x256xf32>
    %6 = arith.addf %3, %5 : vector<16x256xf32>
    %cst_6 = arith.constant dense<0.000000e+00> : vector<256xf32>
    %7 = vector.multi_reduction <add>, %6, %cst_6 [0] : vector<16x256xf32> to vector<256xf32>
    %8 = vector.shape_cast %7 : vector<256xf32> to vector<1x256xf32>
    %cst_7 = arith.constant 1.600000e+01 : f32
    %9 = vector.broadcast %cst_7 : f32 to vector<1x256xf32>
    %10 = arith.divf %8, %9 : vector<1x256xf32>
    %11 = vector.broadcast %10 : vector<1x256xf32> to vector<16x256xf32>
    %12 = arith.subf %6, %11 : vector<16x256xf32>
    %13 = arith.mulf %12, %12 : vector<16x256xf32>
    %cst_8 = arith.constant dense<0.000000e+00> : vector<256xf32>
    %14 = vector.multi_reduction <add>, %13, %cst_8 [0] : vector<16x256xf32> to vector<256xf32>
    %15 = vector.shape_cast %14 : vector<256xf32> to vector<1x256xf32>
    %cst_9 = arith.constant 1.600000e+01 : f32
    %16 = vector.broadcast %cst_9 : f32 to vector<1x256xf32>
    %17 = arith.divf %15, %16 : vector<1x256xf32>
    %18 = vector.broadcast %10 : vector<1x256xf32> to vector<16x256xf32>
    %19 = arith.subf %6, %18 : vector<16x256xf32>
    %cst_10 = arith.constant 9.99999974E-6 : f32
    %20 = vector.broadcast %cst_10 : f32 to vector<1x256xf32>
    %21 = arith.addf %17, %20 : vector<1x256xf32>
    %22 = math.rsqrt %21 : vector<1x256xf32>
    %23 = vector.broadcast %22 : vector<1x256xf32> to vector<16x256xf32>
    %24 = arith.mulf %19, %23 : vector<16x256xf32>
    %cst_11 = arith.constant 0.000000e+00 : f32
    %25 = vector.broadcast %cst_11 : f32 to vector<16x256xf32>
    %26 = arith.cmpf oge, %24, %25 : vector<16x256xf32>
    %cst_12 = arith.constant 2.000000e-01 : f32
    %27 = vector.broadcast %cst_12 : f32 to vector<16x256xf32>
    %28 = arith.mulf %24, %27 : vector<16x256xf32>
    %29 = arith.select %26, %24, %28 : vector<16x256xi1>, vector<16x256xf32>
    %30 = arith.truncf %29 : vector<16x256xf32> to vector<16x256xbf16>
    %c0_13 = arith.constant 0 : index
    %c0_14 = arith.constant 0 : index
    %c0_15 = arith.constant 0 : index
    %31 = vector.load %arg4[%c0_13, %c0_14, %c0_15] : memref<1x16x256xbf16, #tpu.memory_space<vmem>>, vector<1x16x256xbf16>
    %32 = vector.shape_cast %31 : vector<1x16x256xbf16> to vector<16x256xbf16>
    %33 = vector.shape_cast %30 : vector<16x256xbf16> to vector<1x16x256xbf16>
    tpu.vector_store %arg4[%c0_13, %c0_14, %c0_15], %33 {strides = array<i32>} : memref<1x16x256xbf16, #tpu.memory_space<vmem>>, vector<1x16x256xbf16>,
    return
  }
  func.func @transform_0(%arg0: i32) -> (i32, i32, i32) {
    %c0_i32 = arith.constant 0 : i32
    %c0_i32_0 = arith.constant 0 : i32
    %c0_i32_1 = arith.constant 0 : i32
    return %arg0, %c0_i32, %c0_i32_0 : i32, i32, i32
  }
  func.func @transform_1(%arg0: i32) -> (i32, i32) {
    %c0_i32 = arith.constant 0 : i32
    %c0_i32_0 = arith.constant 0 : i32
    %c0_i32_1 = arith.constant 0 : i32
    return %c0_i32, %c0_i32_0 : i32, i32
  }
  func.func @transform_2(%arg0: i32) -> (i32, i32) {
    %c0_i32 = arith.constant 0 : i32
    %c0_i32_0 = arith.constant 0 : i32
    %c0_i32_1 = arith.constant 0 : i32
    return %c0_i32, %c0_i32_0 : i32, i32
  }
  func.func @transform_3(%arg0: i32) -> (i32, i32, i32) {
    %c0_i32 = arith.constant 0 : i32
    %c0_i32_0 = arith.constant 0 : i32
    %c0_i32_1 = arith.constant 0 : i32
    return %arg0, %c0_i32, %c0_i32_0 : i32, i32, i32
  }
}

module attributes {stable_mosaic.version = 11 : i64} {
  func.func @conv_final_fused_kernel(%arg0: i32, %arg1: memref<1x16x4096xbf16, #tpu.memory_space<vmem>>, %arg2: memref<4096x512xbf16, #tpu.memory_space<vmem>>, %arg3: memref<1x512xf32, #tpu.memory_space<vmem>>, %arg4: memref<16x512xf32, #tpu.memory_space<vmem>>, %arg5: memref<1x1x1xf32, #tpu.memory_space<vmem>>) attributes {dimension_semantics = [#tpu.dimension_semantics<parallel>], iteration_bounds = array<i64: 2>, scalar_prefetch = 0 : i64, scratch_operands = 0 : i64, tpu.core_type = #tpu.core_type<tc>, window_params = [{transform_indices = @transform_0, window_bounds = array<i64: 1, 16, 4096>}, {pipeline_mode = #tpu.pipeline_mode<synchronous>, transform_indices = @transform_1, window_bounds = array<i64: 4096, 512>}, {pipeline_mode = #tpu.pipeline_mode<synchronous>, transform_indices = @transform_2, window_bounds = array<i64: 1, 512>}, {pipeline_mode = #tpu.pipeline_mode<synchronous>, transform_indices = @transform_3, window_bounds = array<i64: 16, 512>}, {transform_indices = @transform_4, window_bounds = array<i64: 1, 1, 1>}]} {
    %c0 = arith.constant 0 : index
    %c0_0 = arith.constant 0 : index
    %c0_1 = arith.constant 0 : index
    %0 = vector.load %arg1[%c0, %c0_0, %c0_1] : memref<1x16x4096xbf16, #tpu.memory_space<vmem>>, vector<1x16x4096xbf16>
    %1 = vector.shape_cast %0 : vector<1x16x4096xbf16> to vector<16x4096xbf16>
    %c0_2 = arith.constant 0 : index
    %c0_3 = arith.constant 0 : index
    %2 = vector.load %arg2[%c0_2, %c0_3] : memref<4096x512xbf16, #tpu.memory_space<vmem>>, vector<4096x512xbf16>
    %cst = arith.constant dense<0.000000e+00> : vector<16x512xf32>
    %3 = tpu.matmul %1, %2, %cst {dimension_numbers = #tpu.dot_dimension_numbers<[1], [0], [0], [1], [0, 0, 1, 1], [], []>} : vector<16x4096xbf16>, vector<4096x512xbf16>, vector<16x512xf32> -> vector<16x512xf32>
    %c0_4 = arith.constant 0 : index
    %c0_5 = arith.constant 0 : index
    %4 = vector.load %arg3[%c0_4, %c0_5] : memref<1x512xf32, #tpu.memory_space<vmem>>, vector<1x512xf32>
    %5 = vector.broadcast %4 : vector<1x512xf32> to vector<16x512xf32>
    %6 = arith.addf %3, %5 : vector<16x512xf32>
    %7 = tpu.iota {dimensions = array<i32: 0>} : vector<16x512xi32>
    %c9_i32 = arith.constant 9 : i32
    %8 = vector.broadcast %c9_i32 : i32 to vector<16x512xi32>
    %9 = arith.cmpi slt, %7, %8 : vector<16x512xi32>
    %10 = arith.extui %9 : vector<16x512xi1> to vector<16x512xi32>
    %11 = arith.sitofp %10 : vector<16x512xi32> to vector<16x512xf32>
    %12 = arith.mulf %6, %11 : vector<16x512xf32>
    %cst_6 = arith.constant dense<0.000000e+00> : vector<512xf32>
    %13 = vector.multi_reduction <add>, %12, %cst_6 [0] : vector<16x512xf32> to vector<512xf32>
    %14 = vector.shape_cast %13 : vector<512xf32> to vector<1x512xf32>
    %cst_7 = arith.constant 0.111111112 : f32
    %15 = vector.broadcast %cst_7 : f32 to vector<1x512xf32>
    %16 = arith.mulf %14, %15 : vector<1x512xf32>
    %17 = vector.broadcast %16 : vector<1x512xf32> to vector<16x512xf32>
    %18 = arith.subf %6, %17 : vector<16x512xf32>
    %19 = arith.mulf %18, %11 : vector<16x512xf32>
    %20 = arith.mulf %19, %19 : vector<16x512xf32>
    %cst_8 = arith.constant dense<0.000000e+00> : vector<512xf32>
    %21 = vector.multi_reduction <add>, %20, %cst_8 [0] : vector<16x512xf32> to vector<512xf32>
    %22 = vector.shape_cast %21 : vector<512xf32> to vector<1x512xf32>
    %cst_9 = arith.constant 0.111111112 : f32
    %23 = vector.broadcast %cst_9 : f32 to vector<1x512xf32>
    %24 = arith.mulf %22, %23 : vector<1x512xf32>
    %25 = vector.broadcast %16 : vector<1x512xf32> to vector<16x512xf32>
    %26 = arith.subf %6, %25 : vector<16x512xf32>
    %cst_10 = arith.constant 9.99999974E-6 : f32
    %27 = vector.broadcast %cst_10 : f32 to vector<1x512xf32>
    %28 = arith.addf %24, %27 : vector<1x512xf32>
    %29 = math.rsqrt %28 : vector<1x512xf32>
    %30 = vector.broadcast %29 : vector<1x512xf32> to vector<16x512xf32>
    %31 = arith.mulf %26, %30 : vector<16x512xf32>
    %cst_11 = arith.constant 0.000000e+00 : f32
    %32 = vector.broadcast %cst_11 : f32 to vector<16x512xf32>
    %33 = arith.cmpf oge, %31, %32 : vector<16x512xf32>
    %cst_12 = arith.constant 2.000000e-01 : f32
    %34 = vector.broadcast %cst_12 : f32 to vector<16x512xf32>
    %35 = arith.mulf %31, %34 : vector<16x512xf32>
    %36 = arith.select %33, %31, %35 : vector<16x512xi1>, vector<16x512xf32>
    %c0_13 = arith.constant 0 : index
    %c0_14 = arith.constant 0 : index
    %37 = vector.load %arg4[%c0_13, %c0_14] : memref<16x512xf32, #tpu.memory_space<vmem>>, vector<16x512xf32>
    %38 = arith.mulf %36, %37 : vector<16x512xf32>
    %cst_15 = arith.constant dense<0.000000e+00> : vector<16xf32>
    %39 = vector.multi_reduction <add>, %38, %cst_15 [1] : vector<16x512xf32> to vector<16xf32>
    %40 = vector.shape_cast %39 : vector<16xf32> to vector<16x1xf32>
    %cst_16 = arith.constant dense<0.000000e+00> : vector<1xf32>
    %41 = vector.multi_reduction <add>, %40, %cst_16 [0] : vector<16x1xf32> to vector<1xf32>
    %42 = vector.shape_cast %41 : vector<1xf32> to vector<1x1xf32>
    %cst_17 = arith.constant 2.500000e-01 : f32
    %43 = vector.broadcast %cst_17 : f32 to vector<1x1xf32>
    %44 = arith.mulf %42, %43 : vector<1x1xf32>
    %c0_18 = arith.constant 0 : index
    %c0_19 = arith.constant 0 : index
    %c0_20 = arith.constant 0 : index
    %45 = vector.load %arg5[%c0_18, %c0_19, %c0_20] : memref<1x1x1xf32, #tpu.memory_space<vmem>>, vector<1x1x1xf32>
    %46 = vector.shape_cast %45 : vector<1x1x1xf32> to vector<1x1xf32>
    %47 = vector.shape_cast %44 : vector<1x1xf32> to vector<1x1x1xf32>
    tpu.vector_store %arg5[%c0_18, %c0_19, %c0_20], %47 {strides = array<i32>} : memref<1x1x1xf32, #tpu.memory_space<vmem>>, vector<1x1x1xf32>,
    return
  }
  func.func @transform_0(%arg0: i32) -> (i32, i32, i32) {
    %c0_i32 = arith.constant 0 : i32
    %c0_i32_0 = arith.constant 0 : i32
    %c0_i32_1 = arith.constant 0 : i32
    return %arg0, %c0_i32, %c0_i32_0 : i32, i32, i32
  }
  func.func @transform_1(%arg0: i32) -> (i32, i32) {
    %c0_i32 = arith.constant 0 : i32
    %c0_i32_0 = arith.constant 0 : i32
    %c0_i32_1 = arith.constant 0 : i32
    return %c0_i32, %c0_i32_0 : i32, i32
  }
  func.func @transform_2(%arg0: i32) -> (i32, i32) {
    %c0_i32 = arith.constant 0 : i32
    %c0_i32_0 = arith.constant 0 : i32
    %c0_i32_1 = arith.constant 0 : i32
    return %c0_i32, %c0_i32_0 : i32, i32
  }
  func.func @transform_3(%arg0: i32) -> (i32, i32) {
    %c0_i32 = arith.constant 0 : i32
    %c0_i32_0 = arith.constant 0 : i32
    %c0_i32_1 = arith.constant 0 : i32
    return %c0_i32, %c0_i32_0 : i32, i32
  }
  func.func @transform_4(%arg0: i32) -> (i32, i32, i32) {
    %c0_i32 = arith.constant 0 : i32
    %c0_i32_0 = arith.constant 0 : i32
    %c0_i32_1 = arith.constant 0 : i32
    return %arg0, %c0_i32, %c0_i32_0 : i32, i32, i32
  }
}

</mosaic_0001>

<bundles_post_ra>
// kernel: discriminator_forward.4
= control target key start
LH: loop header
LB: loop body
LE: loop exit
PB: predicated region body
PF: predicated region fallthrough
CT: control target
= control target key end

     0   :  { %s960_s12 = smov 0   ;;  %s1085_s0 = inlined_call_operand.vmem [shape: bf16[2,256,128], index: 0, kind: input, shape index: {}]   ;;  %s1086_s1 = inlined_call_operand.vmem [shape: bf16[128,128], index: 1, kind: input, shape index: {}]   ;;  %s1087_s2 = inlined_call_operand.vmem [shape: f32[1,128], index: 2, kind: input, shape index: {}]   ;;  %s1088_s3 = inlined_call_operand.vmem [shape: bf16[2,256,128], index: 3, kind: output, shape index: {}]  }
   0x1 LB: > { %s671_s13 = sadd.s32 4294967295, %s938_s12   ;;  %p675_p0 = scmp.ge.s32.totalorder %s938_s12, 1  ;;  %s938_s12 = sphi %s960_s12, %s13_s12  }
   0x2   : > { %p137_p1 = scmp.lt.s32.totalorder %s938_s12, 3 }
   0x4   : > { %p138_p2 = pnand %p675_p0, %p137_p1 }
   0x5   : > { %p161_p3 = scmp.lt.s32.totalorder (!%p138_p2), %s671_s13, 1 }
   0x6   : > { %141 = sbr.rel (%p138_p2) target bundleno = 241 (0xf1), region = 32 }
   0xb   : > { %v803_v0 = vld [vmem:[%s1086_s1 + $0x38] sm:$0xff]  ;;  %v802_v1 = vld [vmem:[%s1086_s1 + $0x30] sm:$0xff]  ;;  %v801_v2 = vld [vmem:[%s1086_s1 + $0x28] sm:$0xff]  ;;  %s1090_s13 = smov (!%p161_p3, %s671_s13), 1 }
   0xc   : > { %367 = vmatpush.bf16.msra.mxu0 %v803_v0  ;;  %899 = vmatpush.bf16.msra.mxu1 %v803_v0  ;;  %v800_v3 = vld [vmem:[%s1086_s1 + $0x20] sm:$0xff]  ;;  %v799_v4 = vld [vmem:[%s1086_s1 + $0x18] sm:$0xff]  ;;  %v798_v5 = vld [vmem:[%s1086_s1 + $0x10] sm:$0xff]  ;;  %s778_s28 = sshll.u32 %s1090_s13, 7 }
   0xd   : > { %900 = vmatpush.bf16.msra.mxu2 %v803_v0  ;;  %901 = vmatpush.bf16.msra.mxu3 %v803_v0  ;;  %v797_v6 = vld [vmem:[%s1086_s1 + $0x8] sm:$0xff]  ;;  %v796_v7 = vld [vmem:[%s1086_s1] sm:$0xff]  ;;  %s1004_s6 = scalar_lea.vmem %s1085_s0, %s778_s28  ;;  %s1038_s11 = scalar_lea.vmem %s1088_s3, %s778_s28 }
   0xe   : > { %v780_v8 = vld [vmem:[%s1004_s6] sm:$0xff]  ;;  %v781_v12 = vld [vmem:[%s1004_s6 + $0x8] sm:$0xff]  ;;  %v782_v16 = vld [vmem:[%s1004_s6 + $0x10] sm:$0xff] }
   0xf   : > { %v784_v9 = vld [vmem:[%s1004_s6 + $0x20] sm:$0xff]  ;;  %v785_v13 = vld [vmem:[%s1004_s6 + $0x28] sm:$0xff]  ;;  %v786_v17 = vld [vmem:[%s1004_s6 + $0x30] sm:$0xff] }
  0x10   : > { %368 = vmatpush.bf16.msra.mxu0 %v802_v1  ;;  %902 = vmatpush.bf16.msra.mxu1 %v802_v1  ;;  %v788_v10 = vld [vmem:[%s1004_s6 + $0x40] sm:$0xff]  ;;  %v789_v14 = vld [vmem:[%s1004_s6 + $0x48] sm:$0xff]  ;;  %v790_v18 = vld [vmem:[%s1004_s6 + $0x50] sm:$0xff] }
  0x11   : > { %903 = vmatpush.bf16.msra.mxu2 %v802_v1  ;;  %904 = vmatpush.bf16.msra.mxu3 %v802_v1  ;;  %v792_v11 = vld [vmem:[%s1004_s6 + $0x60] sm:$0xff]  ;;  %v793_v15 = vld [vmem:[%s1004_s6 + $0x68] sm:$0xff]  ;;  %v794_v19 = vld [vmem:[%s1004_s6 + $0x70] sm:$0xff] }
  0x12   : > { %v783_v20 = vld [vmem:[%s1004_s6 + $0x18] sm:$0xff]  ;;  %v1025_v26 = vld [vmem:[%s1087_s2] ss:$0 sm:$0xff] }
  0x13   : > { %v787_v21 = vld [vmem:[%s1004_s6 + $0x38] sm:$0xff] }
  0x14   : > { %369 = vmatpush.bf16.msra.mxu0 %v801_v2  ;;  %905 = vmatpush.bf16.msra.mxu1 %v801_v2  ;;  %v791_v22 = vld [vmem:[%s1004_s6 + $0x58] sm:$0xff] }
  0x15   : > { %906 = vmatpush.bf16.msra.mxu2 %v801_v2  ;;  %907 = vmatpush.bf16.msra.mxu3 %v801_v2  ;;  %v795_v23 = vld [vmem:[%s1004_s6 + $0x78] sm:$0xff] }
  0x18   : > { %370 = vmatpush.bf16.msra.mxu0 %v800_v3  ;;  %908 = vmatpush.bf16.msra.mxu1 %v800_v3 }
  0x19   : > { %909 = vmatpush.bf16.msra.mxu2 %v800_v3  ;;  %910 = vmatpush.bf16.msra.mxu3 %v800_v3 }
  0x1c   : > { %371 = vmatpush.bf16.msra.mxu0 %v799_v4  ;;  %911 = vmatpush.bf16.msra.mxu1 %v799_v4 }
  0x1d   : > { %912 = vmatpush.bf16.msra.mxu2 %v799_v4  ;;  %913 = vmatpush.bf16.msra.mxu3 %v799_v4 }
  0x20   : > { %372 = vmatpush.bf16.msra.mxu0 %v798_v5  ;;  %914 = vmatpush.bf16.msra.mxu1 %v798_v5 }
  0x21   : > { %915 = vmatpush.bf16.msra.mxu2 %v798_v5  ;;  %916 = vmatpush.bf16.msra.mxu3 %v798_v5 }
  0x24   : > { %373 = vmatpush.bf16.msra.mxu0 %v797_v6  ;;  %917 = vmatpush.bf16.msra.mxu1 %v797_v6 }
  0x25   : > { %918 = vmatpush.bf16.msra.mxu2 %v797_v6  ;;  %919 = vmatpush.bf16.msra.mxu3 %v797_v6 }
  0x28   : > { %374 = vmatpush.bf16.msra.mxu0 %v796_v7  ;;  %920 = vmatpush.bf16.msra.mxu1 %v796_v7 }
  0x29   : > { %921 = vmatpush.bf16.msra.mxu2 %v796_v7  ;;  %922 = vmatpush.bf16.msra.mxu3 %v796_v7 }
  0x2b   : > { %375 = vmatmul.bf16.vlgmr.msra.gmra.mxu0 %v780_v8  ;;  %395 = vmatmul.bf16.vlgmr.msra.gmra.mxu1 %v784_v9 }
  0x2c   : > { %415 = vmatmul.bf16.vlgmr.msra.gmra.mxu2 %v788_v10  ;;  %435 = vmatmul.bf16.vlgmr.msra.gmra.mxu3 %v792_v11 }
  0x3b   : > { %380 = vmatmul.bf16.gmra.mxu0 %v781_v12  ;;  %400 = vmatmul.bf16.gmra.mxu1 %v785_v13 }
  0x3c   : > { %420 = vmatmul.bf16.gmra.mxu2 %v789_v14  ;;  %440 = vmatmul.bf16.gmra.mxu3 %v793_v15 }
  0x4b   : > { %385 = vmatmul.bf16.gmra.mxu0 %v782_v16  ;;  %405 = vmatmul.bf16.gmra.mxu1 %v786_v17 }
  0x4c   : > { %425 = vmatmul.bf16.gmra.mxu2 %v790_v18  ;;  %445 = vmatmul.bf16.gmra.mxu3 %v794_v19 }
  0x5b   : > { %390 = vmatmul.bf16.gmra.mxu0 %v783_v20  ;;  %410 = vmatmul.bf16.gmra.mxu1 %v787_v21 }
  0x5c   : > { %430 = vmatmul.bf16.gmra.mxu2 %v791_v22  ;;  %450 = vmatmul.bf16.gmra.mxu3 %v795_v23 }
  0xa8   : > { %v376_v24 = vpop.f32.mrf.mxu0  ;;  %v396_v25 = vpop.f32.mrf.mxu1 }
  0xa9   : > { %v377_v27 = vadd.f32 %v1025_v26, %v376_v24  ;;  %v397_v28 = vadd.f32 %v1025_v26, %v396_v25 }
  0xab   : > { %v488_v33 = vmul.f32 0.2, %v377_v27  ;;  %v496_v34 = vmul.f32 0.2, %v397_v28  ;;  %vm456_vm0 = vcmp.ge.f32.partialorder %v377_v27, 0.0  ;;  %vm464_vm1 = vcmp.ge.f32.partialorder %v397_v28, 0.0 }
  0xad   : > { %v520_v41 = vsel %vm456_vm0, %v377_v27, %v488_v33  ;;  %v528_v42 = vsel %vm464_vm1, %v397_v28, %v496_v34 }
  0xaf   : > { %v416_v29 = vpop.f32.mrf.mxu2  ;;  %v436_v30 = vpop.f32.mrf.mxu3 }
  0xb0   : > { %v378_v31 = vpop.f32.mrf.mxu0  ;;  %v398_v32 = vpop.f32.mrf.mxu1  ;;  %v417_v39 = vadd.f32 %v1025_v26, %v416_v29  ;;  %v437_v40 = vadd.f32 %v1025_v26, %v436_v30 }
  0xb1   : > { %v379_v35 = vadd.f32 %v1025_v26, %v378_v31  ;;  %v399_v36 = vadd.f32 %v1025_v26, %v398_v32 }
  0xb2   : > { %v504_v49 = vmul.f32 0.2, %v417_v39  ;;  %v512_v50 = vmul.f32 0.2, %v437_v40  ;;  %vm472_vm4 = vcmp.ge.f32.partialorder %v417_v39, 0.0  ;;  %vm480_vm5 = vcmp.ge.f32.partialorder %v437_v40, 0.0 }
  0xb3   : > { %vm457_vm2 = vcmp.ge.f32.partialorder %v379_v35, 0.0  ;;  %v489_v37 = vmul.f32 0.2, %v379_v35  ;;  %vm465_vm3 = vcmp.ge.f32.partialorder %v399_v36, 0.0  ;;  %v497_v38 = vmul.f32 0.2, %v399_v36 }
  0xb4   : > { %v536_v57 = vsel %vm472_vm4, %v417_v39, %v504_v49  ;;  %v544_v58 = vsel %vm480_vm5, %v437_v40, %v512_v50 }
  0xb5   : > { %v521_v43 = vsel %vm457_vm2, %v379_v35, %v489_v37  ;;  %v529_v44 = vsel %vm465_vm3, %v399_v36, %v497_v38 }
  0xb6   : > { %v807_v45 = vpack.c.bf16 %v521_v43, %v520_v41  ;;  %v827_v46 = vpack.c.bf16 %v529_v44, %v528_v42 }
  0xb7   : > { %v418_v47 = vpop.f32.mrf.mxu2  ;;  %v438_v48 = vpop.f32.mrf.mxu3 }
  0xb8   : > { %808 = vst [vmem:[%s1038_s11] sm:$0xff] %v807_v45   ;;  %v419_v51 = vadd.f32 %v1025_v26, %v418_v47  ;;  %v439_v52 = vadd.f32 %v1025_v26, %v438_v48  ;;  %v381_v53 = vpop.f32.mrf.mxu0  ;;  %v401_v54 = vpop.f32.mrf.mxu1 }
  0xb9   : > { %887 = vst [vmem:[%s1038_s11 + $0x20] sm:$0xff] %v827_v46   ;;  %v382_v63 = vadd.f32 %v1025_v26, %v381_v53  ;;  %v402_v0 = vadd.f32 %v1025_v26, %v401_v54 }
  0xba   : > { %vm473_vm6 = vcmp.ge.f32.partialorder %v419_v51, 0.0  ;;  %v505_v55 = vmul.f32 0.2, %v419_v51  ;;  %vm481_vm7 = vcmp.ge.f32.partialorder %v439_v52, 0.0  ;;  %v513_v56 = vmul.f32 0.2, %v439_v52 }
  0xbb   : > { %v490_v5 = vmul.f32 0.2, %v382_v63  ;;  %v498_v6 = vmul.f32 0.2, %v402_v0  ;;  %vm458_vm8 = vcmp.ge.f32.partialorder %v382_v63, 0.0  ;;  %vm466_vm9 = vcmp.ge.f32.partialorder %v402_v0, 0.0 }
  0xbc   : > { %v537_v59 = vsel %vm473_vm6, %v419_v51, %v505_v55  ;;  %v545_v60 = vsel %vm481_vm7, %v439_v52, %v513_v56 }
  0xbd   : > { %v847_v61 = vpack.c.bf16 %v537_v59, %v536_v57  ;;  %v867_v62 = vpack.c.bf16 %v545_v60, %v544_v58  ;;  %v522_v13 = vsel %vm458_vm8, %v382_v63, %v490_v5  ;;  %v530_v14 = vsel %vm466_vm9, %v402_v0, %v498_v6 }
  0xbf   : > { %891 = vst [vmem:[%s1038_s11 + $0x40] sm:$0xff] %v847_v61   ;;  %v421_v1 = vpop.f32.mrf.mxu2  ;;  %v441_v2 = vpop.f32.mrf.mxu3 }
  0xc0   : > { %895 = vst [vmem:[%s1038_s11 + $0x60] sm:$0xff] %v867_v62   ;;  %v383_v3 = vpop.f32.mrf.mxu0  ;;  %v403_v4 = vpop.f32.mrf.mxu1  ;;  %v422_v11 = vadd.f32 %v1025_v26, %v421_v1  ;;  %v442_v12 = vadd.f32 %v1025_v26, %v441_v2 }
  0xc1   : > { %v384_v7 = vadd.f32 %v1025_v26, %v383_v3  ;;  %v404_v8 = vadd.f32 %v1025_v26, %v403_v4 }
  0xc2   : > { %v506_v21 = vmul.f32 0.2, %v422_v11  ;;  %v514_v22 = vmul.f32 0.2, %v442_v12  ;;  %vm474_vm12 = vcmp.ge.f32.partialorder %v422_v11, 0.0  ;;  %vm482_vm13 = vcmp.ge.f32.partialorder %v442_v12, 0.0 }
  0xc3   : > { %vm459_vm10 = vcmp.ge.f32.partialorder %v384_v7, 0.0  ;;  %v491_v9 = vmul.f32 0.2, %v384_v7  ;;  %vm467_vm11 = vcmp.ge.f32.partialorder %v404_v8, 0.0  ;;  %v499_v10 = vmul.f32 0.2, %v404_v8 }
  0xc4   : > { %v538_v30 = vsel %vm474_vm12, %v422_v11, %v506_v21  ;;  %v546_v31 = vsel %vm482_vm13, %v442_v12, %v514_v22 }
  0xc5   : > { %v523_v15 = vsel %vm459_vm10, %v384_v7, %v491_v9  ;;  %v531_v16 = vsel %vm467_vm11, %v404_v8, %v499_v10 }
  0xc6   : > { %v812_v17 = vpack.c.bf16 %v523_v15, %v522_v13  ;;  %v832_v18 = vpack.c.bf16 %v531_v16, %v530_v14 }
  0xc7   : > { %v423_v19 = vpop.f32.mrf.mxu2  ;;  %v443_v20 = vpop.f32.mrf.mxu3 }
  0xc8   : > { %884 = vst [vmem:[%s1038_s11 + $0x8] sm:$0xff] %v812_v17   ;;  %v424_v23 = vadd.f32 %v1025_v26, %v423_v19  ;;  %v444_v24 = vadd.f32 %v1025_v26, %v443_v20  ;;  %v386_v25 = vpop.f32.mrf.mxu0  ;;  %v406_v27 = vpop.f32.mrf.mxu1 }
  0xc9   : > { %888 = vst [vmem:[%s1038_s11 + $0x28] sm:$0xff] %v832_v18   ;;  %v387_v36 = vadd.f32 %v1025_v26, %v386_v25  ;;  %v407_v37 = vadd.f32 %v1025_v26, %v406_v27 }
  0xca   : > { %vm475_vm14 = vcmp.ge.f32.partialorder %v424_v23, 0.0  ;;  %v507_v28 = vmul.f32 0.2, %v424_v23  ;;  %vm483_vm15 = vcmp.ge.f32.partialorder %v444_v24, 0.0  ;;  %v515_v29 = vmul.f32 0.2, %v444_v24 }
  0xcb   : > { %v492_v42 = vmul.f32 0.2, %v387_v36  ;;  %v500_v43 = vmul.f32 0.2, %v407_v37  ;;  %vm460_vm0 = vcmp.ge.f32.partialorder %v387_v36, 0.0  ;;  %vm468_vm1 = vcmp.ge.f32.partialorder %v407_v37, 0.0 }
  0xcc   : > { %v539_v32 = vsel %vm475_vm14, %v424_v23, %v507_v28  ;;  %v547_v33 = vsel %vm483_vm15, %v444_v24, %v515_v29 }
  0xcd   : > { %v852_v34 = vpack.c.bf16 %v539_v32, %v538_v30  ;;  %v872_v35 = vpack.c.bf16 %v547_v33, %v546_v31  ;;  %v524_v50 = vsel %vm460_vm0, %v387_v36, %v492_v42  ;;  %v532_v51 = vsel %vm468_vm1, %v407_v37, %v500_v43 }
  0xcf   : > { %892 = vst [vmem:[%s1038_s11 + $0x48] sm:$0xff] %v852_v34   ;;  %v426_v38 = vpop.f32.mrf.mxu2  ;;  %v446_v39 = vpop.f32.mrf.mxu3 }
  0xd0   : > { %896 = vst [vmem:[%s1038_s11 + $0x68] sm:$0xff] %v872_v35   ;;  %v388_v40 = vpop.f32.mrf.mxu0  ;;  %v408_v41 = vpop.f32.mrf.mxu1  ;;  %v427_v48 = vadd.f32 %v1025_v26, %v426_v38  ;;  %v447_v49 = vadd.f32 %v1025_v26, %v446_v39 }
  0xd1   : > { %v389_v44 = vadd.f32 %v1025_v26, %v388_v40  ;;  %v409_v45 = vadd.f32 %v1025_v26, %v408_v41 }
  0xd2   : > { %v508_v58 = vmul.f32 0.2, %v427_v48  ;;  %v516_v59 = vmul.f32 0.2, %v447_v49  ;;  %vm476_vm4 = vcmp.ge.f32.partialorder %v427_v48, 0.0  ;;  %vm484_vm5 = vcmp.ge.f32.partialorder %v447_v49, 0.0 }
  0xd3   : > { %vm461_vm2 = vcmp.ge.f32.partialorder %v389_v44, 0.0  ;;  %v493_v46 = vmul.f32 0.2, %v389_v44  ;;  %vm469_vm3 = vcmp.ge.f32.partialorder %v409_v45, 0.0  ;;  %v501_v47 = vmul.f32 0.2, %v409_v45 }
  0xd4   : > { %v540_v2 = vsel %vm476_vm4, %v427_v48, %v508_v58  ;;  %v548_v3 = vsel %vm484_vm5, %v447_v49, %v516_v59 }
  0xd5   : > { %v525_v52 = vsel %vm461_vm2, %v389_v44, %v493_v46  ;;  %v533_v53 = vsel %vm469_vm3, %v409_v45, %v501_v47 }
  0xd6   : > { %v817_v54 = vpack.c.bf16 %v525_v52, %v524_v50  ;;  %v837_v55 = vpack.c.bf16 %v533_v53, %v532_v51 }
  0xd7   : > { %v428_v56 = vpop.f32.mrf.mxu2  ;;  %v448_v57 = vpop.f32.mrf.mxu3 }
  0xd8   : > { %885 = vst [vmem:[%s1038_s11 + $0x10] sm:$0xff] %v817_v54   ;;  %v429_v60 = vadd.f32 %v1025_v26, %v428_v56  ;;  %v449_v61 = vadd.f32 %v1025_v26, %v448_v57  ;;  %v391_v62 = vpop.f32.mrf.mxu0  ;;  %v411_v63 = vpop.f32.mrf.mxu1 }
  0xd9   : > { %889 = vst [vmem:[%s1038_s11 + $0x30] sm:$0xff] %v837_v55   ;;  %v392_v8 = vadd.f32 %v1025_v26, %v391_v62  ;;  %v412_v9 = vadd.f32 %v1025_v26, %v411_v63 }
  0xda   : > { %vm477_vm6 = vcmp.ge.f32.partialorder %v429_v60, 0.0  ;;  %v509_v0 = vmul.f32 0.2, %v429_v60  ;;  %vm485_vm7 = vcmp.ge.f32.partialorder %v449_v61, 0.0  ;;  %v517_v1 = vmul.f32 0.2, %v449_v61 }
  0xdb   : > { %v494_v14 = vmul.f32 0.2, %v392_v8  ;;  %v502_v15 = vmul.f32 0.2, %v412_v9  ;;  %vm462_vm8 = vcmp.ge.f32.partialorder %v392_v8, 0.0  ;;  %vm470_vm9 = vcmp.ge.f32.partialorder %v412_v9, 0.0 }
  0xdc   : > { %v541_v4 = vsel %vm477_vm6, %v429_v60, %v509_v0  ;;  %v549_v5 = vsel %vm485_vm7, %v449_v61, %v517_v1 }
  0xdd   : > { %v857_v6 = vpack.c.bf16 %v541_v4, %v540_v2  ;;  %v877_v7 = vpack.c.bf16 %v549_v5, %v548_v3  ;;  %v526_v22 = vsel %vm462_vm8, %v392_v8, %v494_v14  ;;  %v534_v23 = vsel %vm470_vm9, %v412_v9, %v502_v15 }
  0xdf   : > { %893 = vst [vmem:[%s1038_s11 + $0x50] sm:$0xff] %v857_v6   ;;  %v431_v10 = vpop.f32.mrf.mxu2  ;;  %v451_v11 = vpop.f32.mrf.mxu3 }
  0xe0   : > { %897 = vst [vmem:[%s1038_s11 + $0x70] sm:$0xff] %v877_v7   ;;  %v393_v12 = vpop.f32.mrf.mxu0  ;;  %v413_v13 = vpop.f32.mrf.mxu1  ;;  %v432_v20 = vadd.f32 %v1025_v26, %v431_v10  ;;  %v452_v21 = vadd.f32 %v1025_v26, %v451_v11 }
  0xe1   : > { %v394_v16 = vadd.f32 %v1025_v26, %v393_v12  ;;  %v414_v17 = vadd.f32 %v1025_v26, %v413_v13 }
  0xe2   : > { %v510_v31 = vmul.f32 0.2, %v432_v20  ;;  %v518_v32 = vmul.f32 0.2, %v452_v21  ;;  %vm478_vm12 = vcmp.ge.f32.partialorder %v432_v20, 0.0  ;;  %vm486_vm13 = vcmp.ge.f32.partialorder %v452_v21, 0.0 }
  0xe3   : > { %vm463_vm10 = vcmp.ge.f32.partialorder %v394_v16, 0.0  ;;  %v495_v18 = vmul.f32 0.2, %v394_v16  ;;  %vm471_vm11 = vcmp.ge.f32.partialorder %v414_v17, 0.0  ;;  %v503_v19 = vmul.f32 0.2, %v414_v17 }
  0xe4   : > { %v542_v37 = vsel %vm478_vm12, %v432_v20, %v510_v31  ;;  %v550_v38 = vsel %vm486_vm13, %v452_v21, %v518_v32 }
  0xe5   : > { %v527_v24 = vsel %vm463_vm10, %v394_v16, %v495_v18  ;;  %v535_v25 = vsel %vm471_vm11, %v414_v17, %v503_v19 }
  0xe6   : > { %v822_v27 = vpack.c.bf16 %v527_v24, %v526_v22  ;;  %v842_v28 = vpack.c.bf16 %v535_v25, %v534_v23 }
  0xe7   : > { %v433_v29 = vpop.f32.mrf.mxu2  ;;  %v453_v30 = vpop.f32.mrf.mxu3 }
  0xe8   : > { %886 = vst [vmem:[%s1038_s11 + $0x18] sm:$0xff] %v822_v27   ;;  %v434_v33 = vadd.f32 %v1025_v26, %v433_v29  ;;  %v454_v34 = vadd.f32 %v1025_v26, %v453_v30 }
  0xe9   : > { %890 = vst [vmem:[%s1038_s11 + $0x38] sm:$0xff] %v842_v28  }
  0xea   : > { %vm479_vm14 = vcmp.ge.f32.partialorder %v434_v33, 0.0  ;;  %v511_v35 = vmul.f32 0.2, %v434_v33  ;;  %vm487_vm15 = vcmp.ge.f32.partialorder %v454_v34, 0.0  ;;  %v519_v36 = vmul.f32 0.2, %v454_v34 }
  0xec   : > { %v543_v39 = vsel %vm479_vm14, %v434_v33, %v511_v35  ;;  %v551_v40 = vsel %vm487_vm15, %v454_v34, %v519_v36 }
  0xed   : > { %v862_v41 = vpack.c.bf16 %v543_v39, %v542_v37  ;;  %v882_v42 = vpack.c.bf16 %v551_v40, %v550_v38 }
  0xef   : > { %894 = vst [vmem:[%s1038_s11 + $0x58] sm:$0xff] %v862_v41  }
  0xf0   : > { %898 = vst [vmem:[%s1038_s11 + $0x78] sm:$0xff] %v882_v42  }
  0xf1 PF: > { %s13_s12 = sadd.s32 1, %s938_s12  }
  0xf2   : > { %p10_p4 = scmp.ge.s32.totalorder %s13_s12, 4  }
  0xf4   :  { %12 = sbr.rel (!%p10_p4) target bundleno = 1 (0x1), region = 62 }

// kernel: discriminator_forward.5
= control target key start
LH: loop header
LB: loop body
LE: loop exit
PB: predicated region body
PF: predicated region fallthrough
CT: control target
= control target key end

     0   :  { %s1835_s12 = smov 0   ;;  %s2158_s0 = inlined_call_operand.vmem [shape: bf16[2,64,1024], index: 0, kind: input, shape index: {}]   ;;  %s2159_s1 = inlined_call_operand.vmem [shape: bf16[1024,128], index: 1, kind: input, shape index: {}]   ;;  %s2160_s2 = inlined_call_operand.vmem [shape: f32[1,128], index: 2, kind: input, shape index: {}]   ;;  %s2161_s3 = inlined_call_operand.vmem [shape: bf16[2,64,128], index: 3, kind: output, shape index: {}]  }
   0x1 LB: > { %s1276_s13 = sadd.s32 4294967295, %s1812_s12   ;;  %p1280_p0 = scmp.ge.s32.totalorder %s1812_s12, 1  ;;  %s1812_s12 = sphi %s1835_s12, %s13_s12  }
   0x2   : > { %p137_p1 = scmp.lt.s32.totalorder %s1812_s12, 3 }
   0x4   : > { %p138_p2 = pnand %p1280_p0, %p137_p1 }
   0x5   : > { %p161_p3 = scmp.lt.s32.totalorder (!%p138_p2), %s1276_s13, 1 }
   0x6   : > { %141 = sbr.rel (%p138_p2) target bundleno = 383 (0x17f), region = 32 }
   0xb   : > { %v1712_v0 = vld [vmem:[%s2159_s1 + $0x38] sm:$0xff]  ;;  %v1711_v4 = vld [vmem:[%s2159_s1 + $0x30] sm:$0xff]  ;;  %v1710_v8 = vld [vmem:[%s2159_s1 + $0x28] sm:$0xff]  ;;  %s2163_s13 = smov (!%p161_p3, %s1276_s13), 1 }
   0xc   : > { %v1720_v1 = vld [vmem:[%s2159_s1 + $0x78] sm:$0xff]  ;;  %879 = vmatpush.bf16.msra.mxu0 %v1712_v0  ;;  %v1719_v5 = vld [vmem:[%s2159_s1 + $0x70] sm:$0xff]  ;;  %v1718_v9 = vld [vmem:[%s2159_s1 + $0x68] sm:$0xff]  ;;  %s1671_s10 = sshll.u32 %s2163_s13, 8 }
   0xd   : > { %v1728_v2 = vld [vmem:[%s2159_s1 + $0xb8] sm:$0xff]  ;;  %908 = vmatpush.bf16.msra.mxu1 %v1720_v1  ;;  %v1727_v6 = vld [vmem:[%s2159_s1 + $0xb0] sm:$0xff]  ;;  %v1726_v10 = vld [vmem:[%s2159_s1 + $0xa8] sm:$0xff]  ;;  %s1931_s19 = scalar_lea.vmem %s2158_s0, %s1671_s10 }
   0xe   : > { %v1736_v3 = vld [vmem:[%s2159_s1 + $0xf8] sm:$0xff]  ;;  %937 = vmatpush.bf16.msra.mxu2 %v1728_v2  ;;  %v1735_v7 = vld [vmem:[%s2159_s1 + $0xf0] sm:$0xff]  ;;  %v1734_v11 = vld [vmem:[%s2159_s1 + $0xe8] sm:$0xff] }
   0xf   : > { %966 = vmatpush.bf16.msra.mxu3 %v1736_v3  ;;  %v1709_v12 = vld [vmem:[%s2159_s1 + $0x20] sm:$0xff]  ;;  %v1708_v16 = vld [vmem:[%s2159_s1 + $0x18] sm:$0xff]  ;;  %v1707_v20 = vld [vmem:[%s2159_s1 + $0x10] sm:$0xff] }
  0x10   : > { %880 = vmatpush.bf16.msra.mxu0 %v1711_v4  ;;  %v1717_v13 = vld [vmem:[%s2159_s1 + $0x60] sm:$0xff]  ;;  %v1716_v17 = vld [vmem:[%s2159_s1 + $0x58] sm:$0xff]  ;;  %v1715_v21 = vld [vmem:[%s2159_s1 + $0x50] sm:$0xff] }
  0x11   : > { %909 = vmatpush.bf16.msra.mxu1 %v1719_v5  ;;  %v1725_v14 = vld [vmem:[%s2159_s1 + $0xa0] sm:$0xff]  ;;  %v1724_v18 = vld [vmem:[%s2159_s1 + $0x98] sm:$0xff]  ;;  %v1723_v22 = vld [vmem:[%s2159_s1 + $0x90] sm:$0xff] }
  0x12   : > { %938 = vmatpush.bf16.msra.mxu2 %v1727_v6  ;;  %v1733_v15 = vld [vmem:[%s2159_s1 + $0xe0] sm:$0xff]  ;;  %v1732_v19 = vld [vmem:[%s2159_s1 + $0xd8] sm:$0xff]  ;;  %v1731_v23 = vld [vmem:[%s2159_s1 + $0xd0] sm:$0xff] }
  0x13   : > { %967 = vmatpush.bf16.msra.mxu3 %v1735_v7  ;;  %v1706_v24 = vld [vmem:[%s2159_s1 + $0x8] sm:$0xff]  ;;  %v1705_v28 = vld [vmem:[%s2159_s1] sm:$0xff]  ;;  %v1760_v40 = vld [vmem:[%s2159_s1 + $0x1b8] sm:$0xff] }
  0x14   : > { %881 = vmatpush.bf16.msra.mxu0 %v1710_v8  ;;  %v1714_v25 = vld [vmem:[%s2159_s1 + $0x48] sm:$0xff]  ;;  %v1713_v29 = vld [vmem:[%s2159_s1 + $0x40] sm:$0xff]  ;;  %v1744_v41 = vld [vmem:[%s2159_s1 + $0x138] sm:$0xff] }
  0x15   : > { %910 = vmatpush.bf16.msra.mxu1 %v1718_v9  ;;  %v1722_v26 = vld [vmem:[%s2159_s1 + $0x88] sm:$0xff]  ;;  %v1721_v30 = vld [vmem:[%s2159_s1 + $0x80] sm:$0xff]  ;;  %v1768_v46 = vld [vmem:[%s2159_s1 + $0x1f8] sm:$0xff] }
  0x16   : > { %939 = vmatpush.bf16.msra.mxu2 %v1726_v10  ;;  %v1730_v27 = vld [vmem:[%s2159_s1 + $0xc8] sm:$0xff]  ;;  %v1729_v31 = vld [vmem:[%s2159_s1 + $0xc0] sm:$0xff]  ;;  %v1752_v47 = vld [vmem:[%s2159_s1 + $0x178] sm:$0xff] }
  0x17   : > { %968 = vmatpush.bf16.msra.mxu3 %v1734_v11  ;;  %v1287_v32 = vld [vmem:[%s1931_s19] sm:$0xf]  ;;  %v1673_v34 = vld [vmem:[%s1931_s19 + $0x4] sm:$0xf]  ;;  %v1295_v36 = vld [vmem:[%s1931_s19 + $0x8] sm:$0xf] }
  0x18   : > { %882 = vmatpush.bf16.msra.mxu0 %v1709_v12  ;;  %v1677_v33 = vld [vmem:[%s1931_s19 + $0x1c] sm:$0xf0]  ;;  %v1289_v35 = vld [vmem:[%s1931_s19 + $0x20] sm:$0xf0]  ;;  %v1678_v37 = vld [vmem:[%s1931_s19 + $0x24] sm:$0xf0] }
  0x19   : > { %911 = vmatpush.bf16.msra.mxu1 %v1717_v13  ;;  %v1674_v38 = vld [vmem:[%s1931_s19 + $0xc] sm:$0xf]  ;;  %v1288_v42 = vor.u32 %v1677_v33, %v1287_v32  ;;  %v1292_v43 = vor.u32 %v1673_v34, %v1289_v35  ;;  %v1296_v44 = vor.u32 %v1678_v37, %v1295_v36  ;;  %v1759_v48 = vld [vmem:[%s2159_s1 + $0x1b0] sm:$0xff]  ;;  %v1319_v56 = vld [vmem:[%s1931_s19 + $0x40] sm:$0xf] }
  0x1a   : > { %940 = vmatpush.bf16.msra.mxu2 %v1725_v14  ;;  %v1297_v39 = vld [vmem:[%s1931_s19 + $0x28] sm:$0xf0]  ;;  %v1743_v49 = vld [vmem:[%s2159_s1 + $0x130] sm:$0xff]  ;;  %v1757_v57 = vld [vmem:[%s2159_s1 + $0x1a0] sm:$0xff] }
  0x1b   : > { %969 = vmatpush.bf16.msra.mxu3 %v1733_v15  ;;  %v1300_v45 = vor.u32 %v1674_v38, %v1297_v39  ;;  %v1767_v50 = vld [vmem:[%s2159_s1 + $0x1f0] sm:$0xff]  ;;  %v1758_v52 = vld [vmem:[%s2159_s1 + $0x1a8] sm:$0xff]  ;;  %v1741_v58 = vld [vmem:[%s2159_s1 + $0x120] sm:$0xff] }
  0x1c   : > { %883 = vmatpush.bf16.msra.mxu0 %v1708_v16  ;;  %v1751_v51 = vld [vmem:[%s2159_s1 + $0x170] sm:$0xff]  ;;  %v1742_v53 = vld [vmem:[%s2159_s1 + $0x128] sm:$0xff]  ;;  %v1685_v59 = vld [vmem:[%s1931_s19 + $0x5c] sm:$0xf0] }
  0x1d   : > { %912 = vmatpush.bf16.msra.mxu1 %v1716_v17  ;;  %v1766_v54 = vld [vmem:[%s2159_s1 + $0x1e8] sm:$0xff]  ;;  %v1681_v60 = vld [vmem:[%s1931_s19 + $0x44] sm:$0xf]  ;;  %v1756_v4 = vld [vmem:[%s2159_s1 + $0x198] sm:$0xff]  ;;  %v1320_v6 = vor.u32 %v1685_v59, %v1319_v56 }
  0x1e   : > { %941 = vmatpush.bf16.msra.mxu2 %v1724_v18  ;;  %v1750_v55 = vld [vmem:[%s2159_s1 + $0x168] sm:$0xff]  ;;  %v1321_v61 = vld [vmem:[%s1931_s19 + $0x60] sm:$0xf0]  ;;  %v1740_v5 = vld [vmem:[%s2159_s1 + $0x118] sm:$0xff] }
  0x1f   : > { %970 = vmatpush.bf16.msra.mxu3 %v1732_v19  ;;  %v1327_v62 = vld [vmem:[%s1931_s19 + $0x48] sm:$0xf]  ;;  %v1682_v0 = vld [vmem:[%s1931_s19 + $0x4c] sm:$0xf]  ;;  %v1765_v2 = vld [vmem:[%s2159_s1 + $0x1e0] sm:$0xff]  ;;  %v1324_v7 = vor.u32 %v1681_v60, %v1321_v61 }
  0x20   : > { %884 = vmatpush.bf16.msra.mxu0 %v1707_v20  ;;  %v1686_v63 = vld [vmem:[%s1931_s19 + $0x64] sm:$0xf0]  ;;  %v1329_v1 = vld [vmem:[%s1931_s19 + $0x68] sm:$0xf0]  ;;  %v1749_v3 = vld [vmem:[%s2159_s1 + $0x160] sm:$0xff] }
  0x21   : > { %913 = vmatpush.bf16.msra.mxu1 %v1715_v21  ;;  %v1328_v8 = vor.u32 %v1686_v63, %v1327_v62  ;;  %v1332_v9 = vor.u32 %v1682_v0, %v1329_v1  ;;  %v1764_v10 = vld [vmem:[%s2159_s1 + $0x1d8] sm:$0xff]  ;;  %v1755_v12 = vld [vmem:[%s2159_s1 + $0x190] sm:$0xff]  ;;  %v1754_v16 = vld [vmem:[%s2159_s1 + $0x188] sm:$0xff] }
  0x22   : > { %942 = vmatpush.bf16.msra.mxu2 %v1723_v22  ;;  %v1748_v11 = vld [vmem:[%s2159_s1 + $0x158] sm:$0xff]  ;;  %v1739_v13 = vld [vmem:[%s2159_s1 + $0x110] sm:$0xff]  ;;  %v1738_v17 = vld [vmem:[%s2159_s1 + $0x108] sm:$0xff] }
  0x23   : > { %971 = vmatpush.bf16.msra.mxu3 %v1731_v23  ;;  %v1763_v14 = vld [vmem:[%s2159_s1 + $0x1d0] sm:$0xff]  ;;  %v1762_v18 = vld [vmem:[%s2159_s1 + $0x1c8] sm:$0xff]  ;;  %v1351_v20 = vld [vmem:[%s1931_s19 + $0x80] sm:$0xf] }
  0x24   : > { %885 = vmatpush.bf16.msra.mxu0 %v1706_v24  ;;  %v1747_v15 = vld [vmem:[%s2159_s1 + $0x150] sm:$0xff]  ;;  %v1746_v19 = vld [vmem:[%s2159_s1 + $0x148] sm:$0xff]  ;;  %v1753_v21 = vld [vmem:[%s2159_s1 + $0x180] sm:$0xff] }
  0x25   : > { %914 = vmatpush.bf16.msra.mxu1 %v1714_v25  ;;  %v1737_v22 = vld [vmem:[%s2159_s1 + $0x100] sm:$0xff]  ;;  %v1335_v60 = vld [vmem:[%s1931_s19 + $0x50] sm:$0xf]  ;;  %v1683_v62 = vld [vmem:[%s1931_s19 + $0x54] sm:$0xf] }
  0x26   : > { %943 = vmatpush.bf16.msra.mxu2 %v1722_v26  ;;  %v1693_v23 = vld [vmem:[%s1931_s19 + $0x9c] sm:$0xf0]  ;;  %v1689_v24 = vld [vmem:[%s1931_s19 + $0x84] sm:$0xf]  ;;  %v1359_v26 = vld [vmem:[%s1931_s19 + $0x88] sm:$0xf] }
  0x27   : > { %972 = vmatpush.bf16.msra.mxu3 %v1730_v27  ;;  %v1353_v25 = vld [vmem:[%s1931_s19 + $0xa0] sm:$0xf0]  ;;  %v1694_v27 = vld [vmem:[%s1931_s19 + $0xa4] sm:$0xf0]  ;;  %v1352_v32 = vor.u32 %v1693_v23, %v1351_v20  ;;  %v1383_v36 = vld [vmem:[%s1931_s19 + $0xc0] sm:$0xf] }
  0x28   : > { %886 = vmatpush.bf16.msra.mxu0 %v1705_v28  ;;  %v1690_v28 = vld [vmem:[%s1931_s19 + $0x8c] sm:$0xf]  ;;  %v1356_v33 = vor.u32 %v1689_v24, %v1353_v25  ;;  %v1360_v34 = vor.u32 %v1694_v27, %v1359_v26  ;;  %v1701_v37 = vld [vmem:[%s1931_s19 + $0xdc] sm:$0xf0]  ;;  %v1697_v38 = vld [vmem:[%s1931_s19 + $0xc4] sm:$0xf] }
  0x29   : > { %915 = vmatpush.bf16.msra.mxu1 %v1713_v29  ;;  %v1361_v29 = vld [vmem:[%s1931_s19 + $0xa8] sm:$0xf0]  ;;  %v1385_v39 = vld [vmem:[%s1931_s19 + $0xe0] sm:$0xf0]  ;;  %v1687_v61 = vld [vmem:[%s1931_s19 + $0x6c] sm:$0xf0] }
  0x2a   : > { %944 = vmatpush.bf16.msra.mxu2 %v1721_v30  ;;  %v1761_v30 = vld [vmem:[%s2159_s1 + $0x1c0] sm:$0xff]  ;;  %v1364_v35 = vor.u32 %v1690_v28, %v1361_v29  ;;  %v1337_v63 = vld [vmem:[%s1931_s19 + $0x70] sm:$0xf0]  ;;  %v1343_v0 = vld [vmem:[%s1931_s19 + $0x58] sm:$0xf] }
  0x2b   : > { %973 = vmatpush.bf16.msra.mxu3 %v1729_v31  ;;  %887 = vmatmul.bf16.vlgmr.msra.gmra.mxu0 %v1288_v42  ;;  %v1745_v31 = vld [vmem:[%s2159_s1 + $0x140] sm:$0xff]  ;;  %v1698_v42 = vld [vmem:[%s1931_s19 + $0xcc] sm:$0xf]  ;;  %v1688_v1 = vld [vmem:[%s1931_s19 + $0x74] sm:$0xf0] }
  0x2c   : > { %995 = vmatpush.bf16.msrb.mxu0 %v1744_v41  ;;  %916 = vmatmul.bf16.vlgmr.msra.gmra.mxu1 %v1292_v43  ;;  %v1702_v41 = vld [vmem:[%s1931_s19 + $0xe4] sm:$0xf0]  ;;  %v1393_v43 = vld [vmem:[%s1931_s19 + $0xe8] sm:$0xf0]  ;;  %v1399_v20 = vld [vmem:[%s1931_s19 + $0xd0] sm:$0xf] }
  0x2d   : > { %945 = vmatmul.bf16.vlgmr.msra.gmra.mxu2 %v1296_v44  ;;  %1024 = vmatpush.bf16.msrb.mxu1 %v1752_v47  ;;  %v1384_v44 = vor.u32 %v1701_v37, %v1383_v36  ;;  %v1396_v47 = vor.u32 %v1698_v42, %v1393_v43  ;;  %v1401_v23 = vld [vmem:[%s1931_s19 + $0xf0] sm:$0xf0]  ;;  %v1407_v24 = vld [vmem:[%s1931_s19 + $0xd8] sm:$0xf]  ;;  %v1700_v26 = vld [vmem:[%s1931_s19 + $0xdc] sm:$0xf] }
  0x2e   : > { %1053 = vmatpush.bf16.msrb.mxu2 %v1760_v40  ;;  %974 = vmatmul.bf16.vlgmr.msra.gmra.mxu3 %v1300_v45  ;;  %v1391_v40 = vld [vmem:[%s1931_s19 + $0xc8] sm:$0xf]  ;;  %v1388_v45 = vor.u32 %v1697_v38, %v1385_v39  ;;  %v1704_v25 = vld [vmem:[%s1931_s19 + $0xf4] sm:$0xf0]  ;;  %v1409_v27 = vld [vmem:[%s1931_s19 + $0xf8] sm:$0xf0] }
  0x2f   : > { %1082 = vmatpush.bf16.msrb.mxu3 %v1768_v46  ;;  %v1392_v46 = vor.u32 %v1702_v41, %v1391_v40 }
  0x30   : > { %996 = vmatpush.bf16.msrb.mxu0 %v1743_v49  ;;  %v1679_v49 = vld [vmem:[%s1931_s19 + $0x2c] sm:$0xf0] }
  0x31   : > { %1025 = vmatpush.bf16.msrb.mxu1 %v1751_v51  ;;  %v1305_v51 = vld [vmem:[%s1931_s19 + $0x30] sm:$0xf0] }
  0x32   : > { %1054 = vmatpush.bf16.msrb.mxu2 %v1759_v48  ;;  %v1303_v48 = vld [vmem:[%s1931_s19 + $0x10] sm:$0xf] }
  0x33   : > { %1083 = vmatpush.bf16.msrb.mxu3 %v1767_v50  ;;  %v1675_v50 = vld [vmem:[%s1931_s19 + $0x14] sm:$0xf]  ;;  %v1304_v56 = vor.u32 %v1679_v49, %v1303_v48 }
  0x34   : > { %997 = vmatpush.bf16.msrb.mxu0 %v1742_v53  ;;  %v1680_v53 = vld [vmem:[%s1931_s19 + $0x34] sm:$0xf0] }
  0x35   : > { %1026 = vmatpush.bf16.msrb.mxu1 %v1750_v55  ;;  %v1313_v55 = vld [vmem:[%s1931_s19 + $0x38] sm:$0xf0] }
  0x36   : > { %1055 = vmatpush.bf16.msrb.mxu2 %v1758_v52  ;;  %v1311_v52 = vld [vmem:[%s1931_s19 + $0x18] sm:$0xf] }
  0x37   : > { %1084 = vmatpush.bf16.msrb.mxu3 %v1766_v54  ;;  %v1676_v54 = vld [vmem:[%s1931_s19 + $0x1c] sm:$0xf] }
  0x38   : > { %998 = vmatpush.bf16.msrb.mxu0 %v1741_v58  ;;  %v1312_v58 = vor.u32 %v1680_v53, %v1311_v52  ;;  %v1316_v59 = vor.u32 %v1676_v54, %v1313_v55 }
  0x39   : > { %1027 = vmatpush.bf16.msrb.mxu1 %v1749_v3  ;;  %v1345_v3 = vld [vmem:[%s1931_s19 + $0x78] sm:$0xf0] }
  0x3a   : > { %1056 = vmatpush.bf16.msrb.mxu2 %v1757_v57  ;;  %v1308_v57 = vor.u32 %v1675_v50, %v1305_v51 }
  0x3b   : > { %1085 = vmatpush.bf16.msrb.mxu3 %v1765_v2  ;;  %892 = vmatmul.bf16.gmra.mxu0 %v1320_v6  ;;  %v1684_v2 = vld [vmem:[%s1931_s19 + $0x5c] sm:$0xf]  ;;  %v1344_v6 = vor.u32 %v1688_v1, %v1343_v0 }
  0x3c   : > { %999 = vmatpush.bf16.msrb.mxu0 %v1740_v5  ;;  %921 = vmatmul.bf16.gmra.mxu1 %v1324_v7  ;;  %v1340_v5 = vor.u32 %v1683_v62, %v1337_v63  ;;  %v1348_v7 = vor.u32 %v1684_v2, %v1345_v3 }
  0x3d   : > { %950 = vmatmul.bf16.gmra.mxu2 %v1328_v8  ;;  %1028 = vmatpush.bf16.msrb.mxu1 %v1748_v11  ;;  %v1367_v8 = vld [vmem:[%s1931_s19 + $0x90] sm:$0xf]  ;;  %v1369_v11 = vld [vmem:[%s1931_s19 + $0xb0] sm:$0xf0] }
  0x3e   : > { %1057 = vmatpush.bf16.msrb.mxu2 %v1756_v4  ;;  %979 = vmatmul.bf16.gmra.mxu3 %v1332_v9  ;;  %v1336_v4 = vor.u32 %v1687_v61, %v1335_v60  ;;  %v1695_v9 = vld [vmem:[%s1931_s19 + $0xac] sm:$0xf0] }
  0x3f   : > { %1086 = vmatpush.bf16.msrb.mxu3 %v1764_v10  ;;  %v1691_v10 = vld [vmem:[%s1931_s19 + $0x94] sm:$0xf] }
  0x40   : > { %1000 = vmatpush.bf16.msrb.mxu0 %v1739_v13  ;;  %v1696_v13 = vld [vmem:[%s1931_s19 + $0xb4] sm:$0xf0] }
  0x41   : > { %1029 = vmatpush.bf16.msrb.mxu1 %v1747_v15  ;;  %v1377_v15 = vld [vmem:[%s1931_s19 + $0xb8] sm:$0xf0] }
  0x42   : > { %1058 = vmatpush.bf16.msrb.mxu2 %v1755_v12  ;;  %v1375_v12 = vld [vmem:[%s1931_s19 + $0x98] sm:$0xf] }
  0x43   : > { %1087 = vmatpush.bf16.msrb.mxu3 %v1763_v14  ;;  %v1692_v14 = vld [vmem:[%s1931_s19 + $0x9c] sm:$0xf] }
  0x44   : > { %1001 = vmatpush.bf16.msrb.mxu0 %v1738_v17  ;;  %v1372_v17 = vor.u32 %v1691_v10, %v1369_v11 }
  0x45   : > { %1030 = vmatpush.bf16.msrb.mxu1 %v1746_v19  ;;  %v1380_v19 = vor.u32 %v1692_v14, %v1377_v15 }
  0x46   : > { %1059 = vmatpush.bf16.msrb.mxu2 %v1754_v16  ;;  %v1368_v16 = vor.u32 %v1695_v9, %v1367_v8 }
  0x47   : > { %1088 = vmatpush.bf16.msrb.mxu3 %v1762_v18  ;;  %v1376_v18 = vor.u32 %v1696_v13, %v1375_v12 }
  0x48   : > { %1002 = vmatpush.bf16.msrb.mxu0 %v1737_v22  ;;  %v1699_v22 = vld [vmem:[%s1931_s19 + $0xd4] sm:$0xf] }
  0x49   : > { %1031 = vmatpush.bf16.msrb.mxu1 %v1745_v31  ;;  %v1404_v29 = vor.u32 %v1699_v22, %v1401_v23  ;;  %v1412_v31 = vor.u32 %v1700_v26, %v1409_v27 }
  0x4a   : > { %1060 = vmatpush.bf16.msrb.mxu2 %v1753_v21  ;;  %v1703_v21 = vld [vmem:[%s1931_s19 + $0xec] sm:$0xf0]  ;;  %s1672_s19 = sshll.u32 %s2163_s13, 5 }
  0x4b   : > { %1089 = vmatpush.bf16.msrb.mxu3 %v1761_v30  ;;  %897 = vmatmul.bf16.gmra.mxu0 %v1352_v32  ;;  %v1400_v28 = vor.u32 %v1703_v21, %v1399_v20  ;;  %v1408_v30 = vor.u32 %v1704_v25, %v1407_v24  ;;  %v2114_v32 = vld [vmem:[%s2160_s2] ss:$0 sm:$0xff]  ;;  %s170_s13 = scalar_lea.vmem %s2161_s3, %s1672_s19 }
  0x4c   : > { %926 = vmatmul.bf16.gmra.mxu1 %v1356_v33 }
  0x4d   : > { %955 = vmatmul.bf16.gmra.mxu2 %v1360_v34 }
  0x4e   : > { %984 = vmatmul.bf16.gmra.mxu3 %v1364_v35 }
  0x5b   : > { %902 = vmatmul.bf16.gmra.mxu0 %v1384_v44 }
  0x5c   : > { %931 = vmatmul.bf16.gmra.mxu1 %v1388_v45 }
  0x5d   : > { %960 = vmatmul.bf16.gmra.mxu2 %v1392_v46 }
  0x5e   : > { %989 = vmatmul.bf16.gmra.mxu3 %v1396_v47 }
  0x6b   : > { %1003 = vmatmul.bf16.vlgmr.msrb.gmra.mxu0 %v1304_v56 }
  0x6c   : > { %1032 = vmatmul.bf16.vlgmr.msrb.gmra.mxu1 %v1308_v57 }
  0x6d   : > { %1061 = vmatmul.bf16.vlgmr.msrb.gmra.mxu2 %v1312_v58 }
  0x6e   : > { %1090 = vmatmul.bf16.vlgmr.msrb.gmra.mxu3 %v1316_v59 }
  0x7b   : > { %1008 = vmatmul.bf16.gmra.mxu0 %v1336_v4 }
  0x7c   : > { %1037 = vmatmul.bf16.gmra.mxu1 %v1340_v5 }
  0x7d   : > { %1066 = vmatmul.bf16.gmra.mxu2 %v1344_v6 }
  0x7e   : > { %1095 = vmatmul.bf16.gmra.mxu3 %v1348_v7 }
  0x8b   : > { %1013 = vmatmul.bf16.gmra.mxu0 %v1368_v16 }
  0x8c   : > { %1042 = vmatmul.bf16.gmra.mxu1 %v1372_v17 }
  0x8d   : > { %1071 = vmatmul.bf16.gmra.mxu2 %v1376_v18 }
  0x8e   : > { %1100 = vmatmul.bf16.gmra.mxu3 %v1380_v19 }
  0x9b   : > { %1018 = vmatmul.bf16.gmra.mxu0 %v1400_v28 }
  0x9c   : > { %1047 = vmatmul.bf16.gmra.mxu1 %v1404_v29 }
  0x9d   : > { %1076 = vmatmul.bf16.gmra.mxu2 %v1408_v30 }
  0x9e   : > { %1105 = vmatmul.bf16.gmra.mxu3 %v1412_v31 }
  0xa8   : > { %v888_v33 = vpop.f32.mrf.mxu0 }
  0xa9   : > { %v917_v34 = vpop.f32.mrf.mxu1  ;;  %v889_v35 = vadd.f32 %v2114_v32, %v888_v33 }
  0xab   : > { %v918_v36 = vadd.f32 %v917_v34, %v889_v35 }
  0xb0   : > { %v946_v37 = vpop.f32.mrf.mxu2  ;;  %v890_v40 = vpop.f32.mrf.mxu0 }
  0xb1   : > { %v975_v38 = vpop.f32.mrf.mxu3  ;;  %v947_v39 = vadd.f32 %v946_v37, %v918_v36  ;;  %v919_v41 = vpop.f32.mrf.mxu1  ;;  %v891_v42 = vadd.f32 %v2114_v32, %v890_v40 }
  0xb3   : > { %v976_v43 = vadd.f32 %v975_v38, %v947_v39  ;;  %v920_v44 = vadd.f32 %v919_v41, %v891_v42 }
  0xb8   : > { %v948_v45 = vpop.f32.mrf.mxu2  ;;  %v893_v48 = vpop.f32.mrf.mxu0 }
  0xb9   : > { %v977_v46 = vpop.f32.mrf.mxu3  ;;  %v949_v47 = vadd.f32 %v948_v45, %v920_v44  ;;  %v922_v49 = vpop.f32.mrf.mxu1  ;;  %v894_v50 = vadd.f32 %v2114_v32, %v893_v48 }
  0xbb   : > { %v978_v51 = vadd.f32 %v977_v46, %v949_v47  ;;  %v923_v52 = vadd.f32 %v922_v49, %v894_v50 }
  0xc0   : > { %v951_v53 = vpop.f32.mrf.mxu2  ;;  %v895_v56 = vpop.f32.mrf.mxu0 }
  0xc1   : > { %v980_v54 = vpop.f32.mrf.mxu3  ;;  %v952_v55 = vadd.f32 %v951_v53, %v923_v52  ;;  %v924_v57 = vpop.f32.mrf.mxu1  ;;  %v896_v58 = vadd.f32 %v2114_v32, %v895_v56 }
  0xc3   : > { %v981_v59 = vadd.f32 %v980_v54, %v952_v55  ;;  %v925_v60 = vadd.f32 %v924_v57, %v896_v58 }
  0xc8   : > { %v953_v61 = vpop.f32.mrf.mxu2  ;;  %v898_v0 = vpop.f32.mrf.mxu0 }
  0xc9   : > { %v982_v62 = vpop.f32.mrf.mxu3  ;;  %v954_v63 = vadd.f32 %v953_v61, %v925_v60  ;;  %v927_v1 = vpop.f32.mrf.mxu1  ;;  %v899_v2 = vadd.f32 %v2114_v32, %v898_v0 }
  0xcb   : > { %v983_v3 = vadd.f32 %v982_v62, %v954_v63  ;;  %v928_v4 = vadd.f32 %v927_v1, %v899_v2 }
  0xd0   : > { %v956_v5 = vpop.f32.mrf.mxu2  ;;  %v900_v8 = vpop.f32.mrf.mxu0 }
  0xd1   : > { %v985_v6 = vpop.f32.mrf.mxu3  ;;  %v957_v7 = vadd.f32 %v956_v5, %v928_v4  ;;  %v929_v9 = vpop.f32.mrf.mxu1  ;;  %v901_v10 = vadd.f32 %v2114_v32, %v900_v8 }
  0xd3   : > { %v986_v11 = vadd.f32 %v985_v6, %v957_v7  ;;  %v930_v12 = vadd.f32 %v929_v9, %v901_v10 }
  0xd8   : > { %v958_v13 = vpop.f32.mrf.mxu2  ;;  %v903_v16 = vpop.f32.mrf.mxu0 }
  0xd9   : > { %v987_v14 = vpop.f32.mrf.mxu3  ;;  %v959_v15 = vadd.f32 %v958_v13, %v930_v12  ;;  %v932_v17 = vpop.f32.mrf.mxu1  ;;  %v904_v0 = vadd.f32 %v2114_v32, %v903_v16 }
  0xdb   : > { %v988_v18 = vadd.f32 %v987_v14, %v959_v15  ;;  %v933_v7 = vadd.f32 %v932_v17, %v904_v0 }
  0xe0   : > { %v961_v19 = vpop.f32.mrf.mxu2  ;;  %v905_v21 = vpop.f32.mrf.mxu0 }
  0xe1   : > { %v990_v20 = vpop.f32.mrf.mxu3  ;;  %v934_v22 = vpop.f32.mrf.mxu1  ;;  %v962_v12 = vadd.f32 %v961_v19, %v933_v7  ;;  %v906_v13 = vadd.f32 %v2114_v32, %v905_v21 }
  0xe3   : > { %v935_v16 = vadd.f32 %v934_v22, %v906_v13 }
  0xe8   : > { %v963_v23 = vpop.f32.mrf.mxu2  ;;  %v1004_v25 = vpop.f32.mrf.mxu0 }
  0xe9   : > { %v2122_v24 = vpop.f32.mrf.mxu3  ;;  %v1033_v26 = vpop.f32.mrf.mxu1  ;;  %v1005_v29 = vadd.f32 %v1004_v25, %v976_v43 }
  0xeb   : > { %v1034_v34 = vadd.f32 %v1033_v26, %v1005_v29 }
  0xf0   : > { %v1062_v27 = vpop.f32.mrf.mxu2  ;;  %v1006_v30 = vpop.f32.mrf.mxu0 }
  0xf1   : > { %v1091_v28 = vpop.f32.mrf.mxu3  ;;  %v1035_v31 = vpop.f32.mrf.mxu1  ;;  %v1007_v33 = vadd.f32 %v1006_v30, %v978_v51  ;;  %v1063_v35 = vadd.f32 %v1062_v27, %v1034_v34  ;;  %v991_v27 = vadd.f32 %v990_v20, %v962_v12  ;;  %v964_v30 = vadd.f32 %v963_v23, %v935_v16 }
  0xf2   : > { %v1814_v34 = vmov 64.0  }
  0xf3   : > { %v1036_v36 = vadd.f32 %v1035_v31, %v1007_v33  ;;  %v2124_v42 = vadd.f32 %v1091_v28, %v1063_v35  ;;  %1802 = vrcp.f32 %v1814_v34  ;;  %v993_v19 = vadd.f32 %v2122_v24, %v964_v30 }
  0xf8   : > { %v1064_v37 = vpop.f32.mrf.mxu2  ;;  %v1009_v40 = vpop.f32.mrf.mxu0 }
  0xf9   : > { %v1093_v38 = vpop.f32.mrf.mxu3  ;;  %v1065_v39 = vadd.f32 %v1064_v37, %v1036_v36  ;;  %v1038_v41 = vpop.f32.mrf.mxu1  ;;  %v1010_v45 = vadd.f32 %v1009_v40, %v981_v59 }
  0xfa   : > { %v1803_v37 = vpop.eup %1802 }
  0xfb   : > { %v2126_v44 = vadd.f32 %v1093_v38, %v1065_v39  ;;  %v1039_v43 = vadd.f32 %v1038_v41, %v1010_v45  ;;  %v1125_v40 = vmul.f32 64.0, %v1803_v37  ;;  %vm1129_vm0 = vweird.f32 %v1803_v37 }
  0xfd   : > { %v1111_v46 = vadd.f32 %v2126_v44, %v2124_v42 }
 0x100   : > { %v1067_v47 = vpop.f32.mrf.mxu2  ;;  %v1011_v50 = vpop.f32.mrf.mxu0 }
 0x101   : > { %v1096_v48 = vpop.f32.mrf.mxu3  ;;  %v1068_v49 = vadd.f32 %v1067_v47, %v1039_v43  ;;  %v1040_v51 = vpop.f32.mrf.mxu1  ;;  %v1012_v53 = vadd.f32 %v1011_v50, %v983_v3  ;;  %v1126_v43 = vsub.f32 1.0, %v1125_v40 }
 0x103   : > { %v2130_v52 = vadd.f32 %v1096_v48, %v1068_v49  ;;  %v1041_v55 = vadd.f32 %v1040_v51, %v1012_v53  ;;  %v1127_v49 = vmul.f32 %v1803_v37, %v1126_v43 }
 0x105   : > { %v1112_v54 = vadd.f32 %v1111_v46, %v2130_v52  ;;  %v1128_v51 = vadd.f32 %v1803_v37, %v1127_v49 }
 0x108   : > { %v1069_v56 = vpop.f32.mrf.mxu2  ;;  %v1014_v60 = vpop.f32.mrf.mxu0 }
 0x109   : > { %v1098_v57 = vpop.f32.mrf.mxu3  ;;  %v1070_v58 = vadd.f32 %v1069_v56, %v1041_v55  ;;  %v1043_v59 = vpop.f32.mrf.mxu1  ;;  %v1015_v62 = vadd.f32 %v1014_v60, %v986_v11  ;;  %v1130_v55 = vsel %vm1129_vm0, %v1803_v37, %v1128_v51 }
 0x10b   : > { %v2133_v61 = vadd.f32 %v1098_v57, %v1070_v58  ;;  %v1044_v1 = vadd.f32 %v1043_v59, %v1015_v62 }
 0x10d   : > { %v1113_v63 = vadd.f32 %v1112_v54, %v2133_v61 }
 0x110   : > { %v1072_v2 = vpop.f32.mrf.mxu2  ;;  %v1016_v3 = vpop.f32.mrf.mxu0 }
 0x111   : > { %v1101_v4 = vpop.f32.mrf.mxu3  ;;  %v1073_v5 = vadd.f32 %v1072_v2, %v1044_v1  ;;  %v1045_v6 = vpop.f32.mrf.mxu1  ;;  %v1017_v9 = vadd.f32 %v1016_v3, %v988_v18 }
 0x113   : > { %v1102_v8 = vadd.f32 %v1101_v4, %v1073_v5  ;;  %v1046_v14 = vadd.f32 %v1045_v6, %v1017_v9 }
 0x115   : > { %v1114_v10 = vadd.f32 %v1113_v63, %v1102_v8 }
 0x118   : > { %v1074_v15 = vpop.f32.mrf.mxu2  ;;  %v1019_v26 = vpop.f32.mrf.mxu0 }
 0x119   : > { %v1103_v11 = vpop.f32.mrf.mxu3  ;;  %v1075_v25 = vadd.f32 %v1074_v15, %v1046_v14  ;;  %v1048_v29 = vpop.f32.mrf.mxu1  ;;  %v1020_v33 = vadd.f32 %v1019_v26, %v991_v27 }
 0x11b   : > { %v1104_v28 = vadd.f32 %v1103_v11, %v1075_v25  ;;  %v1049_v35 = vadd.f32 %v1048_v29, %v1020_v33 }
 0x11d   : > { %v1115_v31 = vadd.f32 %v1114_v10, %v1104_v28 }
 0x120   : > { %v1077_v17 = vpop.f32.mrf.mxu2  ;;  %v1021_v32 = vpop.f32.mrf.mxu0 }
 0x121   : > { %v1106_v18 = vpop.f32.mrf.mxu3  ;;  %v1078_v21 = vadd.f32 %v1077_v17, %v1049_v35  ;;  %v1022_v36 = vadd.f32 %v1021_v32, %v993_v19  ;;  %v1050_v38 = vpop.f32.mrf.mxu1 }
 0x123   : > { %v1107_v39 = vadd.f32 %v1106_v18, %v1078_v21  ;;  %v1051_v20 = vadd.f32 %v1050_v38, %v1022_v36 }
 0x125   : > { %v1116_v45 = vadd.f32 %v1115_v31, %v1107_v39 }
 0x128   : > { %v1079_v22 = vpop.f32.mrf.mxu2 }
 0x129   : > { %v1080_v41 = vadd.f32 %v1079_v22, %v1051_v20  ;;  %v1108_v23 = vpop.f32.mrf.mxu3 }
 0x12b   : > { %v1109_v46 = vadd.f32 %v1108_v23, %v1080_v41 }
 0x12d   : > { %v1117_v47 = vadd.f32 %v1116_v45, %v1109_v46 }
 0x12f   : > { %v1118_v48 = vrot.slane %v1117_v47, 4 }
 0x131   : > { %v1119_v50 = vadd.f32 %v1118_v48, %v1117_v47 }
 0x133   : > { %v1120_v24 = vrot.slane %v1119_v50, 2 }
 0x135   : > { %v1121_v53 = vadd.f32 %v1120_v24, %v1119_v50 }
 0x137   : > { %v1122_v54 = vrot.slane %v1121_v53, 1 }
 0x139   : > { %v1123_v56 = vadd.f32 %v1122_v54, %v1121_v53 }
 0x13b   : > { %v1131_v57 = vmul.f32 %v1130_v55, %v1123_v56 }
 0x13d   : > { %v1132_v58 = vsub.f32 %v2124_v42, %v1131_v57  ;;  %v1133_v60 = vsub.f32 %v2126_v44, %v1131_v57  ;;  %v1134_v59 = vsub.f32 %v2130_v52, %v1131_v57  ;;  %v1135_v62 = vsub.f32 %v2133_v61, %v1131_v57 }
 0x13e   : > { %v1136_v63 = vsub.f32 %v1102_v8, %v1131_v57  ;;  %v1137_v0 = vsub.f32 %v1104_v28, %v1131_v57  ;;  %v1138_v7 = vsub.f32 %v1107_v39, %v1131_v57  ;;  %v1139_v12 = vsub.f32 %v1109_v46, %v1131_v57 }
 0x13f   : > { %v1140_v1 = vmul.f32 %v1132_v58, %v1132_v58  ;;  %v1141_v2 = vmul.f32 %v1133_v60, %v1133_v60  ;;  %v1142_v4 = vmul.f32 %v1134_v59, %v1134_v59  ;;  %v1143_v3 = vmul.f32 %v1135_v62, %v1135_v62 }
 0x140   : > { %v1144_v9 = vmul.f32 %v1136_v63, %v1136_v63  ;;  %v1145_v13 = vmul.f32 %v1137_v0, %v1137_v0  ;;  %v1146_v14 = vmul.f32 %v1138_v7, %v1138_v7  ;;  %v1147_v15 = vmul.f32 %v1139_v12, %v1139_v12 }
 0x141   : > { %v1148_v5 = vadd.f32 %v1141_v2, %v1140_v1 }
 0x143   : > { %v1149_v6 = vadd.f32 %v1148_v5, %v1142_v4 }
 0x145   : > { %v1150_v10 = vadd.f32 %v1149_v6, %v1143_v3 }
 0x147   : > { %v1151_v42 = vadd.f32 %v1150_v10, %v1144_v9 }
 0x149   : > { %v1152_v44 = vadd.f32 %v1151_v42, %v1145_v13 }
 0x14b   : > { %v1153_v52 = vadd.f32 %v1152_v44, %v1146_v14 }
 0x14d   : > { %v1154_v11 = vadd.f32 %v1153_v52, %v1147_v15 }
 0x14f   : > { %v1155_v61 = vrot.slane %v1154_v11, 4 }
 0x151   : > { %v1156_v8 = vadd.f32 %v1155_v61, %v1154_v11 }
 0x153   : > { %v1157_v25 = vrot.slane %v1156_v8, 2 }
 0x155   : > { %v1158_v26 = vadd.f32 %v1157_v25, %v1156_v8 }
 0x157   : > { %v1159_v27 = vrot.slane %v1158_v26, 1 }
 0x159   : > { %v1160_v16 = vadd.f32 %v1159_v27, %v1158_v26 }
 0x15b   : > { %v1161_v28 = vmul.f32 %v1160_v16, %v1130_v55 }
 0x15d   : > { %v1162_v29 = vadd.f32 1e-05, %v1161_v28 }
 0x15f   : > { %1804 = vrsqrt.f32 %v1162_v29  ;;  %vm1169_vm2 = vweird.f32 %v1162_v29 }
 0x165   : > { %v1805_v30 = vpop.eup %1804 }
 0x166   : > { %v1164_v31 = vmul.f32 %v1805_v30, %v1162_v29  ;;  %vm1170_vm1 = vweird.f32 %v1805_v30 }
 0x167   : > { %vm1171_vm3 = vmor %vm1169_vm2, %vm1170_vm1 }
 0x168   : > { %v1165_v33 = vmul.f32 %v1805_v30, %v1164_v31 }
 0x16a   : > { %v1166_v34 = vmul.f32 0.5, %v1165_v33 }
 0x16c   : > { %v1167_v17 = vsub.f32 1.5, %v1166_v34 }
 0x16e   : > { %v1168_v18 = vmul.f32 %v1805_v30, %v1167_v17 }
 0x170   : > { %v1172_v19 = vsel %vm1171_vm3, %v1805_v30, %v1168_v18 }
 0x171   : > { %v1173_v35 = vmul.f32 %v1172_v19, %v1132_v58  ;;  %v1174_v32 = vmul.f32 %v1172_v19, %v1133_v60  ;;  %v1175_v21 = vmul.f32 %v1172_v19, %v1134_v59  ;;  %v1176_v36 = vmul.f32 %v1172_v19, %v1135_v62 }
 0x172   : > { %v1177_v37 = vmul.f32 %v1172_v19, %v1136_v63  ;;  %v1178_v38 = vmul.f32 %v1172_v19, %v1137_v0  ;;  %v1179_v39 = vmul.f32 %v1172_v19, %v1138_v7  ;;  %v1180_v20 = vmul.f32 %v1172_v19, %v1139_v12 }
 0x173   : > { %vm1181_vm4 = vcmp.ge.f32.partialorder %v1173_v35, 0.0  ;;  %vm1182_vm5 = vcmp.ge.f32.partialorder %v1174_v32, 0.0  ;;  %vm1183_vm6 = vcmp.ge.f32.partialorder %v1175_v21, 0.0  ;;  %vm1184_vm7 = vcmp.ge.f32.partialorder %v1176_v36, 0.0 }
 0x174   : > { %vm1185_vm8 = vcmp.ge.f32.partialorder %v1177_v37, 0.0  ;;  %vm1186_vm9 = vcmp.ge.f32.partialorder %v1178_v38, 0.0  ;;  %vm1187_vm10 = vcmp.ge.f32.partialorder %v1179_v39, 0.0  ;;  %vm1188_vm11 = vcmp.ge.f32.partialorder %v1180_v20, 0.0 }
 0x175   : > { %v1189_v22 = vmul.f32 0.2, %v1173_v35  ;;  %v1190_v40 = vmul.f32 0.2, %v1174_v32  ;;  %v1191_v41 = vmul.f32 0.2, %v1175_v21 }
 0x176   : > { %v1192_v23 = vmul.f32 0.2, %v1176_v36  ;;  %v1193_v45 = vmul.f32 0.2, %v1177_v37  ;;  %v1194_v46 = vmul.f32 0.2, %v1178_v38 }
 0x177   : > { %v1195_v43 = vmul.f32 0.2, %v1179_v39  ;;  %v1196_v47 = vmul.f32 0.2, %v1180_v20  ;;  %v1197_v48 = vsel %vm1181_vm4, %v1173_v35, %v1189_v22  ;;  %v1198_v49 = vsel %vm1182_vm5, %v1174_v32, %v1190_v40 }
 0x178   : > { %v1199_v50 = vsel %vm1183_vm6, %v1175_v21, %v1191_v41  ;;  %v1200_v24 = vsel %vm1184_vm7, %v1176_v36, %v1192_v23  ;;  %v1201_v51 = vsel %vm1185_vm8, %v1177_v37, %v1193_v45  ;;  %v1202_v53 = vsel %vm1186_vm9, %v1178_v38, %v1194_v46 }
 0x179   : > { %v1203_v54 = vsel %vm1187_vm10, %v1179_v39, %v1195_v43  ;;  %v1204_v55 = vsel %vm1188_vm11, %v1180_v20, %v1196_v47  ;;  %v1772_v56 = vpack.c.bf16 %v1198_v49, %v1197_v48  ;;  %v1777_v57 = vpack.c.bf16 %v1200_v24, %v1199_v50 }
 0x17a   : > { %v1782_v58 = vpack.c.bf16 %v1202_v53, %v1201_v51  ;;  %v1787_v60 = vpack.c.bf16 %v1204_v55, %v1203_v54 }
 0x17b   : > { %1773 = vst [vmem:[%s170_s13] sm:$0xff] %v1772_v56  }
 0x17c   : > { %1789 = vst [vmem:[%s170_s13 + $0x8] sm:$0xff] %v1777_v57  }
 0x17d   : > { %1790 = vst [vmem:[%s170_s13 + $0x10] sm:$0xff] %v1782_v58  }
 0x17e   : > { %1791 = vst [vmem:[%s170_s13 + $0x18] sm:$0xff] %v1787_v60  }
 0x17f PF: > { %s13_s12 = sadd.s32 1, %s1812_s12  }
 0x180   : > { %p10_p4 = scmp.ge.s32.totalorder %s13_s12, 4  }
 0x182   :  { %12 = sbr.rel (!%p10_p4) target bundleno = 1 (0x1), region = 62 }

// kernel: discriminator_forward.6
= control target key start
LH: loop header
LB: loop body
LE: loop exit
PB: predicated region body
PF: predicated region fallthrough
CT: control target
= control target key end

     0   :  { %s3818_s12 = smov 0   ;;  %s5513_s0 = inlined_call_operand.vmem [shape: bf16[2,16,2048], index: 0, kind: input, shape index: {}]   ;;  %s5514_s1 = inlined_call_operand.vmem [shape: bf16[2048,256], index: 1, kind: input, shape index: {}]   ;;  %s5515_s2 = inlined_call_operand.vmem [shape: f32[1,256], index: 2, kind: input, shape index: {}]   ;;  %s5516_s3 = inlined_call_operand.vmem [shape: bf16[2,16,256], index: 3, kind: output, shape index: {}]  }
   0x1 LB: > { %s2401_s13 = sadd.s32 4294967295, %s3795_s12   ;;  %p2405_p0 = scmp.ge.s32.totalorder %s3795_s12, 1  ;;  %s3795_s12 = sphi %s3818_s12, %s13_s12  }
   0x2   : > { %p137_p1 = scmp.lt.s32.totalorder %s3795_s12, 3 }
   0x4   : > { %p138_p2 = pnand %p2405_p0, %p137_p1 }
   0x5   : > { %p161_p3 = scmp.lt.s32.totalorder (!%p138_p2), %s2401_s13, 1 }
   0x6   : > { %141 = sbr.rel (%p138_p2) target bundleno = 480 (0x1e0), region = 32 }
   0xb   : > { %v2532_v0 = vld [vmem:[%s5514_s1 + $0x70] sm:$0xf]  ;;  %v3533_v1 = vld [vmem:[%s5514_s1 + $0x74] sm:$0xf0]  ;;  %v2524_v11 = vld [vmem:[%s5514_s1 + $0x60] sm:$0xf] }
   0xc   : > { %v2596_v2 = vld [vmem:[%s5514_s1 + $0xf0] sm:$0xf]  ;;  %v2533_v3 = vor.u32 %v3533_v1, %v2532_v0  ;;  %v3549_v4 = vld [vmem:[%s5514_s1 + $0xf4] sm:$0xf0]  ;;  %v3531_v13 = vld [vmem:[%s5514_s1 + $0x64] sm:$0xf0] }
   0xd   : > { %v2660_v5 = vld [vmem:[%s5514_s1 + $0x170] sm:$0xf]  ;;  %v3565_v6 = vld [vmem:[%s5514_s1 + $0x174] sm:$0xf0]  ;;  %v2597_v7 = vor.u32 %v3549_v4, %v2596_v2  ;;  %v2588_v14 = vld [vmem:[%s5514_s1 + $0xe0] sm:$0xf]  ;;  %v2525_v16 = vor.u32 %v3531_v13, %v2524_v11 }
   0xe   : > { %v2661_v8 = vor.u32 %v3565_v6, %v2660_v5  ;;  %v2724_v9 = vld [vmem:[%s5514_s1 + $0x1f0] sm:$0xf]  ;;  %v3581_v10 = vld [vmem:[%s5514_s1 + $0x1f4] sm:$0xf0]  ;;  %1809 = vmatpush.bf16.msra.mxu0 %v2533_v3  ;;  %v3547_v15 = vld [vmem:[%s5514_s1 + $0xe4] sm:$0xf0] }
   0xf   : > { %v2725_v12 = vor.u32 %v3581_v10, %v2724_v9  ;;  %1823 = vmatpush.bf16.msra.mxu1 %v2597_v7  ;;  %v2589_v17 = vor.u32 %v3547_v15, %v2588_v14  ;;  %v2652_v18 = vld [vmem:[%s5514_s1 + $0x160] sm:$0xf]  ;;  %v3563_v19 = vld [vmem:[%s5514_s1 + $0x164] sm:$0xf0]  ;;  %v2516_v23 = vld [vmem:[%s5514_s1 + $0x50] sm:$0xf] }
  0x10   : > { %1837 = vmatpush.bf16.msra.mxu2 %v2661_v8  ;;  %v2716_v20 = vld [vmem:[%s5514_s1 + $0x1e0] sm:$0xf]  ;;  %v2653_v21 = vor.u32 %v3563_v19, %v2652_v18  ;;  %v3579_v22 = vld [vmem:[%s5514_s1 + $0x1e4] sm:$0xf0]  ;;  %v3529_v24 = vld [vmem:[%s5514_s1 + $0x54] sm:$0xf0] }
  0x11   : > { %1851 = vmatpush.bf16.msra.mxu3 %v2725_v12  ;;  %v2717_v25 = vor.u32 %v3579_v22, %v2716_v20  ;;  %v2580_v26 = vld [vmem:[%s5514_s1 + $0xd0] sm:$0xf]  ;;  %v3545_v27 = vld [vmem:[%s5514_s1 + $0xd4] sm:$0xf0]  ;;  %v2517_v29 = vor.u32 %v3529_v24, %v2516_v23  ;;  %v2508_v35 = vld [vmem:[%s5514_s1 + $0x40] sm:$0xf] }
  0x12   : > { %v2644_v28 = vld [vmem:[%s5514_s1 + $0x150] sm:$0xf]  ;;  %1810 = vmatpush.bf16.msra.mxu0 %v2525_v16  ;;  %v3561_v30 = vld [vmem:[%s5514_s1 + $0x154] sm:$0xf0]  ;;  %v2581_v33 = vor.u32 %v3545_v27, %v2580_v26  ;;  %v3527_v36 = vld [vmem:[%s5514_s1 + $0x44] sm:$0xf0] }
  0x13   : > { %v2708_v31 = vld [vmem:[%s5514_s1 + $0x1d0] sm:$0xf]  ;;  %v3577_v32 = vld [vmem:[%s5514_s1 + $0x1d4] sm:$0xf0]  ;;  %1824 = vmatpush.bf16.msra.mxu1 %v2589_v17  ;;  %v2645_v34 = vor.u32 %v3561_v30, %v2644_v28  ;;  %v2572_v37 = vld [vmem:[%s5514_s1 + $0xc0] sm:$0xf]  ;;  %v2509_v44 = vor.u32 %v3527_v36, %v2508_v35 }
  0x14   : > { %1838 = vmatpush.bf16.msra.mxu2 %v2653_v21  ;;  %v2709_v38 = vor.u32 %v3577_v32, %v2708_v31  ;;  %v3543_v39 = vld [vmem:[%s5514_s1 + $0xc4] sm:$0xf0]  ;;  %v2636_v40 = vld [vmem:[%s5514_s1 + $0x140] sm:$0xf]  ;;  %v2500_v47 = vld [vmem:[%s5514_s1 + $0x30] sm:$0xf] }
  0x15   : > { %1852 = vmatpush.bf16.msra.mxu3 %v2717_v25  ;;  %v3559_v41 = vld [vmem:[%s5514_s1 + $0x144] sm:$0xf0]  ;;  %v2700_v42 = vld [vmem:[%s5514_s1 + $0x1c0] sm:$0xf]  ;;  %v2573_v45 = vor.u32 %v3543_v39, %v2572_v37  ;;  %v3525_v48 = vld [vmem:[%s5514_s1 + $0x34] sm:$0xf0] }
  0x16   : > { %v3575_v43 = vld [vmem:[%s5514_s1 + $0x1c4] sm:$0xf0]  ;;  %1811 = vmatpush.bf16.msra.mxu0 %v2517_v29  ;;  %v2637_v46 = vor.u32 %v3559_v41, %v2636_v40  ;;  %v2564_v49 = vld [vmem:[%s5514_s1 + $0xb0] sm:$0xf]  ;;  %v3541_v51 = vld [vmem:[%s5514_s1 + $0xb4] sm:$0xf0]  ;;  %v2501_v56 = vor.u32 %v3525_v48, %v2500_v47 }
  0x17   : > { %1825 = vmatpush.bf16.msra.mxu1 %v2581_v33  ;;  %v2701_v50 = vor.u32 %v3575_v43, %v2700_v42  ;;  %v2628_v52 = vld [vmem:[%s5514_s1 + $0x130] sm:$0xf]  ;;  %v3557_v53 = vld [vmem:[%s5514_s1 + $0x134] sm:$0xf0]  ;;  %v2565_v57 = vor.u32 %v3541_v51, %v2564_v49  ;;  %v2492_v59 = vld [vmem:[%s5514_s1 + $0x20] sm:$0xf] }
  0x18   : > { %1839 = vmatpush.bf16.msra.mxu2 %v2645_v34  ;;  %v2692_v54 = vld [vmem:[%s5514_s1 + $0x1b0] sm:$0xf]  ;;  %v3573_v55 = vld [vmem:[%s5514_s1 + $0x1b4] sm:$0xf0]  ;;  %v2629_v58 = vor.u32 %v3557_v53, %v2628_v52  ;;  %v3523_v60 = vld [vmem:[%s5514_s1 + $0x24] sm:$0xf0] }
  0x19   : > { %1853 = vmatpush.bf16.msra.mxu3 %v2709_v38  ;;  %v2556_v61 = vld [vmem:[%s5514_s1 + $0xa0] sm:$0xf]  ;;  %v2693_v62 = vor.u32 %v3573_v55, %v2692_v54  ;;  %v3539_v63 = vld [vmem:[%s5514_s1 + $0xa4] sm:$0xf0]  ;;  %v2493_v4 = vor.u32 %v3523_v60, %v2492_v59  ;;  %v2484_v7 = vld [vmem:[%s5514_s1 + $0x10] sm:$0xf] }
  0x1a   : > { %1812 = vmatpush.bf16.msra.mxu0 %v2509_v44  ;;  %v2620_v0 = vld [vmem:[%s5514_s1 + $0x120] sm:$0xf]  ;;  %v3555_v1 = vld [vmem:[%s5514_s1 + $0x124] sm:$0xf0]  ;;  %v2557_v5 = vor.u32 %v3539_v63, %v2556_v61  ;;  %v3521_v8 = vld [vmem:[%s5514_s1 + $0x14] sm:$0xf0] }
  0x1b   : > { %1826 = vmatpush.bf16.msra.mxu1 %v2573_v45  ;;  %v2684_v2 = vld [vmem:[%s5514_s1 + $0x1a0] sm:$0xf]  ;;  %v3571_v3 = vld [vmem:[%s5514_s1 + $0x1a4] sm:$0xf0]  ;;  %v2621_v6 = vor.u32 %v3555_v1, %v2620_v0  ;;  %v2548_v9 = vld [vmem:[%s5514_s1 + $0x90] sm:$0xf]  ;;  %v2485_v16 = vor.u32 %v3521_v8, %v2484_v7 }
  0x1c   : > { %1840 = vmatpush.bf16.msra.mxu2 %v2637_v46  ;;  %v2685_v10 = vor.u32 %v3571_v3, %v2684_v2  ;;  %v3537_v11 = vld [vmem:[%s5514_s1 + $0x94] sm:$0xf0]  ;;  %v2612_v12 = vld [vmem:[%s5514_s1 + $0x110] sm:$0xf]  ;;  %v2476_v17 = vld [vmem:[%s5514_s1] sm:$0xf] }
  0x1d   : > { %1854 = vmatpush.bf16.msra.mxu3 %v2701_v50  ;;  %v3553_v13 = vld [vmem:[%s5514_s1 + $0x114] sm:$0xf0]  ;;  %v2676_v14 = vld [vmem:[%s5514_s1 + $0x190] sm:$0xf]  ;;  %v3519_v18 = vld [vmem:[%s5514_s1 + $0x4] sm:$0xf0]  ;;  %v2549_v19 = vor.u32 %v3537_v11, %v2548_v9 }
  0x1e   : > { %1813 = vmatpush.bf16.msra.mxu0 %v2501_v56  ;;  %v3569_v15 = vld [vmem:[%s5514_s1 + $0x194] sm:$0xf0]  ;;  %v2613_v20 = vor.u32 %v3553_v13, %v2612_v12  ;;  %v2540_v21 = vld [vmem:[%s5514_s1 + $0x80] sm:$0xf]  ;;  %v3535_v22 = vld [vmem:[%s5514_s1 + $0x84] sm:$0xf0]  ;;  %v2477_v31 = vor.u32 %v3519_v18, %v2476_v17 }
  0x1f   : > { %1827 = vmatpush.bf16.msra.mxu1 %v2565_v57  ;;  %v2604_v23 = vld [vmem:[%s5514_s1 + $0x100] sm:$0xf]  ;;  %v2677_v24 = vor.u32 %v3569_v15, %v2676_v14  ;;  %v3551_v25 = vld [vmem:[%s5514_s1 + $0x104] sm:$0xf0]  ;;  %v2788_v28 = vld [vmem:[%s5514_s1 + $0x270] sm:$0xf]  ;;  %v2541_v35 = vor.u32 %v3535_v22, %v2540_v21 }
  0x20   : > { %1841 = vmatpush.bf16.msra.mxu2 %v2629_v58  ;;  %v2668_v26 = vld [vmem:[%s5514_s1 + $0x180] sm:$0xf]  ;;  %v3567_v27 = vld [vmem:[%s5514_s1 + $0x184] sm:$0xf0]  ;;  %v3597_v29 = vld [vmem:[%s5514_s1 + $0x274] sm:$0xf0]  ;;  %v2605_v36 = vor.u32 %v3551_v25, %v2604_v23 }
  0x21   : > { %1855 = vmatpush.bf16.msra.mxu3 %v2693_v62  ;;  %v2852_v30 = vld [vmem:[%s5514_s1 + $0x2f0] sm:$0xf]  ;;  %v3613_v32 = vld [vmem:[%s5514_s1 + $0x2f4] sm:$0xf0]  ;;  %v2669_v39 = vor.u32 %v3567_v27, %v2668_v26  ;;  %v2789_v40 = vor.u32 %v3597_v29, %v2788_v28  ;;  %v2780_v43 = vld [vmem:[%s5514_s1 + $0x260] sm:$0xf] }
  0x22   : > { %1814 = vmatpush.bf16.msra.mxu0 %v2493_v4  ;;  %v2916_v33 = vld [vmem:[%s5514_s1 + $0x370] sm:$0xf]  ;;  %v3629_v34 = vld [vmem:[%s5514_s1 + $0x374] sm:$0xf0]  ;;  %v2853_v41 = vor.u32 %v3613_v32, %v2852_v30  ;;  %v3595_v44 = vld [vmem:[%s5514_s1 + $0x264] sm:$0xf0] }
  0x23   : > { %1828 = vmatpush.bf16.msra.mxu1 %v2557_v5  ;;  %v2980_v37 = vld [vmem:[%s5514_s1 + $0x3f0] sm:$0xf]  ;;  %v3645_v38 = vld [vmem:[%s5514_s1 + $0x3f4] sm:$0xf0]  ;;  %v2917_v42 = vor.u32 %v3629_v34, %v2916_v33  ;;  %v2844_v45 = vld [vmem:[%s5514_s1 + $0x2e0] sm:$0xf]  ;;  %v2781_v52 = vor.u32 %v3595_v44, %v2780_v43 }
  0x24   : > { %1842 = vmatpush.bf16.msra.mxu2 %v2621_v6  ;;  %v2981_v46 = vor.u32 %v3645_v38, %v2980_v37  ;;  %v3611_v47 = vld [vmem:[%s5514_s1 + $0x2e4] sm:$0xf0]  ;;  %v2908_v48 = vld [vmem:[%s5514_s1 + $0x360] sm:$0xf]  ;;  %v2772_v53 = vld [vmem:[%s5514_s1 + $0x250] sm:$0xf] }
  0x25   : > { %1856 = vmatpush.bf16.msra.mxu3 %v2685_v10  ;;  %v3627_v49 = vld [vmem:[%s5514_s1 + $0x364] sm:$0xf0]  ;;  %v2972_v50 = vld [vmem:[%s5514_s1 + $0x3e0] sm:$0xf]  ;;  %v3593_v54 = vld [vmem:[%s5514_s1 + $0x254] sm:$0xf0]  ;;  %v2845_v56 = vor.u32 %v3611_v47, %v2844_v45 }
  0x26   : > { %1815 = vmatpush.bf16.msra.mxu0 %v2485_v16  ;;  %v3643_v51 = vld [vmem:[%s5514_s1 + $0x3e4] sm:$0xf0]  ;;  %v2836_v55 = vld [vmem:[%s5514_s1 + $0x2d0] sm:$0xf]  ;;  %v2909_v57 = vor.u32 %v3627_v49, %v2908_v48  ;;  %v3609_v58 = vld [vmem:[%s5514_s1 + $0x2d4] sm:$0xf0]  ;;  %v2773_v2 = vor.u32 %v3593_v54, %v2772_v53 }
  0x27   : > { %1829 = vmatpush.bf16.msra.mxu1 %v2549_v19  ;;  %v2900_v59 = vld [vmem:[%s5514_s1 + $0x350] sm:$0xf]  ;;  %s5518_s13 = smov (!%p161_p3, %s2401_s13), 1  ;;  %v2973_v60 = vor.u32 %v3643_v51, %v2972_v50  ;;  %v3625_v61 = vld [vmem:[%s5514_s1 + $0x354] sm:$0xf0]  ;;  %v2837_v7 = vor.u32 %v3609_v58, %v2836_v55 }
  0x28   : > { %1843 = vmatpush.bf16.msra.mxu2 %v2613_v20  ;;  %v2964_v62 = vld [vmem:[%s5514_s1 + $0x3d0] sm:$0xf]  ;;  %v3641_v63 = vld [vmem:[%s5514_s1 + $0x3d4] sm:$0xf0]  ;;  %v2764_v0 = vld [vmem:[%s5514_s1 + $0x240] sm:$0xf]  ;;  %v2901_v8 = vor.u32 %v3625_v61, %v2900_v59 }
  0x29   : > { %1857 = vmatpush.bf16.msra.mxu3 %v2677_v24  ;;  %v3591_v1 = vld [vmem:[%s5514_s1 + $0x244] sm:$0xf0]  ;;  %s3500_s19 = sshll.u32 %s5518_s13, 7  ;;  %v2828_v3 = vld [vmem:[%s5514_s1 + $0x2c0] sm:$0xf]  ;;  %v2965_v13 = vor.u32 %v3641_v63, %v2964_v62  ;;  %s3501_s6 = sshll.u32 %s5518_s13, 4 }
  0x2a   : > { %1816 = vmatpush.bf16.msra.mxu0 %v2477_v31  ;;  %v3607_v4 = vld [vmem:[%s5514_s1 + $0x2c4] sm:$0xf0]  ;;  %v2892_v5 = vld [vmem:[%s5514_s1 + $0x340] sm:$0xf]  ;;  %s4118_s30 = scalar_lea.vmem %s5513_s0, %s3500_s19  ;;  %v2765_v23 = vor.u32 %v3591_v1, %v2764_v0  ;;  %v2756_v27 = vld [vmem:[%s5514_s1 + $0x230] sm:$0xf]  ;;  %s170_s9 = scalar_lea.vmem %s5516_s3, %s3501_s6 }
  0x2b   : > { %1830 = vmatpush.bf16.msra.mxu1 %v2541_v35  ;;  %v3623_v6 = vld [vmem:[%s5514_s1 + $0x344] sm:$0xf0]  ;;  %v2956_v9 = vld [vmem:[%s5514_s1 + $0x3c0] sm:$0xf]  ;;  %v3502_v16 = vld [vmem:[%s4118_s30 + $0x4] sm:$0xf]  ;;  %v2829_v25 = vor.u32 %v3607_v4, %v2828_v3 }
  0x2c   : > { %1844 = vmatpush.bf16.msra.mxu2 %v2605_v36  ;;  %v2412_v10 = vld [vmem:[%s4118_s30] sm:$0xf]  ;;  %v2420_v12 = vld [vmem:[%s4118_s30 + $0x8] sm:$0xf]  ;;  %v2414_v17 = vld [vmem:[%s4118_s30 + $0x40] sm:$0xf0]  ;;  %v2893_v26 = vor.u32 %v3623_v6, %v2892_v5 }
  0x2d   : > { %1858 = vmatpush.bf16.msra.mxu3 %v2669_v39  ;;  %v3510_v11 = vld [vmem:[%s4118_s30 + $0x3c] sm:$0xf0]  ;;  %v3511_v15 = vld [vmem:[%s4118_s30 + $0x44] sm:$0xf0]  ;;  %v4136_v20 = vor.u32 %v3502_v16, %v2414_v17  ;;  %v3503_v21 = vld [vmem:[%s4118_s30 + $0xc] sm:$0xf] }
  0x2e   : > { %1865 = vmatpush.bf16.msrb.mxu0 %v2789_v40  ;;  %v4126_v14 = vor.u32 %v3510_v11, %v2412_v10  ;;  %v3639_v18 = vld [vmem:[%s5514_s1 + $0x3c4] sm:$0xf0]  ;;  %v4134_v19 = vor.u32 %v3511_v15, %v2420_v12  ;;  %v2422_v22 = vld [vmem:[%s4118_s30 + $0x48] sm:$0xf0]  ;;  %v3589_v28 = vld [vmem:[%s5514_s1 + $0x234] sm:$0xf0] }
  0x2f   : > { %1879 = vmatpush.bf16.msrb.mxu1 %v2853_v41  ;;  %v4140_v24 = vor.u32 %v3503_v21, %v2422_v22  ;;  %v2820_v29 = vld [vmem:[%s5514_s1 + $0x2b0] sm:$0xf]  ;;  %v2957_v30 = vor.u32 %v3639_v18, %v2956_v9  ;;  %v3605_v31 = vld [vmem:[%s5514_s1 + $0x2b4] sm:$0xf0]  ;;  %v2757_v36 = vor.u32 %v3589_v28, %v2756_v27  ;;  %v2748_v39 = vld [vmem:[%s5514_s1 + $0x220] sm:$0xf] }
  0x30   : > { %1893 = vmatpush.bf16.msrb.mxu2 %v2917_v42  ;;  %1817 = vmatmul.bf16.vlgmr.msra.gmra.mxu0 %v4126_v14  ;;  %v2884_v32 = vld [vmem:[%s5514_s1 + $0x330] sm:$0xf]  ;;  %v3621_v33 = vld [vmem:[%s5514_s1 + $0x334] sm:$0xf0]  ;;  %v2821_v37 = vor.u32 %v3605_v31, %v2820_v29  ;;  %v3587_v40 = vld [vmem:[%s5514_s1 + $0x224] sm:$0xf0] }
  0x31   : > { %1907 = vmatpush.bf16.msrb.mxu3 %v2981_v46  ;;  %1845 = vmatmul.bf16.vlgmr.msra.gmra.mxu2 %v4134_v19  ;;  %v2948_v34 = vld [vmem:[%s5514_s1 + $0x3b0] sm:$0xf]  ;;  %v3637_v35 = vld [vmem:[%s5514_s1 + $0x3b4] sm:$0xf0]  ;;  %v2885_v38 = vor.u32 %v3621_v33, %v2884_v32  ;;  %v2812_v41 = vld [vmem:[%s5514_s1 + $0x2a0] sm:$0xf]  ;;  %v2749_v48 = vor.u32 %v3587_v40, %v2748_v39 }
  0x32   : > { %1866 = vmatpush.bf16.msrb.mxu0 %v2781_v52  ;;  %1831 = vmatmul.bf16.vlgmr.msra.gmra.mxu1 %v4136_v20  ;;  %v2949_v42 = vor.u32 %v3637_v35, %v2948_v34  ;;  %v3603_v43 = vld [vmem:[%s5514_s1 + $0x2a4] sm:$0xf0]  ;;  %v2876_v44 = vld [vmem:[%s5514_s1 + $0x320] sm:$0xf]  ;;  %v2740_v49 = vld [vmem:[%s5514_s1 + $0x210] sm:$0xf] }
  0x33   : > { %1880 = vmatpush.bf16.msrb.mxu1 %v2845_v56  ;;  %1859 = vmatmul.bf16.vlgmr.msra.gmra.mxu3 %v4140_v24  ;;  %v3619_v45 = vld [vmem:[%s5514_s1 + $0x324] sm:$0xf0]  ;;  %v2940_v46 = vld [vmem:[%s5514_s1 + $0x3a0] sm:$0xf]  ;;  %v2813_v50 = vor.u32 %v3603_v43, %v2812_v41  ;;  %v3585_v52 = vld [vmem:[%s5514_s1 + $0x214] sm:$0xf0] }
  0x34   : > { %1894 = vmatpush.bf16.msrb.mxu2 %v2909_v57  ;;  %v3635_v47 = vld [vmem:[%s5514_s1 + $0x3a4] sm:$0xf0]  ;;  %v2877_v51 = vor.u32 %v3619_v45, %v2876_v44  ;;  %v2804_v53 = vld [vmem:[%s5514_s1 + $0x290] sm:$0xf]  ;;  %v3601_v54 = vld [vmem:[%s5514_s1 + $0x294] sm:$0xf0]  ;;  %v2741_v62 = vor.u32 %v3585_v52, %v2740_v49 }
  0x35   : > { %1908 = vmatpush.bf16.msrb.mxu3 %v2973_v60  ;;  %v2941_v55 = vor.u32 %v3635_v47, %v2940_v46  ;;  %v2868_v56 = vld [vmem:[%s5514_s1 + $0x310] sm:$0xf]  ;;  %v3617_v57 = vld [vmem:[%s5514_s1 + $0x314] sm:$0xf0]  ;;  %v2732_v60 = vld [vmem:[%s5514_s1 + $0x200] sm:$0xf]  ;;  %v2805_v3 = vor.u32 %v3601_v54, %v2804_v53 }
  0x36   : > { %1867 = vmatpush.bf16.msrb.mxu0 %v2773_v2  ;;  %v2932_v58 = vld [vmem:[%s5514_s1 + $0x390] sm:$0xf]  ;;  %v3633_v59 = vld [vmem:[%s5514_s1 + $0x394] sm:$0xf0]  ;;  %v3583_v61 = vld [vmem:[%s5514_s1 + $0x204] sm:$0xf0]  ;;  %v2869_v4 = vor.u32 %v3617_v57, %v2868_v56 }
  0x37   : > { %1881 = vmatpush.bf16.msrb.mxu1 %v2837_v7  ;;  %v2796_v63 = vld [vmem:[%s5514_s1 + $0x280] sm:$0xf]  ;;  %v3599_v0 = vld [vmem:[%s5514_s1 + $0x284] sm:$0xf0]  ;;  %v3044_v7 = vld [vmem:[%s5514_s1 + $0x470] sm:$0xf]  ;;  %v2733_v16 = vor.u32 %v3583_v61, %v2732_v60 }
  0x38   : > { %1895 = vmatpush.bf16.msrb.mxu2 %v2901_v8  ;;  %v2860_v1 = vld [vmem:[%s5514_s1 + $0x300] sm:$0xf]  ;;  %v3615_v2 = vld [vmem:[%s5514_s1 + $0x304] sm:$0xf0]  ;;  %v2933_v8 = vor.u32 %v3633_v59, %v2932_v58  ;;  %v3661_v9 = vld [vmem:[%s5514_s1 + $0x474] sm:$0xf0]  ;;  %v2797_v22 = vor.u32 %v3599_v0, %v2796_v63 }
  0x39   : > { %1909 = vmatpush.bf16.msrb.mxu3 %v2965_v13  ;;  %v2924_v5 = vld [vmem:[%s5514_s1 + $0x380] sm:$0xf]  ;;  %v3631_v6 = vld [vmem:[%s5514_s1 + $0x384] sm:$0xf0]  ;;  %v3108_v10 = vld [vmem:[%s5514_s1 + $0x4f0] sm:$0xf]  ;;  %v3045_v29 = vor.u32 %v3661_v9, %v3044_v7 }
  0x3a   : > { %1868 = vmatpush.bf16.msrb.mxu0 %v2765_v23  ;;  %v3677_v11 = vld [vmem:[%s5514_s1 + $0x4f4] sm:$0xf0]  ;;  %v3172_v12 = vld [vmem:[%s5514_s1 + $0x570] sm:$0xf]  ;;  %v2861_v23 = vor.u32 %v3615_v2, %v2860_v1  ;;  %v3504_v27 = vld [vmem:[%s4118_s30 + $0x14] sm:$0xf]  ;;  %v2925_v28 = vor.u32 %v3631_v6, %v2924_v5 }
  0x3b   : > { %1882 = vmatpush.bf16.msrb.mxu1 %v2829_v25  ;;  %v3693_v13 = vld [vmem:[%s5514_s1 + $0x574] sm:$0xf0]  ;;  %v3236_v15 = vld [vmem:[%s5514_s1 + $0x5f0] sm:$0xf]  ;;  %v3505_v31 = vld [vmem:[%s4118_s30 + $0x1c] sm:$0xf]  ;;  %v3109_v33 = vor.u32 %v3677_v11, %v3108_v10 }
  0x3c   : > { %1896 = vmatpush.bf16.msrb.mxu2 %v2893_v26  ;;  %v3709_v17 = vld [vmem:[%s5514_s1 + $0x5f4] sm:$0xf0]  ;;  %v2428_v18 = vld [vmem:[%s4118_s30 + $0x10] sm:$0xf]  ;;  %v2438_v32 = vld [vmem:[%s4118_s30 + $0x58] sm:$0xf0]  ;;  %v3173_v34 = vor.u32 %v3693_v13, %v3172_v12 }
  0x3d   : > { %1910 = vmatpush.bf16.msrb.mxu3 %v2957_v30  ;;  %v3512_v21 = vld [vmem:[%s4118_s30 + $0x4c] sm:$0xf0]  ;;  %v2436_v25 = vld [vmem:[%s4118_s30 + $0x18] sm:$0xf]  ;;  %v2430_v30 = vld [vmem:[%s4118_s30 + $0x50] sm:$0xf0]  ;;  %v4304_v47 = vor.u32 %v3505_v31, %v2438_v32 }
  0x3e   : > { %1869 = vmatpush.bf16.msrb.mxu0 %v2757_v36  ;;  %v3513_v26 = vld [vmem:[%s4118_s30 + $0x54] sm:$0xf0]  ;;  %v3036_v35 = vld [vmem:[%s5514_s1 + $0x460] sm:$0xf]  ;;  %v3659_v36 = vld [vmem:[%s5514_s1 + $0x464] sm:$0xf0]  ;;  %v4283_v39 = vor.u32 %v3512_v21, %v2428_v18  ;;  %v4296_v44 = vor.u32 %v3504_v27, %v2430_v30 }
  0x3f   : > { %1883 = vmatpush.bf16.msrb.mxu1 %v2821_v37  ;;  %v3100_v37 = vld [vmem:[%s5514_s1 + $0x4e0] sm:$0xf]  ;;  %v3675_v40 = vld [vmem:[%s5514_s1 + $0x4e4] sm:$0xf0]  ;;  %v4294_v43 = vor.u32 %v3513_v26, %v2436_v25  ;;  %v3657_v52 = vld [vmem:[%s5514_s1 + $0x454] sm:$0xf0] }
  0x40   : > { %1897 = vmatpush.bf16.msrb.mxu2 %v2885_v38  ;;  %v3237_v38 = vor.u32 %v3709_v17, %v3236_v15  ;;  %v3164_v41 = vld [vmem:[%s5514_s1 + $0x560] sm:$0xf]  ;;  %v3707_v46 = vld [vmem:[%s5514_s1 + $0x5e4] sm:$0xf0]  ;;  %v3101_v49 = vor.u32 %v3675_v40, %v3100_v37  ;;  %v3092_v53 = vld [vmem:[%s5514_s1 + $0x4d0] sm:$0xf] }
  0x41   : > { %1911 = vmatpush.bf16.msrb.mxu3 %v2949_v42  ;;  %v3691_v42 = vld [vmem:[%s5514_s1 + $0x564] sm:$0xf0]  ;;  %v3228_v45 = vld [vmem:[%s5514_s1 + $0x5e0] sm:$0xf]  ;;  %v3156_v56 = vld [vmem:[%s5514_s1 + $0x550] sm:$0xf] }
  0x42   : > { %1870 = vmatpush.bf16.msrb.mxu0 %v2749_v48  ;;  %v3037_v48 = vor.u32 %v3659_v36, %v3036_v35  ;;  %v3229_v54 = vor.u32 %v3707_v46, %v3228_v45  ;;  %v3689_v57 = vld [vmem:[%s5514_s1 + $0x554] sm:$0xf0]  ;;  %v3220_v58 = vld [vmem:[%s5514_s1 + $0x5d0] sm:$0xf]  ;;  %v3020_v63 = vld [vmem:[%s5514_s1 + $0x440] sm:$0xf] }
  0x43   : > { %1884 = vmatpush.bf16.msrb.mxu1 %v2813_v50  ;;  %v3165_v50 = vor.u32 %v3691_v42, %v3164_v41  ;;  %v3705_v59 = vld [vmem:[%s5514_s1 + $0x5d4] sm:$0xf0]  ;;  %v3655_v0 = vld [vmem:[%s5514_s1 + $0x444] sm:$0xf0]  ;;  %v3084_v1 = vld [vmem:[%s5514_s1 + $0x4c0] sm:$0xf] }
  0x44   : > { %1898 = vmatpush.bf16.msrb.mxu2 %v2877_v51  ;;  %v3028_v51 = vld [vmem:[%s5514_s1 + $0x450] sm:$0xf]  ;;  %v3221_v2 = vor.u32 %v3705_v59, %v3220_v58  ;;  %v3687_v5 = vld [vmem:[%s5514_s1 + $0x544] sm:$0xf0]  ;;  %v3212_v6 = vld [vmem:[%s5514_s1 + $0x5c0] sm:$0xf] }
  0x45   : > { %1912 = vmatpush.bf16.msrb.mxu3 %v2941_v55  ;;  %v3673_v55 = vld [vmem:[%s5514_s1 + $0x4d4] sm:$0xf0]  ;;  %v3029_v60 = vor.u32 %v3657_v52, %v3028_v51  ;;  %v3703_v7 = vld [vmem:[%s5514_s1 + $0x5c4] sm:$0xf0]  ;;  %v3012_v11 = vld [vmem:[%s5514_s1 + $0x430] sm:$0xf] }
  0x46   : > { %1871 = vmatpush.bf16.msrb.mxu0 %v2741_v62  ;;  %v3093_v61 = vor.u32 %v3673_v55, %v3092_v53  ;;  %v3157_v62 = vor.u32 %v3689_v57, %v3156_v56  ;;  %v3653_v12 = vld [vmem:[%s5514_s1 + $0x434] sm:$0xf0]  ;;  %v3076_v13 = vld [vmem:[%s5514_s1 + $0x4b0] sm:$0xf]  ;;  %v3213_v15 = vor.u32 %v3703_v7, %v3212_v6  ;;  %v3004_v27 = vld [vmem:[%s5514_s1 + $0x420] sm:$0xf] }
  0x47   : > { %1885 = vmatpush.bf16.msrb.mxu1 %v2805_v3  ;;  %v3671_v3 = vld [vmem:[%s5514_s1 + $0x4c4] sm:$0xf0]  ;;  %v3140_v17 = vld [vmem:[%s5514_s1 + $0x530] sm:$0xf]  ;;  %v3685_v18 = vld [vmem:[%s5514_s1 + $0x534] sm:$0xf0] }
  0x48   : > { %1899 = vmatpush.bf16.msrb.mxu2 %v2869_v4  ;;  %v3148_v4 = vld [vmem:[%s5514_s1 + $0x540] sm:$0xf]  ;;  %v3085_v9 = vor.u32 %v3671_v3, %v3084_v1  ;;  %v3204_v21 = vld [vmem:[%s5514_s1 + $0x5b0] sm:$0xf]  ;;  %v3141_v26 = vor.u32 %v3685_v18, %v3140_v17  ;;  %v3667_v31 = vld [vmem:[%s5514_s1 + $0x4a4] sm:$0xf0] }
  0x49   : > { %1913 = vmatpush.bf16.msrb.mxu3 %v2933_v8  ;;  %v3021_v8 = vor.u32 %v3655_v0, %v3020_v63  ;;  %v3149_v10 = vor.u32 %v3687_v5, %v3148_v4  ;;  %v3132_v32 = vld [vmem:[%s5514_s1 + $0x520] sm:$0xf]  ;;  %v3699_v35 = vld [vmem:[%s5514_s1 + $0x5a4] sm:$0xf0]  ;;  %v2996_v37 = vld [vmem:[%s5514_s1 + $0x410] sm:$0xf] }
  0x4a   : > { %1872 = vmatpush.bf16.msrb.mxu0 %v2733_v16  ;;  %v3669_v16 = vld [vmem:[%s5514_s1 + $0x4b4] sm:$0xf0]  ;;  %v3060_v42 = vld [vmem:[%s5514_s1 + $0x490] sm:$0xf]  ;;  %v2988_v52 = vld [vmem:[%s5514_s1 + $0x400] sm:$0xf] }
  0x4b   : > { %1886 = vmatpush.bf16.msrb.mxu1 %v2797_v22  ;;  %v3701_v22 = vld [vmem:[%s5514_s1 + $0x5b4] sm:$0xf0]  ;;  %v3077_v25 = vor.u32 %v3669_v16, %v3076_v13  ;;  %v3647_v53 = vld [vmem:[%s5514_s1 + $0x404] sm:$0xf0]  ;;  %v3052_v55 = vld [vmem:[%s5514_s1 + $0x480] sm:$0xf] }
  0x4c   : > { %1900 = vmatpush.bf16.msrb.mxu2 %v2861_v23  ;;  %v3013_v23 = vor.u32 %v3653_v12, %v3012_v11  ;;  %v3205_v30 = vor.u32 %v3701_v22, %v3204_v21  ;;  %v3649_v41 = vld [vmem:[%s5514_s1 + $0x414] sm:$0xf0]  ;;  %v3663_v56 = vld [vmem:[%s5514_s1 + $0x484] sm:$0xf0]  ;;  %v3116_v57 = vld [vmem:[%s5514_s1 + $0x500] sm:$0xf]  ;;  %v2989_v7 = vor.u32 %v3647_v53, %v2988_v52 }
  0x4d   : > { %1914 = vmatpush.bf16.msrb.mxu3 %v2925_v28  ;;  %1873 = vmatmul.bf16.vlgmr.msrb.gmra.mxu0 %v4283_v39  ;;  %v3651_v28 = vld [vmem:[%s5514_s1 + $0x424] sm:$0xf0]  ;;  %v3665_v45 = vld [vmem:[%s5514_s1 + $0x494] sm:$0xf0]  ;;  %v3300_v63 = vld [vmem:[%s5514_s1 + $0x670] sm:$0xf]  ;;  %v3053_v11 = vor.u32 %v3663_v56, %v3052_v55 }
  0x4e   : > { %1921 = vmatpush.bf16.msra.mxu0 %v3045_v29  ;;  %1887 = vmatmul.bf16.vlgmr.msrb.gmra.mxu1 %v4296_v44  ;;  %v3068_v29 = vld [vmem:[%s5514_s1 + $0x4a0] sm:$0xf]  ;;  %v3005_v36 = vor.u32 %v3651_v28, %v3004_v27  ;;  %v3697_v51 = vld [vmem:[%s5514_s1 + $0x594] sm:$0xf0]  ;;  %v3679_v58 = vld [vmem:[%s5514_s1 + $0x504] sm:$0xf0]  ;;  %v3061_v59 = vor.u32 %v3665_v45, %v3060_v42 }
  0x4f   : > { %1935 = vmatpush.bf16.msra.mxu1 %v3109_v33  ;;  %1901 = vmatmul.bf16.vlgmr.msrb.gmra.mxu2 %v4294_v43  ;;  %v3683_v33 = vld [vmem:[%s5514_s1 + $0x524] sm:$0xf0]  ;;  %v3725_v1 = vld [vmem:[%s5514_s1 + $0x674] sm:$0xf0]  ;;  %v3428_v4 = vld [vmem:[%s5514_s1 + $0x770] sm:$0xf]  ;;  %v3117_v12 = vor.u32 %v3679_v58, %v3116_v57 }
  0x50   : > { %1949 = vmatpush.bf16.msra.mxu2 %v3173_v34  ;;  %1915 = vmatmul.bf16.vlgmr.msrb.gmra.mxu3 %v4304_v47  ;;  %v3196_v34 = vld [vmem:[%s5514_s1 + $0x5a0] sm:$0xf]  ;;  %v3133_v40 = vor.u32 %v3683_v33, %v3132_v32  ;;  %v3741_v3 = vld [vmem:[%s5514_s1 + $0x6f4] sm:$0xf0]  ;;  %v3492_v6 = vld [vmem:[%s5514_s1 + $0x7f0] sm:$0xf]  ;;  %v3301_v18 = vor.u32 %v3725_v1, %v3300_v63 }
  0x51   : > { %1963 = vmatpush.bf16.msra.mxu3 %v3237_v38  ;;  %v3069_v38 = vor.u32 %v3667_v31, %v3068_v29  ;;  %v3197_v46 = vor.u32 %v3699_v35, %v3196_v34  ;;  %v3757_v5 = vld [vmem:[%s5514_s1 + $0x774] sm:$0xf0]  ;;  %v2452_v13 = vld [vmem:[%s4118_s30 + $0x28] sm:$0xf]  ;;  %v3506_v16 = vld [vmem:[%s4118_s30 + $0x24] sm:$0xf] }
  0x52   : > { %1922 = vmatpush.bf16.msra.mxu0 %v3037_v48  ;;  %v3124_v48 = vld [vmem:[%s5514_s1 + $0x510] sm:$0xf]  ;;  %v2446_v21 = vld [vmem:[%s4118_s30 + $0x60] sm:$0xf0]  ;;  %v3507_v22 = vld [vmem:[%s4118_s30 + $0x2c] sm:$0xf] }
  0x53   : > { %1936 = vmatpush.bf16.msra.mxu1 %v3101_v49  ;;  %v3681_v49 = vld [vmem:[%s5514_s1 + $0x514] sm:$0xf0]  ;;  %v3292_v27 = vld [vmem:[%s5514_s1 + $0x660] sm:$0xf]  ;;  %v3723_v28 = vld [vmem:[%s5514_s1 + $0x664] sm:$0xf0] }
  0x54   : > { %1950 = vmatpush.bf16.msra.mxu2 %v3165_v50  ;;  %v3188_v50 = vld [vmem:[%s5514_s1 + $0x590] sm:$0xf]  ;;  %v3356_v29 = vld [vmem:[%s5514_s1 + $0x6e0] sm:$0xf]  ;;  %v3739_v32 = vld [vmem:[%s5514_s1 + $0x6e4] sm:$0xf0] }
  0x55   : > { %1964 = vmatpush.bf16.msra.mxu3 %v3229_v54  ;;  %v2997_v54 = vor.u32 %v3649_v41, %v2996_v37  ;;  %v3189_v0 = vor.u32 %v3697_v51, %v3188_v50  ;;  %v3420_v33 = vld [vmem:[%s5514_s1 + $0x760] sm:$0xf]  ;;  %v3755_v34 = vld [vmem:[%s5514_s1 + $0x764] sm:$0xf0]  ;;  %v3293_v41 = vor.u32 %v3723_v28, %v3292_v27  ;;  %v3357_v42 = vor.u32 %v3739_v32, %v3356_v29  ;;  %v3737_v51 = vld [vmem:[%s5514_s1 + $0x6d4] sm:$0xf0] }
  0x56   : > { %1923 = vmatpush.bf16.msra.mxu0 %v3029_v60  ;;  %v3125_v60 = vor.u32 %v3681_v49, %v3124_v48  ;;  %v3484_v37 = vld [vmem:[%s5514_s1 + $0x7e0] sm:$0xf]  ;;  %v3421_v45 = vor.u32 %v3755_v34, %v3420_v33  ;;  %v3721_v48 = vld [vmem:[%s5514_s1 + $0x654] sm:$0xf0]  ;;  %v3348_v49 = vld [vmem:[%s5514_s1 + $0x6d0] sm:$0xf] }
  0x57   : > { %1937 = vmatpush.bf16.msra.mxu1 %v3093_v61  ;;  %v3180_v61 = vld [vmem:[%s5514_s1 + $0x580] sm:$0xf]  ;;  %v3412_v52 = vld [vmem:[%s5514_s1 + $0x750] sm:$0xf]  ;;  %v3753_v53 = vld [vmem:[%s5514_s1 + $0x754] sm:$0xf0]  ;;  %v3349_v57 = vor.u32 %v3737_v51, %v3348_v49 }
  0x58   : > { %1951 = vmatpush.bf16.msra.mxu2 %v3157_v62  ;;  %v3695_v62 = vld [vmem:[%s5514_s1 + $0x584] sm:$0xf0]  ;;  %v3769_v55 = vld [vmem:[%s5514_s1 + $0x7d4] sm:$0xf0]  ;;  %v3413_v58 = vor.u32 %v3753_v53, %v3412_v52  ;;  %v3388_v28 = vld [vmem:[%s5514_s1 + $0x720] sm:$0xf] }
  0x59   : > { %1965 = vmatpush.bf16.msra.mxu3 %v3221_v2  ;;  %v3364_v2 = vld [vmem:[%s5514_s1 + $0x6f0] sm:$0xf]  ;;  %v3181_v17 = vor.u32 %v3695_v62, %v3180_v61  ;;  %v3340_v61 = vld [vmem:[%s5514_s1 + $0x6c0] sm:$0xf]  ;;  %v3735_v63 = vld [vmem:[%s5514_s1 + $0x6c4] sm:$0xf0] }
  0x5a   : > { %1924 = vmatpush.bf16.msra.mxu0 %v3021_v8  ;;  %v3773_v8 = vld [vmem:[%s5514_s1 + $0x7f4] sm:$0xf0]  ;;  %v3751_v1 = vld [vmem:[%s5514_s1 + $0x744] sm:$0xf0]  ;;  %v3252_v34 = vld [vmem:[%s5514_s1 + $0x610] sm:$0xf] }
  0x5b   : > { %1938 = vmatpush.bf16.msra.mxu1 %v3085_v9  ;;  %v2444_v9 = vld [vmem:[%s4118_s30 + $0x20] sm:$0xf]  ;;  %v3731_v27 = vld [vmem:[%s5514_s1 + $0x6a4] sm:$0xf0]  ;;  %v3745_v49 = vld [vmem:[%s5514_s1 + $0x714] sm:$0xf0] }
  0x5c   : > { %1952 = vmatpush.bf16.msra.mxu2 %v3149_v10  ;;  %v3514_v10 = vld [vmem:[%s4118_s30 + $0x5c] sm:$0xf0]  ;;  %v3747_v29 = vld [vmem:[%s5514_s1 + $0x724] sm:$0xf0]  ;;  %v3761_v51 = vld [vmem:[%s5514_s1 + $0x794] sm:$0xf0] }
  0x5d   : > { %1966 = vmatpush.bf16.msra.mxu3 %v3213_v15  ;;  %v3515_v15 = vld [vmem:[%s4118_s30 + $0x64] sm:$0xf0]  ;;  %v4495_v31 = vor.u32 %v3514_v10, %v2444_v9  ;;  %v3332_v9 = vld [vmem:[%s5514_s1 + $0x6b0] sm:$0xf]  ;;  %v3244_v52 = vld [vmem:[%s5514_s1 + $0x600] sm:$0xf] }
  0x5e   : > { %1925 = vmatpush.bf16.msra.mxu0 %v3013_v23  ;;  %v2454_v23 = vld [vmem:[%s4118_s30 + $0x68] sm:$0xf0]  ;;  %v4506_v35 = vor.u32 %v3515_v15, %v2452_v13  ;;  %v3749_v13 = vld [vmem:[%s5514_s1 + $0x734] sm:$0xf0]  ;;  %v3460_v15 = vld [vmem:[%s5514_s1 + $0x7b0] sm:$0xf] }
  0x5f   : > { %1939 = vmatpush.bf16.msra.mxu1 %v3077_v25  ;;  %v3365_v25 = vor.u32 %v3741_v3, %v3364_v2  ;;  %v3468_v2 = vld [vmem:[%s5514_s1 + $0x7c0] sm:$0xf]  ;;  %v3767_v3 = vld [vmem:[%s5514_s1 + $0x7c4] sm:$0xf0] }
  0x60   : > { %1953 = vmatpush.bf16.msra.mxu2 %v3141_v26  ;;  %v3429_v26 = vor.u32 %v3757_v5, %v3428_v4  ;;  %v3341_v5 = vor.u32 %v3735_v63, %v3340_v61  ;;  %v3469_v10 = vor.u32 %v3767_v3, %v3468_v2  ;;  %v3763_v32 = vld [vmem:[%s5514_s1 + $0x7a4] sm:$0xf0]  ;;  %v3436_v61 = vld [vmem:[%s5514_s1 + $0x780] sm:$0xf]  ;;  %v3532_v63 = vld [vmem:[%s5514_s1 + $0x74] sm:$0xf] }
  0x61   : > { %1967 = vmatpush.bf16.msra.mxu3 %v3205_v30  ;;  %v3493_v30 = vor.u32 %v3773_v8, %v3492_v6  ;;  %v3717_v8 = vld [vmem:[%s5514_s1 + $0x634] sm:$0xf0]  ;;  %v3711_v53 = vld [vmem:[%s5514_s1 + $0x604] sm:$0xf0]  ;;  %v3548_v2 = vld [vmem:[%s5514_s1 + $0xf4] sm:$0xf] }
  0x62   : > { %1926 = vmatpush.bf16.msra.mxu0 %v3005_v36  ;;  %v4508_v36 = vor.u32 %v3506_v16, %v2446_v21  ;;  %v3765_v16 = vld [vmem:[%s5514_s1 + $0x7b4] sm:$0xf0]  ;;  %v2598_v3 = vld [vmem:[%s5514_s1 + $0xf8] sm:$0xf0] }
  0x63   : > { %1940 = vmatpush.bf16.msra.mxu1 %v3069_v38  ;;  %v3771_v38 = vld [vmem:[%s5514_s1 + $0x7e4] sm:$0xf0] }
  0x64   : > { %1954 = vmatpush.bf16.msra.mxu2 %v3133_v40  ;;  %v4516_v40 = vor.u32 %v3507_v22, %v2454_v23  ;;  %v3485_v50 = vor.u32 %v3771_v38, %v3484_v37  ;;  %v3260_v22 = vld [vmem:[%s5514_s1 + $0x620] sm:$0xf]  ;;  %v3715_v23 = vld [vmem:[%s5514_s1 + $0x624] sm:$0xf0]  ;;  %v3389_v38 = vor.u32 %v3747_v29, %v3388_v28  ;;  %v2526_v28 = vld [vmem:[%s5514_s1 + $0x68] sm:$0xf0] }
  0x65   : > { %1968 = vmatpush.bf16.msra.mxu3 %v3197_v46  ;;  %v3284_v46 = vld [vmem:[%s5514_s1 + $0x650] sm:$0xf]  ;;  %v3261_v33 = vor.u32 %v3715_v23, %v3260_v22  ;;  %v3509_v22 = vld [vmem:[%s4118_s30 + $0x3c] sm:$0xf]  ;;  %v3546_v29 = vld [vmem:[%s5514_s1 + $0xe4] sm:$0xf] }
  0x66   : > { %1927 = vmatpush.bf16.msra.mxu0 %v2997_v54  ;;  %v3476_v54 = vld [vmem:[%s5514_s1 + $0x7d0] sm:$0xf]  ;;  %v3285_v56 = vor.u32 %v3721_v48, %v3284_v46  ;;  %v2470_v23 = vld [vmem:[%s4118_s30 + $0x78] sm:$0xf0] }
  0x67   : > { %1941 = vmatpush.bf16.msra.mxu1 %v3061_v59  ;;  %v3276_v59 = vld [vmem:[%s5514_s1 + $0x640] sm:$0xf]  ;;  %v3477_v62 = vor.u32 %v3769_v55, %v3476_v54  ;;  %v3380_v48 = vld [vmem:[%s5514_s1 + $0x710] sm:$0xf] }
  0x68   : > { %1955 = vmatpush.bf16.msra.mxu2 %v3125_v60  ;;  %v3719_v60 = vld [vmem:[%s5514_s1 + $0x644] sm:$0xf0]  ;;  %v3308_v55 = vld [vmem:[%s5514_s1 + $0x680] sm:$0xf] }
  0x69   : > { %1969 = vmatpush.bf16.msra.mxu3 %v3189_v0  ;;  %v3404_v0 = vld [vmem:[%s5514_s1 + $0x740] sm:$0xf]  ;;  %v3277_v4 = vor.u32 %v3719_v60, %v3276_v59  ;;  %v3381_v60 = vor.u32 %v3745_v49, %v3380_v48 }
  0x6a   : > { %1928 = vmatpush.bf16.msra.mxu0 %v2989_v7  ;;  %v3405_v6 = vor.u32 %v3751_v1, %v3404_v0  ;;  %v3268_v7 = vld [vmem:[%s5514_s1 + $0x630] sm:$0xf]  ;;  %v2534_v1 = vld [vmem:[%s5514_s1 + $0x78] sm:$0xf0] }
  0x6b   : > { %1942 = vmatpush.bf16.msra.mxu1 %v3053_v11  ;;  %v3733_v11 = vld [vmem:[%s5514_s1 + $0x6b4] sm:$0xf0] }
  0x6c   : > { %1956 = vmatpush.bf16.msra.mxu2 %v3117_v12  ;;  %v3396_v12 = vld [vmem:[%s5514_s1 + $0x730] sm:$0xf] }
  0x6d   : > { %1970 = vmatpush.bf16.msra.mxu3 %v3181_v17  ;;  %1929 = vmatmul.bf16.vlgmr.msra.gmra.mxu0 %v4495_v31  ;;  %v3269_v17 = vor.u32 %v3717_v8, %v3268_v7  ;;  %v3397_v21 = vor.u32 %v3749_v13, %v3396_v12  ;;  %v3245_v7 = vor.u32 %v3711_v53, %v3244_v52  ;;  %v2726_v8 = vld [vmem:[%s5514_s1 + $0x1f8] sm:$0xf0]  ;;  %v2468_v13 = vld [vmem:[%s4118_s30 + $0x38] sm:$0xf]  ;;  %v3544_v53 = vld [vmem:[%s5514_s1 + $0xd4] sm:$0xf] }
  0x6e   : > { %1977 = vmatpush.bf16.msrb.mxu0 %v3301_v18  ;;  %1943 = vmatmul.bf16.vlgmr.msra.gmra.mxu1 %v4508_v36  ;;  %v3333_v18 = vor.u32 %v3733_v11, %v3332_v9  ;;  %v2460_v9 = vld [vmem:[%s4118_s30 + $0x30] sm:$0xf]  ;;  %v2518_v52 = vld [vmem:[%s5514_s1 + $0x58] sm:$0xf0] }
  0x6f   : > { %1991 = vmatpush.bf16.msrb.mxu1 %v3365_v25  ;;  %1957 = vmatmul.bf16.vlgmr.msra.gmra.mxu2 %v4506_v35  ;;  %v3324_v25 = vld [vmem:[%s5514_s1 + $0x6a0] sm:$0xf] }
  0x70   : > { %2005 = vmatpush.bf16.msrb.mxu2 %v3429_v26  ;;  %1971 = vmatmul.bf16.vlgmr.msra.gmra.mxu3 %v4516_v40  ;;  %v3461_v26 = vor.u32 %v3765_v16, %v3460_v15  ;;  %v3325_v37 = vor.u32 %v3731_v27, %v3324_v25  ;;  %v3517_v15 = vld [vmem:[%s4118_s30 + $0x74] sm:$0xf0]  ;;  %v3508_v16 = vld [vmem:[%s4118_s30 + $0x34] sm:$0xf]  ;;  %v2601_v25 = vor.u32 %v3548_v2, %v2598_v3  ;;  %v3530_v27 = vld [vmem:[%s5514_s1 + $0x64] sm:$0xf] }
  0x71   : > { %2019 = vmatpush.bf16.msrb.mxu3 %v3493_v30  ;;  %v3452_v30 = vld [vmem:[%s5514_s1 + $0x7a0] sm:$0xf]  ;;  %v2529_v48 = vor.u32 %v3530_v27, %v2526_v28  ;;  %v2574_v3 = vld [vmem:[%s5514_s1 + $0xc8] sm:$0xf0]  ;;  %v3522_v27 = vld [vmem:[%s5514_s1 + $0x24] sm:$0xf] }
  0x72   : > { %1978 = vmatpush.bf16.msrb.mxu0 %v3293_v41  ;;  %v3713_v41 = vld [vmem:[%s5514_s1 + $0x614] sm:$0xf0]  ;;  %v3453_v46 = vor.u32 %v3763_v32, %v3452_v30  ;;  %v2494_v28 = vld [vmem:[%s5514_s1 + $0x28] sm:$0xf0] }
  0x73   : > { %1992 = vmatpush.bf16.msrb.mxu1 %v3357_v42  ;;  %v3316_v42 = vld [vmem:[%s5514_s1 + $0x690] sm:$0xf]  ;;  %v3253_v54 = vor.u32 %v3713_v41, %v3252_v34  ;;  %v3562_v34 = vld [vmem:[%s5514_s1 + $0x164] sm:$0xf] }
  0x74   : > { %2006 = vmatpush.bf16.msrb.mxu2 %v3421_v45  ;;  %v3729_v45 = vld [vmem:[%s5514_s1 + $0x694] sm:$0xf0] }
  0x75   : > { %2020 = vmatpush.bf16.msrb.mxu3 %v3485_v50  ;;  %v3444_v50 = vld [vmem:[%s5514_s1 + $0x790] sm:$0xf]  ;;  %v3317_v59 = vor.u32 %v3729_v45, %v3316_v42  ;;  %v3578_v42 = vld [vmem:[%s5514_s1 + $0x1e4] sm:$0xf]  ;;  %v2718_v45 = vld [vmem:[%s5514_s1 + $0x1e8] sm:$0xf0] }
  0x76   : > { %1979 = vmatpush.bf16.msrb.mxu0 %v3285_v56  ;;  %v3727_v56 = vld [vmem:[%s5514_s1 + $0x684] sm:$0xf0]  ;;  %v3445_v0 = vor.u32 %v3761_v51, %v3444_v50  ;;  %v3528_v51 = vld [vmem:[%s5514_s1 + $0x54] sm:$0xf] }
  0x77   : > { %1993 = vmatpush.bf16.msrb.mxu1 %v3349_v57  ;;  %v3372_v57 = vld [vmem:[%s5514_s1 + $0x700] sm:$0xf]  ;;  %v3309_v11 = vor.u32 %v3727_v56, %v3308_v55  ;;  %v2582_v55 = vld [vmem:[%s5514_s1 + $0xd8] sm:$0xf0]  ;;  %v3560_v56 = vld [vmem:[%s5514_s1 + $0x154] sm:$0xf] }
  0x78   : > { %2007 = vmatpush.bf16.msrb.mxu2 %v3413_v58  ;;  %v3743_v58 = vld [vmem:[%s5514_s1 + $0x704] sm:$0xf0] }
  0x79   : > { %2021 = vmatpush.bf16.msrb.mxu3 %v3477_v62  ;;  %v3759_v62 = vld [vmem:[%s5514_s1 + $0x784] sm:$0xf0]  ;;  %v3373_v12 = vor.u32 %v3743_v58, %v3372_v57  ;;  %v2646_v57 = vld [vmem:[%s5514_s1 + $0x158] sm:$0xf0]  ;;  %v3576_v58 = vld [vmem:[%s5514_s1 + $0x1d4] sm:$0xf] }
  0x7a   : > { %1980 = vmatpush.bf16.msrb.mxu0 %v3277_v4  ;;  %v3564_v4 = vld [vmem:[%s5514_s1 + $0x174] sm:$0xf] }
  0x7b   : > { %1994 = vmatpush.bf16.msrb.mxu1 %v3341_v5  ;;  %v2662_v5 = vld [vmem:[%s5514_s1 + $0x178] sm:$0xf0] }
  0x7c   : > { %2008 = vmatpush.bf16.msrb.mxu2 %v3405_v6  ;;  %v3580_v6 = vld [vmem:[%s5514_s1 + $0x1f4] sm:$0xf] }
  0x7d   : > { %2022 = vmatpush.bf16.msrb.mxu3 %v3469_v10  ;;  %v3516_v10 = vld [vmem:[%s4118_s30 + $0x6c] sm:$0xf0]  ;;  %v2729_v30 = vor.u32 %v3580_v6, %v2726_v8  ;;  %v3574_v6 = vld [vmem:[%s5514_s1 + $0x1c4] sm:$0xf] }
  0x7e   : > { %1981 = vmatpush.bf16.msrb.mxu0 %v3269_v17  ;;  %v3437_v17 = vor.u32 %v3759_v62, %v3436_v61  ;;  %v4707_v32 = vor.u32 %v3516_v10, %v2460_v9  ;;  %v2585_v61 = vor.u32 %v3544_v53, %v2582_v55  ;;  %v2649_v62 = vor.u32 %v3560_v56, %v2646_v57  ;;  %v3536_v53 = vld [vmem:[%s5514_s1 + $0x94] sm:$0xf]  ;;  %v2550_v55 = vld [vmem:[%s5514_s1 + $0x98] sm:$0xf0] }
  0x7f   : > { %1995 = vmatpush.bf16.msrb.mxu1 %v3333_v18  ;;  %v2537_v18 = vor.u32 %v3532_v63, %v2534_v1  ;;  %v3526_v63 = vld [vmem:[%s5514_s1 + $0x44] sm:$0xf]  ;;  %v3552_v56 = vld [vmem:[%s5514_s1 + $0x114] sm:$0xf]  ;;  %v2614_v57 = vld [vmem:[%s5514_s1 + $0x118] sm:$0xf0] }
  0x80   : > { %2009 = vmatpush.bf16.msrb.mxu2 %v3397_v21  ;;  %v2462_v21 = vld [vmem:[%s4118_s30 + $0x70] sm:$0xf0]  ;;  %v3542_v1 = vld [vmem:[%s5514_s1 + $0xc4] sm:$0xf] }
  0x81   : > { %2023 = vmatpush.bf16.msrb.mxu3 %v3461_v26  ;;  %v2665_v26 = vor.u32 %v3564_v4, %v2662_v5  ;;  %v4720_v41 = vor.u32 %v3508_v16, %v2462_v21  ;;  %v3558_v4 = vld [vmem:[%s5514_s1 + $0x144] sm:$0xf]  ;;  %v2638_v5 = vld [vmem:[%s5514_s1 + $0x148] sm:$0xf0]  ;;  %v2577_v9 = vor.u32 %v3542_v1, %v2574_v3  ;;  %v2566_v16 = vld [vmem:[%s5514_s1 + $0xb8] sm:$0xf0] }
  0x82   : > { %1982 = vmatpush.bf16.msrb.mxu0 %v3261_v33  ;;  %v2590_v33 = vld [vmem:[%s5514_s1 + $0xe8] sm:$0xf0]  ;;  %v2641_v10 = vor.u32 %v3558_v4, %v2638_v5  ;;  %v3572_v21 = vld [vmem:[%s5514_s1 + $0x1b4] sm:$0xf]  ;;  %v3534_v1 = vld [vmem:[%s5514_s1 + $0x84] sm:$0xf] }
  0x83   : > { %1996 = vmatpush.bf16.msrb.mxu1 %v3325_v37  ;;  %v2654_v37 = vld [vmem:[%s5514_s1 + $0x168] sm:$0xf0]  ;;  %v2593_v49 = vor.u32 %v3546_v29, %v2590_v33  ;;  %v3538_v29 = vld [vmem:[%s5514_s1 + $0xa4] sm:$0xf] }
  0x84   : > { %2010 = vmatpush.bf16.msrb.mxu2 %v3389_v38  ;;  %v4718_v38 = vor.u32 %v3517_v15, %v2468_v13  ;;  %v2657_v50 = vor.u32 %v3562_v34, %v2654_v37  ;;  %v3540_v13 = vld [vmem:[%s5514_s1 + $0xb4] sm:$0xf]  ;;  %v2558_v33 = vld [vmem:[%s5514_s1 + $0xa8] sm:$0xf0]  ;;  %v3554_v34 = vld [vmem:[%s5514_s1 + $0x124] sm:$0xf] }
  0x85   : > { %2024 = vmatpush.bf16.msrb.mxu3 %v3453_v46  ;;  %v4728_v46 = vor.u32 %v3509_v22, %v2470_v23  ;;  %v2694_v22 = vld [vmem:[%s5514_s1 + $0x1b8] sm:$0xf0]  ;;  %v2622_v37 = vld [vmem:[%s5514_s1 + $0x128] sm:$0xf0]  ;;  %v3550_v3 = vld [vmem:[%s5514_s1 + $0x104] sm:$0xf] }
  0x86   : > { %1983 = vmatpush.bf16.msrb.mxu0 %v3253_v54  ;;  %v2721_v54 = vor.u32 %v3578_v42, %v2718_v45  ;;  %v3570_v42 = vld [vmem:[%s5514_s1 + $0x1a4] sm:$0xf]  ;;  %v2686_v45 = vld [vmem:[%s5514_s1 + $0x1a8] sm:$0xf0] }
  0x87   : > { %1997 = vmatpush.bf16.msrb.mxu1 %v3317_v59  ;;  %v2710_v59 = vld [vmem:[%s5514_s1 + $0x1d8] sm:$0xf0]  ;;  %v2606_v5 = vld [vmem:[%s5514_s1 + $0x108] sm:$0xf0] }
  0x88   : > { %2011 = vmatpush.bf16.msrb.mxu2 %v3381_v60  ;;  %v2521_v60 = vor.u32 %v3528_v51, %v2518_v52  ;;  %v2713_v2 = vor.u32 %v3576_v58, %v2710_v59  ;;  %v3520_v51 = vld [vmem:[%s5514_s1 + $0x14] sm:$0xf]  ;;  %v2486_v52 = vld [vmem:[%s5514_s1 + $0x18] sm:$0xf0] }
  0x89   : > { %2025 = vmatpush.bf16.msrb.mxu3 %v3445_v0  ;;  %v2510_v0 = vld [vmem:[%s5514_s1 + $0x48] sm:$0xf0]  ;;  %v3568_v58 = vld [vmem:[%s5514_s1 + $0x194] sm:$0xf]  ;;  %v2678_v59 = vld [vmem:[%s5514_s1 + $0x198] sm:$0xf0] }
  0x8a   : > { %1984 = vmatpush.bf16.msrb.mxu0 %v3245_v7  ;;  %v2702_v7 = vld [vmem:[%s5514_s1 + $0x1c8] sm:$0xf0]  ;;  %v2513_v8 = vor.u32 %v3526_v63, %v2510_v0  ;;  %v2553_v63 = vor.u32 %v3536_v53, %v2550_v55  ;;  %v2617_v0 = vor.u32 %v3552_v56, %v2614_v57  ;;  %v2681_v4 = vor.u32 %v3568_v58, %v2678_v59  ;;  %v3608_v53 = vld [vmem:[%s5514_s1 + $0x2d4] sm:$0xf]  ;;  %v2838_v55 = vld [vmem:[%s5514_s1 + $0x2d8] sm:$0xf0] }
  0x8b   : > { %1998 = vmatpush.bf16.msrb.mxu1 %v3309_v11  ;;  %v3524_v11 = vld [vmem:[%s5514_s1 + $0x34] sm:$0xf]  ;;  %v2705_v15 = vor.u32 %v3574_v6, %v2702_v7  ;;  %v3566_v6 = vld [vmem:[%s5514_s1 + $0x184] sm:$0xf]  ;;  %v2670_v7 = vld [vmem:[%s5514_s1 + $0x188] sm:$0xf0] }
  0x8c   : > { %2012 = vmatpush.bf16.msrb.mxu2 %v3373_v12  ;;  %v2502_v12 = vld [vmem:[%s5514_s1 + $0x38] sm:$0xf0]  ;;  %v3624_v56 = vld [vmem:[%s5514_s1 + $0x354] sm:$0xf] }
  0x8d   : > { %2026 = vmatpush.bf16.msrb.mxu3 %v3437_v17  ;;  %1985 = vmatmul.bf16.vlgmr.msrb.gmra.mxu0 %v4707_v32  ;;  %v3556_v17 = vld [vmem:[%s5514_s1 + $0x134] sm:$0xf]  ;;  %v2505_v23 = vor.u32 %v3524_v11, %v2502_v12  ;;  %v2854_v12 = vld [vmem:[%s5514_s1 + $0x2f8] sm:$0xf0] }
  0x8e   : > { %2033 = vmatpush.bf16.msra.mxu0 %v2537_v18  ;;  %1999 = vmatmul.bf16.vlgmr.msrb.gmra.mxu1 %v4720_v41  ;;  %v2630_v18 = vld [vmem:[%s5514_s1 + $0x138] sm:$0xf0]  ;;  %v3640_v58 = vld [vmem:[%s5514_s1 + $0x3d4] sm:$0xf] }
  0x8f   : > { %2047 = vmatpush.bf16.msra.mxu1 %v2601_v25  ;;  %2013 = vmatmul.bf16.vlgmr.msrb.gmra.mxu2 %v4718_v38  ;;  %v2569_v25 = vor.u32 %v3540_v13, %v2566_v16  ;;  %v3628_v13 = vld [vmem:[%s5514_s1 + $0x374] sm:$0xf]  ;;  %v2902_v57 = vld [vmem:[%s5514_s1 + $0x358] sm:$0xf0] }
  0x90   : > { %2061 = vmatpush.bf16.msra.mxu2 %v2665_v26  ;;  %2027 = vmatmul.bf16.vlgmr.msrb.gmra.mxu3 %v4728_v46  ;;  %v2633_v26 = vor.u32 %v3556_v17, %v2630_v18  ;;  %v2609_v17 = vor.u32 %v3550_v3, %v2606_v5  ;;  %v3644_v18 = vld [vmem:[%s5514_s1 + $0x3f4] sm:$0xf]  ;;  %v2966_v59 = vld [vmem:[%s5514_s1 + $0x3d8] sm:$0xf0]  ;;  %v2958_v3 = vld [vmem:[%s5514_s1 + $0x3c8] sm:$0xf0] }
  0x91   : > { %2075 = vmatpush.bf16.msra.mxu3 %v2729_v30  ;;  %v2697_v30 = vor.u32 %v3572_v21, %v2694_v22  ;;  %v2982_v21 = vld [vmem:[%s5514_s1 + $0x3f8] sm:$0xf0]  ;;  %v2673_v22 = vor.u32 %v3566_v6, %v2670_v7  ;;  %v3588_v5 = vld [vmem:[%s5514_s1 + $0x234] sm:$0xf] }
  0x92   : > { %2034 = vmatpush.bf16.msra.mxu0 %v2529_v48  ;;  %v2497_v48 = vor.u32 %v3522_v27, %v2494_v28  ;;  %v3594_v27 = vld [vmem:[%s5514_s1 + $0x264] sm:$0xf]  ;;  %v2782_v28 = vld [vmem:[%s5514_s1 + $0x268] sm:$0xf0] }
  0x93   : > { %2048 = vmatpush.bf16.msra.mxu1 %v2593_v49  ;;  %v2561_v49 = vor.u32 %v3538_v29, %v2558_v33  ;;  %v3610_v29 = vld [vmem:[%s5514_s1 + $0x2e4] sm:$0xf]  ;;  %v2846_v33 = vld [vmem:[%s5514_s1 + $0x2e8] sm:$0xf0] }
  0x94   : > { %2062 = vmatpush.bf16.msra.mxu2 %v2657_v50  ;;  %v2625_v50 = vor.u32 %v3554_v34, %v2622_v37  ;;  %v3626_v34 = vld [vmem:[%s5514_s1 + $0x364] sm:$0xf]  ;;  %v2910_v37 = vld [vmem:[%s5514_s1 + $0x368] sm:$0xf0] }
  0x95   : > { %2076 = vmatpush.bf16.msra.mxu3 %v2721_v54  ;;  %v2689_v54 = vor.u32 %v3570_v42, %v2686_v45  ;;  %v3642_v42 = vld [vmem:[%s5514_s1 + $0x3e4] sm:$0xf]  ;;  %v2974_v45 = vld [vmem:[%s5514_s1 + $0x3e8] sm:$0xf0] }
  0x96   : > { %2035 = vmatpush.bf16.msra.mxu0 %v2521_v60  ;;  %v2489_v60 = vor.u32 %v3520_v51, %v2486_v52  ;;  %v3592_v51 = vld [vmem:[%s5514_s1 + $0x254] sm:$0xf]  ;;  %v2774_v52 = vld [vmem:[%s5514_s1 + $0x258] sm:$0xf0] }
  0x97   : > { %2049 = vmatpush.bf16.msra.mxu1 %v2585_v61  ;;  %v3518_v61 = vld [vmem:[%s5514_s1 + $0x4] sm:$0xf] }
  0x98   : > { %2063 = vmatpush.bf16.msra.mxu2 %v2649_v62  ;;  %v2478_v62 = vld [vmem:[%s5514_s1 + $0x8] sm:$0xf0] }
  0x99   : > { %2077 = vmatpush.bf16.msra.mxu3 %v2713_v2  ;;  %v2542_v2 = vld [vmem:[%s5514_s1 + $0x88] sm:$0xf0]  ;;  %v2481_v11 = vor.u32 %v3518_v61, %v2478_v62  ;;  %v2841_v61 = vor.u32 %v3608_v53, %v2838_v55  ;;  %v3590_v62 = vld [vmem:[%s5514_s1 + $0x244] sm:$0xf]  ;;  %v2742_v53 = vld [vmem:[%s5514_s1 + $0x218] sm:$0xf0] }
  0x9a   : > { %2036 = vmatpush.bf16.msra.mxu0 %v2513_v8  ;;  %v3596_v8 = vld [vmem:[%s5514_s1 + $0x274] sm:$0xf]  ;;  %v2545_v16 = vor.u32 %v3534_v1, %v2542_v2  ;;  %v2894_v1 = vld [vmem:[%s5514_s1 + $0x348] sm:$0xf0]  ;;  %v3638_v2 = vld [vmem:[%s5514_s1 + $0x3c4] sm:$0xf] }
  0x9b   : > { %2050 = vmatpush.bf16.msra.mxu1 %v2577_v9  ;;  %v2790_v9 = vld [vmem:[%s5514_s1 + $0x278] sm:$0xf0] }
  0x9c   : > { %2064 = vmatpush.bf16.msra.mxu2 %v2641_v10  ;;  %v3612_v10 = vld [vmem:[%s5514_s1 + $0x2f4] sm:$0xf] }
  0x9d   : > { %2078 = vmatpush.bf16.msra.mxu3 %v2705_v15  ;;  %v2918_v15 = vld [vmem:[%s5514_s1 + $0x378] sm:$0xf0] }
  0x9e   : > { %2037 = vmatpush.bf16.msra.mxu0 %v2505_v23  ;;  %v2793_v23 = vor.u32 %v3596_v8, %v2790_v9  ;;  %v2758_v8 = vld [vmem:[%s5514_s1 + $0x238] sm:$0xf0]  ;;  %v3604_v9 = vld [vmem:[%s5514_s1 + $0x2b4] sm:$0xf] }
  0x9f   : > { %2051 = vmatpush.bf16.msra.mxu1 %v2569_v25  ;;  %v2857_v25 = vor.u32 %v3612_v10, %v2854_v12  ;;  %v4990_v10 = vld [vmem:[%s5515_s2] sm:$0x3]  ;;  %v2822_v12 = vld [vmem:[%s5514_s1 + $0x2b8] sm:$0xf0] }
  0xa0   : > { %2065 = vmatpush.bf16.msra.mxu2 %v2633_v26  ;;  %v2921_v26 = vor.u32 %v3628_v13, %v2918_v15  ;;  %v3620_v13 = vld [vmem:[%s5514_s1 + $0x334] sm:$0xf]  ;;  %v2886_v15 = vld [vmem:[%s5514_s1 + $0x338] sm:$0xf0] }
  0xa1   : > { %2079 = vmatpush.bf16.msra.mxu3 %v2697_v30  ;;  %v2985_v30 = vor.u32 %v3644_v18, %v2982_v21  ;;  %v2761_v18 = vor.u32 %v3588_v5, %v2758_v8  ;;  %v445_v21 = vperm.slane %v4990_v10, 0  ;;  %v2926_v5 = vld [vmem:[%s5514_s1 + $0x388] sm:$0xf0]  ;;  %v3046_v8 = vld [vmem:[%s5514_s1 + $0x478] sm:$0xf0] }
  0xa2   : > { %2038 = vmatpush.bf16.msra.mxu0 %v2497_v48  ;;  %v2785_v48 = vor.u32 %v3594_v27, %v2782_v28  ;;  %v3602_v27 = vld [vmem:[%s5514_s1 + $0x2a4] sm:$0xf] }
  0xa3   : > { %2052 = vmatpush.bf16.msra.mxu1 %v2561_v49  ;;  %v2849_v49 = vor.u32 %v3610_v29, %v2846_v33  ;;  %v2814_v29 = vld [vmem:[%s5514_s1 + $0x2a8] sm:$0xf0] }
  0xa4   : > { %2066 = vmatpush.bf16.msra.mxu2 %v2625_v50  ;;  %v2913_v50 = vor.u32 %v3626_v34, %v2910_v37  ;;  %v2878_v33 = vld [vmem:[%s5514_s1 + $0x328] sm:$0xf0]  ;;  %v3634_v34 = vld [vmem:[%s5514_s1 + $0x3a4] sm:$0xf] }
  0xa5   : > { %2080 = vmatpush.bf16.msra.mxu3 %v2689_v54  ;;  %v2977_v54 = vor.u32 %v3642_v42, %v2974_v45  ;;  %v2942_v37 = vld [vmem:[%s5514_s1 + $0x3a8] sm:$0xf0] }
  0xa6   : > { %2039 = vmatpush.bf16.msra.mxu0 %v2489_v60  ;;  %v2777_v60 = vor.u32 %v3592_v51, %v2774_v52  ;;  %v3584_v52 = vld [vmem:[%s5514_s1 + $0x214] sm:$0xf]  ;;  %v2945_v55 = vor.u32 %v3634_v34, %v2942_v37 }
  0xa7   : > { %2053 = vmatpush.bf16.msra.mxu1 %v2553_v63  ;;  %v2766_v63 = vld [vmem:[%s5514_s1 + $0x248] sm:$0xf0] }
  0xa8   : > { %2067 = vmatpush.bf16.msra.mxu2 %v2617_v0  ;;  %v3622_v0 = vld [vmem:[%s5514_s1 + $0x344] sm:$0xf] }
  0xa9   : > { %2081 = vmatpush.bf16.msra.mxu3 %v2681_v4  ;;  %v2769_v4 = vor.u32 %v3590_v62, %v2766_v63  ;;  %v2897_v7 = vor.u32 %v3622_v0, %v2894_v1  ;;  %v3582_v62 = vld [vmem:[%s5514_s1 + $0x204] sm:$0xf]  ;;  %v2734_v63 = vld [vmem:[%s5514_s1 + $0x208] sm:$0xf0] }
  0xaa   : > { %2040 = vmatpush.bf16.msra.mxu0 %v2481_v11  ;;  %v2961_v11 = vor.u32 %v3638_v2, %v2958_v3  ;;  %v2798_v0 = vld [vmem:[%s5514_s1 + $0x288] sm:$0xf0]  ;;  %v3614_v1 = vld [vmem:[%s5514_s1 + $0x304] sm:$0xf] }
  0xab   : > { %2054 = vmatpush.bf16.msra.mxu1 %v2545_v16  ;;  %v3636_v16 = vld [vmem:[%s5514_s1 + $0x3b4] sm:$0xf]  ;;  %v2862_v3 = vld [vmem:[%s5514_s1 + $0x308] sm:$0xf0] }
  0xac   : > { %2068 = vmatpush.bf16.msra.mxu2 %v2609_v17  ;;  %v2950_v17 = vld [vmem:[%s5514_s1 + $0x3b8] sm:$0xf0] }
  0xad   : > { %2082 = vmatpush.bf16.msra.mxu3 %v2673_v22  ;;  %2041 = vmatmul.bf16.vlgmr.msra.gmra.mxu0 %v4126_v14  ;;  %v2905_v14 = vor.u32 %v3624_v56, %v2902_v57  ;;  %v2825_v22 = vor.u32 %v3604_v9, %v2822_v12  ;;  %v2953_v28 = vor.u32 %v3636_v16, %v2950_v17  ;;  %v1818_v42 = vpop.f32.mrf.mxu0  ;;  %v2806_v56 = vld [vmem:[%s5514_s1 + $0x298] sm:$0xf0]  ;;  %v3616_v57 = vld [vmem:[%s5514_s1 + $0x314] sm:$0xf] }
  0xae   : > { %2089 = vmatpush.bf16.msrb.mxu0 %v2793_v23  ;;  %2055 = vmatmul.bf16.vlgmr.msra.gmra.mxu1 %v4136_v20  ;;  %v2969_v20 = vor.u32 %v3640_v58, %v2966_v59  ;;  %v2889_v23 = vor.u32 %v3620_v13, %v2886_v15  ;;  %v2870_v58 = vld [vmem:[%s5514_s1 + $0x318] sm:$0xf0]  ;;  %v3676_v9 = vld [vmem:[%s5514_s1 + $0x4f4] sm:$0xf]  ;;  %v2737_v15 = vor.u32 %v3582_v62, %v2734_v63 }
  0xaf   : > { %2103 = vmatpush.bf16.msrb.mxu1 %v2857_v25  ;;  %2069 = vmatmul.bf16.vlgmr.msra.gmra.mxu2 %v4134_v19  ;;  %v3606_v19 = vld [vmem:[%s5514_s1 + $0x2c4] sm:$0xf]  ;;  %v3110_v16 = vld [vmem:[%s5514_s1 + $0x4f8] sm:$0xf0]  ;;  %v3692_v17 = vld [vmem:[%s5514_s1 + $0x574] sm:$0xf] }
  0xb0   : > { %2117 = vmatpush.bf16.msrb.mxu2 %v2921_v26  ;;  %2083 = vmatmul.bf16.vlgmr.msra.gmra.mxu3 %v4140_v24  ;;  %v2830_v24 = vld [vmem:[%s5514_s1 + $0x2c8] sm:$0xf0]  ;;  %v3586_v25 = vld [vmem:[%s5514_s1 + $0x224] sm:$0xf]  ;;  %v3094_v63 = vld [vmem:[%s5514_s1 + $0x4d8] sm:$0xf0] }
  0xb1   : > { %2131 = vmatpush.bf16.msrb.mxu3 %v2985_v30  ;;  %v2833_v6 = vor.u32 %v3606_v19, %v2830_v24  ;;  %v2750_v26 = vld [vmem:[%s5514_s1 + $0x228] sm:$0xf0]  ;;  %v3618_v30 = vld [vmem:[%s5514_s1 + $0x324] sm:$0xf] }
  0xb2   : > { %2090 = vmatpush.bf16.msrb.mxu0 %v2785_v48  ;;  %v2753_v45 = vor.u32 %v3586_v25, %v2750_v26  ;;  %v1819_v48 = vadd.f32 %v1818_v42, %v445_v21  ;;  %v2881_v51 = vor.u32 %v3618_v30, %v2878_v33  ;;  %v3598_v24 = vld [vmem:[%s5514_s1 + $0x284] sm:$0xf]  ;;  %v2865_v25 = vor.u32 %v3614_v1, %v2862_v3  ;;  %v3708_v26 = vld [vmem:[%s5514_s1 + $0x5f4] sm:$0xf] }
  0xb3   : > { %2104 = vmatpush.bf16.msrb.mxu1 %v2849_v49  ;;  %v1832_v49 = vpop.f32.mrf.mxu1  ;;  %v3658_v42 = vld [vmem:[%s5514_s1 + $0x464] sm:$0xf] }
  0xb4   : > { %2118 = vmatpush.bf16.msrb.mxu2 %v2913_v50  ;;  %v2817_v50 = vor.u32 %v3602_v27, %v2814_v29  ;;  %v1833_v59 = vadd.f32 %v1832_v49, %v1819_v48  ;;  %v3238_v27 = vld [vmem:[%s5514_s1 + $0x5f8] sm:$0xf0]  ;;  %v3674_v48 = vld [vmem:[%s5514_s1 + $0x4e4] sm:$0xf] }
  0xb5   : > { %2132 = vmatpush.bf16.msrb.mxu3 %v2977_v54  ;;  %v3600_v54 = vld [vmem:[%s5514_s1 + $0x294] sm:$0xf]  ;;  %v1820_v12 = vpop.f32.mrf.mxu0  ;;  %v3241_v49 = vor.u32 %v3708_v26, %v3238_v27 }
  0xb6   : > { %2091 = vmatpush.bf16.msrb.mxu0 %v2777_v60  ;;  %v3632_v60 = vld [vmem:[%s5514_s1 + $0x394] sm:$0xf]  ;;  %v2809_v19 = vor.u32 %v3600_v54, %v2806_v56  ;;  %v1860_v13 = vpop.f32.mrf.mxu3  ;;  %v3230_v54 = vld [vmem:[%s5514_s1 + $0x5e8] sm:$0xf0] }
  0xb7   : > { %2105 = vmatpush.bf16.msrb.mxu1 %v2841_v61  ;;  %v2934_v61 = vld [vmem:[%s5514_s1 + $0x398] sm:$0xf0] }
  0xb8   : > { %2119 = vmatpush.bf16.msrb.mxu2 %v2905_v14  ;;  %v2745_v14 = vor.u32 %v3584_v52, %v2742_v53  ;;  %v2937_v2 = vor.u32 %v3632_v60, %v2934_v61  ;;  %v3166_v52 = vld [vmem:[%s5514_s1 + $0x568] sm:$0xf0]  ;;  %v3706_v53 = vld [vmem:[%s5514_s1 + $0x5e4] sm:$0xf]  ;;  %v3030_v60 = vld [vmem:[%s5514_s1 + $0x458] sm:$0xf0] }
  0xb9   : > { %2133 = vmatpush.bf16.msrb.mxu3 %v2969_v20  ;;  %v2873_v20 = vor.u32 %v3616_v57, %v2870_v58  ;;  %v3672_v61 = vld [vmem:[%s5514_s1 + $0x4d4] sm:$0xf]  ;;  %v3233_v62 = vor.u32 %v3706_v53, %v3230_v54  ;;  %v3682_v53 = vld [vmem:[%s5514_s1 + $0x524] sm:$0xf]  ;;  %v3134_v54 = vld [vmem:[%s5514_s1 + $0x528] sm:$0xf0] }
  0xba   : > { %2092 = vmatpush.bf16.msrb.mxu0 %v2769_v4  ;;  %v3630_v4 = vld [vmem:[%s5514_s1 + $0x384] sm:$0xf]  ;;  %v3097_v3 = vor.u32 %v3672_v61, %v3094_v63 }
  0xbb   : > { %2106 = vmatpush.bf16.msrb.mxu1 %v2833_v6  ;;  %v1846_v6 = vpop.f32.mrf.mxu2  ;;  %v1834_v29 = vpop.f32.mrf.mxu1  ;;  %v2929_v30 = vor.u32 %v3630_v4, %v2926_v5  ;;  %v3670_v5 = vld [vmem:[%s5514_s1 + $0x4c4] sm:$0xf] }
  0xbc   : > { %2120 = vmatpush.bf16.msrb.mxu2 %v2897_v7  ;;  %v3660_v7 = vld [vmem:[%s5514_s1 + $0x474] sm:$0xf] }
  0xbd   : > { %2134 = vmatpush.bf16.msrb.mxu3 %v2961_v11  ;;  %v1847_v11 = vadd.f32 %v1846_v6, %v1833_v59  ;;  %v3049_v33 = vor.u32 %v3660_v7, %v3046_v8  ;;  %v3656_v59 = vld [vmem:[%s5514_s1 + $0x454] sm:$0xf]  ;;  %v3086_v6 = vld [vmem:[%s5514_s1 + $0x4c8] sm:$0xf0]  ;;  %v3686_v7 = vld [vmem:[%s5514_s1 + $0x544] sm:$0xf] }
  0xbe   : > { %2093 = vmatpush.bf16.msrb.mxu0 %v2761_v18  ;;  %v3174_v18 = vld [vmem:[%s5514_s1 + $0x578] sm:$0xf0]  ;;  %v3150_v8 = vld [vmem:[%s5514_s1 + $0x548] sm:$0xf0] }
  0xbf   : > { %2107 = vmatpush.bf16.msrb.mxu1 %v2825_v22  ;;  %v1821_v22 = vadd.f32 %v1820_v12, %v445_v21  ;;  %v3113_v21 = vor.u32 %v3676_v9, %v3110_v16  ;;  %v3177_v37 = vor.u32 %v3692_v17, %v3174_v18  ;;  %v3214_v12 = vld [vmem:[%s5514_s1 + $0x5c8] sm:$0xf0]  ;;  %v3089_v17 = vor.u32 %v3670_v5, %v3086_v6 }
  0xc0   : > { %2121 = vmatpush.bf16.msrb.mxu2 %v2889_v23  ;;  %v2801_v23 = vor.u32 %v3598_v24, %v2798_v0  ;;  %v1862_v24 = vpop.f32.mrf.mxu3  ;;  %v3222_v0 = vld [vmem:[%s5514_s1 + $0x5d8] sm:$0xf0]  ;;  %v3153_v18 = vor.u32 %v3686_v7, %v3150_v8  ;;  %v2990_v6 = vld [vmem:[%s5514_s1 + $0x408] sm:$0xf0] }
  0xc1   : > { %2135 = vmatpush.bf16.msrb.mxu3 %v2953_v28  ;;  %v5108_v28 = vadd.f32 %v1860_v13, %v1847_v11  ;;  %v1835_v34 = vadd.f32 %v1834_v29, %v1821_v22  ;;  %v3702_v11 = vld [vmem:[%s5514_s1 + $0x5c4] sm:$0xf]  ;;  %v3652_v22 = vld [vmem:[%s5514_s1 + $0x434] sm:$0xf] }
  0xc2   : > { %2094 = vmatpush.bf16.msrb.mxu0 %v2753_v45  ;;  %v3038_v45 = vld [vmem:[%s5514_s1 + $0x468] sm:$0xf0]  ;;  %v3217_v26 = vor.u32 %v3702_v11, %v3214_v12  ;;  %v3684_v29 = vld [vmem:[%s5514_s1 + $0x534] sm:$0xf]  ;;  %v3678_v12 = vld [vmem:[%s5514_s1 + $0x504] sm:$0xf] }
  0xc3   : > { %2108 = vmatpush.bf16.msrb.mxu1 %v2817_v50  ;;  %v3102_v50 = vld [vmem:[%s5514_s1 + $0x4e8] sm:$0xf0]  ;;  %v1848_v56 = vpop.f32.mrf.mxu2 }
  0xc4   : > { %2122 = vmatpush.bf16.msrb.mxu2 %v2881_v51  ;;  %v3690_v51 = vld [vmem:[%s5514_s1 + $0x564] sm:$0xf]  ;;  %v3105_v57 = vor.u32 %v3674_v48, %v3102_v50  ;;  %v3006_v48 = vld [vmem:[%s5514_s1 + $0x428] sm:$0xf0] }
  0xc5   : > { %2136 = vmatpush.bf16.msrb.mxu3 %v2945_v55  ;;  %v3041_v55 = vor.u32 %v3658_v42, %v3038_v45  ;;  %v3169_v58 = vor.u32 %v3690_v51, %v3166_v52  ;;  %v3650_v45 = vld [vmem:[%s5514_s1 + $0x424] sm:$0xf]  ;;  %v3070_v52 = vld [vmem:[%s5514_s1 + $0x4a8] sm:$0xf0] }
  0xc6   : > { %2095 = vmatpush.bf16.msrb.mxu0 %v2745_v14  ;;  %v1849_v14 = vadd.f32 %v1848_v56, %v1835_v34  ;;  %v3206_v34 = vld [vmem:[%s5514_s1 + $0x5b8] sm:$0xf0]  ;;  %v3009_v61 = vor.u32 %v3650_v45, %v3006_v48  ;;  %v3054_v11 = vld [vmem:[%s5514_s1 + $0x488] sm:$0xf0] }
  0xc7   : > { %2109 = vmatpush.bf16.msrb.mxu1 %v2809_v19  ;;  %v3688_v19 = vld [vmem:[%s5514_s1 + $0x554] sm:$0xf]  ;;  %v3494_v45 = vld [vmem:[%s5514_s1 + $0x7f8] sm:$0xf0] }
  0xc8   : > { %2123 = vmatpush.bf16.msrb.mxu2 %v2873_v20  ;;  %v3158_v20 = vld [vmem:[%s5514_s1 + $0x558] sm:$0xf0]  ;;  %v1863_v1 = vadd.f32 %v1862_v24, %v1849_v14 }
  0xc9   : > { %2137 = vmatpush.bf16.msrb.mxu3 %v2937_v2  ;;  %v3033_v2 = vor.u32 %v3656_v59, %v3030_v60  ;;  %v3161_v4 = vor.u32 %v3688_v19, %v3158_v20  ;;  %v3198_v59 = vld [vmem:[%s5514_s1 + $0x5a8] sm:$0xf0]  ;;  %v3137_v19 = vor.u32 %v3682_v53, %v3134_v54  ;;  %v3648_v20 = vld [vmem:[%s5514_s1 + $0x414] sm:$0xf]  ;;  %v2998_v24 = vld [vmem:[%s5514_s1 + $0x418] sm:$0xf0] }
  0xca   : > { %2096 = vmatpush.bf16.msrb.mxu0 %v2737_v15  ;;  %v1874_v9 = vpop.f32.mrf.mxu0  ;;  %v3001_v5 = vor.u32 %v3648_v20, %v2998_v24  ;;  %v3294_v53 = vld [vmem:[%s5514_s1 + $0x668] sm:$0xf0]  ;;  %v3738_v54 = vld [vmem:[%s5514_s1 + $0x6e4] sm:$0xf]  ;;  %v3286_v20 = vld [vmem:[%s5514_s1 + $0x658] sm:$0xf0] }
  0xcb   : > { %2110 = vmatpush.bf16.msrb.mxu1 %v2801_v23  ;;  %v1875_v13 = vadd.f32 %v1874_v9, %v5108_v28  ;;  %v1888_v16 = vpop.f32.mrf.mxu1  ;;  %v3014_v23 = vld [vmem:[%s5514_s1 + $0x438] sm:$0xf0]  ;;  %v3662_v9 = vld [vmem:[%s5514_s1 + $0x484] sm:$0xf]  ;;  %v3736_v24 = vld [vmem:[%s5514_s1 + $0x6d4] sm:$0xf] }
  0xcc   : > { %2124 = vmatpush.bf16.msrb.mxu2 %v2865_v25  ;;  %v3668_v25 = vld [vmem:[%s5514_s1 + $0x4b4] sm:$0xf]  ;;  %v3078_v28 = vld [vmem:[%s5514_s1 + $0x4b8] sm:$0xf0] }
  0xcd   : > { %2138 = vmatpush.bf16.msrb.mxu3 %v2929_v30  ;;  %2097 = vmatmul.bf16.vlgmr.msrb.gmra.mxu0 %v4283_v39  ;;  %v3704_v39 = vld [vmem:[%s5514_s1 + $0x5d4] sm:$0xf]  ;;  %v1889_v27 = vadd.f32 %v1888_v16, %v1875_v13  ;;  %v3142_v30 = vld [vmem:[%s5514_s1 + $0x538] sm:$0xf0]  ;;  %v3118_v16 = vld [vmem:[%s5514_s1 + $0x508] sm:$0xf0] }
  0xce   : > { %2145 = vmatpush.bf16.msra.mxu0 %v3049_v33  ;;  %2111 = vmatmul.bf16.vlgmr.msrb.gmra.mxu1 %v4296_v44  ;;  %v3022_v44 = vld [vmem:[%s5514_s1 + $0x448] sm:$0xf0]  ;;  %v3700_v33 = vld [vmem:[%s5514_s1 + $0x5b4] sm:$0xf]  ;;  %v3145_v42 = vor.u32 %v3684_v29, %v3142_v30  ;;  %v3366_v29 = vld [vmem:[%s5514_s1 + $0x6f8] sm:$0xf0] }
  0xcf   : > { %2159 = vmatpush.bf16.msra.mxu1 %v3113_v21  ;;  %2125 = vmatmul.bf16.vlgmr.msrb.gmra.mxu2 %v4294_v43  ;;  %v3654_v43 = vld [vmem:[%s5514_s1 + $0x444] sm:$0xf]  ;;  %v3017_v21 = vor.u32 %v3652_v22, %v3014_v23  ;;  %v3209_v50 = vor.u32 %v3700_v33, %v3206_v34  ;;  %v3756_v30 = vld [vmem:[%s5514_s1 + $0x774] sm:$0xf]  ;;  %v3430_v33 = vld [vmem:[%s5514_s1 + $0x778] sm:$0xf0] }
  0xd0   : > { %2173 = vmatpush.bf16.msra.mxu2 %v3177_v37  ;;  %2139 = vmatmul.bf16.vlgmr.msrb.gmra.mxu3 %v4304_v47  ;;  %v3225_v47 = vor.u32 %v3704_v39, %v3222_v0  ;;  %v3025_v15 = vor.u32 %v3654_v43, %v3022_v44  ;;  %v3081_v37 = vor.u32 %v3668_v25, %v3078_v28  ;;  %v3664_v39 = vld [vmem:[%s5514_s1 + $0x494] sm:$0xf]  ;;  %v3190_v44 = vld [vmem:[%s5514_s1 + $0x598] sm:$0xf0] }
  0xd1   : > { %2187 = vmatpush.bf16.msra.mxu3 %v3241_v49  ;;  %v3666_v49 = vld [vmem:[%s5514_s1 + $0x4a4] sm:$0xf]  ;;  %v3696_v43 = vld [vmem:[%s5514_s1 + $0x594] sm:$0xf] }
  0xd2   : > { %2146 = vmatpush.bf16.msra.mxu0 %v3041_v55  ;;  %v1902_v51 = vpop.f32.mrf.mxu2  ;;  %v1876_v56 = vpop.f32.mrf.mxu0  ;;  %v3073_v63 = vor.u32 %v3666_v49, %v3070_v52  ;;  %v3193_v13 = vor.u32 %v3696_v43, %v3190_v44  ;;  %v3724_v25 = vld [vmem:[%s5514_s1 + $0x674] sm:$0xf]  ;;  %v3722_v52 = vld [vmem:[%s5514_s1 + $0x664] sm:$0xf] }
  0xd3   : > { %2160 = vmatpush.bf16.msra.mxu1 %v3105_v57  ;;  %v1903_v55 = vadd.f32 %v1902_v51, %v1889_v27  ;;  %v1916_v57 = vpop.f32.mrf.mxu3  ;;  %v1877_v60 = vadd.f32 %v1876_v56, %v1863_v1  ;;  %v1890_v14 = vpop.f32.mrf.mxu1  ;;  %v3740_v27 = vld [vmem:[%s5514_s1 + $0x6f4] sm:$0xf]  ;;  %v3433_v51 = vor.u32 %v3756_v30, %v3430_v33  ;;  %v3358_v56 = vld [vmem:[%s5514_s1 + $0x6e8] sm:$0xf0]  ;;  %v3462_v30 = vld [vmem:[%s5514_s1 + $0x7b8] sm:$0xf0] }
  0xd4   : > { %2174 = vmatpush.bf16.msra.mxu2 %v3169_v58  ;;  %v3698_v58 = vld [vmem:[%s5514_s1 + $0x5a4] sm:$0xf] }
  0xd5   : > { %2188 = vmatpush.bf16.msra.mxu3 %v3233_v62  ;;  %v5235_v62 = vadd.f32 %v1916_v57, %v1903_v55  ;;  %v3201_v0 = vor.u32 %v3698_v58, %v3198_v59  ;;  %v1891_v1 = vadd.f32 %v1890_v14, %v1877_v60  ;;  %v3754_v57 = vld [vmem:[%s5514_s1 + $0x764] sm:$0xf]  ;;  %v3422_v58 = vld [vmem:[%s5514_s1 + $0x768] sm:$0xf0]  ;;  %v3361_v14 = vor.u32 %v3738_v54, %v3358_v56 }
  0xd6   : > { %2147 = vmatpush.bf16.msra.mxu0 %v3033_v2  ;;  %v3062_v2 = vld [vmem:[%s5514_s1 + $0x498] sm:$0xf0]  ;;  %v3770_v59 = vld [vmem:[%s5514_s1 + $0x7e4] sm:$0xf]  ;;  %v3486_v60 = vld [vmem:[%s5514_s1 + $0x7e8] sm:$0xf0] }
  0xd7   : > { %2161 = vmatpush.bf16.msra.mxu1 %v3097_v3  ;;  %v3680_v3 = vld [vmem:[%s5514_s1 + $0x514] sm:$0xf]  ;;  %v3065_v7 = vor.u32 %v3664_v39, %v3062_v2  ;;  %v3489_v39 = vor.u32 %v3770_v59, %v3486_v60  ;;  %v3414_v2 = vld [vmem:[%s5514_s1 + $0x758] sm:$0xf0] }
  0xd8   : > { %2175 = vmatpush.bf16.msra.mxu2 %v3161_v4  ;;  %v3126_v4 = vld [vmem:[%s5514_s1 + $0x518] sm:$0xf0] }
  0xd9   : > { %2189 = vmatpush.bf16.msra.mxu3 %v3225_v47  ;;  %v3646_v47 = vld [vmem:[%s5514_s1 + $0x404] sm:$0xf]  ;;  %v3129_v8 = vor.u32 %v3680_v3, %v3126_v4  ;;  %v3478_v3 = vld [vmem:[%s5514_s1 + $0x7d8] sm:$0xf0] }
  0xda   : > { %2148 = vmatpush.bf16.msra.mxu0 %v3025_v15  ;;  %v1904_v15 = vpop.f32.mrf.mxu2  ;;  %v2993_v28 = vor.u32 %v3646_v47, %v2990_v6  ;;  %v3342_v47 = vld [vmem:[%s5514_s1 + $0x6c8] sm:$0xf0]  ;;  %v3750_v6 = vld [vmem:[%s5514_s1 + $0x744] sm:$0xf] }
  0xdb   : > { %2162 = vmatpush.bf16.msra.mxu1 %v3089_v17  ;;  %v3694_v17 = vld [vmem:[%s5514_s1 + $0x584] sm:$0xf]  ;;  %v1905_v22 = vadd.f32 %v1904_v15, %v1891_v1  ;;  %v1918_v23 = vpop.f32.mrf.mxu3  ;;  %v3752_v1 = vld [vmem:[%s5514_s1 + $0x754] sm:$0xf] }
  0xdc   : > { %2176 = vmatpush.bf16.msra.mxu2 %v3153_v18  ;;  %v3182_v18 = vld [vmem:[%s5514_s1 + $0x588] sm:$0xf0]  ;;  %v3417_v44 = vor.u32 %v3752_v1, %v3414_v2  ;;  %v3318_v1 = vld [vmem:[%s5514_s1 + $0x698] sm:$0xf0]  ;;  %v3744_v2 = vld [vmem:[%s5514_s1 + $0x714] sm:$0xf] }
  0xdd   : > { %2190 = vmatpush.bf16.msra.mxu3 %v3217_v26  ;;  %v3302_v26 = vld [vmem:[%s5514_s1 + $0x678] sm:$0xf0]  ;;  %v5303_v34 = vadd.f32 %v1918_v23, %v1905_v22  ;;  %v3185_v48 = vor.u32 %v3694_v17, %v3182_v18  ;;  %v3716_v18 = vld [vmem:[%s5514_s1 + $0x634] sm:$0xf] }
  0xde   : > { %2149 = vmatpush.bf16.msra.mxu0 %v3017_v21  ;;  %v3057_v21 = vor.u32 %v3662_v9, %v3054_v11  ;;  %v3305_v49 = vor.u32 %v3724_v25, %v3302_v26  ;;  %v3766_v9 = vld [vmem:[%s5514_s1 + $0x7c4] sm:$0xf]  ;;  %v3470_v11 = vld [vmem:[%s5514_s1 + $0x7c8] sm:$0xf0]  ;;  %v3270_v22 = vld [vmem:[%s5514_s1 + $0x638] sm:$0xf0] }
  0xdf   : > { %2163 = vmatpush.bf16.msra.mxu1 %v3081_v37  ;;  %v3121_v37 = vor.u32 %v3678_v12, %v3118_v16  ;;  %v3732_v23 = vld [vmem:[%s5514_s1 + $0x6b4] sm:$0xf]  ;;  %v3334_v26 = vld [vmem:[%s5514_s1 + $0x6b8] sm:$0xf0]  ;;  %v3273_v33 = vor.u32 %v3716_v18, %v3270_v22 }
  0xe0   : > { %2177 = vmatpush.bf16.msra.mxu2 %v3145_v42  ;;  %v3772_v42 = vld [vmem:[%s5514_s1 + $0x7f4] sm:$0xf] }
  0xe1   : > { %2191 = vmatpush.bf16.msra.mxu3 %v3209_v50  ;;  %v3369_v50 = vor.u32 %v3740_v27, %v3366_v29  ;;  %v3497_v55 = vor.u32 %v3772_v42, %v3494_v45  ;;  %v3748_v27 = vld [vmem:[%s5514_s1 + $0x734] sm:$0xf]  ;;  %v3714_v42 = vld [vmem:[%s5514_s1 + $0x624] sm:$0xf]  ;;  %v3262_v45 = vld [vmem:[%s5514_s1 + $0x628] sm:$0xf0] }
  0xe2   : > { %2150 = vmatpush.bf16.msra.mxu0 %v3009_v61  ;;  %v3297_v61 = vor.u32 %v3722_v52, %v3294_v53  ;;  %v3764_v29 = vld [vmem:[%s5514_s1 + $0x7b4] sm:$0xf]  ;;  %v3746_v52 = vld [vmem:[%s5514_s1 + $0x724] sm:$0xf]  ;;  %v3390_v53 = vld [vmem:[%s5514_s1 + $0x728] sm:$0xf0]  ;;  %v3265_v60 = vor.u32 %v3714_v42, %v3262_v45 }
  0xe3   : > { %2164 = vmatpush.bf16.msra.mxu1 %v3073_v63  ;;  %v3425_v63 = vor.u32 %v3754_v57, %v3422_v58  ;;  %v3762_v57 = vld [vmem:[%s5514_s1 + $0x7a4] sm:$0xf]  ;;  %v3454_v58 = vld [vmem:[%s5514_s1 + $0x7a8] sm:$0xf0] }
  0xe4   : > { %2178 = vmatpush.bf16.msra.mxu2 %v3137_v19  ;;  %v3720_v19 = vld [vmem:[%s5514_s1 + $0x654] sm:$0xf] }
  0xe5   : > { %2192 = vmatpush.bf16.msra.mxu3 %v3201_v0  ;;  %v3350_v0 = vld [vmem:[%s5514_s1 + $0x6d8] sm:$0xf0]  ;;  %v3289_v4 = vor.u32 %v3720_v19, %v3286_v20  ;;  %v3393_v19 = vor.u32 %v3746_v52, %v3390_v53  ;;  %v3712_v20 = vld [vmem:[%s5514_s1 + $0x614] sm:$0xf] }
  0xe6   : > { %2151 = vmatpush.bf16.msra.mxu0 %v3001_v5  ;;  %v3353_v43 = vor.u32 %v3736_v24, %v3350_v0  ;;  %v3734_v5 = vld [vmem:[%s5514_s1 + $0x6c4] sm:$0xf]  ;;  %v3254_v24 = vld [vmem:[%s5514_s1 + $0x618] sm:$0xf0] }
  0xe7   : > { %2165 = vmatpush.bf16.msra.mxu1 %v3065_v7  ;;  %v3406_v7 = vld [vmem:[%s5514_s1 + $0x748] sm:$0xf0]  ;;  %v3345_v16 = vor.u32 %v3734_v5, %v3342_v47 }
  0xe8   : > { %2179 = vmatpush.bf16.msra.mxu2 %v3129_v8  ;;  %v3409_v17 = vor.u32 %v3750_v6, %v3406_v7  ;;  %v3246_v5 = vld [vmem:[%s5514_s1 + $0x608] sm:$0xf0] }
  0xe9   : > { %2193 = vmatpush.bf16.msra.mxu3 %v3193_v13  ;;  %v3310_v7 = vld [vmem:[%s5514_s1 + $0x688] sm:$0xf0] }
  0xea   : > { %2152 = vmatpush.bf16.msra.mxu0 %v2993_v28  ;;  %v1930_v8 = vpop.f32.mrf.mxu0  ;;  %v3398_v28 = vld [vmem:[%s5514_s1 + $0x738] sm:$0xf0] }
  0xeb   : > { %2166 = vmatpush.bf16.msra.mxu1 %v3057_v21  ;;  %v1931_v12 = vadd.f32 %v1930_v8, %v5235_v62  ;;  %v1944_v15 = vpop.f32.mrf.mxu1  ;;  %v3473_v62 = vor.u32 %v3766_v9, %v3470_v11  ;;  %v3337_v21 = vor.u32 %v3732_v23, %v3334_v26  ;;  %v3742_v8 = vld [vmem:[%s5514_s1 + $0x704] sm:$0xf]  ;;  %v3374_v9 = vld [vmem:[%s5514_s1 + $0x708] sm:$0xf0] }
  0xec   : > { %2180 = vmatpush.bf16.msra.mxu2 %v3121_v37  ;;  %v3401_v37 = vor.u32 %v3748_v27, %v3398_v28  ;;  %v3377_v22 = vor.u32 %v3742_v8, %v3374_v9  ;;  %v3797_v28 = vmov 16.0  }
  0xed   : > { %2194 = vmatpush.bf16.msra.mxu3 %v3185_v48  ;;  %2153 = vmatmul.bf16.vlgmr.msra.gmra.mxu0 %v4495_v31  ;;  %v3768_v31 = vld [vmem:[%s5514_s1 + $0x7d4] sm:$0xf]  ;;  %v1945_v25 = vadd.f32 %v1944_v15, %v1931_v12  ;;  %v3730_v48 = vld [vmem:[%s5514_s1 + $0x6a4] sm:$0xf]  ;;  %v3438_v15 = vld [vmem:[%s5514_s1 + $0x788] sm:$0xf0]  ;;  %3783 = vrcp.f32 %v3797_v28 }
  0xee   : > { %2201 = vmatpush.bf16.msrb.mxu0 %v3305_v49  ;;  %2167 = vmatmul.bf16.vlgmr.msra.gmra.mxu1 %v4508_v36  ;;  %v3278_v36 = vld [vmem:[%s5514_s1 + $0x648] sm:$0xf0]  ;;  %v3465_v49 = vor.u32 %v3764_v29, %v3462_v30 }
  0xef   : > { %2215 = vmatpush.bf16.msrb.mxu1 %v3369_v50  ;;  %2181 = vmatmul.bf16.vlgmr.msra.gmra.mxu2 %v4506_v35  ;;  %v3718_v35 = vld [vmem:[%s5514_s1 + $0x644] sm:$0xf] }
  0xf0   : > { %2229 = vmatpush.bf16.msrb.mxu2 %v3433_v51  ;;  %2195 = vmatmul.bf16.vlgmr.msra.gmra.mxu3 %v4516_v40  ;;  %v3481_v40 = vor.u32 %v3768_v31, %v3478_v3  ;;  %v3281_v13 = vor.u32 %v3718_v35, %v3278_v36  ;;  %v3326_v51 = vld [vmem:[%s5514_s1 + $0x6a8] sm:$0xf0]  ;;  %v3382_v31 = vld [vmem:[%s5514_s1 + $0x718] sm:$0xf0]  ;;  %v3760_v3 = vld [vmem:[%s5514_s1 + $0x794] sm:$0xf] }
  0xf1   : > { %2243 = vmatpush.bf16.msrb.mxu3 %v3497_v55  ;;  %v3385_v35 = vor.u32 %v3744_v2, %v3382_v31  ;;  %v3710_v36 = vld [vmem:[%s5514_s1 + $0x604] sm:$0xf] }
  0xf2   : > { %2202 = vmatpush.bf16.msrb.mxu0 %v3297_v61  ;;  %v1958_v50 = vpop.f32.mrf.mxu2  ;;  %v1932_v55 = vpop.f32.mrf.mxu0 }
  0xf3   : > { %2216 = vmatpush.bf16.msrb.mxu1 %v3361_v14  ;;  %v1959_v54 = vadd.f32 %v1958_v50, %v1945_v25  ;;  %v1972_v56 = vpop.f32.mrf.mxu3  ;;  %v1933_v59 = vadd.f32 %v1932_v55, %v5303_v34  ;;  %v1946_v61 = vpop.f32.mrf.mxu1  ;;  %v3457_v34 = vor.u32 %v3762_v57, %v3454_v58 }
  0xf4   : > { %2230 = vmatpush.bf16.msrb.mxu2 %v3425_v63  ;;  %v3329_v63 = vor.u32 %v3730_v48, %v3326_v51  ;;  %v3784_v48 = vpop.eup %3783 }
  0xf5   : > { %2244 = vmatpush.bf16.msrb.mxu3 %v3489_v39  ;;  %v1973_v14 = vadd.f32 %v1972_v56, %v1959_v54  ;;  %v3728_v39 = vld [vmem:[%s5514_s1 + $0x694] sm:$0xf]  ;;  %v1947_v0 = vadd.f32 %v1946_v61, %v1933_v59  ;;  %vm2276_vm0 = vweird.f32 %v3784_v48 }
  0xf6   : > { %2203 = vmatpush.bf16.msrb.mxu0 %v3289_v4  ;;  %v3446_v4 = vld [vmem:[%s5514_s1 + $0x798] sm:$0xf0] }
  0xf7   : > { %2217 = vmatpush.bf16.msrb.mxu1 %v3353_v43  ;;  %v3257_v43 = vor.u32 %v3712_v20, %v3254_v24  ;;  %v3449_v47 = vor.u32 %v3760_v3, %v3446_v4 }
  0xf8   : > { %2231 = vmatpush.bf16.msrb.mxu2 %v3417_v44  ;;  %v3321_v44 = vor.u32 %v3728_v39, %v3318_v1 }
  0xf9   : > { %2245 = vmatpush.bf16.msrb.mxu3 %v3481_v40  ;;  %v3726_v40 = vld [vmem:[%s5514_s1 + $0x684] sm:$0xf] }
  0xfa   : > { %2204 = vmatpush.bf16.msrb.mxu0 %v3281_v13  ;;  %v1960_v6 = vpop.f32.mrf.mxu2  ;;  %v3758_v13 = vld [vmem:[%s5514_s1 + $0x784] sm:$0xf]  ;;  %v3313_v18 = vor.u32 %v3726_v40, %v3310_v7 }
  0xfb   : > { %2218 = vmatpush.bf16.msrb.mxu1 %v3345_v16  ;;  %v1961_v11 = vadd.f32 %v1960_v6, %v1947_v0  ;;  %v1974_v12 = vpop.f32.mrf.mxu3  ;;  %v3249_v16 = vor.u32 %v3710_v36, %v3246_v5  ;;  %v3441_v23 = vor.u32 %v3758_v13, %v3438_v15 }
  0xfc   : > { %2232 = vmatpush.bf16.msrb.mxu2 %v3409_v17 }
  0xfd   : > { %2246 = vmatpush.bf16.msrb.mxu3 %v3473_v62  ;;  %v1975_v17 = vadd.f32 %v1974_v12, %v1961_v11 }
  0xfe   : > { %2205 = vmatpush.bf16.msrb.mxu0 %v3273_v33 }
  0xff   : > { %2219 = vmatpush.bf16.msrb.mxu1 %v3337_v21 }
 0x100   : > { %2233 = vmatpush.bf16.msrb.mxu2 %v3401_v37 }
 0x101   : > { %2247 = vmatpush.bf16.msrb.mxu3 %v3465_v49  ;;  %v2272_v49 = vmul.f32 16.0, %v3784_v48 }
 0x102   : > { %2206 = vmatpush.bf16.msrb.mxu0 %v3265_v60 }
 0x103   : > { %2220 = vmatpush.bf16.msrb.mxu1 %v3329_v63  ;;  %v2273_v51 = vsub.f32 1.0, %v2272_v49 }
 0x104   : > { %2234 = vmatpush.bf16.msrb.mxu2 %v3393_v19 }
 0x105   : > { %2248 = vmatpush.bf16.msrb.mxu3 %v3457_v34  ;;  %v2274_v54 = vmul.f32 %v3784_v48, %v2273_v51 }
 0x106   : > { %2207 = vmatpush.bf16.msrb.mxu0 %v3257_v43 }
 0x107   : > { %2221 = vmatpush.bf16.msrb.mxu1 %v3321_v44  ;;  %v2275_v57 = vadd.f32 %v3784_v48, %v2274_v54 }
 0x108   : > { %2235 = vmatpush.bf16.msrb.mxu2 %v3385_v35 }
 0x109   : > { %2249 = vmatpush.bf16.msrb.mxu3 %v3449_v47  ;;  %v5489_v60 = vsel %vm2276_vm0, %v3784_v48, %v2275_v57 }
 0x10a   : > { %2208 = vmatpush.bf16.msrb.mxu0 %v3249_v16  ;;  %v1986_v62 = vpop.f32.mrf.mxu0 }
 0x10b   : > { %2222 = vmatpush.bf16.msrb.mxu1 %v3313_v18  ;;  %v1987_v25 = vadd.f32 %v1986_v62, %v1973_v14  ;;  %v2000_v26 = vpop.f32.mrf.mxu1  ;;  %v446_v18 = vperm.slane %v4990_v10, 1 }
 0x10c   : > { %2236 = vmatpush.bf16.msrb.mxu2 %v3377_v22 }
 0x10d   : > { %2250 = vmatpush.bf16.msrb.mxu3 %v3441_v23  ;;  %2209 = vmatmul.bf16.vlgmr.msrb.gmra.mxu0 %v4707_v32  ;;  %v2001_v27 = vadd.f32 %v2000_v26, %v1987_v25 }
 0x10e   : > { %2223 = vmatmul.bf16.vlgmr.msrb.gmra.mxu1 %v4720_v41 }
 0x10f   : > { %2237 = vmatmul.bf16.vlgmr.msrb.gmra.mxu2 %v4718_v38 }
 0x110   : > { %2251 = vmatmul.bf16.vlgmr.msrb.gmra.mxu3 %v4728_v46 }
 0x112   : > { %v2014_v29 = vpop.f32.mrf.mxu2  ;;  %v1988_v33 = vpop.f32.mrf.mxu0 }
 0x113   : > { %v2015_v30 = vadd.f32 %v2014_v29, %v2001_v27  ;;  %v2028_v21 = vpop.f32.mrf.mxu3  ;;  %v1989_v37 = vadd.f32 %v1988_v33, %v1975_v17  ;;  %v2002_v42 = vpop.f32.mrf.mxu1 }
 0x115   : > { %v2029_v45 = vadd.f32 %v2028_v21, %v2015_v30  ;;  %v2003_v32 = vadd.f32 %v2002_v42, %v1989_v37 }
 0x11a   : > { %v2016_v41 = vpop.f32.mrf.mxu2 }
 0x11b   : > { %v2017_v38 = vadd.f32 %v2016_v41, %v2003_v32  ;;  %v2030_v50 = vpop.f32.mrf.mxu3 }
 0x11d   : > { %v2031_v46 = vadd.f32 %v2030_v50, %v2017_v38 }
 0x11f   : > { %v2257_v52 = vadd.f32 %v2031_v46, %v2029_v45 }
 0x121   : > { %v2258_v53 = vrot.slane %v2257_v52, 4 }
 0x123   : > { %v2259_v55 = vadd.f32 %v2258_v53, %v2257_v52 }
 0x125   : > { %v2260_v56 = vrot.slane %v2259_v55, 2 }
 0x127   : > { %v2261_v58 = vadd.f32 %v2260_v56, %v2259_v55 }
 0x129   : > { %v2262_v59 = vrot.slane %v2261_v58, 1 }
 0x12a   : > { %v2042_v44 = vpop.f32.mrf.mxu0 }
 0x12b   : > { %v2263_v61 = vadd.f32 %v2262_v59, %v2261_v58  ;;  %v2056_v5 = vpop.f32.mrf.mxu1  ;;  %v2043_v62 = vadd.f32 %v2042_v44, %v446_v18 }
 0x12d   : > { %v2278_v14 = vmul.f32 %v5489_v60, %v2263_v61  ;;  %v2057_v26 = vadd.f32 %v2056_v5, %v2043_v62 }
 0x12f   : > { %v2280_v63 = vsub.f32 %v2029_v45, %v2278_v14  ;;  %v2282_v19 = vsub.f32 %v2031_v46, %v2278_v14 }
 0x131   : > { %v2284_v20 = vmul.f32 %v2280_v63, %v2280_v63  ;;  %v2286_v24 = vmul.f32 %v2282_v19, %v2282_v19 }
 0x132   : > { %v2070_v6 = vpop.f32.mrf.mxu2  ;;  %v2044_v11 = vpop.f32.mrf.mxu0 }
 0x133   : > { %v2288_v39 = vadd.f32 %v2286_v24, %v2284_v20  ;;  %v2084_v8 = vpop.f32.mrf.mxu3  ;;  %v2058_v16 = vpop.f32.mrf.mxu1  ;;  %v2045_v27 = vadd.f32 %v2044_v11, %v446_v18  ;;  %v2071_v30 = vadd.f32 %v2070_v6, %v2057_v26 }
 0x135   : > { %v2289_v34 = vrot.slane %v2288_v39, 4  ;;  %v2059_v33 = vadd.f32 %v2058_v16, %v2045_v27  ;;  %v2085_v42 = vadd.f32 %v2084_v8, %v2071_v30 }
 0x137   : > { %v2290_v0 = vadd.f32 %v2289_v34, %v2288_v39 }
 0x139   : > { %v2291_v1 = vrot.slane %v2290_v0, 2 }
 0x13a   : > { %v2072_v17 = vpop.f32.mrf.mxu2 }
 0x13b   : > { %v2292_v2 = vadd.f32 %v2291_v1, %v2290_v0  ;;  %v2086_v22 = vpop.f32.mrf.mxu3  ;;  %v2073_v45 = vadd.f32 %v2072_v17, %v2059_v33 }
 0x13d   : > { %v2293_v31 = vrot.slane %v2292_v2, 1  ;;  %v2087_v48 = vadd.f32 %v2086_v22, %v2073_v45 }
 0x13f   : > { %v2294_v3 = vadd.f32 %v2293_v31, %v2292_v2 }
 0x141   : > { %v2302_v4 = vmul.f32 %v2294_v3, %v5489_v60 }
 0x143   : > { %v2304_v43 = vadd.f32 1e-05, %v2302_v4 }
 0x145   : > { %3785 = vrsqrt.f32 %v2304_v43  ;;  %vm2312_vm2 = vweird.f32 %v2304_v43 }
 0x14a   : > { %v2098_v23 = vpop.f32.mrf.mxu0 }
 0x14b   : > { %v3786_v35 = vpop.eup %3785  ;;  %v2112_v25 = vpop.f32.mrf.mxu1  ;;  %v2099_v41 = vadd.f32 %v2098_v23, %v2085_v42 }
 0x14c   : > { %v2307_v36 = vmul.f32 %v3786_v35, %v2304_v43  ;;  %vm2313_vm1 = vweird.f32 %v3786_v35 }
 0x14d   : > { %vm2314_vm3 = vmor %vm2312_vm2, %vm2313_vm1  ;;  %v2113_v50 = vadd.f32 %v2112_v25, %v2099_v41 }
 0x14e   : > { %v2308_v40 = vmul.f32 %v3786_v35, %v2307_v36 }
 0x150   : > { %v2309_v47 = vmul.f32 0.5, %v2308_v40 }
 0x152   : > { %v2310_v7 = vsub.f32 1.5, %v2309_v47  ;;  %v2126_v28 = vpop.f32.mrf.mxu2  ;;  %v2100_v21 = vpop.f32.mrf.mxu0 }
 0x153   : > { %v2140_v29 = vpop.f32.mrf.mxu3  ;;  %v2114_v37 = vpop.f32.mrf.mxu1  ;;  %v2101_v46 = vadd.f32 %v2100_v21, %v2087_v48  ;;  %v2127_v52 = vadd.f32 %v2126_v28, %v2113_v50 }
 0x154   : > { %v2311_v9 = vmul.f32 %v3786_v35, %v2310_v7 }
 0x155   : > { %v2115_v53 = vadd.f32 %v2114_v37, %v2101_v46  ;;  %v2141_v57 = vadd.f32 %v2140_v29, %v2127_v52 }
 0x156   : > { %v2315_v12 = vsel %vm2314_vm3, %v3786_v35, %v2311_v9 }
 0x157   : > { %v5493_v13 = vmul.f32 %v2315_v12, %v2280_v63  ;;  %v5495_v15 = vmul.f32 %v2315_v12, %v2282_v19 }
 0x159   : > { %vm2330_vm7 = vcmp.ge.f32.partialorder %v5493_v13, 0.0  ;;  %vm2332_vm8 = vcmp.ge.f32.partialorder %v5495_v15, 0.0 }
 0x15a   : > { %v2128_v32 = vpop.f32.mrf.mxu2 }
 0x15b   : > { %v2142_v49 = vpop.f32.mrf.mxu3  ;;  %v2129_v55 = vadd.f32 %v2128_v32, %v2115_v53  ;;  %v2334_v53 = vmul.f32 0.2, %v5493_v13 }
 0x15d   : > { %v2143_v59 = vadd.f32 %v2142_v49, %v2129_v55 }
 0x16a   : > { %v2154_v38 = vpop.f32.mrf.mxu0 }
 0x16b   : > { %v2168_v10 = vpop.f32.mrf.mxu1  ;;  %v2155_v61 = vadd.f32 %v2154_v38, %v2141_v57 }
 0x16d   : > { %v2169_v19 = vadd.f32 %v2168_v10, %v2155_v61 }
 0x172   : > { %v2182_v51 = vpop.f32.mrf.mxu2  ;;  %v2156_v56 = vpop.f32.mrf.mxu0 }
 0x173   : > { %v2196_v54 = vpop.f32.mrf.mxu3  ;;  %v2170_v58 = vpop.f32.mrf.mxu1  ;;  %v2157_v14 = vadd.f32 %v2156_v56, %v2143_v59  ;;  %v2183_v39 = vadd.f32 %v2182_v51, %v2169_v19 }
 0x175   : > { %v2171_v34 = vadd.f32 %v2170_v58, %v2157_v14  ;;  %v2197_v2 = vadd.f32 %v2196_v54, %v2183_v39  ;;  %v2336_v54 = vmul.f32 0.2, %v5495_v15  ;;  %v2338_v58 = vsel %vm2330_vm7, %v5493_v13, %v2334_v53 }
 0x177   : > { %v2340_v59 = vsel %vm2332_vm8, %v5495_v15, %v2336_v54 }
 0x17a   : > { %v2184_v63 = vpop.f32.mrf.mxu2 }
 0x17b   : > { %v2198_v20 = vpop.f32.mrf.mxu3  ;;  %v2185_v1 = vadd.f32 %v2184_v63, %v2171_v34 }
 0x17d   : > { %v2199_v3 = vadd.f32 %v2198_v20, %v2185_v1 }
 0x18a   : > { %v2210_v24 = vpop.f32.mrf.mxu0 }
 0x18b   : > { %v2224_v0 = vpop.f32.mrf.mxu1  ;;  %v2211_v4 = vadd.f32 %v2210_v24, %v2197_v2 }
 0x18d   : > { %v2225_v36 = vadd.f32 %v2224_v0, %v2211_v4 }
 0x192   : > { %v2238_v31 = vpop.f32.mrf.mxu2  ;;  %v2212_v44 = vpop.f32.mrf.mxu0 }
 0x193   : > { %v2252_v43 = vpop.f32.mrf.mxu3  ;;  %v2213_v35 = vadd.f32 %v2212_v44, %v2199_v3  ;;  %v2226_v5 = vpop.f32.mrf.mxu1  ;;  %v2239_v40 = vadd.f32 %v2238_v31, %v2225_v36 }
 0x195   : > { %v2227_v47 = vadd.f32 %v2226_v5, %v2213_v35  ;;  %v2253_v9 = vadd.f32 %v2252_v43, %v2239_v40 }
 0x19a   : > { %v2240_v6 = vpop.f32.mrf.mxu2 }
 0x19b   : > { %v2241_v7 = vadd.f32 %v2240_v6, %v2227_v47  ;;  %v2254_v8 = vpop.f32.mrf.mxu3 }
 0x19d   : > { %v2255_v11 = vadd.f32 %v2254_v8, %v2241_v7 }
 0x19f   : > { %v2264_v12 = vadd.f32 %v2255_v11, %v2253_v9 }
 0x1a1   : > { %v2265_v16 = vrot.slane %v2264_v12, 4 }
 0x1a3   : > { %v2266_v17 = vadd.f32 %v2265_v16, %v2264_v12 }
 0x1a5   : > { %v2267_v18 = vrot.slane %v2266_v17, 2 }
 0x1a7   : > { %v2268_v22 = vadd.f32 %v2267_v18, %v2266_v17 }
 0x1a9   : > { %v2269_v23 = vrot.slane %v2268_v22, 1 }
 0x1ab   : > { %v2270_v62 = vadd.f32 %v2269_v23, %v2268_v22 }
 0x1ad   : > { %v2279_v25 = vmul.f32 %v5489_v60, %v2270_v62 }
 0x1af   : > { %v2281_v26 = vsub.f32 %v2253_v9, %v2279_v25  ;;  %v2283_v27 = vsub.f32 %v2255_v11, %v2279_v25 }
 0x1b1   : > { %v2285_v28 = vmul.f32 %v2281_v26, %v2281_v26  ;;  %v2287_v29 = vmul.f32 %v2283_v27, %v2283_v27 }
 0x1b3   : > { %v2295_v30 = vadd.f32 %v2287_v29, %v2285_v28 }
 0x1b5   : > { %v2296_v33 = vrot.slane %v2295_v30, 4 }
 0x1b7   : > { %v2297_v21 = vadd.f32 %v2296_v33, %v2295_v30 }
 0x1b9   : > { %v2298_v37 = vrot.slane %v2297_v21, 2 }
 0x1bb   : > { %v2299_v42 = vadd.f32 %v2298_v37, %v2297_v21 }
 0x1bd   : > { %v2300_v45 = vrot.slane %v2299_v42, 1 }
 0x1bf   : > { %v2301_v32 = vadd.f32 %v2300_v45, %v2299_v42 }
 0x1c1   : > { %v2303_v48 = vmul.f32 %v2301_v32, %v5489_v60 }
 0x1c3   : > { %v2305_v41 = vadd.f32 1e-05, %v2303_v48 }
 0x1c5   : > { %3787 = vrsqrt.f32 %v2305_v41  ;;  %vm2322_vm5 = vweird.f32 %v2305_v41 }
 0x1cb   : > { %v3788_v49 = vpop.eup %3787 }
 0x1cc   : > { %v2317_v38 = vmul.f32 %v3788_v49, %v2305_v41  ;;  %vm2323_vm4 = vweird.f32 %v3788_v49 }
 0x1cd   : > { %vm2324_vm6 = vmor %vm2322_vm5, %vm2323_vm4 }
 0x1ce   : > { %v2318_v10 = vmul.f32 %v3788_v49, %v2317_v38 }
 0x1d0   : > { %v2319_v50 = vmul.f32 0.5, %v2318_v10 }
 0x1d2   : > { %v2320_v46 = vsub.f32 1.5, %v2319_v50 }
 0x1d4   : > { %v2321_v51 = vmul.f32 %v3788_v49, %v2320_v46 }
 0x1d6   : > { %v2325_v52 = vsel %vm2324_vm6, %v3788_v49, %v2321_v51 }
 0x1d7   : > { %v2327_v55 = vmul.f32 %v2325_v52, %v2281_v26  ;;  %v2329_v56 = vmul.f32 %v2325_v52, %v2283_v27 }
 0x1d9   : > { %vm2331_vm9 = vcmp.ge.f32.partialorder %v2327_v55, 0.0  ;;  %vm2333_vm10 = vcmp.ge.f32.partialorder %v2329_v56, 0.0  ;;  %v2335_v60 = vmul.f32 0.2, %v2327_v55  ;;  %v2337_v57 = vmul.f32 0.2, %v2329_v56 }
 0x1db   : > { %v2339_v61 = vsel %vm2331_vm9, %v2327_v55, %v2335_v60  ;;  %v2341_v14 = vsel %vm2333_vm10, %v2329_v56, %v2337_v57 }
 0x1dc   : > { %v2342_v63 = vpack.c.bf16 %v2339_v61, %v2338_v58  ;;  %v2343_v19 = vpack.c.bf16 %v2341_v14, %v2340_v59 }
 0x1de   : > { %2344 = vst [vmem:[%s170_s9] sm:$0xff] %v2342_v63 }
 0x1df   : > { %2345 = vst [vmem:[%s170_s9 + $0x8] sm:$0xff] %v2343_v19 }
 0x1e0 PF: > { %s13_s12 = sadd.s32 1, %s3795_s12  }
 0x1e1   : > { %p10_p4 = scmp.ge.s32.totalorder %s13_s12, 4  }
 0x1e3   :  { %12 = sbr.rel (!%p10_p4) target bundleno = 1 (0x1), region = 62 }

// kernel: discriminator_forward.7
= control target key start
LH: loop header
LB: loop body
LE: loop exit
PB: predicated region body
PF: predicated region fallthrough
CT: control target
= control target key end

     0   :  { %s13941_s15 = smov 0   ;;  %s20838_s0 = inlined_call_operand.vmem [shape: bf16[2,16,4096], index: 0, kind: input, shape index: {}]   ;;  %s20839_s1 = inlined_call_operand.vmem [shape: bf16[4096,512], index: 1, kind: input, shape index: {}]   ;;  %s20840_s2 = inlined_call_operand.vmem [shape: f32[1,512], index: 2, kind: input, shape index: {}]   ;;  %s20841_s3 = inlined_call_operand.vmem [shape: f32[16,512], index: 3, kind: input, shape index: {}]   ;;  %s20842_s4 = inlined_call_operand.vmem [shape: f32[2,1,1], index: 4, kind: output, shape index: {}]  }
   0x1 LB: > { %s8596_s16 = sadd.s32 4294967295, %s13913_s15   ;;  %p8600_p0 = scmp.ge.s32.totalorder %s13913_s15, 1  ;;  %s13913_s15 = sphi %s13941_s15, %s14_s15  }
   0x2   : > { %p162_p1 = scmp.lt.s32.totalorder %s13913_s15, 3 }
   0x4   : > { %p163_p2 = pnand %p8600_p0, %p162_p1 }
   0x6   : > { %166 = sbr.rel (%p163_p2) target bundleno = 1405 (0x57d), region = 36 }
   0xb   : > { %v8845_v0 = vld [vmem:[%s20839_s1 + $0xe0] sm:$0xf]  ;;  %v12893_v1 = vld [vmem:[%s20839_s1 + $0xec] sm:$0xf0]  ;;  %p186_p3 = scmp.lt.s32.totalorder %s8596_s16, 1 }
   0xc   : > { %v8973_v2 = vld [vmem:[%s20839_s1 + $0x1e0] sm:$0xf]  ;;  %v8846_v3 = vor.u32 %v12893_v1, %v8845_v0  ;;  %v12925_v4 = vld [vmem:[%s20839_s1 + $0x1ec] sm:$0xf0] }
   0xd   : > { %v9101_v5 = vld [vmem:[%s20839_s1 + $0x2e0] sm:$0xf]  ;;  %v12957_v6 = vld [vmem:[%s20839_s1 + $0x2ec] sm:$0xf0]  ;;  %v8974_v7 = vor.u32 %v12925_v4, %v8973_v2  ;;  %s20971_s16 = smov (!%p186_p3, %s8596_s16), 1 }
   0xe   : > { %v9102_v8 = vor.u32 %v12957_v6, %v9101_v5  ;;  %v9229_v9 = vld [vmem:[%s20839_s1 + $0x3e0] sm:$0xf]  ;;  %v12989_v10 = vld [vmem:[%s20839_s1 + $0x3ec] sm:$0xf0]  ;;  %6540 = vmatpush.bf16.msra.mxu0 %v8846_v3  ;;  %s12830_s29 = sshll.u32 %s20971_s16, 8  ;;  %s193_s27 = scalar_lea.vmem %s20842_s4, %s20971_s16 }
   0xf   : > { %v8829_v11 = vld [vmem:[%s20839_s1 + $0xc0] sm:$0xf]  ;;  %v9230_v12 = vor.u32 %v12989_v10, %v9229_v9  ;;  %v12889_v13 = vld [vmem:[%s20839_s1 + $0xcc] sm:$0xf0]  ;;  %6554 = vmatpush.bf16.msra.mxu1 %v8974_v7  ;;  %s14241_s14 = scalar_lea.vmem %s20838_s0, %s12830_s29 }
  0x10   : > { %v8957_v14 = vld [vmem:[%s20839_s1 + $0x1c0] sm:$0xf]  ;;  %v12921_v15 = vld [vmem:[%s20839_s1 + $0x1cc] sm:$0xf0]  ;;  %6568 = vmatpush.bf16.msra.mxu2 %v9102_v8  ;;  %v8830_v16 = vor.u32 %v12889_v13, %v8829_v11 }
  0x11   : > { %v8958_v17 = vor.u32 %v12921_v15, %v8957_v14  ;;  %v9085_v18 = vld [vmem:[%s20839_s1 + $0x2c0] sm:$0xf]  ;;  %v12953_v19 = vld [vmem:[%s20839_s1 + $0x2cc] sm:$0xf0]  ;;  %6582 = vmatpush.bf16.msra.mxu3 %v9230_v12 }
  0x12   : > { %v9213_v20 = vld [vmem:[%s20839_s1 + $0x3c0] sm:$0xf]  ;;  %v9086_v21 = vor.u32 %v12953_v19, %v9085_v18  ;;  %v12985_v22 = vld [vmem:[%s20839_s1 + $0x3cc] sm:$0xf0]  ;;  %6541 = vmatpush.bf16.msra.mxu0 %v8830_v16 }
  0x13   : > { %v8813_v23 = vld [vmem:[%s20839_s1 + $0xa0] sm:$0xf]  ;;  %v12885_v24 = vld [vmem:[%s20839_s1 + $0xac] sm:$0xf0]  ;;  %v9214_v25 = vor.u32 %v12985_v22, %v9213_v20  ;;  %6555 = vmatpush.bf16.msra.mxu1 %v8958_v17 }
  0x14   : > { %v8941_v26 = vld [vmem:[%s20839_s1 + $0x1a0] sm:$0xf]  ;;  %v12917_v27 = vld [vmem:[%s20839_s1 + $0x1ac] sm:$0xf0]  ;;  %v8814_v29 = vor.u32 %v12885_v24, %v8813_v23  ;;  %6569 = vmatpush.bf16.msra.mxu2 %v9086_v21 }
  0x15   : > { %v9069_v28 = vld [vmem:[%s20839_s1 + $0x2a0] sm:$0xf]  ;;  %v12949_v30 = vld [vmem:[%s20839_s1 + $0x2ac] sm:$0xf0]  ;;  %v8942_v33 = vor.u32 %v12917_v27, %v8941_v26  ;;  %6583 = vmatpush.bf16.msra.mxu3 %v9214_v25 }
  0x16   : > { %v9197_v31 = vld [vmem:[%s20839_s1 + $0x3a0] sm:$0xf]  ;;  %v12981_v32 = vld [vmem:[%s20839_s1 + $0x3ac] sm:$0xf0]  ;;  %v9070_v34 = vor.u32 %v12949_v30, %v9069_v28  ;;  %6542 = vmatpush.bf16.msra.mxu0 %v8814_v29 }
  0x17   : > { %v8797_v35 = vld [vmem:[%s20839_s1 + $0x80] sm:$0xf]  ;;  %v12881_v36 = vld [vmem:[%s20839_s1 + $0x8c] sm:$0xf0]  ;;  %v9198_v38 = vor.u32 %v12981_v32, %v9197_v31  ;;  %6556 = vmatpush.bf16.msra.mxu1 %v8942_v33 }
  0x18   : > { %v8925_v37 = vld [vmem:[%s20839_s1 + $0x180] sm:$0xf]  ;;  %v12913_v39 = vld [vmem:[%s20839_s1 + $0x18c] sm:$0xf0]  ;;  %v8798_v44 = vor.u32 %v12881_v36, %v8797_v35  ;;  %6570 = vmatpush.bf16.msra.mxu2 %v9070_v34 }
  0x19   : > { %v9053_v40 = vld [vmem:[%s20839_s1 + $0x280] sm:$0xf]  ;;  %v12945_v41 = vld [vmem:[%s20839_s1 + $0x28c] sm:$0xf0]  ;;  %v8926_v45 = vor.u32 %v12913_v39, %v8925_v37  ;;  %6584 = vmatpush.bf16.msra.mxu3 %v9198_v38 }
  0x1a   : > { %v9181_v42 = vld [vmem:[%s20839_s1 + $0x380] sm:$0xf]  ;;  %v12977_v43 = vld [vmem:[%s20839_s1 + $0x38c] sm:$0xf0]  ;;  %v9054_v46 = vor.u32 %v12945_v41, %v9053_v40  ;;  %6543 = vmatpush.bf16.msra.mxu0 %v8798_v44 }
  0x1b   : > { %v8781_v47 = vld [vmem:[%s20839_s1 + $0x60] sm:$0xf]  ;;  %v12877_v48 = vld [vmem:[%s20839_s1 + $0x6c] sm:$0xf0]  ;;  %v9182_v50 = vor.u32 %v12977_v43, %v9181_v42  ;;  %6557 = vmatpush.bf16.msra.mxu1 %v8926_v45 }
  0x1c   : > { %v8909_v49 = vld [vmem:[%s20839_s1 + $0x160] sm:$0xf]  ;;  %v12909_v51 = vld [vmem:[%s20839_s1 + $0x16c] sm:$0xf0]  ;;  %v8782_v56 = vor.u32 %v12877_v48, %v8781_v47  ;;  %6571 = vmatpush.bf16.msra.mxu2 %v9054_v46 }
  0x1d   : > { %v9037_v52 = vld [vmem:[%s20839_s1 + $0x260] sm:$0xf]  ;;  %v12941_v53 = vld [vmem:[%s20839_s1 + $0x26c] sm:$0xf0]  ;;  %v8910_v57 = vor.u32 %v12909_v51, %v8909_v49  ;;  %6585 = vmatpush.bf16.msra.mxu3 %v9182_v50 }
  0x1e   : > { %v9165_v54 = vld [vmem:[%s20839_s1 + $0x360] sm:$0xf]  ;;  %v12973_v55 = vld [vmem:[%s20839_s1 + $0x36c] sm:$0xf0]  ;;  %v9038_v58 = vor.u32 %v12941_v53, %v9037_v52  ;;  %6544 = vmatpush.bf16.msra.mxu0 %v8782_v56 }
  0x1f   : > { %v8765_v59 = vld [vmem:[%s20839_s1 + $0x40] sm:$0xf]  ;;  %v12873_v60 = vld [vmem:[%s20839_s1 + $0x4c] sm:$0xf0]  ;;  %v9166_v62 = vor.u32 %v12973_v55, %v9165_v54  ;;  %6558 = vmatpush.bf16.msra.mxu1 %v8910_v57 }
  0x20   : > { %v8893_v61 = vld [vmem:[%s20839_s1 + $0x140] sm:$0xf]  ;;  %v12905_v63 = vld [vmem:[%s20839_s1 + $0x14c] sm:$0xf0]  ;;  %v8766_v4 = vor.u32 %v12873_v60, %v8765_v59  ;;  %6572 = vmatpush.bf16.msra.mxu2 %v9038_v58 }
  0x21   : > { %v9021_v0 = vld [vmem:[%s20839_s1 + $0x240] sm:$0xf]  ;;  %v12937_v1 = vld [vmem:[%s20839_s1 + $0x24c] sm:$0xf0]  ;;  %v8894_v5 = vor.u32 %v12905_v63, %v8893_v61  ;;  %6586 = vmatpush.bf16.msra.mxu3 %v9166_v62 }
  0x22   : > { %v9149_v2 = vld [vmem:[%s20839_s1 + $0x340] sm:$0xf]  ;;  %v12969_v3 = vld [vmem:[%s20839_s1 + $0x34c] sm:$0xf0]  ;;  %v9022_v6 = vor.u32 %v12937_v1, %v9021_v0  ;;  %6545 = vmatpush.bf16.msra.mxu0 %v8766_v4 }
  0x23   : > { %v8749_v7 = vld [vmem:[%s20839_s1 + $0x20] sm:$0xf]  ;;  %v12869_v8 = vld [vmem:[%s20839_s1 + $0x2c] sm:$0xf0]  ;;  %v9150_v10 = vor.u32 %v12969_v3, %v9149_v2  ;;  %6559 = vmatpush.bf16.msra.mxu1 %v8894_v5 }
  0x24   : > { %v8877_v9 = vld [vmem:[%s20839_s1 + $0x120] sm:$0xf]  ;;  %v12901_v11 = vld [vmem:[%s20839_s1 + $0x12c] sm:$0xf0]  ;;  %v8750_v16 = vor.u32 %v12869_v8, %v8749_v7  ;;  %6573 = vmatpush.bf16.msra.mxu2 %v9022_v6 }
  0x25   : > { %v9005_v12 = vld [vmem:[%s20839_s1 + $0x220] sm:$0xf]  ;;  %v12933_v13 = vld [vmem:[%s20839_s1 + $0x22c] sm:$0xf0]  ;;  %v8878_v19 = vor.u32 %v12901_v11, %v8877_v9  ;;  %6587 = vmatpush.bf16.msra.mxu3 %v9150_v10 }
  0x26   : > { %v9133_v14 = vld [vmem:[%s20839_s1 + $0x320] sm:$0xf]  ;;  %v12965_v15 = vld [vmem:[%s20839_s1 + $0x32c] sm:$0xf0]  ;;  %v9006_v20 = vor.u32 %v12933_v13, %v9005_v12  ;;  %6546 = vmatpush.bf16.msra.mxu0 %v8750_v16  ;;  %v8613_v12 = vld [vmem:[%s14241_s14 + $0x8] sm:$0xf] }
  0x27   : > { %v8733_v17 = vld [vmem:[%s20839_s1] sm:$0xf]  ;;  %v12865_v18 = vld [vmem:[%s20839_s1 + $0xc] sm:$0xf0]  ;;  %v9134_v24 = vor.u32 %v12965_v15, %v9133_v14  ;;  %6560 = vmatpush.bf16.msra.mxu1 %v8878_v19  ;;  %v12848_v15 = vld [vmem:[%s14241_s14 + $0x84] sm:$0xf0] }
  0x28   : > { %v8861_v21 = vld [vmem:[%s20839_s1 + $0x100] sm:$0xf]  ;;  %v12897_v22 = vld [vmem:[%s20839_s1 + $0x10c] sm:$0xf0]  ;;  %v8734_v31 = vor.u32 %v12865_v18, %v8733_v17  ;;  %6574 = vmatpush.bf16.msra.mxu2 %v9006_v20  ;;  %v12831_v16 = vld [vmem:[%s14241_s14 + $0x4] sm:$0xf]  ;;  %v14257_v19 = vor.u32 %v12848_v15, %v8613_v12 }
  0x29   : > { %v8989_v23 = vld [vmem:[%s20839_s1 + $0x200] sm:$0xf]  ;;  %v12929_v25 = vld [vmem:[%s20839_s1 + $0x20c] sm:$0xf0]  ;;  %v8862_v35 = vor.u32 %v12897_v22, %v8861_v21  ;;  %6588 = vmatpush.bf16.msra.mxu3 %v9134_v24  ;;  %v8607_v17 = vld [vmem:[%s14241_s14 + $0x80] sm:$0xf0] }
  0x2a   : > { %v9117_v26 = vld [vmem:[%s20839_s1 + $0x300] sm:$0xf]  ;;  %v12961_v27 = vld [vmem:[%s20839_s1 + $0x30c] sm:$0xf0]  ;;  %v8990_v36 = vor.u32 %v12929_v25, %v8989_v23  ;;  %6547 = vmatpush.bf16.msra.mxu0 %v8734_v31  ;;  %20895 = vst [vmem:[#allocation2_spill] sm:$0xff] %v14257_v19  ;;  %v14259_v20 = vor.u32 %v12831_v16, %v8607_v17 }
  0x2b   : > { %v9357_v28 = vld [vmem:[%s20839_s1 + $0x4e0] sm:$0xf]  ;;  %v13021_v29 = vld [vmem:[%s20839_s1 + $0x4ec] sm:$0xf0]  ;;  %v9118_v39 = vor.u32 %v12961_v27, %v9117_v26  ;;  %6561 = vmatpush.bf16.msra.mxu1 %v8862_v35  ;;  %v12832_v21 = vld [vmem:[%s14241_s14 + $0xc] sm:$0xf] }
  0x2c   : > { %v9485_v30 = vld [vmem:[%s20839_s1 + $0x5e0] sm:$0xf]  ;;  %v13053_v32 = vld [vmem:[%s20839_s1 + $0x5ec] sm:$0xf0]  ;;  %v9358_v40 = vor.u32 %v13021_v29, %v9357_v28  ;;  %6575 = vmatpush.bf16.msra.mxu2 %v8990_v36  ;;  %20896 = vst [vmem:[#allocation3_spill] sm:$0xff] %v14259_v20 }
  0x2d   : > { %v9613_v33 = vld [vmem:[%s20839_s1 + $0x6e0] sm:$0xf]  ;;  %v13085_v34 = vld [vmem:[%s20839_s1 + $0x6ec] sm:$0xf0]  ;;  %v9486_v41 = vor.u32 %v13053_v32, %v9485_v30  ;;  %6589 = vmatpush.bf16.msra.mxu3 %v9118_v39  ;;  %v8615_v22 = vld [vmem:[%s14241_s14 + $0x88] sm:$0xf0] }
  0x2e   : > { %v9741_v37 = vld [vmem:[%s20839_s1 + $0x7e0] sm:$0xf]  ;;  %v13117_v38 = vld [vmem:[%s20839_s1 + $0x7ec] sm:$0xf0]  ;;  %v9614_v42 = vor.u32 %v13085_v34, %v9613_v33  ;;  %6596 = vmatpush.bf16.msrb.mxu0 %v9358_v40  ;;  %v14263_v24 = vor.u32 %v12832_v21, %v8615_v22  ;;  %6562 = vmatmul.bf16.vlgmr.msra.gmra.mxu1 %v14259_v20 }
  0x2f   : > { %v9341_v43 = vld [vmem:[%s20839_s1 + $0x4c0] sm:$0xf]  ;;  %v13017_v44 = vld [vmem:[%s20839_s1 + $0x4cc] sm:$0xf0]  ;;  %v9742_v46 = vor.u32 %v13117_v38, %v9741_v37  ;;  %6610 = vmatpush.bf16.msrb.mxu1 %v9486_v41  ;;  %6576 = vmatmul.bf16.vlgmr.msra.gmra.mxu2 %v14257_v19 }
  0x30   : > { %v9469_v45 = vld [vmem:[%s20839_s1 + $0x5c0] sm:$0xf]  ;;  %v13049_v47 = vld [vmem:[%s20839_s1 + $0x5cc] sm:$0xf0]  ;;  %v9342_v52 = vor.u32 %v13017_v44, %v9341_v43  ;;  %6624 = vmatpush.bf16.msrb.mxu2 %v9614_v42  ;;  %20897 = vst [vmem:[#allocation4_spill] sm:$0xff] %v14263_v24  ;;  %6590 = vmatmul.bf16.vlgmr.msra.gmra.mxu3 %v14263_v24 }
  0x31   : > { %v9597_v48 = vld [vmem:[%s20839_s1 + $0x6c0] sm:$0xf]  ;;  %v13081_v49 = vld [vmem:[%s20839_s1 + $0x6cc] sm:$0xf0]  ;;  %v9470_v56 = vor.u32 %v13049_v47, %v9469_v45  ;;  %6638 = vmatpush.bf16.msrb.mxu3 %v9742_v46 }
  0x32   : > { %v9725_v50 = vld [vmem:[%s20839_s1 + $0x7c0] sm:$0xf]  ;;  %v13113_v51 = vld [vmem:[%s20839_s1 + $0x7cc] sm:$0xf0]  ;;  %v9598_v57 = vor.u32 %v13081_v49, %v9597_v48  ;;  %6597 = vmatpush.bf16.msrb.mxu0 %v9342_v52 }
  0x33   : > { %v9325_v53 = vld [vmem:[%s20839_s1 + $0x4a0] sm:$0xf]  ;;  %v13013_v54 = vld [vmem:[%s20839_s1 + $0x4ac] sm:$0xf0]  ;;  %v9726_v60 = vor.u32 %v13113_v51, %v9725_v50  ;;  %6611 = vmatpush.bf16.msrb.mxu1 %v9470_v56 }
  0x34   : > { %v9453_v55 = vld [vmem:[%s20839_s1 + $0x5a0] sm:$0xf]  ;;  %v13045_v58 = vld [vmem:[%s20839_s1 + $0x5ac] sm:$0xf0]  ;;  %v9326_v2 = vor.u32 %v13013_v54, %v9325_v53  ;;  %6625 = vmatpush.bf16.msrb.mxu2 %v9598_v57 }
  0x35   : > { %v9581_v59 = vld [vmem:[%s20839_s1 + $0x6a0] sm:$0xf]  ;;  %v13077_v61 = vld [vmem:[%s20839_s1 + $0x6ac] sm:$0xf0]  ;;  %v9454_v7 = vor.u32 %v13045_v58, %v9453_v55  ;;  %6639 = vmatpush.bf16.msrb.mxu3 %v9726_v60 }
  0x36   : > { %v9709_v62 = vld [vmem:[%s20839_s1 + $0x7a0] sm:$0xf]  ;;  %v13109_v63 = vld [vmem:[%s20839_s1 + $0x7ac] sm:$0xf0]  ;;  %v9582_v8 = vor.u32 %v13077_v61, %v9581_v59  ;;  %6598 = vmatpush.bf16.msrb.mxu0 %v9326_v2 }
  0x37   : > { %v9309_v0 = vld [vmem:[%s20839_s1 + $0x480] sm:$0xf]  ;;  %v13009_v1 = vld [vmem:[%s20839_s1 + $0x48c] sm:$0xf0]  ;;  %v9710_v13 = vor.u32 %v13109_v63, %v9709_v62  ;;  %6612 = vmatpush.bf16.msrb.mxu1 %v9454_v7 }
  0x38   : > { %v9437_v3 = vld [vmem:[%s20839_s1 + $0x580] sm:$0xf]  ;;  %v13041_v4 = vld [vmem:[%s20839_s1 + $0x58c] sm:$0xf0]  ;;  %v9310_v23 = vor.u32 %v13009_v1, %v9309_v0  ;;  %6626 = vmatpush.bf16.msrb.mxu2 %v9582_v8 }
  0x39   : > { %v9565_v5 = vld [vmem:[%s20839_s1 + $0x680] sm:$0xf]  ;;  %v13073_v6 = vld [vmem:[%s20839_s1 + $0x68c] sm:$0xf0]  ;;  %v9438_v25 = vor.u32 %v13041_v4, %v9437_v3  ;;  %6640 = vmatpush.bf16.msrb.mxu3 %v9710_v13 }
  0x3a   : > { %v9693_v9 = vld [vmem:[%s20839_s1 + $0x780] sm:$0xf]  ;;  %v13105_v18 = vld [vmem:[%s20839_s1 + $0x78c] sm:$0xf0]  ;;  %v9566_v26 = vor.u32 %v13073_v6, %v9565_v5  ;;  %6599 = vmatpush.bf16.msrb.mxu0 %v9310_v23 }
  0x3b   : > { %v8605_v10 = vld [vmem:[%s14241_s14] sm:$0xf]  ;;  %v13005_v28 = vld [vmem:[%s20839_s1 + $0x46c] sm:$0xf0]  ;;  %v9694_v30 = vor.u32 %v13105_v18, %v9693_v9  ;;  %6613 = vmatpush.bf16.msrb.mxu1 %v9438_v25  ;;  %v8629_v25 = vld [vmem:[%s14241_s14 + $0x18] sm:$0xf] }
  0x3c   : > { %v12847_v11 = vld [vmem:[%s14241_s14 + $0x7c] sm:$0xf0]  ;;  %v13037_v31 = vld [vmem:[%s20839_s1 + $0x56c] sm:$0xf0]  ;;  %6627 = vmatpush.bf16.msrb.mxu2 %v9566_v26  ;;  %v12850_v26 = vld [vmem:[%s14241_s14 + $0x94] sm:$0xf0] }
  0x3d   : > { %v14249_v14 = vor.u32 %v12847_v11, %v8605_v10  ;;  %v9293_v27 = vld [vmem:[%s20839_s1 + $0x460] sm:$0xf]  ;;  %v13069_v33 = vld [vmem:[%s20839_s1 + $0x66c] sm:$0xf0]  ;;  %6641 = vmatpush.bf16.msrb.mxu3 %v9694_v30  ;;  %v8623_v30 = vld [vmem:[%s14241_s14 + $0x90] sm:$0xf0] }
  0x3e   : > { %v9421_v29 = vld [vmem:[%s20839_s1 + $0x560] sm:$0xf]  ;;  %v13101_v35 = vld [vmem:[%s20839_s1 + $0x76c] sm:$0xf0]  ;;  %v9294_v36 = vor.u32 %v13005_v28, %v9293_v27  ;;  %v12833_v27 = vld [vmem:[%s14241_s14 + $0x14] sm:$0xf] }
  0x3f   : > { %6548 = vmatmul.bf16.vlgmr.msra.gmra.mxu0 %v14249_v14  ;;  %v9549_v32 = vld [vmem:[%s20839_s1 + $0x660] sm:$0xf]  ;;  %v9422_v37 = vor.u32 %v13037_v31, %v9421_v29  ;;  %v13001_v40 = vld [vmem:[%s20839_s1 + $0x44c] sm:$0xf0]  ;;  %v12834_v31 = vld [vmem:[%s14241_s14 + $0x1c] sm:$0xf] }
  0x40   : > { %v9677_v34 = vld [vmem:[%s20839_s1 + $0x760] sm:$0xf]  ;;  %v9550_v38 = vor.u32 %v13069_v33, %v9549_v32  ;;  %v13033_v43 = vld [vmem:[%s20839_s1 + $0x54c] sm:$0xf0]  ;;  %6600 = vmatpush.bf16.msrb.mxu0 %v9294_v36  ;;  %v8631_v32 = vld [vmem:[%s14241_s14 + $0x98] sm:$0xf0] }
  0x41   : > { %v9277_v39 = vld [vmem:[%s20839_s1 + $0x440] sm:$0xf]  ;;  %v9678_v42 = vor.u32 %v13101_v35, %v9677_v34  ;;  %v13065_v45 = vld [vmem:[%s20839_s1 + $0x64c] sm:$0xf0]  ;;  %6614 = vmatpush.bf16.msrb.mxu1 %v9422_v37 }
  0x42   : > { %v9405_v41 = vld [vmem:[%s20839_s1 + $0x540] sm:$0xf]  ;;  %v13097_v47 = vld [vmem:[%s20839_s1 + $0x74c] sm:$0xf0]  ;;  %v9278_v48 = vor.u32 %v13001_v40, %v9277_v39  ;;  %6628 = vmatpush.bf16.msrb.mxu2 %v9550_v38 }
  0x43   : > { %v9533_v44 = vld [vmem:[%s20839_s1 + $0x640] sm:$0xf]  ;;  %v9406_v50 = vor.u32 %v13033_v43, %v9405_v41  ;;  %v12997_v52 = vld [vmem:[%s20839_s1 + $0x42c] sm:$0xf0]  ;;  %6642 = vmatpush.bf16.msrb.mxu3 %v9678_v42  ;;  %v14417_v43 = vor.u32 %v12850_v26, %v8629_v25 }
  0x44   : > { %v9661_v46 = vld [vmem:[%s20839_s1 + $0x740] sm:$0xf]  ;;  %v9534_v51 = vor.u32 %v13065_v45, %v9533_v44  ;;  %v13029_v54 = vld [vmem:[%s20839_s1 + $0x52c] sm:$0xf0]  ;;  %6601 = vmatpush.bf16.msrb.mxu0 %v9278_v48  ;;  %v14419_v44 = vor.u32 %v12833_v27, %v8623_v30 }
  0x45   : > { %v9261_v49 = vld [vmem:[%s20839_s1 + $0x420] sm:$0xf]  ;;  %v9662_v55 = vor.u32 %v13097_v47, %v9661_v46  ;;  %v13061_v57 = vld [vmem:[%s20839_s1 + $0x62c] sm:$0xf0]  ;;  %6615 = vmatpush.bf16.msrb.mxu1 %v9406_v50  ;;  %20899 = vst [vmem:[#allocation6_spill] sm:$0xff] %v14417_v43  ;;  %v14427_v47 = vor.u32 %v12834_v31, %v8631_v32 }
  0x46   : > { %v9389_v53 = vld [vmem:[%s20839_s1 + $0x520] sm:$0xf]  ;;  %v13093_v59 = vld [vmem:[%s20839_s1 + $0x72c] sm:$0xf0]  ;;  %v9262_v62 = vor.u32 %v12997_v52, %v9261_v49  ;;  %6629 = vmatpush.bf16.msrb.mxu2 %v9534_v51  ;;  %20900 = vst [vmem:[#allocation7_spill] sm:$0xff] %v14419_v44 }
  0x47   : > { %v9517_v56 = vld [vmem:[%s20839_s1 + $0x620] sm:$0xf]  ;;  %v12993_v61 = vld [vmem:[%s20839_s1 + $0x40c] sm:$0xf0]  ;;  %v9390_v3 = vor.u32 %v13029_v54, %v9389_v53  ;;  %6643 = vmatpush.bf16.msrb.mxu3 %v9662_v55  ;;  %20901 = vst [vmem:[#allocation8_spill] sm:$0xff] %v14427_v47 }
  0x48   : > { %v9645_v58 = vld [vmem:[%s20839_s1 + $0x720] sm:$0xf]  ;;  %v13025_v0 = vld [vmem:[%s20839_s1 + $0x50c] sm:$0xf0]  ;;  %v9518_v4 = vor.u32 %v13061_v57, %v9517_v56  ;;  %6602 = vmatpush.bf16.msrb.mxu0 %v9262_v62 }
  0x49   : > { %v9245_v60 = vld [vmem:[%s20839_s1 + $0x400] sm:$0xf]  ;;  %v13057_v2 = vld [vmem:[%s20839_s1 + $0x60c] sm:$0xf0]  ;;  %v9646_v8 = vor.u32 %v13093_v59, %v9645_v58  ;;  %6616 = vmatpush.bf16.msrb.mxu1 %v9390_v3 }
  0x4a   : > { %v9373_v63 = vld [vmem:[%s20839_s1 + $0x500] sm:$0xf]  ;;  %v13089_v6 = vld [vmem:[%s20839_s1 + $0x70c] sm:$0xf0]  ;;  %v9246_v16 = vor.u32 %v12993_v61, %v9245_v60  ;;  %6630 = vmatpush.bf16.msrb.mxu2 %v9518_v4 }
  0x4b   : > { %v9501_v1 = vld [vmem:[%s20839_s1 + $0x600] sm:$0xf]  ;;  %v13149_v9 = vld [vmem:[%s20839_s1 + $0x8ec] sm:$0xf0]  ;;  %v9374_v22 = vor.u32 %v13025_v0, %v9373_v63  ;;  %6644 = vmatpush.bf16.msrb.mxu3 %v9646_v8 }
  0x4c   : > { %v9629_v5 = vld [vmem:[%s20839_s1 + $0x700] sm:$0xf]  ;;  %v13181_v11 = vld [vmem:[%s20839_s1 + $0x9ec] sm:$0xf0]  ;;  %v9502_v23 = vor.u32 %v13057_v2, %v9501_v1  ;;  %6603 = vmatpush.bf16.msrb.mxu0 %v9246_v16 }
  0x4d   : > { %v9869_v7 = vld [vmem:[%s20839_s1 + $0x8e0] sm:$0xf]  ;;  %v13213_v13 = vld [vmem:[%s20839_s1 + $0xaec] sm:$0xf0]  ;;  %v9630_v28 = vor.u32 %v13089_v6, %v9629_v5  ;;  %6617 = vmatpush.bf16.msrb.mxu1 %v9374_v22 }
  0x4e   : > { %v9997_v10 = vld [vmem:[%s20839_s1 + $0x9e0] sm:$0xf]  ;;  %v13245_v17 = vld [vmem:[%s20839_s1 + $0xbec] sm:$0xf0]  ;;  %v9870_v29 = vor.u32 %v13149_v9, %v9869_v7  ;;  %6631 = vmatpush.bf16.msrb.mxu2 %v9502_v23 }
  0x4f   : > { %v10125_v12 = vld [vmem:[%s20839_s1 + $0xae0] sm:$0xf]  ;;  %v8621_v18 = vld [vmem:[%s14241_s14 + $0x10] sm:$0xf]  ;;  %v9998_v33 = vor.u32 %v13181_v11, %v9997_v10  ;;  %6645 = vmatpush.bf16.msrb.mxu3 %v9630_v28 }
  0x50   : > { %v10253_v15 = vld [vmem:[%s20839_s1 + $0xbe0] sm:$0xf]  ;;  %v12849_v21 = vld [vmem:[%s14241_s14 + $0x8c] sm:$0xf0]  ;;  %v10126_v34 = vor.u32 %v13213_v13, %v10125_v12  ;;  %6652 = vmatpush.bf16.msra.mxu0 %v9870_v29  ;;  %6618 = vmatmul.bf16.vlgmr.msrb.gmra.mxu1 %v14419_v44 }
  0x51   : > { %v9853_v35 = vld [vmem:[%s20839_s1 + $0x8c0] sm:$0xf]  ;;  %v13145_v36 = vld [vmem:[%s20839_s1 + $0x8cc] sm:$0xf0]  ;;  %v10254_v38 = vor.u32 %v13245_v17, %v10253_v15  ;;  %v14406_v39 = vor.u32 %v12849_v21, %v8621_v18  ;;  %6666 = vmatpush.bf16.msra.mxu1 %v9998_v33  ;;  %6632 = vmatmul.bf16.vlgmr.msrb.gmra.mxu2 %v14417_v43 }
  0x52   : > { %v9981_v37 = vld [vmem:[%s20839_s1 + $0x9c0] sm:$0xf]  ;;  %v13177_v40 = vld [vmem:[%s20839_s1 + $0x9cc] sm:$0xf0]  ;;  %v9854_v48 = vor.u32 %v13145_v36, %v9853_v35  ;;  %6680 = vmatpush.bf16.msra.mxu2 %v10126_v34  ;;  %6646 = vmatmul.bf16.vlgmr.msrb.gmra.mxu3 %v14427_v47 }
  0x53   : > { %20898 = vst [vmem:[#allocation5_spill] sm:$0xff] %v14406_v39  ;;  %v10109_v41 = vld [vmem:[%s20839_s1 + $0xac0] sm:$0xf]  ;;  %v13209_v42 = vld [vmem:[%s20839_s1 + $0xacc] sm:$0xf0]  ;;  %v9982_v49 = vor.u32 %v13177_v40, %v9981_v37  ;;  %6694 = vmatpush.bf16.msra.mxu3 %v10254_v38  ;;  %6604 = vmatmul.bf16.vlgmr.msrb.gmra.mxu0 %v14406_v39 }
  0x54   : > { %v10237_v45 = vld [vmem:[%s20839_s1 + $0xbc0] sm:$0xf]  ;;  %v13241_v46 = vld [vmem:[%s20839_s1 + $0xbcc] sm:$0xf0]  ;;  %v10110_v50 = vor.u32 %v13209_v42, %v10109_v41  ;;  %6653 = vmatpush.bf16.msra.mxu0 %v9854_v48 }
  0x55   : > { %v9837_v51 = vld [vmem:[%s20839_s1 + $0x8a0] sm:$0xf]  ;;  %v13141_v52 = vld [vmem:[%s20839_s1 + $0x8ac] sm:$0xf0]  ;;  %v10238_v54 = vor.u32 %v13241_v46, %v10237_v45  ;;  %6667 = vmatpush.bf16.msra.mxu1 %v9982_v49 }
  0x56   : > { %v9965_v53 = vld [vmem:[%s20839_s1 + $0x9a0] sm:$0xf]  ;;  %v13173_v55 = vld [vmem:[%s20839_s1 + $0x9ac] sm:$0xf0]  ;;  %v9838_v60 = vor.u32 %v13141_v52, %v9837_v51  ;;  %6681 = vmatpush.bf16.msra.mxu2 %v10110_v50 }
  0x57   : > { %v10093_v56 = vld [vmem:[%s20839_s1 + $0xaa0] sm:$0xf]  ;;  %v13205_v57 = vld [vmem:[%s20839_s1 + $0xaac] sm:$0xf0]  ;;  %v9966_v61 = vor.u32 %v13173_v55, %v9965_v53  ;;  %6695 = vmatpush.bf16.msra.mxu3 %v10238_v54 }
  0x58   : > { %v10221_v58 = vld [vmem:[%s20839_s1 + $0xba0] sm:$0xf]  ;;  %v13237_v59 = vld [vmem:[%s20839_s1 + $0xbac] sm:$0xf0]  ;;  %v10094_v62 = vor.u32 %v13205_v57, %v10093_v56  ;;  %6654 = vmatpush.bf16.msra.mxu0 %v9838_v60 }
  0x59   : > { %v9821_v63 = vld [vmem:[%s20839_s1 + $0x880] sm:$0xf]  ;;  %v13137_v0 = vld [vmem:[%s20839_s1 + $0x88c] sm:$0xf0]  ;;  %v10222_v2 = vor.u32 %v13237_v59, %v10221_v58  ;;  %6668 = vmatpush.bf16.msra.mxu1 %v9966_v61 }
  0x5a   : > { %v9949_v1 = vld [vmem:[%s20839_s1 + $0x980] sm:$0xf]  ;;  %v13169_v3 = vld [vmem:[%s20839_s1 + $0x98c] sm:$0xf0]  ;;  %v9822_v8 = vor.u32 %v13137_v0, %v9821_v63  ;;  %6682 = vmatpush.bf16.msra.mxu2 %v10094_v62 }
  0x5b   : > { %v10077_v4 = vld [vmem:[%s20839_s1 + $0xa80] sm:$0xf]  ;;  %v13201_v5 = vld [vmem:[%s20839_s1 + $0xa8c] sm:$0xf0]  ;;  %v9950_v9 = vor.u32 %v13169_v3, %v9949_v1  ;;  %6696 = vmatpush.bf16.msra.mxu3 %v10222_v2 }
  0x5c   : > { %v10205_v6 = vld [vmem:[%s20839_s1 + $0xb80] sm:$0xf]  ;;  %v13233_v7 = vld [vmem:[%s20839_s1 + $0xb8c] sm:$0xf0]  ;;  %v10078_v10 = vor.u32 %v13201_v5, %v10077_v4  ;;  %6655 = vmatpush.bf16.msra.mxu0 %v9822_v8 }
  0x5d   : > { %v9805_v11 = vld [vmem:[%s20839_s1 + $0x860] sm:$0xf]  ;;  %v13133_v12 = vld [vmem:[%s20839_s1 + $0x86c] sm:$0xf0]  ;;  %v10206_v15 = vor.u32 %v13233_v7, %v10205_v6  ;;  %6669 = vmatpush.bf16.msra.mxu1 %v9950_v9 }
  0x5e   : > { %v9933_v13 = vld [vmem:[%s20839_s1 + $0x960] sm:$0xf]  ;;  %v13165_v16 = vld [vmem:[%s20839_s1 + $0x96c] sm:$0xf0]  ;;  %v9806_v23 = vor.u32 %v13133_v12, %v9805_v11  ;;  %6683 = vmatpush.bf16.msra.mxu2 %v10078_v10 }
  0x5f   : > { %v10061_v17 = vld [vmem:[%s20839_s1 + $0xa60] sm:$0xf]  ;;  %v13197_v18 = vld [vmem:[%s20839_s1 + $0xa6c] sm:$0xf0]  ;;  %v9934_v25 = vor.u32 %v13165_v16, %v9933_v13  ;;  %6697 = vmatpush.bf16.msra.mxu3 %v10206_v15  ;;  %v8645_v13 = vld [vmem:[%s14241_s14 + $0x28] sm:$0xf] }
  0x60   : > { %v10189_v21 = vld [vmem:[%s20839_s1 + $0xb60] sm:$0xf]  ;;  %v13229_v22 = vld [vmem:[%s20839_s1 + $0xb6c] sm:$0xf0]  ;;  %v10062_v26 = vor.u32 %v13197_v18, %v10061_v17  ;;  %6656 = vmatpush.bf16.msra.mxu0 %v9806_v23  ;;  %v12852_v15 = vld [vmem:[%s14241_s14 + $0xa4] sm:$0xf0] }
  0x61   : > { %v9789_v27 = vld [vmem:[%s20839_s1 + $0x840] sm:$0xf]  ;;  %v13129_v28 = vld [vmem:[%s20839_s1 + $0x84c] sm:$0xf0]  ;;  %v10190_v30 = vor.u32 %v13229_v22, %v10189_v21  ;;  %6670 = vmatpush.bf16.msra.mxu1 %v9934_v25  ;;  %v12835_v16 = vld [vmem:[%s14241_s14 + $0x24] sm:$0xf] }
  0x62   : > { %v9917_v29 = vld [vmem:[%s20839_s1 + $0x940] sm:$0xf]  ;;  %v13161_v31 = vld [vmem:[%s20839_s1 + $0x94c] sm:$0xf0]  ;;  %v9790_v36 = vor.u32 %v13129_v28, %v9789_v27  ;;  %6684 = vmatpush.bf16.msra.mxu2 %v10062_v26  ;;  %v8639_v21 = vld [vmem:[%s14241_s14 + $0xa0] sm:$0xf0] }
  0x63   : > { %v10045_v32 = vld [vmem:[%s20839_s1 + $0xa40] sm:$0xf]  ;;  %v13193_v33 = vld [vmem:[%s20839_s1 + $0xa4c] sm:$0xf0]  ;;  %v9918_v38 = vor.u32 %v13161_v31, %v9917_v29  ;;  %6698 = vmatpush.bf16.msra.mxu3 %v10190_v30  ;;  %v12836_v22 = vld [vmem:[%s14241_s14 + $0x2c] sm:$0xf] }
  0x64   : > { %v10173_v34 = vld [vmem:[%s20839_s1 + $0xb40] sm:$0xf]  ;;  %v13225_v35 = vld [vmem:[%s20839_s1 + $0xb4c] sm:$0xf0]  ;;  %v10046_v40 = vor.u32 %v13193_v33, %v10045_v32  ;;  %6657 = vmatpush.bf16.msra.mxu0 %v9790_v36  ;;  %v8647_v23 = vld [vmem:[%s14241_s14 + $0xa8] sm:$0xf0]  ;;  %v14631_v36 = vor.u32 %v12835_v16, %v8639_v21 }
  0x65   : > { %v9773_v37 = vld [vmem:[%s20839_s1 + $0x820] sm:$0xf]  ;;  %v13125_v41 = vld [vmem:[%s20839_s1 + $0x82c] sm:$0xf0]  ;;  %v10174_v46 = vor.u32 %v13225_v35, %v10173_v34  ;;  %6671 = vmatpush.bf16.msra.mxu1 %v9918_v38  ;;  %v14629_v35 = vor.u32 %v12852_v15, %v8645_v13 }
  0x66   : > { %v9901_v42 = vld [vmem:[%s20839_s1 + $0x920] sm:$0xf]  ;;  %v13157_v45 = vld [vmem:[%s20839_s1 + $0x92c] sm:$0xf0]  ;;  %v9774_v54 = vor.u32 %v13125_v41, %v9773_v37  ;;  %6685 = vmatpush.bf16.msra.mxu2 %v10046_v40  ;;  %20904 = vst [vmem:[#allocation11_spill] sm:$0xff] %v14631_v36  ;;  %v14639_v40 = vor.u32 %v12836_v22, %v8647_v23 }
  0x67   : > { %v10029_v48 = vld [vmem:[%s20839_s1 + $0xa20] sm:$0xf]  ;;  %v13189_v49 = vld [vmem:[%s20839_s1 + $0xa2c] sm:$0xf0]  ;;  %v9902_v59 = vor.u32 %v13157_v45, %v9901_v42  ;;  %6699 = vmatpush.bf16.msra.mxu3 %v10174_v46  ;;  %20903 = vst [vmem:[#allocation10_spill] sm:$0xff] %v14629_v35 }
  0x68   : > { %v10157_v50 = vld [vmem:[%s20839_s1 + $0xb20] sm:$0xf]  ;;  %v13221_v51 = vld [vmem:[%s20839_s1 + $0xb2c] sm:$0xf0]  ;;  %v10030_v60 = vor.u32 %v13189_v49, %v10029_v48  ;;  %6658 = vmatpush.bf16.msra.mxu0 %v9774_v54  ;;  %20905 = vst [vmem:[#allocation12_spill] sm:$0xff] %v14639_v40 }
  0x69   : > { %v9757_v52 = vld [vmem:[%s20839_s1 + $0x800] sm:$0xf]  ;;  %v13121_v53 = vld [vmem:[%s20839_s1 + $0x80c] sm:$0xf0]  ;;  %v10158_v0 = vor.u32 %v13221_v51, %v10157_v50  ;;  %6672 = vmatpush.bf16.msra.mxu1 %v9902_v59 }
  0x6a   : > { %v9885_v55 = vld [vmem:[%s20839_s1 + $0x900] sm:$0xf]  ;;  %v13153_v56 = vld [vmem:[%s20839_s1 + $0x90c] sm:$0xf0]  ;;  %v9758_v7 = vor.u32 %v13121_v53, %v9757_v52  ;;  %6686 = vmatpush.bf16.msra.mxu2 %v10030_v60 }
  0x6b   : > { %v10013_v57 = vld [vmem:[%s20839_s1 + $0xa00] sm:$0xf]  ;;  %v13185_v58 = vld [vmem:[%s20839_s1 + $0xa0c] sm:$0xf0]  ;;  %v9886_v11 = vor.u32 %v13153_v56, %v9885_v55  ;;  %6700 = vmatpush.bf16.msra.mxu3 %v10158_v0 }
  0x6c   : > { %v10141_v61 = vld [vmem:[%s20839_s1 + $0xb00] sm:$0xf]  ;;  %v13217_v62 = vld [vmem:[%s20839_s1 + $0xb0c] sm:$0xf0]  ;;  %v10014_v12 = vor.u32 %v13185_v58, %v10013_v57  ;;  %6659 = vmatpush.bf16.msra.mxu0 %v9758_v7 }
  0x6d   : > { %v10381_v63 = vld [vmem:[%s20839_s1 + $0xce0] sm:$0xf]  ;;  %v13277_v1 = vld [vmem:[%s20839_s1 + $0xcec] sm:$0xf0]  ;;  %v10142_v17 = vor.u32 %v13217_v62, %v10141_v61  ;;  %6673 = vmatpush.bf16.msra.mxu1 %v9886_v11 }
  0x6e   : > { %v10509_v2 = vld [vmem:[%s20839_s1 + $0xde0] sm:$0xf]  ;;  %v13309_v3 = vld [vmem:[%s20839_s1 + $0xdec] sm:$0xf0]  ;;  %v10382_v18 = vor.u32 %v13277_v1, %v10381_v63  ;;  %6687 = vmatpush.bf16.msra.mxu2 %v10014_v12 }
  0x6f   : > { %v10637_v4 = vld [vmem:[%s20839_s1 + $0xee0] sm:$0xf]  ;;  %v13341_v5 = vld [vmem:[%s20839_s1 + $0xeec] sm:$0xf0]  ;;  %v10510_v25 = vor.u32 %v13309_v3, %v10509_v2  ;;  %6701 = vmatpush.bf16.msra.mxu3 %v10142_v17 }
  0x70   : > { %v10765_v6 = vld [vmem:[%s20839_s1 + $0xfe0] sm:$0xf]  ;;  %v13373_v8 = vld [vmem:[%s20839_s1 + $0xfec] sm:$0xf0]  ;;  %v10638_v26 = vor.u32 %v13341_v5, %v10637_v4  ;;  %6708 = vmatpush.bf16.msrb.mxu0 %v10382_v18  ;;  %6674 = vmatmul.bf16.vlgmr.msra.gmra.mxu1 %v14631_v36 }
  0x71   : > { %v8637_v9 = vld [vmem:[%s14241_s14 + $0x20] sm:$0xf]  ;;  %v13273_v28 = vld [vmem:[%s20839_s1 + $0xccc] sm:$0xf0]  ;;  %v10766_v30 = vor.u32 %v13373_v8, %v10765_v6  ;;  %6722 = vmatpush.bf16.msrb.mxu1 %v10510_v25  ;;  %6688 = vmatmul.bf16.vlgmr.msra.gmra.mxu2 %v14629_v35 }
  0x72   : > { %v12851_v10 = vld [vmem:[%s14241_s14 + $0x9c] sm:$0xf0]  ;;  %v13305_v32 = vld [vmem:[%s20839_s1 + $0xdcc] sm:$0xf0]  ;;  %6736 = vmatpush.bf16.msrb.mxu2 %v10638_v26  ;;  %6702 = vmatmul.bf16.vlgmr.msra.gmra.mxu3 %v14639_v40 }
  0x73   : > { %v10365_v27 = vld [vmem:[%s20839_s1 + $0xcc0] sm:$0xf]  ;;  %v14618_v31 = vor.u32 %v12851_v10, %v8637_v9  ;;  %v13337_v34 = vld [vmem:[%s20839_s1 + $0xecc] sm:$0xf0]  ;;  %6750 = vmatpush.bf16.msrb.mxu3 %v10766_v30 }
  0x74   : > { %v10493_v29 = vld [vmem:[%s20839_s1 + $0xdc0] sm:$0xf]  ;;  %v13369_v38 = vld [vmem:[%s20839_s1 + $0xfcc] sm:$0xf0]  ;;  %v10366_v41 = vor.u32 %v13273_v28, %v10365_v27 }
  0x75   : > { %20902 = vst [vmem:[#allocation9_spill] sm:$0xff] %v14618_v31  ;;  %v10621_v33 = vld [vmem:[%s20839_s1 + $0xec0] sm:$0xf]  ;;  %v10494_v42 = vor.u32 %v13305_v32, %v10493_v29  ;;  %v13269_v48 = vld [vmem:[%s20839_s1 + $0xcac] sm:$0xf0]  ;;  %6660 = vmatmul.bf16.vlgmr.msra.gmra.mxu0 %v14618_v31 }
  0x76   : > { %v10749_v37 = vld [vmem:[%s20839_s1 + $0xfc0] sm:$0xf]  ;;  %v10622_v45 = vor.u32 %v13337_v34, %v10621_v33  ;;  %v13301_v51 = vld [vmem:[%s20839_s1 + $0xdac] sm:$0xf0]  ;;  %6709 = vmatpush.bf16.msrb.mxu0 %v10366_v41 }
  0x77   : > { %v10349_v46 = vld [vmem:[%s20839_s1 + $0xca0] sm:$0xf]  ;;  %v10750_v50 = vor.u32 %v13369_v38, %v10749_v37  ;;  %v13333_v53 = vld [vmem:[%s20839_s1 + $0xeac] sm:$0xf0]  ;;  %6723 = vmatpush.bf16.msrb.mxu1 %v10494_v42 }
  0x78   : > { %v10477_v49 = vld [vmem:[%s20839_s1 + $0xda0] sm:$0xf]  ;;  %v13365_v55 = vld [vmem:[%s20839_s1 + $0xfac] sm:$0xf0]  ;;  %v10350_v56 = vor.u32 %v13269_v48, %v10349_v46  ;;  %6737 = vmatpush.bf16.msrb.mxu2 %v10622_v45 }
  0x79   : > { %v10605_v52 = vld [vmem:[%s20839_s1 + $0xea0] sm:$0xf]  ;;  %v10478_v57 = vor.u32 %v13301_v51, %v10477_v49  ;;  %v13265_v60 = vld [vmem:[%s20839_s1 + $0xc8c] sm:$0xf0]  ;;  %6751 = vmatpush.bf16.msrb.mxu3 %v10750_v50 }
  0x7a   : > { %v10733_v54 = vld [vmem:[%s20839_s1 + $0xfa0] sm:$0xf]  ;;  %v10606_v58 = vor.u32 %v13333_v53, %v10605_v52  ;;  %v13297_v63 = vld [vmem:[%s20839_s1 + $0xd8c] sm:$0xf0]  ;;  %6710 = vmatpush.bf16.msrb.mxu0 %v10350_v56 }
  0x7b   : > { %v10333_v59 = vld [vmem:[%s20839_s1 + $0xc80] sm:$0xf]  ;;  %v10734_v62 = vor.u32 %v13365_v55, %v10733_v54  ;;  %v13329_v1 = vld [vmem:[%s20839_s1 + $0xe8c] sm:$0xf0]  ;;  %6724 = vmatpush.bf16.msrb.mxu1 %v10478_v57 }
  0x7c   : > { %v10461_v61 = vld [vmem:[%s20839_s1 + $0xd80] sm:$0xf]  ;;  %v13361_v3 = vld [vmem:[%s20839_s1 + $0xf8c] sm:$0xf0]  ;;  %v10334_v4 = vor.u32 %v13265_v60, %v10333_v59  ;;  %6738 = vmatpush.bf16.msrb.mxu2 %v10606_v58 }
  0x7d   : > { %v10589_v0 = vld [vmem:[%s20839_s1 + $0xe80] sm:$0xf]  ;;  %v10462_v5 = vor.u32 %v13297_v63, %v10461_v61  ;;  %v13261_v8 = vld [vmem:[%s20839_s1 + $0xc6c] sm:$0xf0]  ;;  %6752 = vmatpush.bf16.msrb.mxu3 %v10734_v62 }
  0x7e   : > { %v10717_v2 = vld [vmem:[%s20839_s1 + $0xf80] sm:$0xf]  ;;  %v10590_v6 = vor.u32 %v13329_v1, %v10589_v0  ;;  %v13293_v11 = vld [vmem:[%s20839_s1 + $0xd6c] sm:$0xf0]  ;;  %6711 = vmatpush.bf16.msrb.mxu0 %v10334_v4 }
  0x7f   : > { %v10317_v7 = vld [vmem:[%s20839_s1 + $0xc60] sm:$0xf]  ;;  %v10718_v10 = vor.u32 %v13361_v3, %v10717_v2  ;;  %v13325_v13 = vld [vmem:[%s20839_s1 + $0xe6c] sm:$0xf0]  ;;  %6725 = vmatpush.bf16.msrb.mxu1 %v10462_v5 }
  0x80   : > { %v10445_v9 = vld [vmem:[%s20839_s1 + $0xd60] sm:$0xf]  ;;  %v13357_v16 = vld [vmem:[%s20839_s1 + $0xf6c] sm:$0xf0]  ;;  %v10318_v17 = vor.u32 %v13261_v8, %v10317_v7  ;;  %6739 = vmatpush.bf16.msrb.mxu2 %v10590_v6 }
  0x81   : > { %v10573_v12 = vld [vmem:[%s20839_s1 + $0xe60] sm:$0xf]  ;;  %v10446_v18 = vor.u32 %v13293_v11, %v10445_v9  ;;  %v13257_v23 = vld [vmem:[%s20839_s1 + $0xc4c] sm:$0xf0]  ;;  %6753 = vmatpush.bf16.msrb.mxu3 %v10718_v10 }
  0x82   : > { %v10701_v15 = vld [vmem:[%s20839_s1 + $0xf60] sm:$0xf]  ;;  %v10574_v21 = vor.u32 %v13325_v13, %v10573_v12  ;;  %v13289_v27 = vld [vmem:[%s20839_s1 + $0xd4c] sm:$0xf0]  ;;  %6712 = vmatpush.bf16.msrb.mxu0 %v10318_v17  ;;  %v8661_v13 = vld [vmem:[%s14241_s14 + $0x38] sm:$0xf] }
  0x83   : > { %v10301_v22 = vld [vmem:[%s20839_s1 + $0xc40] sm:$0xf]  ;;  %v10702_v26 = vor.u32 %v13357_v16, %v10701_v15  ;;  %v13321_v29 = vld [vmem:[%s20839_s1 + $0xe4c] sm:$0xf0]  ;;  %6726 = vmatpush.bf16.msrb.mxu1 %v10446_v18  ;;  %v12854_v15 = vld [vmem:[%s14241_s14 + $0xb4] sm:$0xf0] }
  0x84   : > { %v10429_v25 = vld [vmem:[%s20839_s1 + $0xd40] sm:$0xf]  ;;  %v13353_v32 = vld [vmem:[%s20839_s1 + $0xf4c] sm:$0xf0]  ;;  %v10302_v33 = vor.u32 %v13257_v23, %v10301_v22  ;;  %6740 = vmatpush.bf16.msrb.mxu2 %v10574_v21  ;;  %v12837_v16 = vld [vmem:[%s14241_s14 + $0x34] sm:$0xf] }
  0x85   : > { %v10557_v28 = vld [vmem:[%s20839_s1 + $0xe40] sm:$0xf]  ;;  %v10430_v37 = vor.u32 %v13289_v27, %v10429_v25  ;;  %v13253_v41 = vld [vmem:[%s20839_s1 + $0xc2c] sm:$0xf0]  ;;  %6754 = vmatpush.bf16.msrb.mxu3 %v10702_v26  ;;  %v8655_v21 = vld [vmem:[%s14241_s14 + $0xb0] sm:$0xf0] }
  0x86   : > { %v10685_v30 = vld [vmem:[%s20839_s1 + $0xf40] sm:$0xf]  ;;  %v10558_v38 = vor.u32 %v13321_v29, %v10557_v28  ;;  %v13285_v45 = vld [vmem:[%s20839_s1 + $0xd2c] sm:$0xf0]  ;;  %6713 = vmatpush.bf16.msrb.mxu0 %v10302_v33  ;;  %v12838_v22 = vld [vmem:[%s14241_s14 + $0x3c] sm:$0xf] }
  0x87   : > { %v10285_v34 = vld [vmem:[%s20839_s1 + $0xc20] sm:$0xf]  ;;  %v10686_v46 = vor.u32 %v13353_v32, %v10685_v30  ;;  %v13317_v49 = vld [vmem:[%s20839_s1 + $0xe2c] sm:$0xf0]  ;;  %6727 = vmatpush.bf16.msrb.mxu1 %v10430_v37  ;;  %v8663_v23 = vld [vmem:[%s14241_s14 + $0xb8] sm:$0xf0] }
  0x88   : > { %v10413_v42 = vld [vmem:[%s20839_s1 + $0xd20] sm:$0xf]  ;;  %v13349_v51 = vld [vmem:[%s20839_s1 + $0xf2c] sm:$0xf0]  ;;  %v10286_v54 = vor.u32 %v13253_v41, %v10285_v34  ;;  %6741 = vmatpush.bf16.msrb.mxu2 %v10558_v38  ;;  %v14841_v38 = vor.u32 %v12854_v15, %v8661_v13  ;;  %v14843_v41 = vor.u32 %v12837_v16, %v8655_v21 }
  0x89   : > { %v10541_v48 = vld [vmem:[%s20839_s1 + $0xe20] sm:$0xf]  ;;  %v13249_v53 = vld [vmem:[%s20839_s1 + $0xc0c] sm:$0xf0]  ;;  %v10414_v59 = vor.u32 %v13285_v45, %v10413_v42  ;;  %6755 = vmatpush.bf16.msrb.mxu3 %v10686_v46  ;;  %v14851_v46 = vor.u32 %v12838_v22, %v8663_v23 }
  0x8a   : > { %v10669_v50 = vld [vmem:[%s20839_s1 + $0xf20] sm:$0xf]  ;;  %v13281_v56 = vld [vmem:[%s20839_s1 + $0xd0c] sm:$0xf0]  ;;  %v10542_v60 = vor.u32 %v13317_v49, %v10541_v48  ;;  %6714 = vmatpush.bf16.msrb.mxu0 %v10286_v54  ;;  %20907 = vst [vmem:[#allocation14_spill] sm:$0xff] %v14841_v38 }
  0x8b   : > { %v10269_v52 = vld [vmem:[%s20839_s1 + $0xc00] sm:$0xf]  ;;  %v13313_v58 = vld [vmem:[%s20839_s1 + $0xe0c] sm:$0xf0]  ;;  %v10670_v0 = vor.u32 %v13349_v51, %v10669_v50  ;;  %6728 = vmatpush.bf16.msrb.mxu1 %v10414_v59  ;;  %20908 = vst [vmem:[#allocation15_spill] sm:$0xff] %v14843_v41 }
  0x8c   : > { %v10397_v55 = vld [vmem:[%s20839_s1 + $0xd00] sm:$0xf]  ;;  %v13345_v62 = vld [vmem:[%s20839_s1 + $0xf0c] sm:$0xf0]  ;;  %v10270_v7 = vor.u32 %v13249_v53, %v10269_v52  ;;  %6742 = vmatpush.bf16.msrb.mxu2 %v10542_v60  ;;  %20909 = vst [vmem:[#allocation16_spill] sm:$0xff] %v14851_v46 }
  0x8d   : > { %v10525_v57 = vld [vmem:[%s20839_s1 + $0xe00] sm:$0xf]  ;;  %v13405_v1 = vld [vmem:[%s20839_s1 + $0x10ec] sm:$0xf0]  ;;  %v10398_v11 = vor.u32 %v13281_v56, %v10397_v55  ;;  %6756 = vmatpush.bf16.msrb.mxu3 %v10670_v0 }
  0x8e   : > { %v10653_v61 = vld [vmem:[%s20839_s1 + $0xf00] sm:$0xf]  ;;  %v13437_v3 = vld [vmem:[%s20839_s1 + $0x11ec] sm:$0xf0]  ;;  %v10526_v12 = vor.u32 %v13313_v58, %v10525_v57  ;;  %6715 = vmatpush.bf16.msrb.mxu0 %v10270_v7 }
  0x8f   : > { %v10893_v63 = vld [vmem:[%s20839_s1 + $0x10e0] sm:$0xf]  ;;  %v13469_v5 = vld [vmem:[%s20839_s1 + $0x12ec] sm:$0xf0]  ;;  %v10654_v17 = vor.u32 %v13345_v62, %v10653_v61  ;;  %6729 = vmatpush.bf16.msrb.mxu1 %v10398_v11 }
  0x90   : > { %v11021_v2 = vld [vmem:[%s20839_s1 + $0x11e0] sm:$0xf]  ;;  %v13501_v8 = vld [vmem:[%s20839_s1 + $0x13ec] sm:$0xf0]  ;;  %v10894_v18 = vor.u32 %v13405_v1, %v10893_v63  ;;  %6743 = vmatpush.bf16.msrb.mxu2 %v10526_v12 }
  0x91   : > { %v11149_v4 = vld [vmem:[%s20839_s1 + $0x12e0] sm:$0xf]  ;;  %v8653_v9 = vld [vmem:[%s14241_s14 + $0x30] sm:$0xf]  ;;  %v11022_v25 = vor.u32 %v13437_v3, %v11021_v2  ;;  %6757 = vmatpush.bf16.msrb.mxu3 %v10654_v17 }
  0x92   : > { %v11277_v6 = vld [vmem:[%s20839_s1 + $0x13e0] sm:$0xf]  ;;  %v12853_v10 = vld [vmem:[%s14241_s14 + $0xac] sm:$0xf0]  ;;  %v11150_v26 = vor.u32 %v13469_v5, %v11149_v4  ;;  %6764 = vmatpush.bf16.msra.mxu0 %v10894_v18  ;;  %6730 = vmatmul.bf16.vlgmr.msrb.gmra.mxu1 %v14843_v41 }
  0x93   : > { %v10877_v27 = vld [vmem:[%s20839_s1 + $0x10c0] sm:$0xf]  ;;  %v13401_v28 = vld [vmem:[%s20839_s1 + $0x10cc] sm:$0xf0]  ;;  %v11278_v30 = vor.u32 %v13501_v8, %v11277_v6  ;;  %v14830_v32 = vor.u32 %v12853_v10, %v8653_v9  ;;  %6778 = vmatpush.bf16.msra.mxu1 %v11022_v25  ;;  %6744 = vmatmul.bf16.vlgmr.msrb.gmra.mxu2 %v14841_v38 }
  0x94   : > { %v11005_v29 = vld [vmem:[%s20839_s1 + $0x11c0] sm:$0xf]  ;;  %v13433_v33 = vld [vmem:[%s20839_s1 + $0x11cc] sm:$0xf0]  ;;  %v10878_v48 = vor.u32 %v13401_v28, %v10877_v27  ;;  %6792 = vmatpush.bf16.msra.mxu2 %v11150_v26  ;;  %6758 = vmatmul.bf16.vlgmr.msrb.gmra.mxu3 %v14851_v46 }
  0x95   : > { %20906 = vst [vmem:[#allocation13_spill] sm:$0xff] %v14830_v32  ;;  %v11133_v34 = vld [vmem:[%s20839_s1 + $0x12c0] sm:$0xf]  ;;  %v13465_v37 = vld [vmem:[%s20839_s1 + $0x12cc] sm:$0xf0]  ;;  %v11006_v49 = vor.u32 %v13433_v33, %v11005_v29  ;;  %6806 = vmatpush.bf16.msra.mxu3 %v11278_v30  ;;  %6716 = vmatmul.bf16.vlgmr.msrb.gmra.mxu0 %v14830_v32 }
  0x96   : > { %v11261_v42 = vld [vmem:[%s20839_s1 + $0x13c0] sm:$0xf]  ;;  %v13497_v45 = vld [vmem:[%s20839_s1 + $0x13cc] sm:$0xf0]  ;;  %v11134_v50 = vor.u32 %v13465_v37, %v11133_v34  ;;  %6765 = vmatpush.bf16.msra.mxu0 %v10878_v48 }
  0x97   : > { %v10861_v51 = vld [vmem:[%s20839_s1 + $0x10a0] sm:$0xf]  ;;  %v13397_v52 = vld [vmem:[%s20839_s1 + $0x10ac] sm:$0xf0]  ;;  %v11262_v54 = vor.u32 %v13497_v45, %v11261_v42  ;;  %6779 = vmatpush.bf16.msra.mxu1 %v11006_v49 }
  0x98   : > { %v10989_v53 = vld [vmem:[%s20839_s1 + $0x11a0] sm:$0xf]  ;;  %v13429_v55 = vld [vmem:[%s20839_s1 + $0x11ac] sm:$0xf0]  ;;  %v10862_v60 = vor.u32 %v13397_v52, %v10861_v51  ;;  %6793 = vmatpush.bf16.msra.mxu2 %v11134_v50 }
  0x99   : > { %v11117_v56 = vld [vmem:[%s20839_s1 + $0x12a0] sm:$0xf]  ;;  %v13461_v57 = vld [vmem:[%s20839_s1 + $0x12ac] sm:$0xf0]  ;;  %v10990_v61 = vor.u32 %v13429_v55, %v10989_v53  ;;  %6807 = vmatpush.bf16.msra.mxu3 %v11262_v54 }
  0x9a   : > { %v11245_v58 = vld [vmem:[%s20839_s1 + $0x13a0] sm:$0xf]  ;;  %v13493_v59 = vld [vmem:[%s20839_s1 + $0x13ac] sm:$0xf0]  ;;  %v11118_v62 = vor.u32 %v13461_v57, %v11117_v56  ;;  %6766 = vmatpush.bf16.msra.mxu0 %v10862_v60 }
  0x9b   : > { %v10845_v63 = vld [vmem:[%s20839_s1 + $0x1080] sm:$0xf]  ;;  %v13393_v0 = vld [vmem:[%s20839_s1 + $0x108c] sm:$0xf0]  ;;  %v11246_v2 = vor.u32 %v13493_v59, %v11245_v58  ;;  %6780 = vmatpush.bf16.msra.mxu1 %v10990_v61 }
  0x9c   : > { %v10973_v1 = vld [vmem:[%s20839_s1 + $0x1180] sm:$0xf]  ;;  %v13425_v3 = vld [vmem:[%s20839_s1 + $0x118c] sm:$0xf0]  ;;  %v10846_v8 = vor.u32 %v13393_v0, %v10845_v63  ;;  %6794 = vmatpush.bf16.msra.mxu2 %v11118_v62 }
  0x9d   : > { %v11101_v4 = vld [vmem:[%s20839_s1 + $0x1280] sm:$0xf]  ;;  %v13457_v5 = vld [vmem:[%s20839_s1 + $0x128c] sm:$0xf0]  ;;  %v10974_v9 = vor.u32 %v13425_v3, %v10973_v1  ;;  %6808 = vmatpush.bf16.msra.mxu3 %v11246_v2 }
  0x9e   : > { %v11229_v6 = vld [vmem:[%s20839_s1 + $0x1380] sm:$0xf]  ;;  %v13489_v7 = vld [vmem:[%s20839_s1 + $0x138c] sm:$0xf0]  ;;  %v11102_v10 = vor.u32 %v13457_v5, %v11101_v4  ;;  %6767 = vmatpush.bf16.msra.mxu0 %v10846_v8 }
  0x9f   : > { %v10829_v11 = vld [vmem:[%s20839_s1 + $0x1060] sm:$0xf]  ;;  %v13389_v12 = vld [vmem:[%s20839_s1 + $0x106c] sm:$0xf0]  ;;  %v11230_v15 = vor.u32 %v13489_v7, %v11229_v6  ;;  %6781 = vmatpush.bf16.msra.mxu1 %v10974_v9 }
  0xa0   : > { %v10957_v13 = vld [vmem:[%s20839_s1 + $0x1160] sm:$0xf]  ;;  %v13421_v16 = vld [vmem:[%s20839_s1 + $0x116c] sm:$0xf0]  ;;  %v10830_v23 = vor.u32 %v13389_v12, %v10829_v11  ;;  %6795 = vmatpush.bf16.msra.mxu2 %v11102_v10 }
  0xa1   : > { %v11085_v17 = vld [vmem:[%s20839_s1 + $0x1260] sm:$0xf]  ;;  %v13453_v18 = vld [vmem:[%s20839_s1 + $0x126c] sm:$0xf0]  ;;  %v10958_v25 = vor.u32 %v13421_v16, %v10957_v13  ;;  %6809 = vmatpush.bf16.msra.mxu3 %v11230_v15 }
  0xa2   : > { %v11213_v21 = vld [vmem:[%s20839_s1 + $0x1360] sm:$0xf]  ;;  %v13485_v22 = vld [vmem:[%s20839_s1 + $0x136c] sm:$0xf0]  ;;  %v11086_v26 = vor.u32 %v13453_v18, %v11085_v17  ;;  %6768 = vmatpush.bf16.msra.mxu0 %v10830_v23 }
  0xa3   : > { %v10813_v27 = vld [vmem:[%s20839_s1 + $0x1040] sm:$0xf]  ;;  %v13385_v28 = vld [vmem:[%s20839_s1 + $0x104c] sm:$0xf0]  ;;  %v11214_v30 = vor.u32 %v13485_v22, %v11213_v21  ;;  %6782 = vmatpush.bf16.msra.mxu1 %v10958_v25  ;;  %v8677_v25 = vld [vmem:[%s14241_s14 + $0x48] sm:$0xf] }
  0xa4   : > { %v10941_v29 = vld [vmem:[%s20839_s1 + $0x1140] sm:$0xf]  ;;  %v13417_v33 = vld [vmem:[%s20839_s1 + $0x114c] sm:$0xf0]  ;;  %v10814_v48 = vor.u32 %v13385_v28, %v10813_v27  ;;  %6796 = vmatpush.bf16.msra.mxu2 %v11086_v26  ;;  %v12856_v26 = vld [vmem:[%s14241_s14 + $0xc4] sm:$0xf0] }
  0xa5   : > { %v11069_v34 = vld [vmem:[%s20839_s1 + $0x1240] sm:$0xf]  ;;  %v13449_v37 = vld [vmem:[%s20839_s1 + $0x124c] sm:$0xf0]  ;;  %v10942_v50 = vor.u32 %v13417_v33, %v10941_v29  ;;  %6810 = vmatpush.bf16.msra.mxu3 %v11214_v30  ;;  %v12839_v27 = vld [vmem:[%s14241_s14 + $0x44] sm:$0xf] }
  0xa6   : > { %v11197_v42 = vld [vmem:[%s20839_s1 + $0x1340] sm:$0xf]  ;;  %v13481_v45 = vld [vmem:[%s20839_s1 + $0x134c] sm:$0xf0]  ;;  %v11070_v51 = vor.u32 %v13449_v37, %v11069_v34  ;;  %6769 = vmatpush.bf16.msra.mxu0 %v10814_v48  ;;  %v8671_v30 = vld [vmem:[%s14241_s14 + $0xc0] sm:$0xf0] }
  0xa7   : > { %v10797_v49 = vld [vmem:[%s20839_s1 + $0x1020] sm:$0xf]  ;;  %v13381_v52 = vld [vmem:[%s20839_s1 + $0x102c] sm:$0xf0]  ;;  %v11198_v55 = vor.u32 %v13481_v45, %v11197_v42  ;;  %6783 = vmatpush.bf16.msra.mxu1 %v10942_v50  ;;  %v12840_v33 = vld [vmem:[%s14241_s14 + $0x4c] sm:$0xf] }
  0xa8   : > { %v10925_v53 = vld [vmem:[%s20839_s1 + $0x1120] sm:$0xf]  ;;  %v13413_v54 = vld [vmem:[%s20839_s1 + $0x112c] sm:$0xf0]  ;;  %v10798_v62 = vor.u32 %v13381_v52, %v10797_v49  ;;  %6797 = vmatpush.bf16.msra.mxu2 %v11070_v51  ;;  %v8679_v34 = vld [vmem:[%s14241_s14 + $0xc8] sm:$0xf0] }
  0xa9   : > { %v11053_v56 = vld [vmem:[%s20839_s1 + $0x1220] sm:$0xf]  ;;  %v13445_v57 = vld [vmem:[%s20839_s1 + $0x122c] sm:$0xf0]  ;;  %v10926_v3 = vor.u32 %v13413_v54, %v10925_v53  ;;  %6811 = vmatpush.bf16.msra.mxu3 %v11198_v55  ;;  %v15053_v55 = vor.u32 %v12856_v26, %v8677_v25 }
  0xaa   : > { %v11181_v58 = vld [vmem:[%s20839_s1 + $0x1320] sm:$0xf]  ;;  %v13477_v59 = vld [vmem:[%s20839_s1 + $0x132c] sm:$0xf0]  ;;  %v11054_v4 = vor.u32 %v13445_v57, %v11053_v56  ;;  %6770 = vmatpush.bf16.msra.mxu0 %v10798_v62  ;;  %v15055_v56 = vor.u32 %v12839_v27, %v8671_v30 }
  0xab   : > { %v10781_v60 = vld [vmem:[%s20839_s1 + $0x1000] sm:$0xf]  ;;  %v13377_v61 = vld [vmem:[%s20839_s1 + $0x100c] sm:$0xf0]  ;;  %v11182_v8 = vor.u32 %v13477_v59, %v11181_v58  ;;  %6784 = vmatpush.bf16.msra.mxu1 %v10926_v3  ;;  %20911 = vst [vmem:[#allocation18_spill] sm:$0xff] %v15053_v55  ;;  %v15063_v59 = vor.u32 %v12840_v33, %v8679_v34 }
  0xac   : > { %v10909_v63 = vld [vmem:[%s20839_s1 + $0x1100] sm:$0xf]  ;;  %v13409_v0 = vld [vmem:[%s20839_s1 + $0x110c] sm:$0xf0]  ;;  %v10782_v16 = vor.u32 %v13377_v61, %v10781_v60  ;;  %6798 = vmatpush.bf16.msra.mxu2 %v11054_v4  ;;  %20912 = vst [vmem:[#allocation19_spill] sm:$0xff] %v15055_v56 }
  0xad   : > { %v11037_v1 = vld [vmem:[%s20839_s1 + $0x1200] sm:$0xf]  ;;  %v13441_v2 = vld [vmem:[%s20839_s1 + $0x120c] sm:$0xf0]  ;;  %v10910_v22 = vor.u32 %v13409_v0, %v10909_v63  ;;  %6812 = vmatpush.bf16.msra.mxu3 %v11182_v8  ;;  %20913 = vst [vmem:[#allocation20_spill] sm:$0xff] %v15063_v59 }
  0xae   : > { %v11165_v5 = vld [vmem:[%s20839_s1 + $0x1300] sm:$0xf]  ;;  %v13473_v6 = vld [vmem:[%s20839_s1 + $0x130c] sm:$0xf0]  ;;  %v11038_v23 = vor.u32 %v13441_v2, %v11037_v1  ;;  %6771 = vmatpush.bf16.msra.mxu0 %v10782_v16 }
  0xaf   : > { %v11405_v7 = vld [vmem:[%s20839_s1 + $0x14e0] sm:$0xf]  ;;  %v13533_v9 = vld [vmem:[%s20839_s1 + $0x14ec] sm:$0xf0]  ;;  %v11166_v28 = vor.u32 %v13473_v6, %v11165_v5  ;;  %6785 = vmatpush.bf16.msra.mxu1 %v10910_v22 }
  0xb0   : > { %v11533_v10 = vld [vmem:[%s20839_s1 + $0x15e0] sm:$0xf]  ;;  %v13565_v11 = vld [vmem:[%s20839_s1 + $0x15ec] sm:$0xf0]  ;;  %v11406_v29 = vor.u32 %v13533_v9, %v11405_v7  ;;  %6799 = vmatpush.bf16.msra.mxu2 %v11038_v23 }
  0xb1   : > { %v11661_v12 = vld [vmem:[%s20839_s1 + $0x16e0] sm:$0xf]  ;;  %v13597_v13 = vld [vmem:[%s20839_s1 + $0x16ec] sm:$0xf0]  ;;  %v11534_v37 = vor.u32 %v13565_v11, %v11533_v10  ;;  %6813 = vmatpush.bf16.msra.mxu3 %v11166_v28 }
  0xb2   : > { %v11789_v15 = vld [vmem:[%s20839_s1 + $0x17e0] sm:$0xf]  ;;  %v13629_v17 = vld [vmem:[%s20839_s1 + $0x17ec] sm:$0xf0]  ;;  %v11662_v42 = vor.u32 %v13597_v13, %v11661_v12  ;;  %6820 = vmatpush.bf16.msrb.mxu0 %v11406_v29  ;;  %6786 = vmatmul.bf16.vlgmr.msra.gmra.mxu1 %v15055_v56 }
  0xb3   : > { %v8669_v18 = vld [vmem:[%s14241_s14 + $0x40] sm:$0xf]  ;;  %v13529_v48 = vld [vmem:[%s20839_s1 + $0x14cc] sm:$0xf0]  ;;  %v11790_v50 = vor.u32 %v13629_v17, %v11789_v15  ;;  %6834 = vmatpush.bf16.msrb.mxu1 %v11534_v37  ;;  %6800 = vmatmul.bf16.vlgmr.msra.gmra.mxu2 %v15053_v55 }
  0xb4   : > { %v12855_v21 = vld [vmem:[%s14241_s14 + $0xbc] sm:$0xf0]  ;;  %v13561_v52 = vld [vmem:[%s20839_s1 + $0x15cc] sm:$0xf0]  ;;  %6848 = vmatpush.bf16.msrb.mxu2 %v11662_v42  ;;  %6814 = vmatmul.bf16.vlgmr.msra.gmra.mxu3 %v15063_v59 }
  0xb5   : > { %v11389_v45 = vld [vmem:[%s20839_s1 + $0x14c0] sm:$0xf]  ;;  %v15042_v51 = vor.u32 %v12855_v21, %v8669_v18  ;;  %v13593_v54 = vld [vmem:[%s20839_s1 + $0x16cc] sm:$0xf0]  ;;  %6862 = vmatpush.bf16.msrb.mxu3 %v11790_v50 }
  0xb6   : > { %v11517_v49 = vld [vmem:[%s20839_s1 + $0x15c0] sm:$0xf]  ;;  %v13625_v58 = vld [vmem:[%s20839_s1 + $0x17cc] sm:$0xf0]  ;;  %v11390_v60 = vor.u32 %v13529_v48, %v11389_v45 }
  0xb7   : > { %20910 = vst [vmem:[#allocation17_spill] sm:$0xff] %v15042_v51  ;;  %v11645_v53 = vld [vmem:[%s20839_s1 + $0x16c0] sm:$0xf]  ;;  %v11518_v61 = vor.u32 %v13561_v52, %v11517_v49  ;;  %v13525_v0 = vld [vmem:[%s20839_s1 + $0x14ac] sm:$0xf0]  ;;  %6772 = vmatmul.bf16.vlgmr.msra.gmra.mxu0 %v15042_v51 }
  0xb8   : > { %v11773_v57 = vld [vmem:[%s20839_s1 + $0x17c0] sm:$0xf]  ;;  %v11646_v62 = vor.u32 %v13593_v54, %v11645_v53  ;;  %v13557_v3 = vld [vmem:[%s20839_s1 + $0x15ac] sm:$0xf0]  ;;  %6821 = vmatpush.bf16.msrb.mxu0 %v11390_v60 }
  0xb9   : > { %v11373_v63 = vld [vmem:[%s20839_s1 + $0x14a0] sm:$0xf]  ;;  %v11774_v2 = vor.u32 %v13625_v58, %v11773_v57  ;;  %v13589_v5 = vld [vmem:[%s20839_s1 + $0x16ac] sm:$0xf0]  ;;  %6835 = vmatpush.bf16.msrb.mxu1 %v11518_v61 }
  0xba   : > { %v11501_v1 = vld [vmem:[%s20839_s1 + $0x15a0] sm:$0xf]  ;;  %v13621_v7 = vld [vmem:[%s20839_s1 + $0x17ac] sm:$0xf0]  ;;  %v11374_v8 = vor.u32 %v13525_v0, %v11373_v63  ;;  %6849 = vmatpush.bf16.msrb.mxu2 %v11646_v62 }
  0xbb   : > { %v11629_v4 = vld [vmem:[%s20839_s1 + $0x16a0] sm:$0xf]  ;;  %v11502_v9 = vor.u32 %v13557_v3, %v11501_v1  ;;  %v13521_v12 = vld [vmem:[%s20839_s1 + $0x148c] sm:$0xf0]  ;;  %6863 = vmatpush.bf16.msrb.mxu3 %v11774_v2 }
  0xbc   : > { %v11757_v6 = vld [vmem:[%s20839_s1 + $0x17a0] sm:$0xf]  ;;  %v11630_v10 = vor.u32 %v13589_v5, %v11629_v4  ;;  %v13553_v16 = vld [vmem:[%s20839_s1 + $0x158c] sm:$0xf0]  ;;  %6822 = vmatpush.bf16.msrb.mxu0 %v11374_v8  ;;  %v6549_v2 = vpop.f32.mrf.mxu0 }
  0xbd   : > { %v11357_v11 = vld [vmem:[%s20839_s1 + $0x1480] sm:$0xf]  ;;  %v11758_v15 = vor.u32 %v13621_v7, %v11757_v6  ;;  %v13585_v18 = vld [vmem:[%s20839_s1 + $0x168c] sm:$0xf0]  ;;  %6836 = vmatpush.bf16.msrb.mxu1 %v11502_v9 }
  0xbe   : > { %v11485_v13 = vld [vmem:[%s20839_s1 + $0x1580] sm:$0xf]  ;;  %v13617_v22 = vld [vmem:[%s20839_s1 + $0x178c] sm:$0xf0]  ;;  %v11358_v23 = vor.u32 %v13521_v12, %v11357_v11  ;;  %6850 = vmatpush.bf16.msrb.mxu2 %v11630_v10  ;;  %v6563_v11 = vpop.f32.mrf.mxu1 }
  0xbf   : > { %v11613_v17 = vld [vmem:[%s20839_s1 + $0x1680] sm:$0xf]  ;;  %v11486_v26 = vor.u32 %v13553_v16, %v11485_v13  ;;  %v13517_v28 = vld [vmem:[%s20839_s1 + $0x146c] sm:$0xf0]  ;;  %6864 = vmatpush.bf16.msrb.mxu3 %v11758_v15 }
  0xc0   : > { %v11741_v21 = vld [vmem:[%s20839_s1 + $0x1780] sm:$0xf]  ;;  %v11614_v27 = vor.u32 %v13585_v18, %v11613_v17  ;;  %v13549_v34 = vld [vmem:[%s20839_s1 + $0x156c] sm:$0xf0]  ;;  %6823 = vmatpush.bf16.msrb.mxu0 %v11358_v23 }
  0xc1   : > { %v11341_v25 = vld [vmem:[%s20839_s1 + $0x1460] sm:$0xf]  ;;  %v11742_v33 = vor.u32 %v13617_v22, %v11741_v21  ;;  %v13581_v42 = vld [vmem:[%s20839_s1 + $0x166c] sm:$0xf0]  ;;  %6837 = vmatpush.bf16.msrb.mxu1 %v11486_v26 }
  0xc2   : > { %v11469_v29 = vld [vmem:[%s20839_s1 + $0x1560] sm:$0xf]  ;;  %v13613_v48 = vld [vmem:[%s20839_s1 + $0x176c] sm:$0xf0]  ;;  %v11342_v49 = vor.u32 %v13517_v28, %v11341_v25  ;;  %6851 = vmatpush.bf16.msrb.mxu2 %v11614_v27 }
  0xc3   : > { %v15129_v30 = vld [vmem:[%s20840_s2] sm:$0xf]  ;;  %v11470_v52 = vor.u32 %v13549_v34, %v11469_v29  ;;  %v13513_v57 = vld [vmem:[%s20839_s1 + $0x144c] sm:$0xf0]  ;;  %6865 = vmatpush.bf16.msrb.mxu3 %v11742_v33 }
  0xc4   : > { %v11597_v37 = vld [vmem:[%s20839_s1 + $0x1660] sm:$0xf]  ;;  %v20843_v50 = vperm.slane %v15129_v30, 0  ;;  %v13545_v61 = vld [vmem:[%s20839_s1 + $0x154c] sm:$0xf0]  ;;  %6824 = vmatpush.bf16.msrb.mxu0 %v11342_v49 }
  0xc5   : > { %v11725_v45 = vld [vmem:[%s20839_s1 + $0x1760] sm:$0xf]  ;;  %v11598_v53 = vor.u32 %v13581_v42, %v11597_v37  ;;  %v13577_v63 = vld [vmem:[%s20839_s1 + $0x164c] sm:$0xf0]  ;;  %6838 = vmatpush.bf16.msrb.mxu1 %v11470_v52 }
  0xc6   : > { %v11325_v54 = vld [vmem:[%s20839_s1 + $0x1440] sm:$0xf]  ;;  %v11726_v60 = vor.u32 %v13613_v48, %v11725_v45  ;;  %v13609_v1 = vld [vmem:[%s20839_s1 + $0x174c] sm:$0xf0]  ;;  %v6550_v4 = vadd.f32 %v6549_v2, %v20843_v50  ;;  %v8725_v50 = vld [vmem:[%s14241_s14 + $0x78] sm:$0xf] }
  0xc7   : > { %v11453_v58 = vld [vmem:[%s20839_s1 + $0x1540] sm:$0xf]  ;;  %v11326_v3 = vor.u32 %v13513_v57, %v11325_v54  ;;  %6852 = vmatpush.bf16.msrb.mxu2 %v11598_v53  ;;  %v13509_v8 = vld [vmem:[%s20839_s1 + $0x142c] sm:$0xf0]  ;;  %v6577_v53 = vpop.f32.mrf.mxu2 }
  0xc8   : > { %v11581_v62 = vld [vmem:[%s20839_s1 + $0x1640] sm:$0xf]  ;;  %v11454_v6 = vor.u32 %v13545_v61, %v11453_v58  ;;  %v13541_v10 = vld [vmem:[%s20839_s1 + $0x152c] sm:$0xf0]  ;;  %6866 = vmatpush.bf16.msrb.mxu3 %v11726_v60  ;;  %v6564_v17 = vadd.f32 %v6563_v11, %v6550_v4  ;;  %v8693_v4 = vld [vmem:[%s14241_s14 + $0x58] sm:$0xf] }
  0xc9   : > { %v11709_v0 = vld [vmem:[%s20839_s1 + $0x1740] sm:$0xf]  ;;  %v11582_v7 = vor.u32 %v13577_v63, %v11581_v62  ;;  %v13573_v15 = vld [vmem:[%s20839_s1 + $0x162c] sm:$0xf0]  ;;  %6825 = vmatpush.bf16.msrb.mxu0 %v11326_v3  ;;  %v12842_v11 = vld [vmem:[%s14241_s14 + $0x5c] sm:$0xf] }
  0xca   : > { %v11309_v5 = vld [vmem:[%s20839_s1 + $0x1420] sm:$0xf]  ;;  %v11710_v12 = vor.u32 %v13609_v1, %v11709_v0  ;;  %v13605_v18 = vld [vmem:[%s20839_s1 + $0x172c] sm:$0xf0]  ;;  %6839 = vmatpush.bf16.msrb.mxu1 %v11454_v6  ;;  %v6578_v60 = vadd.f32 %v6577_v53, %v6564_v17  ;;  %v6591_v1 = vpop.f32.mrf.mxu3 }
  0xcb   : > { %v11437_v9 = vld [vmem:[%s20839_s1 + $0x1520] sm:$0xf]  ;;  %v13505_v22 = vld [vmem:[%s20839_s1 + $0x140c] sm:$0xf0]  ;;  %v11310_v23 = vor.u32 %v13509_v8, %v11309_v5  ;;  %6853 = vmatpush.bf16.msrb.mxu2 %v11582_v7  ;;  %v12858_v5 = vld [vmem:[%s14241_s14 + $0xd4] sm:$0xf0] }
  0xcc   : > { %v11565_v13 = vld [vmem:[%s20839_s1 + $0x1620] sm:$0xf]  ;;  %v13537_v26 = vld [vmem:[%s20839_s1 + $0x150c] sm:$0xf0]  ;;  %v11438_v29 = vor.u32 %v13541_v10, %v11437_v9  ;;  %6867 = vmatpush.bf16.msrb.mxu3 %v11710_v12  ;;  %v15249_v6 = vadd.f32 %v6591_v1, %v6578_v60  ;;  %v12841_v7 = vld [vmem:[%s14241_s14 + $0x54] sm:$0xf] }
  0xcd   : > { %v11693_v16 = vld [vmem:[%s20839_s1 + $0x1720] sm:$0xf]  ;;  %v13569_v28 = vld [vmem:[%s20839_s1 + $0x160c] sm:$0xf0]  ;;  %v11566_v33 = vor.u32 %v13573_v15, %v11565_v13  ;;  %6826 = vmatpush.bf16.msrb.mxu0 %v11310_v23  ;;  %v8687_v10 = vld [vmem:[%s14241_s14 + $0xd0] sm:$0xf0] }
  0xce   : > { %v11293_v21 = vld [vmem:[%s20839_s1 + $0x1400] sm:$0xf]  ;;  %v13601_v37 = vld [vmem:[%s20839_s1 + $0x170c] sm:$0xf0]  ;;  %v11694_v45 = vor.u32 %v13605_v18, %v11693_v16  ;;  %6840 = vmatpush.bf16.msrb.mxu1 %v11438_v29  ;;  %v8695_v12 = vld [vmem:[%s14241_s14 + $0xd8] sm:$0xf0]  ;;  %v15255_v16 = vpop.f32.mrf.mxu0  ;;  %v15279_v29 = vor.u32 %v12841_v7, %v8687_v10 }
  0xcf   : > { %v11421_v25 = vld [vmem:[%s20839_s1 + $0x1500] sm:$0xf]  ;;  %v13661_v48 = vld [vmem:[%s20839_s1 + $0x18ec] sm:$0xf0]  ;;  %v11294_v61 = vor.u32 %v13505_v22, %v11293_v21  ;;  %6854 = vmatpush.bf16.msrb.mxu2 %v11566_v33  ;;  %v15319_v1 = vpop.f32.mrf.mxu2 }
  0xd0   : > { %v11549_v27 = vld [vmem:[%s20839_s1 + $0x1600] sm:$0xf]  ;;  %v13693_v52 = vld [vmem:[%s20839_s1 + $0x19ec] sm:$0xf0]  ;;  %v11422_v2 = vor.u32 %v13537_v26, %v11421_v25  ;;  %6868 = vmatpush.bf16.msrb.mxu3 %v11694_v45  ;;  %20916 = vst [vmem:[#allocation23_spill] sm:$0xff] %v15279_v29 }
  0xd1   : > { %v11677_v34 = vld [vmem:[%s20839_s1 + $0x1700] sm:$0xf]  ;;  %v13725_v57 = vld [vmem:[%s20839_s1 + $0x1aec] sm:$0xf0]  ;;  %v11550_v3 = vor.u32 %v13569_v28, %v11549_v27  ;;  %6827 = vmatpush.bf16.msrb.mxu0 %v11294_v61  ;;  %v15277_v28 = vor.u32 %v12858_v5, %v8693_v4  ;;  %20918 = vst [vmem:[#allocation25_spill] sm:$0xff] %v15319_v1 }
  0xd2   : > { %v11917_v42 = vld [vmem:[%s20839_s1 + $0x18e0] sm:$0xf]  ;;  %v13757_v62 = vld [vmem:[%s20839_s1 + $0x1bec] sm:$0xf0]  ;;  %v11678_v8 = vor.u32 %v13601_v37, %v11677_v34  ;;  %6841 = vmatpush.bf16.msrb.mxu1 %v11422_v2  ;;  %v15287_v37 = vpop.f32.mrf.mxu1  ;;  %v12887_v1 = vld [vmem:[%s20839_s1 + $0xc4] sm:$0xf] }
  0xd3   : > { %v12045_v49 = vld [vmem:[%s20839_s1 + $0x19e0] sm:$0xf]  ;;  %v8685_v63 = vld [vmem:[%s14241_s14 + $0x50] sm:$0xf]  ;;  %v11918_v9 = vor.u32 %v13661_v48, %v11917_v42  ;;  %6855 = vmatpush.bf16.msrb.mxu2 %v11550_v3  ;;  %20915 = vst [vmem:[#allocation22_spill] sm:$0xff] %v15277_v28  ;;  %v15289_v42 = vor.u32 %v12842_v11, %v8695_v12 }
  0xd4   : > { %v12173_v54 = vld [vmem:[%s20839_s1 + $0x1ae0] sm:$0xf]  ;;  %v12857_v0 = vld [vmem:[%s14241_s14 + $0xcc] sm:$0xf0]  ;;  %v12046_v13 = vor.u32 %v13693_v52, %v12045_v49  ;;  %6869 = vmatpush.bf16.msrb.mxu3 %v11678_v8 }
  0xd5   : > { %v12301_v58 = vld [vmem:[%s20839_s1 + $0x1be0] sm:$0xf]  ;;  %v12174_v15 = vor.u32 %v13725_v57, %v12173_v54  ;;  %v13657_v18 = vld [vmem:[%s20839_s1 + $0x18cc] sm:$0xf0]  ;;  %v15266_v23 = vor.u32 %v12857_v0, %v8685_v63  ;;  %6876 = vmatpush.bf16.msra.mxu0 %v11918_v9  ;;  %20917 = vst [vmem:[#allocation24_spill] sm:$0xff] %v15289_v42  ;;  %6842 = vmatmul.bf16.vlgmr.msrb.gmra.mxu1 %v15279_v29  ;;  %v15330_v9 = vpop.f32.mrf.mxu3 }
  0xd6   : > { %v11901_v17 = vld [vmem:[%s20839_s1 + $0x18c0] sm:$0xf]  ;;  %v12302_v22 = vor.u32 %v13757_v62, %v12301_v58  ;;  %v13689_v25 = vld [vmem:[%s20839_s1 + $0x19cc] sm:$0xf0]  ;;  %6890 = vmatpush.bf16.msra.mxu1 %v12046_v13  ;;  %6856 = vmatmul.bf16.vlgmr.msrb.gmra.mxu2 %v15277_v28  ;;  %20919 = vst [vmem:[#allocation26_spill] sm:$0xff] %v15330_v9  ;;  %v6605_v13 = vpop.f32.mrf.mxu0 }
  0xd7   : > { %v12029_v21 = vld [vmem:[%s20839_s1 + $0x19c0] sm:$0xf]  ;;  %20914 = vst [vmem:[#allocation21_spill] sm:$0xff] %v15266_v23  ;;  %v13721_v27 = vld [vmem:[%s20839_s1 + $0x1acc] sm:$0xf0]  ;;  %v11902_v45 = vor.u32 %v13657_v18, %v11901_v17  ;;  %6904 = vmatpush.bf16.msra.mxu2 %v12174_v15  ;;  %6828 = vmatmul.bf16.vlgmr.msrb.gmra.mxu0 %v15266_v23  ;;  %v6606_v18 = vadd.f32 %v6605_v13, %v15249_v6 }
  0xd8   : > { %v12157_v26 = vld [vmem:[%s20839_s1 + $0x1ac0] sm:$0xf]  ;;  %v13753_v34 = vld [vmem:[%s20839_s1 + $0x1bcc] sm:$0xf0]  ;;  %v12030_v48 = vor.u32 %v13689_v25, %v12029_v21  ;;  %6918 = vmatpush.bf16.msra.mxu3 %v12302_v22  ;;  %v12846_v9 = vld [vmem:[%s14241_s14 + $0x7c] sm:$0xf] }
  0xd9   : > { %v12285_v33 = vld [vmem:[%s20839_s1 + $0x1bc0] sm:$0xf]  ;;  %v12158_v49 = vor.u32 %v13721_v27, %v12157_v26  ;;  %v13653_v53 = vld [vmem:[%s20839_s1 + $0x18ac] sm:$0xf0]  ;;  %6870 = vmatmul.bf16.vlgmr.msrb.gmra.mxu3 %v15289_v42  ;;  %6877 = vmatpush.bf16.msra.mxu0 %v11902_v45 }
  0xda   : > { %v11885_v52 = vld [vmem:[%s20839_s1 + $0x18a0] sm:$0xf]  ;;  %v12286_v57 = vor.u32 %v13753_v34, %v12285_v33  ;;  %v13685_v58 = vld [vmem:[%s20839_s1 + $0x19ac] sm:$0xf0]  ;;  %6891 = vmatpush.bf16.msra.mxu1 %v12030_v48  ;;  %v6619_v26 = vpop.f32.mrf.mxu1 }
  0xdb   : > { %v12013_v54 = vld [vmem:[%s20839_s1 + $0x19a0] sm:$0xf]  ;;  %v13717_v61 = vld [vmem:[%s20839_s1 + $0x1aac] sm:$0xf0]  ;;  %v11886_v0 = vor.u32 %v13653_v53, %v11885_v52  ;;  %6905 = vmatpush.bf16.msra.mxu2 %v12158_v49  ;;  %v6620_v45 = vadd.f32 %v6619_v26, %v6606_v18 }
  0xdc   : > { %v12141_v60 = vld [vmem:[%s20839_s1 + $0x1aa0] sm:$0xf]  ;;  %v13749_v63 = vld [vmem:[%s20839_s1 + $0x1bac] sm:$0xf0]  ;;  %v12014_v2 = vor.u32 %v13685_v58, %v12013_v54  ;;  %6919 = vmatpush.bf16.msra.mxu3 %v12286_v57 }
  0xdd   : > { %v12269_v62 = vld [vmem:[%s20839_s1 + $0x1ba0] sm:$0xf]  ;;  %v12142_v3 = vor.u32 %v13717_v61, %v12141_v60  ;;  %v13649_v5 = vld [vmem:[%s20839_s1 + $0x188c] sm:$0xf0]  ;;  %6878 = vmatpush.bf16.msra.mxu0 %v11886_v0 }
  0xde   : > { %v11869_v4 = vld [vmem:[%s20839_s1 + $0x1880] sm:$0xf]  ;;  %v12270_v8 = vor.u32 %v13749_v63, %v12269_v62  ;;  %v13681_v10 = vld [vmem:[%s20839_s1 + $0x198c] sm:$0xf0]  ;;  %6892 = vmatpush.bf16.msra.mxu1 %v12014_v2  ;;  %v6633_v2 = vpop.f32.mrf.mxu2 }
  0xdf   : > { %v11997_v7 = vld [vmem:[%s20839_s1 + $0x1980] sm:$0xf]  ;;  %v13713_v12 = vld [vmem:[%s20839_s1 + $0x1a8c] sm:$0xf0]  ;;  %v11870_v21 = vor.u32 %v13649_v5, %v11869_v4  ;;  %6906 = vmatpush.bf16.msra.mxu2 %v12142_v3 }
  0xe0   : > { %v12125_v11 = vld [vmem:[%s20839_s1 + $0x1a80] sm:$0xf]  ;;  %v13745_v17 = vld [vmem:[%s20839_s1 + $0x1b8c] sm:$0xf0]  ;;  %v11998_v22 = vor.u32 %v13681_v10, %v11997_v7  ;;  %6920 = vmatpush.bf16.msra.mxu3 %v12270_v8  ;;  %v6634_v7 = vadd.f32 %v6633_v2, %v6620_v45 }
  0xe1   : > { %v12253_v15 = vld [vmem:[%s20839_s1 + $0x1b80] sm:$0xf]  ;;  %v12126_v25 = vor.u32 %v13713_v12, %v12125_v11  ;;  %v13645_v33 = vld [vmem:[%s20839_s1 + $0x186c] sm:$0xf0]  ;;  %6879 = vmatpush.bf16.msra.mxu0 %v11870_v21  ;;  %v6647_v11 = vpop.f32.mrf.mxu3 }
  0xe2   : > { %v11853_v27 = vld [vmem:[%s20839_s1 + $0x1860] sm:$0xf]  ;;  %v12254_v6 = vor.u32 %v13745_v17, %v12253_v15  ;;  %v13677_v48 = vld [vmem:[%s20839_s1 + $0x196c] sm:$0xf0]  ;;  %6893 = vmatpush.bf16.msra.mxu1 %v11998_v22  ;;  %v15399_v15 = vadd.f32 %v6647_v11, %v6634_v7 }
  0xe3   : > { %v11981_v34 = vld [vmem:[%s20839_s1 + $0x1960] sm:$0xf]  ;;  %v13709_v52 = vld [vmem:[%s20839_s1 + $0x1a6c] sm:$0xf0]  ;;  %v11854_v57 = vor.u32 %v13645_v33, %v11853_v27  ;;  %6907 = vmatpush.bf16.msra.mxu2 %v12126_v25 }
  0xe4   : > { %v12109_v49 = vld [vmem:[%s20839_s1 + $0x1a60] sm:$0xf]  ;;  %v13741_v54 = vld [vmem:[%s20839_s1 + $0x1b6c] sm:$0xf0]  ;;  %v11982_v58 = vor.u32 %v13677_v48, %v11981_v34  ;;  %6921 = vmatpush.bf16.msra.mxu3 %v12254_v6 }
  0xe5   : > { %v12237_v53 = vld [vmem:[%s20839_s1 + $0x1b60] sm:$0xf]  ;;  %v12110_v60 = vor.u32 %v13709_v52, %v12109_v49  ;;  %v13641_v62 = vld [vmem:[%s20839_s1 + $0x184c] sm:$0xf0]  ;;  %6880 = vmatpush.bf16.msra.mxu0 %v11854_v57 }
  0xe6   : > { %v11837_v61 = vld [vmem:[%s20839_s1 + $0x1840] sm:$0xf]  ;;  %v12238_v0 = vor.u32 %v13741_v54, %v12237_v53  ;;  %v13673_v3 = vld [vmem:[%s20839_s1 + $0x194c] sm:$0xf0]  ;;  %6894 = vmatpush.bf16.msra.mxu1 %v11982_v58 }
  0xe7   : > { %v11965_v63 = vld [vmem:[%s20839_s1 + $0x1940] sm:$0xf]  ;;  %v13705_v5 = vld [vmem:[%s20839_s1 + $0x1a4c] sm:$0xf0]  ;;  %v11838_v12 = vor.u32 %v13641_v62, %v11837_v61  ;;  %6908 = vmatpush.bf16.msra.mxu2 %v12110_v60 }
  0xe8   : > { %v12093_v4 = vld [vmem:[%s20839_s1 + $0x1a40] sm:$0xf]  ;;  %v13737_v10 = vld [vmem:[%s20839_s1 + $0x1b4c] sm:$0xf0]  ;;  %v11966_v17 = vor.u32 %v13673_v3, %v11965_v63  ;;  %6922 = vmatpush.bf16.msra.mxu3 %v12238_v0 }
  0xe9   : > { %v12221_v8 = vld [vmem:[%s20839_s1 + $0x1b40] sm:$0xf]  ;;  %v12094_v18 = vor.u32 %v13705_v5, %v12093_v4  ;;  %v13637_v21 = vld [vmem:[%s20839_s1 + $0x182c] sm:$0xf0]  ;;  %6881 = vmatpush.bf16.msra.mxu0 %v11838_v12 }
  0xea   : > { %v11821_v13 = vld [vmem:[%s20839_s1 + $0x1820] sm:$0xf]  ;;  %v13669_v25 = vld [vmem:[%s20839_s1 + $0x192c] sm:$0xf0]  ;;  %v12222_v26 = vor.u32 %v13737_v10, %v12221_v8  ;;  %6895 = vmatpush.bf16.msra.mxu1 %v11966_v17 }
  0xeb   : > { %v11949_v22 = vld [vmem:[%s20839_s1 + $0x1920] sm:$0xf]  ;;  %v13701_v33 = vld [vmem:[%s20839_s1 + $0x1a2c] sm:$0xf0]  ;;  %v11822_v49 = vor.u32 %v13637_v21, %v11821_v13  ;;  %6909 = vmatpush.bf16.msra.mxu2 %v12094_v18  ;;  %v8709_v21 = vld [vmem:[%s14241_s14 + $0x68] sm:$0xf] }
  0xec   : > { %v12077_v27 = vld [vmem:[%s20839_s1 + $0x1a20] sm:$0xf]  ;;  %v13733_v6 = vld [vmem:[%s20839_s1 + $0x1b2c] sm:$0xf0]  ;;  %v11950_v58 = vor.u32 %v13669_v25, %v11949_v22  ;;  %6923 = vmatpush.bf16.msra.mxu3 %v12222_v26  ;;  %v12860_v22 = vld [vmem:[%s14241_s14 + $0xe4] sm:$0xf0] }
  0xed   : > { %v12205_v34 = vld [vmem:[%s20839_s1 + $0x1b20] sm:$0xf]  ;;  %v13633_v48 = vld [vmem:[%s20839_s1 + $0x180c] sm:$0xf0]  ;;  %v12078_v60 = vor.u32 %v13701_v33, %v12077_v27  ;;  %6882 = vmatpush.bf16.msra.mxu0 %v11822_v49  ;;  %v12843_v25 = vld [vmem:[%s14241_s14 + $0x64] sm:$0xf] }
  0xee   : > { %v11805_v45 = vld [vmem:[%s20839_s1 + $0x1800] sm:$0xf]  ;;  %v13665_v53 = vld [vmem:[%s20839_s1 + $0x190c] sm:$0xf0]  ;;  %v12206_v0 = vor.u32 %v13733_v6, %v12205_v34  ;;  %6896 = vmatpush.bf16.msra.mxu1 %v11950_v58  ;;  %v8703_v33 = vld [vmem:[%s14241_s14 + $0xe0] sm:$0xf0] }
  0xef   : > { %v11933_v52 = vld [vmem:[%s20839_s1 + $0x1900] sm:$0xf]  ;;  %v13697_v57 = vld [vmem:[%s20839_s1 + $0x1a0c] sm:$0xf0]  ;;  %v11806_v10 = vor.u32 %v13633_v48, %v11805_v45  ;;  %6910 = vmatpush.bf16.msra.mxu2 %v12078_v60  ;;  %v12844_v34 = vld [vmem:[%s14241_s14 + $0x6c] sm:$0xf] }
  0xf0   : > { %v12061_v54 = vld [vmem:[%s20839_s1 + $0x1a00] sm:$0xf]  ;;  %v13729_v62 = vld [vmem:[%s20839_s1 + $0x1b0c] sm:$0xf0]  ;;  %v11934_v17 = vor.u32 %v13665_v53, %v11933_v52  ;;  %6924 = vmatpush.bf16.msra.mxu3 %v12206_v0  ;;  %v8711_v6 = vld [vmem:[%s14241_s14 + $0xe8] sm:$0xf0]  ;;  %v15502_v0 = vor.u32 %v12843_v25, %v8703_v33 }
  0xf1   : > { %v12189_v61 = vld [vmem:[%s20839_s1 + $0x1b00] sm:$0xf]  ;;  %v13789_v2 = vld [vmem:[%s20839_s1 + $0x1cec] sm:$0xf0]  ;;  %v12062_v18 = vor.u32 %v13697_v57, %v12061_v54  ;;  %6883 = vmatpush.bf16.msra.mxu0 %v11806_v10 }
  0xf2   : > { %v12429_v63 = vld [vmem:[%s20839_s1 + $0x1ce0] sm:$0xf]  ;;  %v13821_v4 = vld [vmem:[%s20839_s1 + $0x1dec] sm:$0xf0]  ;;  %v12190_v26 = vor.u32 %v13729_v62, %v12189_v61  ;;  %v15498_v62 = vpop.f32.mrf.mxu0  ;;  %6897 = vmatpush.bf16.msra.mxu1 %v11934_v17 }
  0xf3   : > { %v12557_v3 = vld [vmem:[%s20839_s1 + $0x1de0] sm:$0xf]  ;;  %v13853_v7 = vld [vmem:[%s20839_s1 + $0x1eec] sm:$0xf0]  ;;  %v12430_v27 = vor.u32 %v13789_v2, %v12429_v63  ;;  %20920 = vst [vmem:[#allocation27_spill] sm:$0xff] %v15498_v62  ;;  %6911 = vmatpush.bf16.msra.mxu2 %v12062_v18  ;;  %v15500_v63 = vor.u32 %v12860_v22, %v8709_v21 }
  0xf4   : > { %v12685_v5 = vld [vmem:[%s20839_s1 + $0x1ee0] sm:$0xf]  ;;  %v13885_v11 = vld [vmem:[%s20839_s1 + $0x1fec] sm:$0xf0]  ;;  %v12558_v45 = vor.u32 %v13821_v4, %v12557_v3  ;;  %v15510_v4 = vpop.f32.mrf.mxu1  ;;  %6925 = vmatpush.bf16.msra.mxu3 %v12190_v26 }
  0xf5   : > { %v12813_v8 = vld [vmem:[%s20839_s1 + $0x1fe0] sm:$0xf]  ;;  %v12686_v48 = vor.u32 %v13853_v7, %v12685_v5  ;;  %v13785_v52 = vld [vmem:[%s20839_s1 + $0x1ccc] sm:$0xf0]  ;;  %20921 = vst [vmem:[#allocation28_spill] sm:$0xff] %v15510_v4  ;;  %6932 = vmatpush.bf16.msrb.mxu0 %v12430_v27  ;;  %v15512_v5 = vor.u32 %v12844_v34, %v8711_v6  ;;  %6898 = vmatmul.bf16.vlgmr.msra.gmra.mxu1 %v15502_v0 }
  0xf6   : > { %v8701_v12 = vld [vmem:[%s14241_s14 + $0x60] sm:$0xf]  ;;  %v12814_v54 = vor.u32 %v13885_v11, %v12813_v8  ;;  %v13817_v58 = vld [vmem:[%s20839_s1 + $0x1dcc] sm:$0xf0]  ;;  %6946 = vmatpush.bf16.msrb.mxu1 %v12558_v45  ;;  %6912 = vmatmul.bf16.vlgmr.msra.gmra.mxu2 %v15500_v63 }
  0xf7   : > { %v12859_v13 = vld [vmem:[%s14241_s14 + $0xdc] sm:$0xf0]  ;;  %v13849_v61 = vld [vmem:[%s20839_s1 + $0x1ecc] sm:$0xf0]  ;;  %20922 = vst [vmem:[#allocation29_spill] sm:$0xff] %v15512_v5  ;;  %6960 = vmatpush.bf16.msrb.mxu2 %v12686_v48  ;;  %6926 = vmatmul.bf16.vlgmr.msra.gmra.mxu3 %v15512_v5 }
  0xf8   : > { %v12413_v49 = vld [vmem:[%s20839_s1 + $0x1cc0] sm:$0xf]  ;;  %v15487_v57 = vor.u32 %v12859_v13, %v8701_v12  ;;  %v13881_v3 = vld [vmem:[%s20839_s1 + $0x1fcc] sm:$0xf0]  ;;  %6974 = vmatpush.bf16.msrb.mxu3 %v12814_v54 }
  0xf9   : > { %v12541_v53 = vld [vmem:[%s20839_s1 + $0x1dc0] sm:$0xf]  ;;  %v12414_v7 = vor.u32 %v13785_v52, %v12413_v49  ;;  %v13781_v12 = vld [vmem:[%s20839_s1 + $0x1cac] sm:$0xf0]  ;;  %v15551_v49 = vpop.f32.mrf.mxu2 }
  0xfa   : > { %v12669_v60 = vld [vmem:[%s20839_s1 + $0x1ec0] sm:$0xf]  ;;  %v12542_v8 = vor.u32 %v13817_v58, %v12541_v53  ;;  %6884 = vmatmul.bf16.vlgmr.msra.gmra.mxu0 %v15487_v57  ;;  %v13813_v18 = vld [vmem:[%s20839_s1 + $0x1dac] sm:$0xf0]  ;;  %20923 = vst [vmem:[#allocation30_spill] sm:$0xff] %v15551_v49 }
  0xfb   : > { %v12797_v2 = vld [vmem:[%s20839_s1 + $0x1fc0] sm:$0xf]  ;;  %v12670_v10 = vor.u32 %v13849_v61, %v12669_v60  ;;  %v13845_v22 = vld [vmem:[%s20839_s1 + $0x1eac] sm:$0xf0]  ;;  %6933 = vmatpush.bf16.msrb.mxu0 %v12414_v7  ;;  %v15562_v60 = vpop.f32.mrf.mxu3  ;;  %v6661_v61 = vpop.f32.mrf.mxu0  ;;  %v12845_v49 = vld [vmem:[%s14241_s14 + $0x74] sm:$0xf] }
  0xfc   : > { %v12397_v11 = vld [vmem:[%s20839_s1 + $0x1ca0] sm:$0xf]  ;;  %v12798_v17 = vor.u32 %v13881_v3, %v12797_v2  ;;  %v13877_v26 = vld [vmem:[%s20839_s1 + $0x1fac] sm:$0xf0]  ;;  %6947 = vmatpush.bf16.msrb.mxu1 %v12542_v8  ;;  %20924 = vst [vmem:[#allocation31_spill] sm:$0xff] %v15562_v60  ;;  %v6662_v7 = vadd.f32 %v6661_v61, %v15399_v15 }
  0xfd   : > { %v12525_v13 = vld [vmem:[%s20839_s1 + $0x1da0] sm:$0xf]  ;;  %v12398_v27 = vor.u32 %v13781_v12, %v12397_v11  ;;  %6961 = vmatpush.bf16.msrb.mxu2 %v12670_v10  ;;  %v13777_v45 = vld [vmem:[%s20839_s1 + $0x1c8c] sm:$0xf0]  ;;  %v6675_v10 = vpop.f32.mrf.mxu1  ;;  %v12862_v60 = vld [vmem:[%s14241_s14 + $0xf4] sm:$0xf0] }
  0xfe   : > { %v12653_v21 = vld [vmem:[%s20839_s1 + $0x1ea0] sm:$0xf]  ;;  %v12526_v33 = vor.u32 %v13813_v18, %v12525_v13  ;;  %6975 = vmatpush.bf16.msrb.mxu3 %v12798_v17  ;;  %v13809_v53 = vld [vmem:[%s20839_s1 + $0x1d8c] sm:$0xf0] }
  0xff   : > { %v12781_v25 = vld [vmem:[%s20839_s1 + $0x1fa0] sm:$0xf]  ;;  %v12654_v34 = vor.u32 %v13845_v22, %v12653_v21  ;;  %v13841_v58 = vld [vmem:[%s20839_s1 + $0x1e8c] sm:$0xf0]  ;;  %6934 = vmatpush.bf16.msrb.mxu0 %v12398_v27  ;;  %v6676_v21 = vadd.f32 %v6675_v10, %v6662_v7 }
 0x100   : > { %v12381_v6 = vld [vmem:[%s20839_s1 + $0x1c80] sm:$0xf]  ;;  %v12782_v52 = vor.u32 %v13877_v26, %v12781_v25  ;;  %v13873_v3 = vld [vmem:[%s20839_s1 + $0x1f8c] sm:$0xf0]  ;;  %6948 = vmatpush.bf16.msrb.mxu1 %v12526_v33 }
 0x101   : > { %v12509_v48 = vld [vmem:[%s20839_s1 + $0x1d80] sm:$0xf]  ;;  %v12382_v8 = vor.u32 %v13777_v45, %v12381_v6  ;;  %6962 = vmatpush.bf16.msrb.mxu2 %v12654_v34  ;;  %v13773_v17 = vld [vmem:[%s20839_s1 + $0x1c6c] sm:$0xf0] }
 0x102   : > { %v12637_v54 = vld [vmem:[%s20839_s1 + $0x1e80] sm:$0xf]  ;;  %v12510_v11 = vor.u32 %v13809_v53, %v12509_v48  ;;  %6976 = vmatpush.bf16.msrb.mxu3 %v12782_v52  ;;  %v13805_v22 = vld [vmem:[%s20839_s1 + $0x1d6c] sm:$0xf0] }
 0x103   : > { %v12765_v2 = vld [vmem:[%s20839_s1 + $0x1f80] sm:$0xf]  ;;  %v12638_v12 = vor.u32 %v13841_v58, %v12637_v54  ;;  %v13837_v26 = vld [vmem:[%s20839_s1 + $0x1e6c] sm:$0xf0]  ;;  %6935 = vmatpush.bf16.msrb.mxu0 %v12382_v8  ;;  %v6689_v58 = vpop.f32.mrf.mxu2  ;;  %v6703_v8 = vpop.f32.mrf.mxu3 }
 0x104   : > { %v12365_v13 = vld [vmem:[%s20839_s1 + $0x1c60] sm:$0xf]  ;;  %v12766_v15 = vor.u32 %v13873_v3, %v12765_v2  ;;  %v13869_v33 = vld [vmem:[%s20839_s1 + $0x1f6c] sm:$0xf0]  ;;  %6949 = vmatpush.bf16.msrb.mxu1 %v12510_v11  ;;  %v6690_v7 = vadd.f32 %v6689_v58, %v6676_v21 }
 0x105   : > { %v12493_v18 = vld [vmem:[%s20839_s1 + $0x1d60] sm:$0xf]  ;;  %v12366_v34 = vor.u32 %v13773_v17, %v12365_v13  ;;  %6963 = vmatpush.bf16.msrb.mxu2 %v12638_v12  ;;  %v13769_v52 = vld [vmem:[%s20839_s1 + $0x1c4c] sm:$0xf0] }
 0x106   : > { %v12621_v25 = vld [vmem:[%s20839_s1 + $0x1e60] sm:$0xf]  ;;  %v12494_v6 = vor.u32 %v13805_v22, %v12493_v18  ;;  %6977 = vmatpush.bf16.msrb.mxu3 %v12766_v15  ;;  %v13801_v61 = vld [vmem:[%s20839_s1 + $0x1d4c] sm:$0xf0]  ;;  %v15622_v17 = vadd.f32 %v6703_v8, %v6690_v7 }
 0x107   : > { %v12749_v27 = vld [vmem:[%s20839_s1 + $0x1f60] sm:$0xf]  ;;  %v12622_v45 = vor.u32 %v13837_v26, %v12621_v25  ;;  %v13833_v3 = vld [vmem:[%s20839_s1 + $0x1e4c] sm:$0xf0]  ;;  %6936 = vmatpush.bf16.msrb.mxu0 %v12366_v34 }
 0x108   : > { %v12349_v48 = vld [vmem:[%s20839_s1 + $0x1c40] sm:$0xf]  ;;  %v12750_v54 = vor.u32 %v13869_v33, %v12749_v27  ;;  %v13865_v11 = vld [vmem:[%s20839_s1 + $0x1f4c] sm:$0xf0]  ;;  %6950 = vmatpush.bf16.msrb.mxu1 %v12494_v6 }
 0x109   : > { %v12477_v53 = vld [vmem:[%s20839_s1 + $0x1d40] sm:$0xf]  ;;  %v12350_v12 = vor.u32 %v13769_v52, %v12349_v48  ;;  %6964 = vmatpush.bf16.msrb.mxu2 %v12622_v45  ;;  %v13765_v21 = vld [vmem:[%s20839_s1 + $0x1c2c] sm:$0xf0] }
 0x10a   : > { %v12605_v2 = vld [vmem:[%s20839_s1 + $0x1e40] sm:$0xf]  ;;  %v12478_v18 = vor.u32 %v13801_v61, %v12477_v53  ;;  %v13797_v25 = vld [vmem:[%s20839_s1 + $0x1d2c] sm:$0xf0]  ;;  %6978 = vmatpush.bf16.msrb.mxu3 %v12750_v54 }
 0x10b   : > { %v12733_v10 = vld [vmem:[%s20839_s1 + $0x1f40] sm:$0xf]  ;;  %v12606_v15 = vor.u32 %v13833_v3, %v12605_v2  ;;  %v13829_v33 = vld [vmem:[%s20839_s1 + $0x1e2c] sm:$0xf0]  ;;  %6937 = vmatpush.bf16.msrb.mxu0 %v12350_v12  ;;  %v8847_v12 = vld [vmem:[%s20839_s1 + $0xf0] sm:$0xf0] }
 0x10c   : > { %v12333_v13 = vld [vmem:[%s20839_s1 + $0x1c20] sm:$0xf]  ;;  %v12734_v26 = vor.u32 %v13865_v11, %v12733_v10  ;;  %v13861_v6 = vld [vmem:[%s20839_s1 + $0x1f2c] sm:$0xf0]  ;;  %6951 = vmatpush.bf16.msrb.mxu1 %v12478_v18  ;;  %v12891_v10 = vld [vmem:[%s20839_s1 + $0xe4] sm:$0xf] }
 0x10d   : > { %v12461_v22 = vld [vmem:[%s20839_s1 + $0x1d20] sm:$0xf]  ;;  %v13761_v48 = vld [vmem:[%s20839_s1 + $0x1c0c] sm:$0xf0]  ;;  %v12334_v52 = vor.u32 %v13765_v21, %v12333_v13  ;;  %6965 = vmatpush.bf16.msrb.mxu2 %v12606_v15  ;;  %v12923_v13 = vld [vmem:[%s20839_s1 + $0x1e4] sm:$0xf]  ;;  %v8850_v62 = vor.u32 %v12891_v10, %v8847_v12  ;;  %v15723_v10 = vor.u32 %v12862_v60, %v8725_v50 }
 0x10e   : > { %v12589_v27 = vld [vmem:[%s20839_s1 + $0x1e20] sm:$0xf]  ;;  %v13793_v54 = vld [vmem:[%s20839_s1 + $0x1d0c] sm:$0xf0]  ;;  %v12462_v2 = vor.u32 %v13797_v25, %v12461_v22  ;;  %6979 = vmatpush.bf16.msrb.mxu3 %v12734_v26  ;;  %v8975_v18 = vld [vmem:[%s20839_s1 + $0x1f0] sm:$0xf0] }
 0x10f   : > { %v12717_v34 = vld [vmem:[%s20839_s1 + $0x1f20] sm:$0xf]  ;;  %v13825_v61 = vld [vmem:[%s20839_s1 + $0x1e0c] sm:$0xf0]  ;;  %v12590_v3 = vor.u32 %v13829_v33, %v12589_v27  ;;  %v12955_v15 = vld [vmem:[%s20839_s1 + $0x2e4] sm:$0xf]  ;;  %6938 = vmatpush.bf16.msrb.mxu0 %v12334_v52 }
 0x110   : > { %v12317_v45 = vld [vmem:[%s20839_s1 + $0x1c00] sm:$0xf]  ;;  %v13857_v8 = vld [vmem:[%s20839_s1 + $0x1f0c] sm:$0xf0]  ;;  %v12718_v11 = vor.u32 %v13861_v6, %v12717_v34  ;;  %v9103_v21 = vld [vmem:[%s20839_s1 + $0x2f0] sm:$0xf0]  ;;  %6952 = vmatpush.bf16.msrb.mxu1 %v12462_v2 }
 0x111   : > { %v12445_v53 = vld [vmem:[%s20839_s1 + $0x1d00] sm:$0xf]  ;;  %v12987_v22 = vld [vmem:[%s20839_s1 + $0x3e4] sm:$0xf]  ;;  %v12318_v25 = vor.u32 %v13761_v48, %v12317_v45  ;;  %v9231_v26 = vld [vmem:[%s20839_s1 + $0x3f0] sm:$0xf0]  ;;  %6966 = vmatpush.bf16.msrb.mxu2 %v12590_v3  ;;  %v8978_v48 = vor.u32 %v12923_v13, %v8975_v18  ;;  %v9106_v5 = vor.u32 %v12955_v15, %v9103_v21  ;;  %v15733_v18 = vpop.f32.mrf.mxu1 }
 0x112   : > { %v12573_v58 = vld [vmem:[%s20839_s1 + $0x1e00] sm:$0xf]  ;;  %v8717_v27 = vld [vmem:[%s14241_s14 + $0x70] sm:$0xf]  ;;  %v12446_v34 = vor.u32 %v13793_v54, %v12445_v53  ;;  %6980 = vmatpush.bf16.msrb.mxu3 %v12718_v11  ;;  %v8719_v52 = vld [vmem:[%s14241_s14 + $0xf0] sm:$0xf0] }
 0x113   : > { %v12701_v7 = vld [vmem:[%s20839_s1 + $0x1f00] sm:$0xf]  ;;  %v12861_v33 = vld [vmem:[%s14241_s14 + $0xec] sm:$0xf0]  ;;  %v12574_v6 = vor.u32 %v13825_v61, %v12573_v58  ;;  %v8727_v45 = vld [vmem:[%s14241_s14 + $0xf8] sm:$0xf0]  ;;  %6939 = vmatpush.bf16.msrb.mxu0 %v12318_v25  ;;  %v9234_v58 = vor.u32 %v12987_v22, %v9231_v26  ;;  %v15725_v11 = vor.u32 %v12845_v49, %v8719_v52 }
 0x114   : > { %v12702_v4 = vor.u32 %v13857_v8, %v12701_v7  ;;  %v8831_v53 = vld [vmem:[%s20839_s1 + $0xd0] sm:$0xf0]  ;;  %v12919_v54 = vld [vmem:[%s20839_s1 + $0x1c4] sm:$0xf]  ;;  %v15710_v61 = vor.u32 %v12861_v33, %v8717_v27  ;;  %v15721_v8 = vpop.f32.mrf.mxu0  ;;  %6953 = vmatpush.bf16.msrb.mxu1 %v12446_v34  ;;  %v15735_v15 = vor.u32 %v12846_v9, %v8727_v45 }
 0x115   : > { %v8959_v2 = vld [vmem:[%s20839_s1 + $0x1d0] sm:$0xf0]  ;;  %v12951_v3 = vld [vmem:[%s20839_s1 + $0x2c4] sm:$0xf]  ;;  %6967 = vmatpush.bf16.msrb.mxu2 %v12574_v6  ;;  %v8834_v21 = vor.u32 %v12887_v1, %v8831_v53 }
 0x116   : > { %v9087_v7 = vld [vmem:[%s20839_s1 + $0x2d0] sm:$0xf0]  ;;  %v12983_v12 = vld [vmem:[%s20839_s1 + $0x3c4] sm:$0xf]  ;;  %6981 = vmatpush.bf16.msrb.mxu3 %v12702_v4  ;;  %v8962_v50 = vor.u32 %v12919_v54, %v8959_v2  ;;  %6940 = vmatmul.bf16.vlgmr.msrb.gmra.mxu0 %v15710_v61 }
 0x117   : > { %v9215_v13 = vld [vmem:[%s20839_s1 + $0x3d0] sm:$0xf0]  ;;  %6988 = vmatpush.bf16.msra.mxu0 %v8850_v62  ;;  %v9090_v49 = vor.u32 %v12951_v3, %v9087_v7  ;;  %v12883_v60 = vld [vmem:[%s20839_s1 + $0xa4] sm:$0xf]  ;;  %6954 = vmatmul.bf16.vlgmr.msrb.gmra.mxu1 %v15725_v11  ;;  %v15785_v3 = vpop.f32.mrf.mxu3 }
 0x118   : > { %7002 = vmatpush.bf16.msra.mxu1 %v8978_v48  ;;  %v8815_v22 = vld [vmem:[%s20839_s1 + $0xb0] sm:$0xf0]  ;;  %v12915_v4 = vld [vmem:[%s20839_s1 + $0x1a4] sm:$0xf]  ;;  %v9218_v1 = vor.u32 %v12983_v12, %v9215_v13  ;;  %6968 = vmatmul.bf16.vlgmr.msrb.gmra.mxu2 %v15723_v10  ;;  %v15774_v48 = vpop.f32.mrf.mxu2 }
 0x119   : > { %7016 = vmatpush.bf16.msra.mxu2 %v9106_v5  ;;  %v8943_v9 = vld [vmem:[%s20839_s1 + $0x1b0] sm:$0xf0]  ;;  %v12947_v62 = vld [vmem:[%s20839_s1 + $0x2a4] sm:$0xf]  ;;  %6982 = vmatmul.bf16.vlgmr.msrb.gmra.mxu3 %v15735_v15  ;;  %v8818_v27 = vor.u32 %v12883_v60, %v8815_v22 }
 0x11a   : > { %7030 = vmatpush.bf16.msra.mxu3 %v9234_v58  ;;  %v9071_v5 = vld [vmem:[%s20839_s1 + $0x2b0] sm:$0xf0]  ;;  %v12979_v25 = vld [vmem:[%s20839_s1 + $0x3a4] sm:$0xf]  ;;  %v8946_v33 = vor.u32 %v12915_v4, %v8943_v9 }
 0x11b   : > { %v9199_v26 = vld [vmem:[%s20839_s1 + $0x3b0] sm:$0xf0]  ;;  %6989 = vmatpush.bf16.msra.mxu0 %v8834_v21  ;;  %v9074_v34 = vor.u32 %v12947_v62, %v9071_v5  ;;  %v12879_v6 = vld [vmem:[%s20839_s1 + $0x84] sm:$0xf] }
 0x11c   : > { %7003 = vmatpush.bf16.msra.mxu1 %v8962_v50  ;;  %v8799_v52 = vld [vmem:[%s20839_s1 + $0x90] sm:$0xf0]  ;;  %v12911_v45 = vld [vmem:[%s20839_s1 + $0x184] sm:$0xf]  ;;  %v9202_v53 = vor.u32 %v12979_v25, %v9199_v26  ;;  %v6717_v7 = vpop.f32.mrf.mxu0 }
 0x11d   : > { %7017 = vmatpush.bf16.msra.mxu2 %v9090_v49  ;;  %v8927_v54 = vld [vmem:[%s20839_s1 + $0x190] sm:$0xf0]  ;;  %v12943_v58 = vld [vmem:[%s20839_s1 + $0x284] sm:$0xf]  ;;  %v6718_v21 = vadd.f32 %v6717_v7, %v15622_v17  ;;  %v8802_v50 = vor.u32 %v12879_v6, %v8799_v52  ;;  %v6731_v49 = vpop.f32.mrf.mxu1 }
 0x11e   : > { %7031 = vmatpush.bf16.msra.mxu3 %v9218_v1  ;;  %v9055_v2 = vld [vmem:[%s20839_s1 + $0x290] sm:$0xf0]  ;;  %v12975_v12 = vld [vmem:[%s20839_s1 + $0x384] sm:$0xf]  ;;  %v8930_v60 = vor.u32 %v12911_v45, %v8927_v54 }
 0x11f   : > { %v9183_v13 = vld [vmem:[%s20839_s1 + $0x390] sm:$0xf0]  ;;  %6990 = vmatpush.bf16.msra.mxu0 %v8818_v27  ;;  %v9058_v22 = vor.u32 %v12943_v58, %v9055_v2  ;;  %v12875_v4 = vld [vmem:[%s20839_s1 + $0x64] sm:$0xf]  ;;  %v6732_v62 = vadd.f32 %v6731_v49, %v6718_v21 }
 0x120   : > { %7004 = vmatpush.bf16.msra.mxu1 %v8946_v33  ;;  %v8783_v1 = vld [vmem:[%s20839_s1 + $0x70] sm:$0xf0]  ;;  %v12907_v9 = vld [vmem:[%s20839_s1 + $0x164] sm:$0xf]  ;;  %v9186_v17 = vor.u32 %v12975_v12, %v9183_v13  ;;  %v6745_v2 = vpop.f32.mrf.mxu2 }
 0x121   : > { %7018 = vmatpush.bf16.msra.mxu2 %v9074_v34  ;;  %v8911_v5 = vld [vmem:[%s20839_s1 + $0x170] sm:$0xf0]  ;;  %v12939_v25 = vld [vmem:[%s20839_s1 + $0x264] sm:$0xf]  ;;  %v8786_v34 = vor.u32 %v12875_v4, %v8783_v1  ;;  %v6746_v21 = vadd.f32 %v6745_v2, %v6732_v62 }
 0x122   : > { %7032 = vmatpush.bf16.msra.mxu3 %v9202_v53  ;;  %v9039_v26 = vld [vmem:[%s20839_s1 + $0x270] sm:$0xf0]  ;;  %v12971_v27 = vld [vmem:[%s20839_s1 + $0x364] sm:$0xf]  ;;  %v8914_v6 = vor.u32 %v12907_v9, %v8911_v5 }
 0x123   : > { %v9167_v33 = vld [vmem:[%s20839_s1 + $0x370] sm:$0xf0]  ;;  %6991 = vmatpush.bf16.msra.mxu0 %v8802_v50  ;;  %v9042_v52 = vor.u32 %v12939_v25, %v9039_v26  ;;  %v12871_v45 = vld [vmem:[%s20839_s1 + $0x44] sm:$0xf]  ;;  %v6759_v50 = vpop.f32.mrf.mxu3 }
 0x124   : > { %7005 = vmatpush.bf16.msra.mxu1 %v8930_v60  ;;  %v8767_v53 = vld [vmem:[%s20839_s1 + $0x50] sm:$0xf0]  ;;  %v12903_v54 = vld [vmem:[%s20839_s1 + $0x144] sm:$0xf]  ;;  %v9170_v58 = vor.u32 %v12971_v27, %v9167_v33  ;;  %v15842_v4 = vadd.f32 %v6759_v50, %v6746_v21 }
 0x125   : > { %7019 = vmatpush.bf16.msra.mxu2 %v9058_v22  ;;  %v8895_v7 = vld [vmem:[%s20839_s1 + $0x150] sm:$0xf0]  ;;  %v12935_v12 = vld [vmem:[%s20839_s1 + $0x244] sm:$0xf]  ;;  %v8770_v22 = vor.u32 %v12871_v45, %v8767_v53 }
 0x126   : > { %7033 = vmatpush.bf16.msra.mxu3 %v9186_v17  ;;  %v9023_v13 = vld [vmem:[%s20839_s1 + $0x250] sm:$0xf0]  ;;  %v12967_v49 = vld [vmem:[%s20839_s1 + $0x344] sm:$0xf]  ;;  %v8898_v1 = vor.u32 %v12903_v54, %v8895_v7 }
 0x127   : > { %v9151_v60 = vld [vmem:[%s20839_s1 + $0x350] sm:$0xf0]  ;;  %6992 = vmatpush.bf16.msra.mxu0 %v8786_v34  ;;  %v9026_v9 = vor.u32 %v12935_v12, %v9023_v13  ;;  %v12867_v17 = vld [vmem:[%s20839_s1 + $0x24] sm:$0xf] }
 0x128   : > { %7006 = vmatpush.bf16.msra.mxu1 %v8914_v6  ;;  %v8751_v62 = vld [vmem:[%s20839_s1 + $0x30] sm:$0xf0]  ;;  %v12899_v5 = vld [vmem:[%s20839_s1 + $0x124] sm:$0xf]  ;;  %v9154_v25 = vor.u32 %v12967_v49, %v9151_v60 }
 0x129   : > { %7020 = vmatpush.bf16.msra.mxu2 %v9042_v52  ;;  %v8879_v26 = vld [vmem:[%s20839_s1 + $0x130] sm:$0xf0]  ;;  %v12931_v27 = vld [vmem:[%s20839_s1 + $0x224] sm:$0xf]  ;;  %v8754_v52 = vor.u32 %v12867_v17, %v8751_v62 }
 0x12a   : > { %7034 = vmatpush.bf16.msra.mxu3 %v9170_v58  ;;  %v9007_v33 = vld [vmem:[%s20839_s1 + $0x230] sm:$0xf0]  ;;  %v12963_v34 = vld [vmem:[%s20839_s1 + $0x324] sm:$0xf]  ;;  %v8882_v54 = vor.u32 %v12899_v5, %v8879_v26 }
 0x12b   : > { %v9135_v6 = vld [vmem:[%s20839_s1 + $0x330] sm:$0xf0]  ;;  %6993 = vmatpush.bf16.msra.mxu0 %v8770_v22  ;;  %v12863_v45 = vld [vmem:[%s20839_s1 + $0x4] sm:$0xf]  ;;  %v9010_v58 = vor.u32 %v12931_v27, %v9007_v33 }
 0x12c   : > { %v8735_v53 = vld [vmem:[%s20839_s1 + $0x10] sm:$0xf0]  ;;  %7007 = vmatpush.bf16.msra.mxu1 %v8898_v1  ;;  %v12895_v2 = vld [vmem:[%s20839_s1 + $0x104] sm:$0xf]  ;;  %v9138_v13 = vor.u32 %v12963_v34, %v9135_v6 }
 0x12d   : > { %7021 = vmatpush.bf16.msra.mxu2 %v9026_v9  ;;  %v8863_v7 = vld [vmem:[%s20839_s1 + $0x110] sm:$0xf0]  ;;  %v12927_v12 = vld [vmem:[%s20839_s1 + $0x204] sm:$0xf]  ;;  %v8738_v9 = vor.u32 %v12863_v45, %v8735_v53 }
 0x12e   : > { %7035 = vmatpush.bf16.msra.mxu3 %v9154_v25  ;;  %v8991_v21 = vld [vmem:[%s20839_s1 + $0x210] sm:$0xf0]  ;;  %v12959_v50 = vld [vmem:[%s20839_s1 + $0x304] sm:$0xf]  ;;  %v8866_v25 = vor.u32 %v12895_v2, %v8863_v7 }
 0x12f   : > { %v9119_v49 = vld [vmem:[%s20839_s1 + $0x310] sm:$0xf0]  ;;  %v13019_v60 = vld [vmem:[%s20839_s1 + $0x4e4] sm:$0xf]  ;;  %6994 = vmatpush.bf16.msra.mxu0 %v8754_v52  ;;  %v8994_v26 = vor.u32 %v12927_v12, %v8991_v21  ;;  %v15934_v21 = vpop.f32.mrf.mxu0 }
 0x130   : > { %v9359_v22 = vld [vmem:[%s20839_s1 + $0x4f0] sm:$0xf0]  ;;  %v13051_v1 = vld [vmem:[%s20839_s1 + $0x5e4] sm:$0xf]  ;;  %7008 = vmatpush.bf16.msra.mxu1 %v8882_v54  ;;  %v9122_v34 = vor.u32 %v12959_v50, %v9119_v49 }
 0x131   : > { %v9487_v17 = vld [vmem:[%s20839_s1 + $0x5f0] sm:$0xf0]  ;;  %v13083_v62 = vld [vmem:[%s20839_s1 + $0x6e4] sm:$0xf]  ;;  %7022 = vmatpush.bf16.msra.mxu2 %v9010_v58  ;;  %v9362_v6 = vor.u32 %v13019_v60, %v9359_v22  ;;  %v15942_v60 = vpop.f32.mrf.mxu1 }
 0x132   : > { %v9615_v5 = vld [vmem:[%s20839_s1 + $0x6f0] sm:$0xf0]  ;;  %v13115_v27 = vld [vmem:[%s20839_s1 + $0x7e4] sm:$0xf]  ;;  %7036 = vmatpush.bf16.msra.mxu3 %v9138_v13  ;;  %v9490_v52 = vor.u32 %v13051_v1, %v9487_v17 }
 0x133   : > { %v9743_v33 = vld [vmem:[%s20839_s1 + $0x7f0] sm:$0xf0]  ;;  %v9618_v45 = vor.u32 %v13083_v62, %v9615_v5  ;;  %v13015_v53 = vld [vmem:[%s20839_s1 + $0x4c4] sm:$0xf]  ;;  %6995 = vmatpush.bf16.msra.mxu0 %v8738_v9 }
 0x134   : > { %v9343_v54 = vld [vmem:[%s20839_s1 + $0x4d0] sm:$0xf0]  ;;  %v13047_v58 = vld [vmem:[%s20839_s1 + $0x5c4] sm:$0xf]  ;;  %v9746_v2 = vor.u32 %v13115_v27, %v9743_v33  ;;  %7009 = vmatpush.bf16.msra.mxu1 %v8866_v25 }
 0x135   : > { %v9471_v7 = vld [vmem:[%s20839_s1 + $0x5d0] sm:$0xf0]  ;;  %v13079_v12 = vld [vmem:[%s20839_s1 + $0x6c4] sm:$0xf]  ;;  %7023 = vmatpush.bf16.msra.mxu2 %v8994_v26  ;;  %v9346_v22 = vor.u32 %v13015_v53, %v9343_v54 }
 0x136   : > { %v9599_v13 = vld [vmem:[%s20839_s1 + $0x6d0] sm:$0xf0]  ;;  %v13111_v50 = vld [vmem:[%s20839_s1 + $0x7c4] sm:$0xf]  ;;  %7037 = vmatpush.bf16.msra.mxu3 %v9122_v34  ;;  %v9474_v1 = vor.u32 %v13047_v58, %v9471_v7  ;;  %6996 = vmatmul.bf16.vlgmr.msra.gmra.mxu0 %v14249_v14  ;;  %v15981_v7 = vpop.f32.mrf.mxu2 }
 0x137   : > { %v9727_v49 = vld [vmem:[%s20839_s1 + $0x7d0] sm:$0xf0]  ;;  %7044 = vmatpush.bf16.msrb.mxu0 %v9362_v6  ;;  %v9602_v9 = vor.u32 %v13079_v12, %v9599_v13  ;;  %v13011_v17 = vld [vmem:[%s20839_s1 + $0x4a4] sm:$0xf]  ;;  %7010 = vmatmul.bf16.vlgmr.msra.gmra.mxu1 %v14259_v20 }
 0x138   : > { %7058 = vmatpush.bf16.msrb.mxu1 %v9490_v52  ;;  %v9327_v62 = vld [vmem:[%s20839_s1 + $0x4b0] sm:$0xf0]  ;;  %v13043_v5 = vld [vmem:[%s20839_s1 + $0x5a4] sm:$0xf]  ;;  %v9730_v25 = vor.u32 %v13111_v50, %v9727_v49  ;;  %7024 = vmatmul.bf16.vlgmr.msra.gmra.mxu2 %v14257_v19 }
 0x139   : > { %7072 = vmatpush.bf16.msrb.mxu2 %v9618_v45  ;;  %v9455_v26 = vld [vmem:[%s20839_s1 + $0x5b0] sm:$0xf0]  ;;  %v13075_v27 = vld [vmem:[%s20839_s1 + $0x6a4] sm:$0xf]  ;;  %v9330_v52 = vor.u32 %v13011_v17, %v9327_v62  ;;  %7038 = vmatmul.bf16.vlgmr.msra.gmra.mxu3 %v14263_v24 }
 0x13a   : > { %7086 = vmatpush.bf16.msrb.mxu3 %v9746_v2  ;;  %v9583_v33 = vld [vmem:[%s20839_s1 + $0x6b0] sm:$0xf0]  ;;  %v13107_v34 = vld [vmem:[%s20839_s1 + $0x7a4] sm:$0xf]  ;;  %v9458_v45 = vor.u32 %v13043_v5, %v9455_v26 }
 0x13b   : > { %v9711_v6 = vld [vmem:[%s20839_s1 + $0x7b0] sm:$0xf0]  ;;  %7045 = vmatpush.bf16.msrb.mxu0 %v9346_v22  ;;  %v9586_v53 = vor.u32 %v13075_v27, %v9583_v33  ;;  %v13007_v54 = vld [vmem:[%s20839_s1 + $0x484] sm:$0xf]  ;;  %v15992_v22 = vpop.f32.mrf.mxu3 }
 0x13c   : > { %7059 = vmatpush.bf16.msrb.mxu1 %v9474_v1  ;;  %v9311_v58 = vld [vmem:[%s20839_s1 + $0x490] sm:$0xf0]  ;;  %v13039_v2 = vld [vmem:[%s20839_s1 + $0x584] sm:$0xf]  ;;  %v9714_v12 = vor.u32 %v13107_v34, %v9711_v6  ;;  %v6773_v1 = vpop.f32.mrf.mxu0 }
 0x13d   : > { %7073 = vmatpush.bf16.msrb.mxu2 %v9602_v9  ;;  %v9439_v13 = vld [vmem:[%s20839_s1 + $0x590] sm:$0xf0]  ;;  %v13071_v50 = vld [vmem:[%s20839_s1 + $0x684] sm:$0xf]  ;;  %v6774_v62 = vadd.f32 %v6773_v1, %v15842_v4  ;;  %v9314_v5 = vor.u32 %v13007_v54, %v9311_v58 }
 0x13e   : > { %7087 = vmatpush.bf16.msrb.mxu3 %v9730_v25  ;;  %v9567_v49 = vld [vmem:[%s20839_s1 + $0x690] sm:$0xf0]  ;;  %v13103_v9 = vld [vmem:[%s20839_s1 + $0x784] sm:$0xf]  ;;  %v6787_v25 = vpop.f32.mrf.mxu1  ;;  %v9442_v26 = vor.u32 %v13039_v2, %v9439_v13 }
 0x13f   : > { %v9695_v17 = vld [vmem:[%s20839_s1 + $0x790] sm:$0xf0]  ;;  %7046 = vmatpush.bf16.msrb.mxu0 %v9330_v52  ;;  %v9570_v27 = vor.u32 %v13071_v50, %v9567_v49  ;;  %v13003_v33 = vld [vmem:[%s20839_s1 + $0x464] sm:$0xf]  ;;  %v6788_v52 = vadd.f32 %v6787_v25, %v6774_v62  ;;  %v6801_v62 = vpop.f32.mrf.mxu2 }
 0x140   : > { %7060 = vmatpush.bf16.msrb.mxu1 %v9458_v45  ;;  %v9295_v34 = vld [vmem:[%s20839_s1 + $0x470] sm:$0xf0]  ;;  %v13035_v6 = vld [vmem:[%s20839_s1 + $0x564] sm:$0xf]  ;;  %v9698_v4 = vor.u32 %v13103_v9, %v9695_v17 }
 0x141   : > { %7074 = vmatpush.bf16.msrb.mxu2 %v9586_v53  ;;  %v9423_v45 = vld [vmem:[%s20839_s1 + $0x570] sm:$0xf0]  ;;  %v13067_v53 = vld [vmem:[%s20839_s1 + $0x664] sm:$0xf] }
 0x142   : > { %7088 = vmatpush.bf16.msrb.mxu3 %v9714_v12  ;;  %v9551_v54 = vld [vmem:[%s20839_s1 + $0x670] sm:$0xf0]  ;;  %v13099_v58 = vld [vmem:[%s20839_s1 + $0x764] sm:$0xf]  ;;  %v9298_v12 = vor.u32 %v13003_v33, %v9295_v34  ;;  %v9426_v13 = vor.u32 %v13035_v6, %v9423_v45 }
 0x143   : > { %v9679_v2 = vld [vmem:[%s20839_s1 + $0x770] sm:$0xf0]  ;;  %7047 = vmatpush.bf16.msrb.mxu0 %v9314_v5  ;;  %v9554_v50 = vor.u32 %v13067_v53, %v9551_v54  ;;  %v12999_v49 = vld [vmem:[%s20839_s1 + $0x444] sm:$0xf]  ;;  %v6815_v33 = vpop.f32.mrf.mxu3 }
 0x144   : > { %7061 = vmatpush.bf16.msrb.mxu1 %v9442_v26  ;;  %v9279_v1 = vld [vmem:[%s20839_s1 + $0x450] sm:$0xf0]  ;;  %v13031_v9 = vld [vmem:[%s20839_s1 + $0x544] sm:$0xf]  ;;  %v9682_v17 = vor.u32 %v13099_v58, %v9679_v2 }
 0x145   : > { %7075 = vmatpush.bf16.msrb.mxu2 %v9570_v27  ;;  %v9407_v5 = vld [vmem:[%s20839_s1 + $0x550] sm:$0xf0]  ;;  %v13063_v25 = vld [vmem:[%s20839_s1 + $0x644] sm:$0xf]  ;;  %v6802_v27 = vadd.f32 %v6801_v62, %v6788_v52 }
 0x146   : > { %7089 = vmatpush.bf16.msrb.mxu3 %v9698_v4  ;;  %v9535_v26 = vld [vmem:[%s20839_s1 + $0x650] sm:$0xf0]  ;;  %v13095_v34 = vld [vmem:[%s20839_s1 + $0x744] sm:$0xf]  ;;  %v9282_v4 = vor.u32 %v12999_v49, %v9279_v1  ;;  %v9410_v53 = vor.u32 %v13031_v9, %v9407_v5 }
 0x147   : > { %v9663_v6 = vld [vmem:[%s20839_s1 + $0x750] sm:$0xf0]  ;;  %7048 = vmatpush.bf16.msrb.mxu0 %v9298_v12  ;;  %v16049_v45 = vadd.f32 %v6815_v33, %v6802_v27  ;;  %v9538_v54 = vor.u32 %v13063_v25, %v9535_v26  ;;  %v12995_v52 = vld [vmem:[%s20839_s1 + $0x424] sm:$0xf] }
 0x148   : > { %7062 = vmatpush.bf16.msrb.mxu1 %v9426_v13  ;;  %v9263_v58 = vld [vmem:[%s20839_s1 + $0x430] sm:$0xf0]  ;;  %v13027_v2 = vld [vmem:[%s20839_s1 + $0x524] sm:$0xf]  ;;  %v9666_v12 = vor.u32 %v13095_v34, %v9663_v6 }
 0x149   : > { %7076 = vmatpush.bf16.msrb.mxu2 %v9554_v50  ;;  %v9391_v13 = vld [vmem:[%s20839_s1 + $0x530] sm:$0xf0]  ;;  %v13059_v50 = vld [vmem:[%s20839_s1 + $0x624] sm:$0xf] }
 0x14a   : > { %7090 = vmatpush.bf16.msrb.mxu3 %v9682_v17  ;;  %v9519_v49 = vld [vmem:[%s20839_s1 + $0x630] sm:$0xf0]  ;;  %v13091_v1 = vld [vmem:[%s20839_s1 + $0x724] sm:$0xf]  ;;  %v9266_v17 = vor.u32 %v12995_v52, %v9263_v58  ;;  %v9394_v25 = vor.u32 %v13027_v2, %v9391_v13 }
 0x14b   : > { %v9647_v9 = vld [vmem:[%s20839_s1 + $0x730] sm:$0xf0]  ;;  %7049 = vmatpush.bf16.msrb.mxu0 %v9282_v4  ;;  %v12991_v62 = vld [vmem:[%s20839_s1 + $0x404] sm:$0xf]  ;;  %v9522_v26 = vor.u32 %v13059_v50, %v9519_v49 }
 0x14c   : > { %v9247_v5 = vld [vmem:[%s20839_s1 + $0x410] sm:$0xf0]  ;;  %7063 = vmatpush.bf16.msrb.mxu1 %v9410_v53  ;;  %v13023_v27 = vld [vmem:[%s20839_s1 + $0x504] sm:$0xf]  ;;  %v9650_v6 = vor.u32 %v13091_v1, %v9647_v9 }
 0x14d   : > { %7077 = vmatpush.bf16.msrb.mxu2 %v9538_v54  ;;  %v9375_v33 = vld [vmem:[%s20839_s1 + $0x510] sm:$0xf0]  ;;  %v13055_v34 = vld [vmem:[%s20839_s1 + $0x604] sm:$0xf] }
 0x14e   : > { %7091 = vmatpush.bf16.msrb.mxu3 %v9666_v12  ;;  %v9503_v4 = vld [vmem:[%s20839_s1 + $0x610] sm:$0xf0]  ;;  %v13087_v53 = vld [vmem:[%s20839_s1 + $0x704] sm:$0xf]  ;;  %v9250_v12 = vor.u32 %v12991_v62, %v9247_v5  ;;  %v9378_v1 = vor.u32 %v13023_v27, %v9375_v33 }
 0x14f   : > { %v9631_v54 = vld [vmem:[%s20839_s1 + $0x710] sm:$0xf0]  ;;  %v13147_v52 = vld [vmem:[%s20839_s1 + $0x8e4] sm:$0xf]  ;;  %7050 = vmatpush.bf16.msrb.mxu0 %v9266_v17  ;;  %v9506_v9 = vor.u32 %v13055_v34, %v9503_v4 }
 0x150   : > { %v9871_v58 = vld [vmem:[%s20839_s1 + $0x8f0] sm:$0xf0]  ;;  %v13179_v2 = vld [vmem:[%s20839_s1 + $0x9e4] sm:$0xf]  ;;  %7064 = vmatpush.bf16.msrb.mxu1 %v9394_v25  ;;  %v9634_v5 = vor.u32 %v13087_v53, %v9631_v54  ;;  %v16141_v53 = vpop.f32.mrf.mxu0 }
 0x151   : > { %v9999_v13 = vld [vmem:[%s20839_s1 + $0x9f0] sm:$0xf0]  ;;  %v13211_v50 = vld [vmem:[%s20839_s1 + $0xae4] sm:$0xf]  ;;  %7078 = vmatpush.bf16.msrb.mxu2 %v9522_v26  ;;  %v9874_v24 = vor.u32 %v13147_v52, %v9871_v58  ;;  %v16149_v58 = vpop.f32.mrf.mxu1 }
 0x152   : > { %v10127_v49 = vld [vmem:[%s20839_s1 + $0xaf0] sm:$0xf0]  ;;  %v13243_v17 = vld [vmem:[%s20839_s1 + $0xbe4] sm:$0xf]  ;;  %7092 = vmatpush.bf16.msrb.mxu3 %v9650_v6  ;;  %v10002_v20 = vor.u32 %v13179_v2, %v9999_v13 }
 0x153   : > { %v10255_v62 = vld [vmem:[%s20839_s1 + $0xbf0] sm:$0xf0]  ;;  %v10130_v19 = vor.u32 %v13211_v50, %v10127_v49  ;;  %v13143_v25 = vld [vmem:[%s20839_s1 + $0x8c4] sm:$0xf]  ;;  %7051 = vmatpush.bf16.msrb.mxu0 %v9250_v12 }
 0x154   : > { %v9855_v26 = vld [vmem:[%s20839_s1 + $0x8d0] sm:$0xf0]  ;;  %v13175_v27 = vld [vmem:[%s20839_s1 + $0x9c4] sm:$0xf]  ;;  %v10258_v33 = vor.u32 %v13243_v17, %v10255_v62  ;;  %7065 = vmatpush.bf16.msrb.mxu1 %v9378_v1 }
 0x155   : > { %v9983_v34 = vld [vmem:[%s20839_s1 + $0x9d0] sm:$0xf0]  ;;  %v13207_v6 = vld [vmem:[%s20839_s1 + $0xac4] sm:$0xf]  ;;  %7079 = vmatpush.bf16.msrb.mxu2 %v9506_v9  ;;  %v9858_v2 = vor.u32 %v13143_v25, %v9855_v26 }
 0x156   : > { %v10111_v4 = vld [vmem:[%s20839_s1 + $0xad0] sm:$0xf0]  ;;  %v13239_v54 = vld [vmem:[%s20839_s1 + $0xbc4] sm:$0xf]  ;;  %7093 = vmatpush.bf16.msrb.mxu3 %v9634_v5  ;;  %v9986_v12 = vor.u32 %v13175_v27, %v9983_v34  ;;  %7052 = vmatmul.bf16.vlgmr.msrb.gmra.mxu0 %v14406_v39 }
 0x157   : > { %v10239_v52 = vld [vmem:[%s20839_s1 + $0xbd0] sm:$0xf0]  ;;  %7100 = vmatpush.bf16.msra.mxu0 %v9874_v24  ;;  %v10114_v13 = vor.u32 %v13207_v6, %v10111_v4  ;;  %v13139_v50 = vld [vmem:[%s20839_s1 + $0x8a4] sm:$0xf]  ;;  %7066 = vmatmul.bf16.vlgmr.msrb.gmra.mxu1 %v14419_v44  ;;  %v16188_v6 = vpop.f32.mrf.mxu2 }
 0x158   : > { %7114 = vmatpush.bf16.msra.mxu1 %v10002_v20  ;;  %v9839_v49 = vld [vmem:[%s20839_s1 + $0x8b0] sm:$0xf0]  ;;  %v13171_v1 = vld [vmem:[%s20839_s1 + $0x9a4] sm:$0xf]  ;;  %v10242_v24 = vor.u32 %v13239_v54, %v10239_v52  ;;  %7080 = vmatmul.bf16.vlgmr.msrb.gmra.mxu2 %v14417_v43 }
 0x159   : > { %7128 = vmatpush.bf16.msra.mxu2 %v10130_v19  ;;  %v9967_v19 = vld [vmem:[%s20839_s1 + $0x9b0] sm:$0xf0]  ;;  %v13203_v20 = vld [vmem:[%s20839_s1 + $0xaa4] sm:$0xf]  ;;  %7094 = vmatmul.bf16.vlgmr.msrb.gmra.mxu3 %v14427_v47  ;;  %v9842_v5 = vor.u32 %v13139_v50, %v9839_v49 }
 0x15a   : > { %7142 = vmatpush.bf16.msra.mxu3 %v10258_v33  ;;  %v10095_v9 = vld [vmem:[%s20839_s1 + $0xab0] sm:$0xf0]  ;;  %v13235_v17 = vld [vmem:[%s20839_s1 + $0xba4] sm:$0xf]  ;;  %v9970_v25 = vor.u32 %v13171_v1, %v9967_v19  ;;  %v6843_v19 = vpop.f32.mrf.mxu1 }
 0x15b   : > { %v10223_v62 = vld [vmem:[%s20839_s1 + $0xbb0] sm:$0xf0]  ;;  %7101 = vmatpush.bf16.msra.mxu0 %v9858_v2  ;;  %v10098_v26 = vor.u32 %v13203_v20, %v10095_v9  ;;  %v13135_v27 = vld [vmem:[%s20839_s1 + $0x884] sm:$0xf] }
 0x15c   : > { %7115 = vmatpush.bf16.msra.mxu1 %v9986_v12  ;;  %v9823_v33 = vld [vmem:[%s20839_s1 + $0x890] sm:$0xf0]  ;;  %v13167_v34 = vld [vmem:[%s20839_s1 + $0x984] sm:$0xf]  ;;  %v10226_v4 = vor.u32 %v13235_v17, %v10223_v62  ;;  %v16199_v12 = vpop.f32.mrf.mxu3 }
 0x15d   : > { %7129 = vmatpush.bf16.msra.mxu2 %v10114_v13  ;;  %v9951_v54 = vld [vmem:[%s20839_s1 + $0x990] sm:$0xf0]  ;;  %v13199_v52 = vld [vmem:[%s20839_s1 + $0xa84] sm:$0xf]  ;;  %v6829_v13 = vpop.f32.mrf.mxu0 }
 0x15e   : > { %7143 = vmatpush.bf16.msra.mxu3 %v10242_v24  ;;  %v10079_v2 = vld [vmem:[%s20839_s1 + $0xa90] sm:$0xf0]  ;;  %v13231_v50 = vld [vmem:[%s20839_s1 + $0xb84] sm:$0xf]  ;;  %v6830_v1 = vadd.f32 %v6829_v13, %v16049_v45  ;;  %v9826_v24 = vor.u32 %v13135_v27, %v9823_v33  ;;  %v9954_v20 = vor.u32 %v13167_v34, %v9951_v54 }
 0x15f   : > { %v10207_v49 = vld [vmem:[%s20839_s1 + $0xb90] sm:$0xf0]  ;;  %7102 = vmatpush.bf16.msra.mxu0 %v9842_v5  ;;  %v10082_v9 = vor.u32 %v13199_v52, %v10079_v2  ;;  %v13131_v17 = vld [vmem:[%s20839_s1 + $0x864] sm:$0xf] }
 0x160   : > { %7116 = vmatpush.bf16.msra.mxu1 %v9970_v25  ;;  %v9807_v62 = vld [vmem:[%s20839_s1 + $0x870] sm:$0xf0]  ;;  %v13163_v5 = vld [vmem:[%s20839_s1 + $0x964] sm:$0xf]  ;;  %v10210_v45 = vor.u32 %v13231_v50, %v10207_v49  ;;  %v6844_v27 = vadd.f32 %v6843_v19, %v6830_v1 }
 0x161   : > { %7130 = vmatpush.bf16.msra.mxu2 %v10098_v26  ;;  %v9935_v25 = vld [vmem:[%s20839_s1 + $0x970] sm:$0xf0]  ;;  %v13195_v26 = vld [vmem:[%s20839_s1 + $0xa64] sm:$0xf]  ;;  %v9810_v54 = vor.u32 %v13131_v17, %v9807_v62 }
 0x162   : > { %7144 = vmatpush.bf16.msra.mxu3 %v10226_v4  ;;  %v10063_v33 = vld [vmem:[%s20839_s1 + $0xa70] sm:$0xf0]  ;;  %v13227_v34 = vld [vmem:[%s20839_s1 + $0xb64] sm:$0xf]  ;;  %v9938_v52 = vor.u32 %v13163_v5, %v9935_v25 }
 0x163   : > { %v10191_v4 = vld [vmem:[%s20839_s1 + $0xb70] sm:$0xf0]  ;;  %7103 = vmatpush.bf16.msra.mxu0 %v9826_v24  ;;  %v10066_v2 = vor.u32 %v13195_v26, %v10063_v33  ;;  %v13127_v13 = vld [vmem:[%s20839_s1 + $0x844] sm:$0xf]  ;;  %v6857_v24 = vpop.f32.mrf.mxu2 }
 0x164   : > { %7117 = vmatpush.bf16.msra.mxu1 %v9954_v20  ;;  %v9791_v50 = vld [vmem:[%s20839_s1 + $0x850] sm:$0xf0]  ;;  %v13159_v49 = vld [vmem:[%s20839_s1 + $0x944] sm:$0xf]  ;;  %v10194_v1 = vor.u32 %v13227_v34, %v10191_v4  ;;  %v6858_v17 = vadd.f32 %v6857_v24, %v6844_v27  ;;  %v6871_v62 = vpop.f32.mrf.mxu3 }
 0x165   : > { %7131 = vmatpush.bf16.msra.mxu2 %v10082_v9  ;;  %v9919_v19 = vld [vmem:[%s20839_s1 + $0x950] sm:$0xf0]  ;;  %v13191_v20 = vld [vmem:[%s20839_s1 + $0xa44] sm:$0xf]  ;;  %v9794_v25 = vor.u32 %v13127_v13, %v9791_v50 }
 0x166   : > { %7145 = vmatpush.bf16.msra.mxu3 %v10210_v45  ;;  %v10047_v9 = vld [vmem:[%s20839_s1 + $0xa50] sm:$0xf0]  ;;  %v13223_v5 = vld [vmem:[%s20839_s1 + $0xb44] sm:$0xf]  ;;  %v16256_v26 = vadd.f32 %v6871_v62, %v6858_v17  ;;  %v9922_v33 = vor.u32 %v13159_v49, %v9919_v19 }
 0x167   : > { %v10175_v45 = vld [vmem:[%s20839_s1 + $0xb50] sm:$0xf0]  ;;  %7104 = vmatpush.bf16.msra.mxu0 %v9810_v54  ;;  %v10050_v34 = vor.u32 %v13191_v20, %v10047_v9  ;;  %v13123_v27 = vld [vmem:[%s20839_s1 + $0x824] sm:$0xf] }
 0x168   : > { %7118 = vmatpush.bf16.msra.mxu1 %v9938_v52  ;;  %v9775_v4 = vld [vmem:[%s20839_s1 + $0x830] sm:$0xf0]  ;;  %v13155_v24 = vld [vmem:[%s20839_s1 + $0x924] sm:$0xf]  ;;  %v10178_v54 = vor.u32 %v13223_v5, %v10175_v45 }
 0x169   : > { %7132 = vmatpush.bf16.msra.mxu2 %v10066_v2  ;;  %v9903_v52 = vld [vmem:[%s20839_s1 + $0x930] sm:$0xf0]  ;;  %v13187_v2 = vld [vmem:[%s20839_s1 + $0xa24] sm:$0xf] }
 0x16a   : > { %7146 = vmatpush.bf16.msra.mxu3 %v10194_v1  ;;  %v10031_v13 = vld [vmem:[%s20839_s1 + $0xa30] sm:$0xf0]  ;;  %v13219_v50 = vld [vmem:[%s20839_s1 + $0xb24] sm:$0xf]  ;;  %v9778_v1 = vor.u32 %v13123_v27, %v9775_v4  ;;  %v9906_v9 = vor.u32 %v13155_v24, %v9903_v52 }
 0x16b   : > { %v10159_v49 = vld [vmem:[%s20839_s1 + $0xb30] sm:$0xf0]  ;;  %7105 = vmatpush.bf16.msra.mxu0 %v9794_v25  ;;  %v13119_v19 = vld [vmem:[%s20839_s1 + $0x804] sm:$0xf]  ;;  %v10034_v17 = vor.u32 %v13187_v2, %v10031_v13 }
 0x16c   : > { %v9759_v20 = vld [vmem:[%s20839_s1 + $0x810] sm:$0xf0]  ;;  %7119 = vmatpush.bf16.msra.mxu1 %v9922_v33  ;;  %v13151_v62 = vld [vmem:[%s20839_s1 + $0x904] sm:$0xf]  ;;  %v10162_v25 = vor.u32 %v13219_v50, %v10159_v49 }
 0x16d   : > { %7133 = vmatpush.bf16.msra.mxu2 %v10050_v34  ;;  %v9887_v5 = vld [vmem:[%s20839_s1 + $0x910] sm:$0xf0]  ;;  %v13183_v45 = vld [vmem:[%s20839_s1 + $0xa04] sm:$0xf]  ;;  %v9762_v52 = vor.u32 %v13119_v19, %v9759_v20 }
 0x16e   : > { %7147 = vmatpush.bf16.msra.mxu3 %v10178_v54  ;;  %v10015_v33 = vld [vmem:[%s20839_s1 + $0xa10] sm:$0xf0]  ;;  %v13215_v34 = vld [vmem:[%s20839_s1 + $0xb04] sm:$0xf]  ;;  %v9890_v49 = vor.u32 %v13151_v62, %v9887_v5 }
 0x16f   : > { %v10143_v27 = vld [vmem:[%s20839_s1 + $0xb10] sm:$0xf0]  ;;  %v13275_v4 = vld [vmem:[%s20839_s1 + $0xce4] sm:$0xf]  ;;  %7106 = vmatpush.bf16.msra.mxu0 %v9778_v1  ;;  %v10018_v47 = vor.u32 %v13183_v45, %v10015_v33 }
 0x170   : > { %v10383_v24 = vld [vmem:[%s20839_s1 + $0xcf0] sm:$0xf0]  ;;  %v13307_v54 = vld [vmem:[%s20839_s1 + $0xde4] sm:$0xf]  ;;  %7120 = vmatpush.bf16.msra.mxu1 %v9906_v9  ;;  %v10146_v20 = vor.u32 %v13215_v34, %v10143_v27  ;;  %v16348_v34 = vpop.f32.mrf.mxu0 }
 0x171   : > { %v10511_v2 = vld [vmem:[%s20839_s1 + $0xdf0] sm:$0xf0]  ;;  %v13339_v13 = vld [vmem:[%s20839_s1 + $0xee4] sm:$0xf]  ;;  %7134 = vmatpush.bf16.msra.mxu2 %v10034_v17  ;;  %v10386_v44 = vor.u32 %v13275_v4, %v10383_v24  ;;  %v16356_v24 = vpop.f32.mrf.mxu1 }
 0x172   : > { %v10639_v50 = vld [vmem:[%s20839_s1 + $0xef0] sm:$0xf0]  ;;  %v13371_v1 = vld [vmem:[%s20839_s1 + $0xfe4] sm:$0xf]  ;;  %7148 = vmatpush.bf16.msra.mxu3 %v10162_v25  ;;  %v10514_v43 = vor.u32 %v13307_v54, %v10511_v2 }
 0x173   : > { %v10767_v19 = vld [vmem:[%s20839_s1 + $0xff0] sm:$0xf0]  ;;  %v10642_v39 = vor.u32 %v13339_v13, %v10639_v50  ;;  %v13271_v9 = vld [vmem:[%s20839_s1 + $0xcc4] sm:$0xf]  ;;  %7107 = vmatpush.bf16.msra.mxu0 %v9762_v52 }
 0x174   : > { %v10367_v17 = vld [vmem:[%s20839_s1 + $0xcd0] sm:$0xf0]  ;;  %v13303_v62 = vld [vmem:[%s20839_s1 + $0xdc4] sm:$0xf]  ;;  %v10770_v5 = vor.u32 %v13371_v1, %v10767_v19  ;;  %7121 = vmatpush.bf16.msra.mxu1 %v9890_v49 }
 0x175   : > { %v10495_v45 = vld [vmem:[%s20839_s1 + $0xdd0] sm:$0xf0]  ;;  %v13335_v25 = vld [vmem:[%s20839_s1 + $0xec4] sm:$0xf]  ;;  %7135 = vmatpush.bf16.msra.mxu2 %v10018_v47  ;;  %v10370_v54 = vor.u32 %v13271_v9, %v10367_v17 }
 0x176   : > { %v10623_v33 = vld [vmem:[%s20839_s1 + $0xed0] sm:$0xf0]  ;;  %v13367_v27 = vld [vmem:[%s20839_s1 + $0xfc4] sm:$0xf]  ;;  %7149 = vmatpush.bf16.msra.mxu3 %v10146_v20  ;;  %v10498_v52 = vor.u32 %v13303_v62, %v10495_v45  ;;  %7108 = vmatmul.bf16.vlgmr.msra.gmra.mxu0 %v14618_v31 }
 0x177   : > { %v10751_v4 = vld [vmem:[%s20839_s1 + $0xfd0] sm:$0xf0]  ;;  %7156 = vmatpush.bf16.msrb.mxu0 %v10386_v44  ;;  %v10626_v2 = vor.u32 %v13335_v25, %v10623_v33  ;;  %v13267_v47 = vld [vmem:[%s20839_s1 + $0xca4] sm:$0xf]  ;;  %7122 = vmatmul.bf16.vlgmr.msra.gmra.mxu1 %v14631_v36  ;;  %v16395_v25 = vpop.f32.mrf.mxu2 }
 0x178   : > { %7170 = vmatpush.bf16.msrb.mxu1 %v10514_v43  ;;  %v10351_v13 = vld [vmem:[%s20839_s1 + $0xcb0] sm:$0xf0]  ;;  %v13299_v50 = vld [vmem:[%s20839_s1 + $0xda4] sm:$0xf]  ;;  %v10754_v44 = vor.u32 %v13367_v27, %v10751_v4  ;;  %7136 = vmatmul.bf16.vlgmr.msra.gmra.mxu2 %v14629_v35 }
 0x179   : > { %7184 = vmatpush.bf16.msrb.mxu2 %v10642_v39  ;;  %v10479_v39 = vld [vmem:[%s20839_s1 + $0xdb0] sm:$0xf0]  ;;  %v13331_v43 = vld [vmem:[%s20839_s1 + $0xea4] sm:$0xf]  ;;  %7150 = vmatmul.bf16.vlgmr.msra.gmra.mxu3 %v14639_v40  ;;  %v10354_v20 = vor.u32 %v13267_v47, %v10351_v13 }
 0x17a   : > { %7198 = vmatpush.bf16.msrb.mxu3 %v10770_v5  ;;  %v10607_v49 = vld [vmem:[%s20839_s1 + $0xeb0] sm:$0xf0]  ;;  %v13363_v1 = vld [vmem:[%s20839_s1 + $0xfa4] sm:$0xf]  ;;  %v10482_v9 = vor.u32 %v13299_v50, %v10479_v39  ;;  %v6899_v39 = vpop.f32.mrf.mxu1 }
 0x17b   : > { %v10735_v19 = vld [vmem:[%s20839_s1 + $0xfb0] sm:$0xf0]  ;;  %7157 = vmatpush.bf16.msrb.mxu0 %v10370_v54  ;;  %v10610_v17 = vor.u32 %v13331_v43, %v10607_v49  ;;  %v13263_v62 = vld [vmem:[%s20839_s1 + $0xc84] sm:$0xf] }
 0x17c   : > { %7171 = vmatpush.bf16.msrb.mxu1 %v10498_v52  ;;  %v10335_v5 = vld [vmem:[%s20839_s1 + $0xc90] sm:$0xf0]  ;;  %v13295_v45 = vld [vmem:[%s20839_s1 + $0xd84] sm:$0xf]  ;;  %v10738_v33 = vor.u32 %v13363_v1, %v10735_v19  ;;  %v16406_v52 = vpop.f32.mrf.mxu3 }
 0x17d   : > { %7185 = vmatpush.bf16.msrb.mxu2 %v10626_v2  ;;  %v10463_v27 = vld [vmem:[%s20839_s1 + $0xd90] sm:$0xf0]  ;;  %v13327_v4 = vld [vmem:[%s20839_s1 + $0xe84] sm:$0xf]  ;;  %v6885_v2 = vpop.f32.mrf.mxu0 }
 0x17e   : > { %7199 = vmatpush.bf16.msrb.mxu3 %v10754_v44  ;;  %v10591_v54 = vld [vmem:[%s20839_s1 + $0xe90] sm:$0xf0]  ;;  %v13359_v47 = vld [vmem:[%s20839_s1 + $0xf84] sm:$0xf]  ;;  %v6886_v50 = vadd.f32 %v6885_v2, %v16256_v26  ;;  %v10338_v44 = vor.u32 %v13263_v62, %v10335_v5  ;;  %v10466_v43 = vor.u32 %v13295_v45, %v10463_v27 }
 0x17f   : > { %v10719_v13 = vld [vmem:[%s20839_s1 + $0xf90] sm:$0xf0]  ;;  %7158 = vmatpush.bf16.msrb.mxu0 %v10354_v20  ;;  %v10594_v49 = vor.u32 %v13327_v4, %v10591_v54  ;;  %v13259_v1 = vld [vmem:[%s20839_s1 + $0xc64] sm:$0xf] }
 0x180   : > { %7172 = vmatpush.bf16.msrb.mxu1 %v10482_v9  ;;  %v10319_v19 = vld [vmem:[%s20839_s1 + $0xc70] sm:$0xf0]  ;;  %v13291_v20 = vld [vmem:[%s20839_s1 + $0xd64] sm:$0xf]  ;;  %v10722_v26 = vor.u32 %v13359_v47, %v10719_v13  ;;  %v6900_v62 = vadd.f32 %v6899_v39, %v6886_v50 }
 0x181   : > { %7186 = vmatpush.bf16.msrb.mxu2 %v10610_v17  ;;  %v10447_v9 = vld [vmem:[%s20839_s1 + $0xd70] sm:$0xf0]  ;;  %v13323_v17 = vld [vmem:[%s20839_s1 + $0xe64] sm:$0xf]  ;;  %v10322_v27 = vor.u32 %v13259_v1, %v10319_v19 }
 0x182   : > { %7200 = vmatpush.bf16.msrb.mxu3 %v10738_v33  ;;  %v10575_v5 = vld [vmem:[%s20839_s1 + $0xe70] sm:$0xf0]  ;;  %v13355_v45 = vld [vmem:[%s20839_s1 + $0xf64] sm:$0xf]  ;;  %v10450_v4 = vor.u32 %v13291_v20, %v10447_v9 }
 0x183   : > { %v10703_v33 = vld [vmem:[%s20839_s1 + $0xf70] sm:$0xf0]  ;;  %7159 = vmatpush.bf16.msrb.mxu0 %v10338_v44  ;;  %v10578_v54 = vor.u32 %v13323_v17, %v10575_v5  ;;  %v13255_v2 = vld [vmem:[%s20839_s1 + $0xc44] sm:$0xf]  ;;  %v6913_v44 = vpop.f32.mrf.mxu2 }
 0x184   : > { %7173 = vmatpush.bf16.msrb.mxu1 %v10466_v43  ;;  %v10303_v47 = vld [vmem:[%s20839_s1 + $0xc50] sm:$0xf0]  ;;  %v13287_v13 = vld [vmem:[%s20839_s1 + $0xd44] sm:$0xf]  ;;  %v10706_v50 = vor.u32 %v13355_v45, %v10703_v33  ;;  %v6914_v1 = vadd.f32 %v6913_v44, %v6900_v62  ;;  %v6927_v19 = vpop.f32.mrf.mxu3 }
 0x185   : > { %7187 = vmatpush.bf16.msrb.mxu2 %v10594_v49  ;;  %v10431_v39 = vld [vmem:[%s20839_s1 + $0xd50] sm:$0xf0]  ;;  %v13319_v43 = vld [vmem:[%s20839_s1 + $0xe44] sm:$0xf]  ;;  %v10306_v9 = vor.u32 %v13255_v2, %v10303_v47 }
 0x186   : > { %7201 = vmatpush.bf16.msrb.mxu3 %v10722_v26  ;;  %v10559_v49 = vld [vmem:[%s20839_s1 + $0xe50] sm:$0xf0]  ;;  %v13351_v20 = vld [vmem:[%s20839_s1 + $0xf44] sm:$0xf]  ;;  %v16463_v17 = vadd.f32 %v6927_v19, %v6914_v1  ;;  %v10434_v5 = vor.u32 %v13287_v13, %v10431_v39 }
 0x187   : > { %v10687_v26 = vld [vmem:[%s20839_s1 + $0xf50] sm:$0xf0]  ;;  %7160 = vmatpush.bf16.msrb.mxu0 %v10322_v27  ;;  %v10562_v45 = vor.u32 %v13319_v43, %v10559_v49  ;;  %v13251_v62 = vld [vmem:[%s20839_s1 + $0xc24] sm:$0xf] }
 0x188   : > { %7174 = vmatpush.bf16.msrb.mxu1 %v10450_v4  ;;  %v10287_v33 = vld [vmem:[%s20839_s1 + $0xc30] sm:$0xf0]  ;;  %v13283_v44 = vld [vmem:[%s20839_s1 + $0xd24] sm:$0xf]  ;;  %v10690_v27 = vor.u32 %v13351_v20, %v10687_v26 }
 0x189   : > { %7188 = vmatpush.bf16.msrb.mxu2 %v10578_v54  ;;  %v10415_v4 = vld [vmem:[%s20839_s1 + $0xd30] sm:$0xf0]  ;;  %v13315_v54 = vld [vmem:[%s20839_s1 + $0xe24] sm:$0xf] }
 0x18a   : > { %7202 = vmatpush.bf16.msrb.mxu3 %v10706_v50  ;;  %v10543_v2 = vld [vmem:[%s20839_s1 + $0xe30] sm:$0xf0]  ;;  %v13347_v47 = vld [vmem:[%s20839_s1 + $0xf24] sm:$0xf]  ;;  %v10290_v50 = vor.u32 %v13251_v62, %v10287_v33  ;;  %v10418_v49 = vor.u32 %v13283_v44, %v10415_v4 }
 0x18b   : > { %v10671_v13 = vld [vmem:[%s20839_s1 + $0xf30] sm:$0xf0]  ;;  %7161 = vmatpush.bf16.msrb.mxu0 %v10306_v9  ;;  %v13247_v39 = vld [vmem:[%s20839_s1 + $0xc04] sm:$0xf]  ;;  %v10546_v1 = vor.u32 %v13315_v54, %v10543_v2 }
 0x18c   : > { %v10271_v43 = vld [vmem:[%s20839_s1 + $0xc10] sm:$0xf0]  ;;  %7175 = vmatpush.bf16.msrb.mxu1 %v10434_v5  ;;  %v13279_v19 = vld [vmem:[%s20839_s1 + $0xd04] sm:$0xf]  ;;  %v10674_v9 = vor.u32 %v13347_v47, %v10671_v13 }
 0x18d   : > { %7189 = vmatpush.bf16.msrb.mxu2 %v10562_v45  ;;  %v10399_v20 = vld [vmem:[%s20839_s1 + $0xd10] sm:$0xf0]  ;;  %v13311_v26 = vld [vmem:[%s20839_s1 + $0xe04] sm:$0xf]  ;;  %v10274_v4 = vor.u32 %v13247_v39, %v10271_v43 }
 0x18e   : > { %7203 = vmatpush.bf16.msrb.mxu3 %v10690_v27  ;;  %v10527_v5 = vld [vmem:[%s20839_s1 + $0xe10] sm:$0xf0]  ;;  %v13343_v45 = vld [vmem:[%s20839_s1 + $0xf04] sm:$0xf]  ;;  %v10402_v13 = vor.u32 %v13279_v19, %v10399_v20 }
 0x18f   : > { %v10655_v62 = vld [vmem:[%s20839_s1 + $0xf10] sm:$0xf0]  ;;  %v13403_v33 = vld [vmem:[%s20839_s1 + $0x10e4] sm:$0xf]  ;;  %7162 = vmatpush.bf16.msrb.mxu0 %v10290_v50  ;;  %v10530_v40 = vor.u32 %v13311_v26, %v10527_v5 }
 0x190   : > { %v10895_v44 = vld [vmem:[%s20839_s1 + $0x10f0] sm:$0xf0]  ;;  %v13435_v27 = vld [vmem:[%s20839_s1 + $0x11e4] sm:$0xf]  ;;  %7176 = vmatpush.bf16.msrb.mxu1 %v10418_v49  ;;  %v10658_v43 = vor.u32 %v13343_v45, %v10655_v62  ;;  %v16555_v45 = vpop.f32.mrf.mxu0 }
 0x191   : > { %v11023_v54 = vld [vmem:[%s20839_s1 + $0x11f0] sm:$0xf0]  ;;  %v13467_v2 = vld [vmem:[%s20839_s1 + $0x12e4] sm:$0xf]  ;;  %7190 = vmatpush.bf16.msrb.mxu2 %v10546_v1  ;;  %v10898_v36 = vor.u32 %v13403_v33, %v10895_v44  ;;  %v16563_v44 = vpop.f32.mrf.mxu1 }
 0x192   : > { %v11151_v47 = vld [vmem:[%s20839_s1 + $0x12f0] sm:$0xf0]  ;;  %v13499_v50 = vld [vmem:[%s20839_s1 + $0x13e4] sm:$0xf]  ;;  %7204 = vmatpush.bf16.msrb.mxu3 %v10674_v9  ;;  %v11026_v35 = vor.u32 %v13435_v27, %v11023_v54 }
 0x193   : > { %v11279_v39 = vld [vmem:[%s20839_s1 + $0x13f0] sm:$0xf0]  ;;  %v11154_v31 = vor.u32 %v13467_v2, %v11151_v47  ;;  %v13399_v49 = vld [vmem:[%s20839_s1 + $0x10c4] sm:$0xf]  ;;  %7163 = vmatpush.bf16.msrb.mxu0 %v10274_v4 }
 0x194   : > { %v10879_v1 = vld [vmem:[%s20839_s1 + $0x10d0] sm:$0xf0]  ;;  %v13431_v19 = vld [vmem:[%s20839_s1 + $0x11c4] sm:$0xf]  ;;  %v11282_v20 = vor.u32 %v13499_v50, %v11279_v39  ;;  %7177 = vmatpush.bf16.msrb.mxu1 %v10402_v13 }
 0x195   : > { %v11007_v26 = vld [vmem:[%s20839_s1 + $0x11d0] sm:$0xf0]  ;;  %v13463_v9 = vld [vmem:[%s20839_s1 + $0x12c4] sm:$0xf]  ;;  %7191 = vmatpush.bf16.msrb.mxu2 %v10530_v40  ;;  %v10882_v27 = vor.u32 %v13399_v49, %v10879_v1 }
 0x196   : > { %v11135_v5 = vld [vmem:[%s20839_s1 + $0x12d0] sm:$0xf0]  ;;  %v13495_v62 = vld [vmem:[%s20839_s1 + $0x13c4] sm:$0xf]  ;;  %7205 = vmatpush.bf16.msrb.mxu3 %v10658_v43  ;;  %v11010_v4 = vor.u32 %v13431_v19, %v11007_v26  ;;  %7164 = vmatmul.bf16.vlgmr.msrb.gmra.mxu0 %v14830_v32 }
 0x197   : > { %v11263_v33 = vld [vmem:[%s20839_s1 + $0x13d0] sm:$0xf0]  ;;  %7212 = vmatpush.bf16.msra.mxu0 %v10898_v36  ;;  %v11138_v54 = vor.u32 %v13463_v9, %v11135_v5  ;;  %v13395_v40 = vld [vmem:[%s20839_s1 + $0x10a4] sm:$0xf]  ;;  %7178 = vmatmul.bf16.vlgmr.msrb.gmra.mxu1 %v14843_v41  ;;  %v16602_v9 = vpop.f32.mrf.mxu2 }
 0x198   : > { %7226 = vmatpush.bf16.msra.mxu1 %v11026_v35  ;;  %v10863_v2 = vld [vmem:[%s20839_s1 + $0x10b0] sm:$0xf0]  ;;  %v13427_v47 = vld [vmem:[%s20839_s1 + $0x11a4] sm:$0xf]  ;;  %v11266_v36 = vor.u32 %v13495_v62, %v11263_v33  ;;  %7192 = vmatmul.bf16.vlgmr.msrb.gmra.mxu2 %v14841_v38 }
 0x199   : > { %7240 = vmatpush.bf16.msra.mxu2 %v11154_v31  ;;  %v10991_v31 = vld [vmem:[%s20839_s1 + $0x11b0] sm:$0xf0]  ;;  %v13459_v35 = vld [vmem:[%s20839_s1 + $0x12a4] sm:$0xf]  ;;  %7206 = vmatmul.bf16.vlgmr.msrb.gmra.mxu3 %v14851_v46  ;;  %v10866_v43 = vor.u32 %v13395_v40, %v10863_v2 }
 0x19a   : > { %7254 = vmatpush.bf16.msra.mxu3 %v11282_v20  ;;  %v11119_v13 = vld [vmem:[%s20839_s1 + $0x12b0] sm:$0xf0]  ;;  %v13491_v50 = vld [vmem:[%s20839_s1 + $0x13a4] sm:$0xf]  ;;  %v10994_v49 = vor.u32 %v13427_v47, %v10991_v31  ;;  %v6955_v31 = vpop.f32.mrf.mxu1 }
 0x19b   : > { %v11247_v39 = vld [vmem:[%s20839_s1 + $0x13b0] sm:$0xf0]  ;;  %7213 = vmatpush.bf16.msra.mxu0 %v10882_v27  ;;  %v11122_v1 = vor.u32 %v13459_v35, %v11119_v13  ;;  %v13391_v19 = vld [vmem:[%s20839_s1 + $0x1084] sm:$0xf] }
 0x19c   : > { %7227 = vmatpush.bf16.msra.mxu1 %v11010_v4  ;;  %v10847_v20 = vld [vmem:[%s20839_s1 + $0x1090] sm:$0xf0]  ;;  %v13423_v26 = vld [vmem:[%s20839_s1 + $0x1184] sm:$0xf]  ;;  %v11250_v5 = vor.u32 %v13491_v50, %v11247_v39  ;;  %v16613_v4 = vpop.f32.mrf.mxu3 }
 0x19d   : > { %7241 = vmatpush.bf16.msra.mxu2 %v11138_v54  ;;  %v10975_v62 = vld [vmem:[%s20839_s1 + $0x1190] sm:$0xf0]  ;;  %v13455_v33 = vld [vmem:[%s20839_s1 + $0x1284] sm:$0xf]  ;;  %v6941_v54 = vpop.f32.mrf.mxu0 }
 0x19e   : > { %7255 = vmatpush.bf16.msra.mxu3 %v11266_v36  ;;  %v11103_v27 = vld [vmem:[%s20839_s1 + $0x1290] sm:$0xf0]  ;;  %v13487_v40 = vld [vmem:[%s20839_s1 + $0x1384] sm:$0xf]  ;;  %v6942_v47 = vadd.f32 %v6941_v54, %v16463_v17  ;;  %v10850_v36 = vor.u32 %v13391_v19, %v10847_v20  ;;  %v10978_v35 = vor.u32 %v13423_v26, %v10975_v62 }
 0x19f   : > { %v11231_v2 = vld [vmem:[%s20839_s1 + $0x1390] sm:$0xf0]  ;;  %7214 = vmatpush.bf16.msra.mxu0 %v10866_v43  ;;  %v11106_v13 = vor.u32 %v13455_v33, %v11103_v27  ;;  %v13387_v50 = vld [vmem:[%s20839_s1 + $0x1064] sm:$0xf] }
 0x1a0   : > { %7228 = vmatpush.bf16.msra.mxu1 %v10994_v49  ;;  %v10831_v39 = vld [vmem:[%s20839_s1 + $0x1070] sm:$0xf0]  ;;  %v13419_v43 = vld [vmem:[%s20839_s1 + $0x1164] sm:$0xf]  ;;  %v11234_v17 = vor.u32 %v13487_v40, %v11231_v2  ;;  %v6956_v19 = vadd.f32 %v6955_v31, %v6942_v47 }
 0x1a1   : > { %7242 = vmatpush.bf16.msra.mxu2 %v11122_v1  ;;  %v10959_v49 = vld [vmem:[%s20839_s1 + $0x1170] sm:$0xf0]  ;;  %v13451_v1 = vld [vmem:[%s20839_s1 + $0x1264] sm:$0xf]  ;;  %v10834_v62 = vor.u32 %v13387_v50, %v10831_v39 }
 0x1a2   : > { %7256 = vmatpush.bf16.msra.mxu3 %v11250_v5  ;;  %v11087_v20 = vld [vmem:[%s20839_s1 + $0x1270] sm:$0xf0]  ;;  %v13483_v26 = vld [vmem:[%s20839_s1 + $0x1364] sm:$0xf]  ;;  %v10962_v33 = vor.u32 %v13419_v43, %v10959_v49 }
 0x1a3   : > { %v11215_v5 = vld [vmem:[%s20839_s1 + $0x1370] sm:$0xf0]  ;;  %7215 = vmatpush.bf16.msra.mxu0 %v10850_v36  ;;  %v11090_v27 = vor.u32 %v13451_v1, %v11087_v20  ;;  %v13383_v54 = vld [vmem:[%s20839_s1 + $0x1044] sm:$0xf]  ;;  %v6969_v36 = vpop.f32.mrf.mxu2 }
 0x1a4   : > { %7229 = vmatpush.bf16.msra.mxu1 %v10978_v35  ;;  %v10815_v40 = vld [vmem:[%s20839_s1 + $0x1050] sm:$0xf0]  ;;  %v13415_v2 = vld [vmem:[%s20839_s1 + $0x1144] sm:$0xf]  ;;  %v11218_v47 = vor.u32 %v13483_v26, %v11215_v5  ;;  %v6970_v50 = vadd.f32 %v6969_v36, %v6956_v19  ;;  %v6983_v39 = vpop.f32.mrf.mxu3 }
 0x1a5   : > { %7243 = vmatpush.bf16.msra.mxu2 %v11106_v13  ;;  %v10943_v31 = vld [vmem:[%s20839_s1 + $0x1150] sm:$0xf0]  ;;  %v13447_v35 = vld [vmem:[%s20839_s1 + $0x1244] sm:$0xf]  ;;  %v10818_v49 = vor.u32 %v13383_v54, %v10815_v40 }
 0x1a6   : > { %7257 = vmatpush.bf16.msra.mxu3 %v11234_v17  ;;  %v11071_v13 = vld [vmem:[%s20839_s1 + $0x1250] sm:$0xf0]  ;;  %v13479_v43 = vld [vmem:[%s20839_s1 + $0x1344] sm:$0xf]  ;;  %v16670_v1 = vadd.f32 %v6983_v39, %v6970_v50  ;;  %v10946_v20 = vor.u32 %v13415_v2, %v10943_v31 }
 0x1a7   : > { %v11199_v17 = vld [vmem:[%s20839_s1 + $0x1350] sm:$0xf0]  ;;  %7216 = vmatpush.bf16.msra.mxu0 %v10834_v62  ;;  %v11074_v26 = vor.u32 %v13447_v35, %v11071_v13  ;;  %v13379_v19 = vld [vmem:[%s20839_s1 + $0x1024] sm:$0xf] }
 0x1a8   : > { %7230 = vmatpush.bf16.msra.mxu1 %v10962_v33  ;;  %20925 = vst [vmem:[#allocation32_spill] sm:$0xff] %v16670_v1  ;;  %v10799_v5 = vld [vmem:[%s20839_s1 + $0x1030] sm:$0xf0]  ;;  %v13411_v36 = vld [vmem:[%s20839_s1 + $0x1124] sm:$0xf]  ;;  %v11202_v62 = vor.u32 %v13479_v43, %v11199_v17 }
 0x1a9   : > { %7244 = vmatpush.bf16.msra.mxu2 %v11090_v27  ;;  %v10927_v33 = vld [vmem:[%s20839_s1 + $0x1130] sm:$0xf0]  ;;  %v13443_v27 = vld [vmem:[%s20839_s1 + $0x1224] sm:$0xf] }
 0x1aa   : > { %7258 = vmatpush.bf16.msra.mxu3 %v11218_v47  ;;  %v11055_v54 = vld [vmem:[%s20839_s1 + $0x1230] sm:$0xf0]  ;;  %v13475_v40 = vld [vmem:[%s20839_s1 + $0x1324] sm:$0xf]  ;;  %v10802_v47 = vor.u32 %v13379_v19, %v10799_v5  ;;  %v10930_v13 = vor.u32 %v13411_v36, %v10927_v33 }
 0x1ab   : > { %v11183_v2 = vld [vmem:[%s20839_s1 + $0x1330] sm:$0xf0]  ;;  %7217 = vmatpush.bf16.msra.mxu0 %v10818_v49  ;;  %v13375_v31 = vld [vmem:[%s20839_s1 + $0x1004] sm:$0xf]  ;;  %v11058_v50 = vor.u32 %v13443_v27, %v11055_v54 }
 0x1ac   : > { %v10783_v35 = vld [vmem:[%s20839_s1 + $0x1010] sm:$0xf0]  ;;  %7231 = vmatpush.bf16.msra.mxu1 %v10946_v20  ;;  %v13407_v39 = vld [vmem:[%s20839_s1 + $0x1104] sm:$0xf]  ;;  %v11186_v49 = vor.u32 %v13475_v40, %v11183_v2 }
 0x1ad   : > { %7245 = vmatpush.bf16.msra.mxu2 %v11074_v26  ;;  %v10911_v43 = vld [vmem:[%s20839_s1 + $0x1110] sm:$0xf0]  ;;  %v13439_v17 = vld [vmem:[%s20839_s1 + $0x1204] sm:$0xf]  ;;  %v10786_v33 = vor.u32 %v13375_v31, %v10783_v35 }
 0x1ae   : > { %7259 = vmatpush.bf16.msra.mxu3 %v11202_v62  ;;  %v11039_v20 = vld [vmem:[%s20839_s1 + $0x1210] sm:$0xf0]  ;;  %v13471_v26 = vld [vmem:[%s20839_s1 + $0x1304] sm:$0xf]  ;;  %v10914_v2 = vor.u32 %v13407_v39, %v10911_v43 }
 0x1af   : > { %v11167_v19 = vld [vmem:[%s20839_s1 + $0x1310] sm:$0xf0]  ;;  %v13531_v5 = vld [vmem:[%s20839_s1 + $0x14e4] sm:$0xf]  ;;  %7218 = vmatpush.bf16.msra.mxu0 %v10802_v47  ;;  %v11042_v46 = vor.u32 %v13439_v17, %v11039_v20 }
 0x1b0   : > { %v11407_v36 = vld [vmem:[%s20839_s1 + $0x14f0] sm:$0xf0]  ;;  %v13563_v62 = vld [vmem:[%s20839_s1 + $0x15e4] sm:$0xf]  ;;  %7232 = vmatpush.bf16.msra.mxu1 %v10930_v13  ;;  %v11170_v35 = vor.u32 %v13471_v26, %v11167_v19 }
 0x1b1   : > { %v11535_v27 = vld [vmem:[%s20839_s1 + $0x15f0] sm:$0xf0]  ;;  %v13595_v54 = vld [vmem:[%s20839_s1 + $0x16e4] sm:$0xf]  ;;  %7246 = vmatpush.bf16.msra.mxu2 %v11058_v50  ;;  %v11410_v41 = vor.u32 %v13531_v5, %v11407_v36 }
 0x1b2   : > { %v11663_v40 = vld [vmem:[%s20839_s1 + $0x16f0] sm:$0xf0]  ;;  %v13627_v47 = vld [vmem:[%s20839_s1 + $0x17e4] sm:$0xf]  ;;  %7260 = vmatpush.bf16.msra.mxu3 %v11186_v49  ;;  %v11538_v38 = vor.u32 %v13563_v62, %v11535_v27 }
 0x1b3   : > { %v11791_v31 = vld [vmem:[%s20839_s1 + $0x17f0] sm:$0xf0]  ;;  %v11666_v32 = vor.u32 %v13595_v54, %v11663_v40  ;;  %v13527_v13 = vld [vmem:[%s20839_s1 + $0x14c4] sm:$0xf]  ;;  %7219 = vmatpush.bf16.msra.mxu0 %v10786_v33  ;;  %v16777_v54 = vpop.f32.mrf.mxu0 }
 0x1b4   : > { %v11391_v50 = vld [vmem:[%s20839_s1 + $0x14d0] sm:$0xf0]  ;;  %v13559_v39 = vld [vmem:[%s20839_s1 + $0x15c4] sm:$0xf]  ;;  %v11794_v43 = vor.u32 %v13627_v47, %v11791_v31  ;;  %7233 = vmatpush.bf16.msra.mxu1 %v10914_v2  ;;  %v16797_v31 = vpop.f32.mrf.mxu1 }
 0x1b5   : > { %v11519_v17 = vld [vmem:[%s20839_s1 + $0x15d0] sm:$0xf0]  ;;  %v13591_v49 = vld [vmem:[%s20839_s1 + $0x16c4] sm:$0xf]  ;;  %7247 = vmatpush.bf16.msra.mxu2 %v11042_v46  ;;  %v11394_v5 = vor.u32 %v13527_v13, %v11391_v50 }
 0x1b6   : > { %v11647_v20 = vld [vmem:[%s20839_s1 + $0x16d0] sm:$0xf0]  ;;  %v13623_v26 = vld [vmem:[%s20839_s1 + $0x17c4] sm:$0xf]  ;;  %7261 = vmatpush.bf16.msra.mxu3 %v11170_v35  ;;  %v11522_v36 = vor.u32 %v13559_v39, %v11519_v17  ;;  %7220 = vmatmul.bf16.vlgmr.msra.gmra.mxu0 %v15042_v51 }
 0x1b7   : > { %v11775_v19 = vld [vmem:[%s20839_s1 + $0x17d0] sm:$0xf0]  ;;  %7268 = vmatpush.bf16.msrb.mxu0 %v11410_v41  ;;  %v11650_v62 = vor.u32 %v13591_v49, %v11647_v20  ;;  %v13523_v33 = vld [vmem:[%s20839_s1 + $0x14a4] sm:$0xf]  ;;  %7234 = vmatmul.bf16.vlgmr.msra.gmra.mxu1 %v15055_v56 }
 0x1b8   : > { %7282 = vmatpush.bf16.msrb.mxu1 %v11538_v38  ;;  %v11375_v46 = vld [vmem:[%s20839_s1 + $0x14b0] sm:$0xf0]  ;;  %v13555_v27 = vld [vmem:[%s20839_s1 + $0x15a4] sm:$0xf]  ;;  %7248 = vmatmul.bf16.vlgmr.msra.gmra.mxu2 %v15053_v55 }
 0x1b9   : > { %7296 = vmatpush.bf16.msrb.mxu2 %v11666_v32  ;;  %v11778_v32 = vor.u32 %v13623_v26, %v11775_v19  ;;  %v11503_v38 = vld [vmem:[%s20839_s1 + $0x15b0] sm:$0xf0]  ;;  %v13587_v41 = vld [vmem:[%s20839_s1 + $0x16a4] sm:$0xf]  ;;  %7262 = vmatmul.bf16.vlgmr.msra.gmra.mxu3 %v15063_v59  ;;  %v11378_v35 = vor.u32 %v13523_v33, %v11375_v46 }
 0x1ba   : > { %7310 = vmatpush.bf16.msrb.mxu3 %v11794_v43  ;;  %v11631_v40 = vld [vmem:[%s20839_s1 + $0x16b0] sm:$0xf0]  ;;  %v13619_v2 = vld [vmem:[%s20839_s1 + $0x17a4] sm:$0xf]  ;;  %v11506_v13 = vor.u32 %v13555_v27, %v11503_v38  ;;  %v16829_v27 = vpop.f32.mrf.mxu3 }
 0x1bb   : > { %v11759_v47 = vld [vmem:[%s20839_s1 + $0x17b0] sm:$0xf0]  ;;  %7269 = vmatpush.bf16.msrb.mxu0 %v11394_v5  ;;  %v11634_v50 = vor.u32 %v13587_v41, %v11631_v40  ;;  %v13519_v39 = vld [vmem:[%s20839_s1 + $0x1484] sm:$0xf]  ;;  %v16818_v5 = vpop.f32.mrf.mxu2  ;;  %20927 = vst [vmem:[#allocation34_spill] sm:$0xff] %v16829_v27 }
 0x1bc   : > { %7283 = vmatpush.bf16.msrb.mxu1 %v11522_v36  ;;  %v11359_v43 = vld [vmem:[%s20839_s1 + $0x1490] sm:$0xf0]  ;;  %v13551_v17 = vld [vmem:[%s20839_s1 + $0x1584] sm:$0xf]  ;;  %v11762_v49 = vor.u32 %v13619_v2, %v11759_v47  ;;  %20926 = vst [vmem:[#allocation33_spill] sm:$0xff] %v16818_v5 }
 0x1bd   : > { %7297 = vmatpush.bf16.msrb.mxu2 %v11650_v62  ;;  %v11487_v20 = vld [vmem:[%s20839_s1 + $0x1590] sm:$0xf0]  ;;  %v13583_v26 = vld [vmem:[%s20839_s1 + $0x1684] sm:$0xf]  ;;  %v11362_v33 = vor.u32 %v13519_v39, %v11359_v43  ;;  %v16840_v2 = vld [vmem:[%s20840_s2] sm:$0xf]  ;;  %v6997_v43 = vpop.f32.mrf.mxu0 }
 0x1be   : > { %7311 = vmatpush.bf16.msrb.mxu3 %v11778_v32  ;;  %v11615_v19 = vld [vmem:[%s20839_s1 + $0x1690] sm:$0xf0]  ;;  %v13615_v36 = vld [vmem:[%s20839_s1 + $0x1784] sm:$0xf]  ;;  %v11490_v32 = vor.u32 %v13551_v17, %v11487_v20  ;;  %v20882_v47 = vperm.slane %v16840_v2, 1 }
 0x1bf   : > { %v11743_v62 = vld [vmem:[%s20839_s1 + $0x1790] sm:$0xf0]  ;;  %7270 = vmatpush.bf16.msrb.mxu0 %v11378_v35  ;;  %v13515_v46 = vld [vmem:[%s20839_s1 + $0x1464] sm:$0xf]  ;;  %v11618_v38 = vor.u32 %v13583_v26, %v11615_v19  ;;  %v7011_v19 = vpop.f32.mrf.mxu1 }
 0x1c0   : > { %7284 = vmatpush.bf16.msrb.mxu1 %v11506_v13  ;;  %v11343_v41 = vld [vmem:[%s20839_s1 + $0x1470] sm:$0xf0]  ;;  %v13547_v40 = vld [vmem:[%s20839_s1 + $0x1564] sm:$0xf]  ;;  %v11746_v35 = vor.u32 %v13615_v36, %v11743_v62  ;;  %v6998_v20 = vadd.f32 %v6997_v43, %v20882_v47 }
 0x1c1   : > { %7298 = vmatpush.bf16.msrb.mxu2 %v11634_v50  ;;  %v11471_v13 = vld [vmem:[%s20839_s1 + $0x1570] sm:$0xf0]  ;;  %v13579_v50 = vld [vmem:[%s20839_s1 + $0x1664] sm:$0xf]  ;;  %v11346_v26 = vor.u32 %v13515_v46, %v11343_v41 }
 0x1c2   : > { %7312 = vmatpush.bf16.msrb.mxu3 %v11762_v49  ;;  %v11599_v39 = vld [vmem:[%s20839_s1 + $0x1670] sm:$0xf0]  ;;  %v13611_v17 = vld [vmem:[%s20839_s1 + $0x1764] sm:$0xf]  ;;  %v11474_v36 = vor.u32 %v13547_v40, %v11471_v13  ;;  %v7012_v43 = vadd.f32 %v7011_v19, %v6998_v20  ;;  %v7039_v47 = vpop.f32.mrf.mxu3 }
 0x1c3   : > { %v11727_v49 = vld [vmem:[%s20839_s1 + $0x1770] sm:$0xf0]  ;;  %7271 = vmatpush.bf16.msrb.mxu0 %v11362_v33  ;;  %v11602_v62 = vor.u32 %v13579_v50, %v11599_v39  ;;  %v13511_v59 = vld [vmem:[%s20839_s1 + $0x1444] sm:$0xf] }
 0x1c4   : > { %7285 = vmatpush.bf16.msrb.mxu1 %v11490_v32  ;;  %v11327_v56 = vld [vmem:[%s20839_s1 + $0x1450] sm:$0xf0]  ;;  %v13543_v55 = vld [vmem:[%s20839_s1 + $0x1544] sm:$0xf]  ;;  %v11730_v33 = vor.u32 %v13611_v17, %v11727_v49 }
 0x1c5   : > { %7299 = vmatpush.bf16.msrb.mxu2 %v11618_v38  ;;  %v11455_v46 = vld [vmem:[%s20839_s1 + $0x1550] sm:$0xf0]  ;;  %v13575_v32 = vld [vmem:[%s20839_s1 + $0x1644] sm:$0xf]  ;;  %v11330_v13 = vor.u32 %v13511_v59, %v11327_v56  ;;  %v16958_v5 = vpop.f32.mrf.mxu0 }
 0x1c6   : > { %7313 = vmatpush.bf16.msrb.mxu3 %v11746_v35  ;;  %v11583_v38 = vld [vmem:[%s20839_s1 + $0x1650] sm:$0xf0]  ;;  %v13607_v41 = vld [vmem:[%s20839_s1 + $0x1744] sm:$0xf]  ;;  %v7025_v35 = vpop.f32.mrf.mxu2  ;;  %v11458_v39 = vor.u32 %v13543_v55, %v11455_v46 }
 0x1c7   : > { %v11711_v40 = vld [vmem:[%s20839_s1 + $0x1750] sm:$0xf0]  ;;  %7272 = vmatpush.bf16.msrb.mxu0 %v11346_v26  ;;  %v7026_v50 = vadd.f32 %v7025_v35, %v7012_v43  ;;  %v11586_v17 = vor.u32 %v13575_v32, %v11583_v38  ;;  %v13507_v49 = vld [vmem:[%s20839_s1 + $0x1424] sm:$0xf] }
 0x1c8   : > { %7286 = vmatpush.bf16.msrb.mxu1 %v11474_v36  ;;  %v11311_v20 = vld [vmem:[%s20839_s1 + $0x1430] sm:$0xf0]  ;;  %v13539_v19 = vld [vmem:[%s20839_s1 + $0x1524] sm:$0xf]  ;;  %v11714_v56 = vor.u32 %v13607_v41, %v11711_v40 }
 0x1c9   : > { %7300 = vmatpush.bf16.msrb.mxu2 %v11602_v62  ;;  %v11439_v55 = vld [vmem:[%s20839_s1 + $0x1530] sm:$0xf0]  ;;  %v13571_v59 = vld [vmem:[%s20839_s1 + $0x1624] sm:$0xf]  ;;  %v16902_v36 = vadd.f32 %v7039_v47, %v7026_v50 }
 0x1ca   : > { %7314 = vmatpush.bf16.msrb.mxu3 %v11730_v33  ;;  %v11567_v26 = vld [vmem:[%s20839_s1 + $0x1630] sm:$0xf0]  ;;  %v13603_v62 = vld [vmem:[%s20839_s1 + $0x1724] sm:$0xf]  ;;  %v11314_v33 = vor.u32 %v13507_v49, %v11311_v20  ;;  %v11442_v47 = vor.u32 %v13539_v19, %v11439_v55 }
 0x1cb   : > { %v11695_v43 = vld [vmem:[%s20839_s1 + $0x1730] sm:$0xf0]  ;;  %7273 = vmatpush.bf16.msrb.mxu0 %v11330_v13  ;;  %v13503_v46 = vld [vmem:[%s20839_s1 + $0x1404] sm:$0xf]  ;;  %v11570_v38 = vor.u32 %v13571_v59, %v11567_v26 }
 0x1cc   : > { %v11295_v32 = vld [vmem:[%s20839_s1 + $0x1410] sm:$0xf0]  ;;  %7287 = vmatpush.bf16.msrb.mxu1 %v11458_v39  ;;  %v13535_v41 = vld [vmem:[%s20839_s1 + $0x1504] sm:$0xf]  ;;  %v11698_v13 = vor.u32 %v13603_v62, %v11695_v43 }
 0x1cd   : > { %7301 = vmatpush.bf16.msrb.mxu2 %v11586_v17  ;;  %v11423_v40 = vld [vmem:[%s20839_s1 + $0x1510] sm:$0xf0]  ;;  %v13567_v35 = vld [vmem:[%s20839_s1 + $0x1604] sm:$0xf] }
 0x1ce   : > { %7315 = vmatpush.bf16.msrb.mxu3 %v11714_v56  ;;  %v11551_v50 = vld [vmem:[%s20839_s1 + $0x1610] sm:$0xf0]  ;;  %v13599_v39 = vld [vmem:[%s20839_s1 + $0x1704] sm:$0xf]  ;;  %v11298_v56 = vor.u32 %v13503_v46, %v11295_v32  ;;  %v11426_v62 = vor.u32 %v13535_v41, %v11423_v40 }
 0x1cf   : > { %v11679_v17 = vld [vmem:[%s20839_s1 + $0x1710] sm:$0xf0]  ;;  %v13659_v49 = vld [vmem:[%s20839_s1 + $0x18e4] sm:$0xf]  ;;  %7274 = vmatpush.bf16.msrb.mxu0 %v11314_v33  ;;  %v11554_v43 = vor.u32 %v13567_v35, %v11551_v50 }
 0x1d0   : > { %v11919_v20 = vld [vmem:[%s20839_s1 + $0x18f0] sm:$0xf0]  ;;  %v13691_v19 = vld [vmem:[%s20839_s1 + $0x19e4] sm:$0xf]  ;;  %7288 = vmatpush.bf16.msrb.mxu1 %v11442_v47  ;;  %v11682_v32 = vor.u32 %v13599_v39, %v11679_v17 }
 0x1d1   : > { %v12047_v55 = vld [vmem:[%s20839_s1 + $0x19f0] sm:$0xf0]  ;;  %v13723_v59 = vld [vmem:[%s20839_s1 + $0x1ae4] sm:$0xf]  ;;  %7302 = vmatpush.bf16.msrb.mxu2 %v11570_v38  ;;  %v11922_v51 = vor.u32 %v13659_v49, %v11919_v20  ;;  %v16984_v49 = vpop.f32.mrf.mxu1 }
 0x1d2   : > { %v12175_v26 = vld [vmem:[%s20839_s1 + $0x1af0] sm:$0xf0]  ;;  %v13755_v33 = vld [vmem:[%s20839_s1 + $0x1be4] sm:$0xf]  ;;  %7316 = vmatpush.bf16.msrb.mxu3 %v11698_v13  ;;  %v12050_v1 = vor.u32 %v13691_v19, %v12047_v55 }
 0x1d3   : > { %v12303_v46 = vld [vmem:[%s20839_s1 + $0x1bf0] sm:$0xf0]  ;;  %v12178_v27 = vor.u32 %v13723_v59, %v12175_v26  ;;  %v13655_v47 = vld [vmem:[%s20839_s1 + $0x18c4] sm:$0xf]  ;;  %7275 = vmatpush.bf16.msrb.mxu0 %v11298_v56 }
 0x1d4   : > { %v11903_v38 = vld [vmem:[%s20839_s1 + $0x18d0] sm:$0xf0]  ;;  %v13687_v41 = vld [vmem:[%s20839_s1 + $0x19c4] sm:$0xf]  ;;  %v12306_v40 = vor.u32 %v13755_v33, %v12303_v46  ;;  %7289 = vmatpush.bf16.msrb.mxu1 %v11426_v62 }
 0x1d5   : > { %v12031_v35 = vld [vmem:[%s20839_s1 + $0x19d0] sm:$0xf0]  ;;  %v13719_v13 = vld [vmem:[%s20839_s1 + $0x1ac4] sm:$0xf]  ;;  %7303 = vmatpush.bf16.msrb.mxu2 %v11554_v43  ;;  %v11906_v20 = vor.u32 %v13655_v47, %v11903_v38 }
 0x1d6   : > { %v12159_v50 = vld [vmem:[%s20839_s1 + $0x1ad0] sm:$0xf0]  ;;  %v13751_v39 = vld [vmem:[%s20839_s1 + $0x1bc4] sm:$0xf]  ;;  %7317 = vmatpush.bf16.msrb.mxu3 %v11682_v32  ;;  %v12034_v19 = vor.u32 %v13687_v41, %v12031_v35  ;;  %7276 = vmatmul.bf16.vlgmr.msrb.gmra.mxu0 %v15266_v23  ;;  %v17014_v32 = vpop.f32.mrf.mxu2 }
 0x1d7   : > { %v12287_v17 = vld [vmem:[%s20839_s1 + $0x1bd0] sm:$0xf0]  ;;  %7324 = vmatpush.bf16.msra.mxu0 %v11922_v51  ;;  %v12162_v56 = vor.u32 %v13719_v13, %v12159_v50  ;;  %v13651_v55 = vld [vmem:[%s20839_s1 + $0x18a4] sm:$0xf]  ;;  %7290 = vmatmul.bf16.vlgmr.msrb.gmra.mxu1 %v15279_v29  ;;  %v17025_v50 = vpop.f32.mrf.mxu3 }
 0x1d8   : > { %7338 = vmatpush.bf16.msra.mxu1 %v12050_v1  ;;  %v11887_v59 = vld [vmem:[%s20839_s1 + $0x18b0] sm:$0xf0]  ;;  %v13683_v26 = vld [vmem:[%s20839_s1 + $0x19a4] sm:$0xf]  ;;  %v12290_v51 = vor.u32 %v13751_v39, %v12287_v17  ;;  %7304 = vmatmul.bf16.vlgmr.msrb.gmra.mxu2 %v15277_v28 }
 0x1d9   : > { %7352 = vmatpush.bf16.msra.mxu2 %v12178_v27  ;;  %v12015_v1 = vld [vmem:[%s20839_s1 + $0x19b0] sm:$0xf0]  ;;  %v13715_v27 = vld [vmem:[%s20839_s1 + $0x1aa4] sm:$0xf]  ;;  %7318 = vmatmul.bf16.vlgmr.msrb.gmra.mxu3 %v15289_v42  ;;  %v11890_v46 = vor.u32 %v13651_v55, %v11887_v59 }
 0x1da   : > { %7366 = vmatpush.bf16.msra.mxu3 %v12306_v40  ;;  %v12143_v62 = vld [vmem:[%s20839_s1 + $0x1ab0] sm:$0xf0]  ;;  %v13747_v43 = vld [vmem:[%s20839_s1 + $0x1ba4] sm:$0xf]  ;;  %v12018_v47 = vor.u32 %v13683_v26, %v12015_v1 }
 0x1db   : > { %v12271_v33 = vld [vmem:[%s20839_s1 + $0x1bb0] sm:$0xf0]  ;;  %7325 = vmatpush.bf16.msra.mxu0 %v11906_v20  ;;  %v12146_v38 = vor.u32 %v13715_v27, %v12143_v62  ;;  %v13647_v41 = vld [vmem:[%s20839_s1 + $0x1884] sm:$0xf]  ;;  %v7067_v27 = vpop.f32.mrf.mxu1 }
 0x1dc   : > { %7339 = vmatpush.bf16.msra.mxu1 %v12034_v19  ;;  %v11871_v40 = vld [vmem:[%s20839_s1 + $0x1890] sm:$0xf0]  ;;  %v13679_v35 = vld [vmem:[%s20839_s1 + $0x1984] sm:$0xf]  ;;  %v12274_v13 = vor.u32 %v13747_v43, %v12271_v33  ;;  %v7053_v19 = vpop.f32.mrf.mxu0 }
 0x1dd   : > { %7353 = vmatpush.bf16.msra.mxu2 %v12162_v56  ;;  %v11999_v39 = vld [vmem:[%s20839_s1 + $0x1990] sm:$0xf0]  ;;  %v13711_v17 = vld [vmem:[%s20839_s1 + $0x1a84] sm:$0xf]  ;;  %v7054_v59 = vadd.f32 %v7053_v19, %v16902_v36  ;;  %v11874_v26 = vor.u32 %v13647_v41, %v11871_v40 }
 0x1de   : > { %7367 = vmatpush.bf16.msra.mxu3 %v12290_v51  ;;  %v12127_v20 = vld [vmem:[%s20839_s1 + $0x1a90] sm:$0xf0]  ;;  %v13743_v56 = vld [vmem:[%s20839_s1 + $0x1b84] sm:$0xf]  ;;  %v12002_v51 = vor.u32 %v13679_v35, %v11999_v39 }
 0x1df   : > { %v12255_v55 = vld [vmem:[%s20839_s1 + $0x1b90] sm:$0xf0]  ;;  %7326 = vmatpush.bf16.msra.mxu0 %v11890_v46  ;;  %v12130_v1 = vor.u32 %v13711_v17, %v12127_v20  ;;  %v13643_v62 = vld [vmem:[%s20839_s1 + $0x1864] sm:$0xf]  ;;  %v7068_v46 = vadd.f32 %v7067_v27, %v7054_v59  ;;  %v7081_v59 = vpop.f32.mrf.mxu2 }
 0x1e0   : > { %7340 = vmatpush.bf16.msra.mxu1 %v12018_v47  ;;  %v11855_v43 = vld [vmem:[%s20839_s1 + $0x1870] sm:$0xf0]  ;;  %v13675_v33 = vld [vmem:[%s20839_s1 + $0x1964] sm:$0xf]  ;;  %v12258_v36 = vor.u32 %v13743_v56, %v12255_v55 }
 0x1e1   : > { %7354 = vmatpush.bf16.msra.mxu2 %v12146_v38  ;;  %v11983_v47 = vld [vmem:[%s20839_s1 + $0x1970] sm:$0xf0]  ;;  %v13707_v38 = vld [vmem:[%s20839_s1 + $0x1a64] sm:$0xf]  ;;  %v7082_v27 = vadd.f32 %v7081_v59, %v7068_v46 }
 0x1e2   : > { %7368 = vmatpush.bf16.msra.mxu3 %v12274_v13  ;;  %v12111_v41 = vld [vmem:[%s20839_s1 + $0x1a70] sm:$0xf0]  ;;  %v13739_v40 = vld [vmem:[%s20839_s1 + $0x1b64] sm:$0xf]  ;;  %v11858_v13 = vor.u32 %v13643_v62, %v11855_v43  ;;  %v11986_v39 = vor.u32 %v13675_v33, %v11983_v47  ;;  %v7095_v33 = vpop.f32.mrf.mxu3 }
 0x1e3   : > { %v12239_v35 = vld [vmem:[%s20839_s1 + $0x1b70] sm:$0xf0]  ;;  %7327 = vmatpush.bf16.msra.mxu0 %v11874_v26  ;;  %v12114_v17 = vor.u32 %v13707_v38, %v12111_v41  ;;  %v13639_v20 = vld [vmem:[%s20839_s1 + $0x1844] sm:$0xf]  ;;  %v17091_v47 = vadd.f32 %v7095_v33, %v7082_v27 }
 0x1e4   : > { %7341 = vmatpush.bf16.msra.mxu1 %v12002_v51  ;;  %v11839_v19 = vld [vmem:[%s20839_s1 + $0x1850] sm:$0xf0]  ;;  %v13671_v56 = vld [vmem:[%s20839_s1 + $0x1944] sm:$0xf]  ;;  %v12242_v55 = vor.u32 %v13739_v40, %v12239_v35 }
 0x1e5   : > { %7355 = vmatpush.bf16.msra.mxu2 %v12130_v1  ;;  %v11967_v26 = vld [vmem:[%s20839_s1 + $0x1950] sm:$0xf0]  ;;  %v13703_v51 = vld [vmem:[%s20839_s1 + $0x1a44] sm:$0xf] }
 0x1e6   : > { %7369 = vmatpush.bf16.msra.mxu3 %v12258_v36  ;;  %v12095_v1 = vld [vmem:[%s20839_s1 + $0x1a50] sm:$0xf0]  ;;  %v13735_v62 = vld [vmem:[%s20839_s1 + $0x1b44] sm:$0xf]  ;;  %v11842_v36 = vor.u32 %v13639_v20, %v11839_v19  ;;  %v11970_v38 = vor.u32 %v13671_v56, %v11967_v26 }
 0x1e7   : > { %v12223_v43 = vld [vmem:[%s20839_s1 + $0x1b50] sm:$0xf0]  ;;  %7328 = vmatpush.bf16.msra.mxu0 %v11858_v13  ;;  %v12098_v41 = vor.u32 %v13703_v51, %v12095_v1  ;;  %v13635_v46 = vld [vmem:[%s20839_s1 + $0x1824] sm:$0xf] }
 0x1e8   : > { %7342 = vmatpush.bf16.msra.mxu1 %v11986_v39  ;;  %v11823_v40 = vld [vmem:[%s20839_s1 + $0x1830] sm:$0xf0]  ;;  %v13667_v35 = vld [vmem:[%s20839_s1 + $0x1924] sm:$0xf]  ;;  %v12226_v13 = vor.u32 %v13735_v62, %v12223_v43 }
 0x1e9   : > { %7356 = vmatpush.bf16.msra.mxu2 %v12114_v17  ;;  %v11951_v39 = vld [vmem:[%s20839_s1 + $0x1930] sm:$0xf0]  ;;  %v13699_v17 = vld [vmem:[%s20839_s1 + $0x1a24] sm:$0xf] }
 0x1ea   : > { %7370 = vmatpush.bf16.msra.mxu3 %v12242_v55  ;;  %v12079_v20 = vld [vmem:[%s20839_s1 + $0x1a30] sm:$0xf0]  ;;  %v13731_v19 = vld [vmem:[%s20839_s1 + $0x1b24] sm:$0xf]  ;;  %v11826_v55 = vor.u32 %v13635_v46, %v11823_v40  ;;  %v11954_v51 = vor.u32 %v13667_v35, %v11951_v39 }
 0x1eb   : > { %v12207_v56 = vld [vmem:[%s20839_s1 + $0x1b30] sm:$0xf0]  ;;  %7329 = vmatpush.bf16.msra.mxu0 %v11842_v36  ;;  %v13631_v59 = vld [vmem:[%s20839_s1 + $0x1804] sm:$0xf]  ;;  %v12082_v1 = vor.u32 %v13699_v17, %v12079_v20 }
 0x1ec   : > { %v11807_v26 = vld [vmem:[%s20839_s1 + $0x1810] sm:$0xf0]  ;;  %7343 = vmatpush.bf16.msra.mxu1 %v11970_v38  ;;  %v13663_v27 = vld [vmem:[%s20839_s1 + $0x1904] sm:$0xf]  ;;  %v12210_v33 = vor.u32 %v13731_v19, %v12207_v56 }
 0x1ed   : > { %7357 = vmatpush.bf16.msra.mxu2 %v12098_v41  ;;  %v11935_v62 = vld [vmem:[%s20839_s1 + $0x1910] sm:$0xf0]  ;;  %v13695_v43 = vld [vmem:[%s20839_s1 + $0x1a04] sm:$0xf] }
 0x1ee   : > { %7371 = vmatpush.bf16.msra.mxu3 %v12226_v13  ;;  %v12063_v36 = vld [vmem:[%s20839_s1 + $0x1a10] sm:$0xf0]  ;;  %v13727_v38 = vld [vmem:[%s20839_s1 + $0x1b04] sm:$0xf]  ;;  %v11810_v13 = vor.u32 %v13631_v59, %v11807_v26  ;;  %v11938_v19 = vor.u32 %v13663_v27, %v11935_v62  ;;  %v20928_v26 = vperm.slane %v15129_v30, 0 }
 0x1ef   : > { %v12191_v41 = vld [vmem:[%s20839_s1 + $0x1b10] sm:$0xf0]  ;;  %v13787_v46 = vld [vmem:[%s20839_s1 + $0x1ce4] sm:$0xf]  ;;  %7330 = vmatpush.bf16.msra.mxu0 %v11826_v55  ;;  %v12066_v56 = vor.u32 %v13695_v43, %v12063_v36  ;;  %v17186_v36 = vpop.f32.mrf.mxu0 }
 0x1f0   : > { %v12431_v40 = vld [vmem:[%s20839_s1 + $0x1cf0] sm:$0xf0]  ;;  %v13819_v35 = vld [vmem:[%s20839_s1 + $0x1de4] sm:$0xf]  ;;  %7344 = vmatpush.bf16.msra.mxu1 %v11954_v51  ;;  %v6552_v42 = vadd.f32 %v15255_v16, %v20928_v26  ;;  %v12194_v29 = vor.u32 %v13727_v38, %v12191_v41  ;;  %v20930_v26 = vld [vmem:[#allocation29_spill] sm:$0xff] }
 0x1f1   : > { %v12559_v39 = vld [vmem:[%s20839_s1 + $0x1df0] sm:$0xf0]  ;;  %v13851_v17 = vld [vmem:[%s20839_s1 + $0x1ee4] sm:$0xf]  ;;  %7358 = vmatpush.bf16.msra.mxu2 %v12082_v1  ;;  %v12434_v28 = vor.u32 %v13787_v46, %v12431_v40  ;;  %v17195_v40 = vpop.f32.mrf.mxu1 }
 0x1f2   : > { %v12687_v20 = vld [vmem:[%s20839_s1 + $0x1ef0] sm:$0xf0]  ;;  %v13883_v55 = vld [vmem:[%s20839_s1 + $0x1fe4] sm:$0xf]  ;;  %7372 = vmatpush.bf16.msra.mxu3 %v12210_v33  ;;  %v12562_v23 = vor.u32 %v13819_v35, %v12559_v39  ;;  %v6566_v46 = vadd.f32 %v15287_v37, %v6552_v42 }
 0x1f3   : > { %v12815_v59 = vld [vmem:[%s20839_s1 + $0x1ff0] sm:$0xf0]  ;;  %v12690_v51 = vor.u32 %v13851_v17, %v12687_v20  ;;  %v13783_v1 = vld [vmem:[%s20839_s1 + $0x1cc4] sm:$0xf]  ;;  %7331 = vmatpush.bf16.msra.mxu0 %v11810_v13 }
 0x1f4   : > { %v12415_v27 = vld [vmem:[%s20839_s1 + $0x1cd0] sm:$0xf0]  ;;  %v13815_v62 = vld [vmem:[%s20839_s1 + $0x1dc4] sm:$0xf]  ;;  %v12818_v30 = vor.u32 %v13883_v55, %v12815_v59  ;;  %7345 = vmatpush.bf16.msra.mxu1 %v11938_v19  ;;  %v20929_v55 = vld [vmem:[#allocation25_spill] sm:$0xff] }
 0x1f5   : > { %v12543_v16 = vld [vmem:[%s20839_s1 + $0x1dd0] sm:$0xf0]  ;;  %v13847_v43 = vld [vmem:[%s20839_s1 + $0x1ec4] sm:$0xf]  ;;  %7359 = vmatpush.bf16.msra.mxu2 %v12066_v56  ;;  %v12418_v35 = vor.u32 %v13783_v1, %v12415_v27  ;;  %v6580_v59 = vadd.f32 %v20929_v55, %v6566_v46 }
 0x1f6   : > { %v12671_v33 = vld [vmem:[%s20839_s1 + $0x1ed0] sm:$0xf0]  ;;  %v13879_v38 = vld [vmem:[%s20839_s1 + $0x1fc4] sm:$0xf]  ;;  %7373 = vmatpush.bf16.msra.mxu3 %v12194_v29  ;;  %v12546_v13 = vor.u32 %v13815_v62, %v12543_v16  ;;  %7332 = vmatmul.bf16.vlgmr.msra.gmra.mxu0 %v15487_v57 }
 0x1f7   : > { %v12799_v41 = vld [vmem:[%s20839_s1 + $0x1fd0] sm:$0xf0]  ;;  %7380 = vmatpush.bf16.msrb.mxu0 %v12434_v28  ;;  %v12674_v39 = vor.u32 %v13847_v43, %v12671_v33  ;;  %v13779_v17 = vld [vmem:[%s20839_s1 + $0x1ca4] sm:$0xf]  ;;  %7346 = vmatmul.bf16.vlgmr.msra.gmra.mxu1 %v15502_v0  ;;  %v17235_v43 = vpop.f32.mrf.mxu2 }
 0x1f8   : > { %7394 = vmatpush.bf16.msrb.mxu1 %v12562_v23  ;;  %v12399_v20 = vld [vmem:[%s20839_s1 + $0x1cb0] sm:$0xf0]  ;;  %v13811_v37 = vld [vmem:[%s20839_s1 + $0x1da4] sm:$0xf]  ;;  %v12802_v28 = vor.u32 %v13879_v38, %v12799_v41  ;;  %7360 = vmatmul.bf16.vlgmr.msra.gmra.mxu2 %v15500_v63 }
 0x1f9   : > { %7408 = vmatpush.bf16.msrb.mxu2 %v12690_v51  ;;  %v12527_v23 = vld [vmem:[%s20839_s1 + $0x1db0] sm:$0xf0]  ;;  %v13843_v29 = vld [vmem:[%s20839_s1 + $0x1ea4] sm:$0xf]  ;;  %7374 = vmatmul.bf16.vlgmr.msra.gmra.mxu3 %v20930_v26  ;;  %v12402_v51 = vor.u32 %v13779_v17, %v12399_v20 }
 0x1fa   : > { %7422 = vmatpush.bf16.msrb.mxu3 %v12818_v30  ;;  %v12655_v42 = vld [vmem:[%s20839_s1 + $0x1eb0] sm:$0xf0]  ;;  %v13875_v19 = vld [vmem:[%s20839_s1 + $0x1fa4] sm:$0xf]  ;;  %v12530_v1 = vor.u32 %v13811_v37, %v12527_v23 }
 0x1fb   : > { %v12783_v56 = vld [vmem:[%s20839_s1 + $0x1fb0] sm:$0xf0]  ;;  %7381 = vmatpush.bf16.msrb.mxu0 %v12418_v35  ;;  %v12658_v27 = vor.u32 %v13843_v29, %v12655_v42  ;;  %v13775_v62 = vld [vmem:[%s20839_s1 + $0x1c84] sm:$0xf]  ;;  %v17246_v35 = vpop.f32.mrf.mxu3  ;;  %v7123_v29 = vpop.f32.mrf.mxu1 }
 0x1fc   : > { %7395 = vmatpush.bf16.msrb.mxu1 %v12546_v13  ;;  %v12383_v30 = vld [vmem:[%s20839_s1 + $0x1c90] sm:$0xf0]  ;;  %v13807_v16 = vld [vmem:[%s20839_s1 + $0x1d84] sm:$0xf]  ;;  %v12786_v33 = vor.u32 %v13875_v19, %v12783_v56  ;;  %v7109_v13 = vpop.f32.mrf.mxu0 }
 0x1fd   : > { %7409 = vmatpush.bf16.msrb.mxu2 %v12674_v39  ;;  %v12511_v38 = vld [vmem:[%s20839_s1 + $0x1d90] sm:$0xf0]  ;;  %v13839_v41 = vld [vmem:[%s20839_s1 + $0x1e84] sm:$0xf]  ;;  %v12386_v23 = vor.u32 %v13775_v62, %v12383_v30 }
 0x1fe   : > { %7423 = vmatpush.bf16.msrb.mxu3 %v12802_v28  ;;  %v12639_v46 = vld [vmem:[%s20839_s1 + $0x1e90] sm:$0xf0]  ;;  %v13871_v39 = vld [vmem:[%s20839_s1 + $0x1f84] sm:$0xf]  ;;  %v7110_v28 = vadd.f32 %v7109_v13, %v17091_v47  ;;  %v12514_v42 = vor.u32 %v13807_v16, %v12511_v38 }
 0x1ff   : > { %v12767_v17 = vld [vmem:[%s20839_s1 + $0x1f90] sm:$0xf0]  ;;  %v20931_v20 = vld [vmem:[#allocation26_spill] sm:$0xff]  ;;  %7382 = vmatpush.bf16.msrb.mxu0 %v12402_v51  ;;  %v12642_v19 = vor.u32 %v13839_v41, %v12639_v46 }
 0x200   : > { %v6594_v37 = vadd.f32 %v20931_v20, %v6580_v59  ;;  %7396 = vmatpush.bf16.msrb.mxu1 %v12530_v1  ;;  %v13771_v56 = vld [vmem:[%s20839_s1 + $0x1c64] sm:$0xf]  ;;  %v12367_v55 = vld [vmem:[%s20839_s1 + $0x1c70] sm:$0xf0]  ;;  %v12770_v47 = vor.u32 %v13871_v39, %v12767_v17  ;;  %v7124_v51 = vadd.f32 %v7123_v29, %v7110_v28  ;;  %v7137_v28 = vpop.f32.mrf.mxu2 }
 0x201   : > { %7410 = vmatpush.bf16.msrb.mxu2 %v12658_v27  ;;  %v13803_v59 = vld [vmem:[%s20839_s1 + $0x1d64] sm:$0xf]  ;;  %v12495_v1 = vld [vmem:[%s20839_s1 + $0x1d70] sm:$0xf0]  ;;  %v12370_v41 = vor.u32 %v13771_v56, %v12367_v55 }
 0x202   : > { %7424 = vmatpush.bf16.msrb.mxu3 %v12786_v33  ;;  %v13835_v27 = vld [vmem:[%s20839_s1 + $0x1e64] sm:$0xf]  ;;  %v12623_v62 = vld [vmem:[%s20839_s1 + $0x1e70] sm:$0xf0]  ;;  %v20932_v33 = vld [vmem:[#allocation27_spill] sm:$0xff]  ;;  %v12498_v46 = vor.u32 %v13803_v59, %v12495_v1 }
 0x203   : > { %v13867_v30 = vld [vmem:[%s20839_s1 + $0x1f64] sm:$0xf]  ;;  %v12751_v16 = vld [vmem:[%s20839_s1 + $0x1f70] sm:$0xf0]  ;;  %v6608_v38 = vadd.f32 %v20932_v33, %v6594_v37  ;;  %7383 = vmatpush.bf16.msrb.mxu0 %v12386_v23  ;;  %v12626_v13 = vor.u32 %v13835_v27, %v12623_v62  ;;  %v7151_v56 = vpop.f32.mrf.mxu3 }
 0x204   : > { %7397 = vmatpush.bf16.msrb.mxu1 %v12514_v42  ;;  %v13767_v39 = vld [vmem:[%s20839_s1 + $0x1c44] sm:$0xf]  ;;  %v12351_v17 = vld [vmem:[%s20839_s1 + $0x1c50] sm:$0xf0]  ;;  %v12754_v37 = vor.u32 %v13867_v30, %v12751_v16 }
 0x205   : > { %7411 = vmatpush.bf16.msrb.mxu2 %v12642_v19  ;;  %v13799_v20 = vld [vmem:[%s20839_s1 + $0x1d44] sm:$0xf]  ;;  %v12479_v23 = vld [vmem:[%s20839_s1 + $0x1d50] sm:$0xf0]  ;;  %v7138_v19 = vadd.f32 %v7137_v28, %v7124_v51  ;;  %v12354_v27 = vor.u32 %v13767_v39, %v12351_v17 }
 0x206   : > { %7425 = vmatpush.bf16.msrb.mxu3 %v12770_v47  ;;  %v13831_v29 = vld [vmem:[%s20839_s1 + $0x1e44] sm:$0xf]  ;;  %v12607_v42 = vld [vmem:[%s20839_s1 + $0x1e50] sm:$0xf0]  ;;  %v12482_v30 = vor.u32 %v13799_v20, %v12479_v23 }
 0x207   : > { %v13863_v55 = vld [vmem:[%s20839_s1 + $0x1f44] sm:$0xf]  ;;  %v12735_v59 = vld [vmem:[%s20839_s1 + $0x1f50] sm:$0xf0]  ;;  %7384 = vmatpush.bf16.msrb.mxu0 %v12370_v41  ;;  %v17306_v62 = vadd.f32 %v7151_v56, %v7138_v19  ;;  %v12610_v16 = vor.u32 %v13831_v29, %v12607_v42 }
 0x208   : > { %v20933_v47 = vld [vmem:[#allocation28_spill] sm:$0xff]  ;;  %7398 = vmatpush.bf16.msrb.mxu1 %v12498_v46  ;;  %v13763_v51 = vld [vmem:[%s20839_s1 + $0x1c24] sm:$0xf]  ;;  %v12738_v46 = vor.u32 %v13863_v55, %v12735_v59 }
 0x209   : > { %v6622_v1 = vadd.f32 %v20933_v47, %v6608_v38  ;;  %7412 = vmatpush.bf16.msrb.mxu2 %v12626_v13  ;;  %v12335_v33 = vld [vmem:[%s20839_s1 + $0x1c30] sm:$0xf0]  ;;  %v13795_v38 = vld [vmem:[%s20839_s1 + $0x1d24] sm:$0xf] }
 0x20a   : > { %v20934_v41 = vld [vmem:[#allocation30_spill] sm:$0xff]  ;;  %7426 = vmatpush.bf16.msrb.mxu3 %v12754_v37  ;;  %v12463_v13 = vld [vmem:[%s20839_s1 + $0x1d30] sm:$0xf0]  ;;  %v12338_v23 = vor.u32 %v13763_v51, %v12335_v33 }
 0x20b   : > { %v6636_v39 = vadd.f32 %v20934_v41, %v6622_v1  ;;  %v13827_v17 = vld [vmem:[%s20839_s1 + $0x1e24] sm:$0xf]  ;;  %v12591_v20 = vld [vmem:[%s20839_s1 + $0x1e30] sm:$0xf0]  ;;  %7385 = vmatpush.bf16.msrb.mxu0 %v12354_v27  ;;  %v12466_v19 = vor.u32 %v13795_v38, %v12463_v13  ;;  %v20935_v1 = vld [vmem:[#allocation31_spill] sm:$0xff] }
 0x20c   : > { %v13859_v28 = vld [vmem:[%s20839_s1 + $0x1f24] sm:$0xf]  ;;  %v12719_v37 = vld [vmem:[%s20839_s1 + $0x1f30] sm:$0xf0]  ;;  %7399 = vmatpush.bf16.msrb.mxu1 %v12482_v30  ;;  %v12594_v56 = vor.u32 %v13827_v17, %v12591_v20  ;;  %v8853_v38 = vld [vmem:[%s20839_s1 + $0xe8] sm:$0xf] }
 0x20d   : > { %v13759_v29 = vld [vmem:[%s20839_s1 + $0x1c04] sm:$0xf]  ;;  %v12319_v42 = vld [vmem:[%s20839_s1 + $0x1c10] sm:$0xf0]  ;;  %7413 = vmatpush.bf16.msrb.mxu2 %v12610_v16  ;;  %v6650_v27 = vadd.f32 %v20935_v1, %v6636_v39  ;;  %v12722_v51 = vor.u32 %v13859_v28, %v12719_v37  ;;  %v12894_v41 = vld [vmem:[%s20839_s1 + $0xf4] sm:$0xf0] }
 0x20e   : > { %v13791_v55 = vld [vmem:[%s20839_s1 + $0x1d04] sm:$0xf]  ;;  %v12447_v59 = vld [vmem:[%s20839_s1 + $0x1d10] sm:$0xf0]  ;;  %7427 = vmatpush.bf16.msrb.mxu3 %v12738_v46  ;;  %v8981_v39 = vld [vmem:[%s20839_s1 + $0x1e8] sm:$0xf]  ;;  %v12322_v13 = vor.u32 %v13759_v29, %v12319_v42  ;;  %v8854_v42 = vor.u32 %v12894_v41, %v8853_v38 }
 0x20f   : > { %v13823_v47 = vld [vmem:[%s20839_s1 + $0x1e04] sm:$0xf]  ;;  %v12575_v30 = vld [vmem:[%s20839_s1 + $0x1e10] sm:$0xf0]  ;;  %v6664_v46 = vadd.f32 %v15721_v8, %v6650_v27  ;;  %7386 = vmatpush.bf16.msrb.mxu0 %v12338_v23  ;;  %v12926_v17 = vld [vmem:[%s20839_s1 + $0x1f4] sm:$0xf0]  ;;  %v12450_v37 = vor.u32 %v13791_v55, %v12447_v59 }
 0x210   : > { %v13855_v16 = vld [vmem:[%s20839_s1 + $0x1f04] sm:$0xf]  ;;  %v12703_v33 = vld [vmem:[%s20839_s1 + $0x1f10] sm:$0xf0]  ;;  %v9109_v20 = vld [vmem:[%s20839_s1 + $0x2e8] sm:$0xf]  ;;  %7400 = vmatpush.bf16.msrb.mxu1 %v12466_v19  ;;  %v12578_v1 = vor.u32 %v13823_v47, %v12575_v30  ;;  %v8982_v27 = vor.u32 %v12926_v17, %v8981_v39  ;;  %v17411_v39 = vpop.f32.mrf.mxu1 }
 0x211   : > { %v12958_v28 = vld [vmem:[%s20839_s1 + $0x2f4] sm:$0xf0]  ;;  %7414 = vmatpush.bf16.msrb.mxu2 %v12594_v56  ;;  %v9237_v8 = vld [vmem:[%s20839_s1 + $0x3e8] sm:$0xf]  ;;  %v12706_v29 = vor.u32 %v13855_v16, %v12703_v33  ;;  %v6678_v59 = vadd.f32 %v15733_v18, %v6664_v46  ;;  %v17402_v33 = vpop.f32.mrf.mxu0 }
 0x212   : > { %v12990_v23 = vld [vmem:[%s20839_s1 + $0x3f4] sm:$0xf0]  ;;  %7428 = vmatpush.bf16.msrb.mxu3 %v12722_v51  ;;  %v9110_v26 = vor.u32 %v12958_v28, %v9109_v20  ;;  %v8837_v19 = vld [vmem:[%s20839_s1 + $0xc8] sm:$0xf] }
 0x213   : > { %v12890_v56 = vld [vmem:[%s20839_s1 + $0xd4] sm:$0xf0]  ;;  %v8965_v55 = vld [vmem:[%s20839_s1 + $0x1c8] sm:$0xf]  ;;  %7387 = vmatpush.bf16.msrb.mxu0 %v12322_v13  ;;  %v9238_v47 = vor.u32 %v12990_v23, %v9237_v8  ;;  %v6692_v41 = vadd.f32 %v15774_v48, %v6678_v59 }
 0x214   : > { %v12922_v51 = vld [vmem:[%s20839_s1 + $0x1d4] sm:$0xf0]  ;;  %v9093_v30 = vld [vmem:[%s20839_s1 + $0x2c8] sm:$0xf]  ;;  %7401 = vmatpush.bf16.msrb.mxu1 %v12450_v37  ;;  %v8838_v46 = vor.u32 %v12890_v56, %v8837_v19 }
 0x215   : > { %v12954_v16 = vld [vmem:[%s20839_s1 + $0x2d4] sm:$0xf0]  ;;  %7415 = vmatpush.bf16.msrb.mxu2 %v12578_v1  ;;  %v9221_v18 = vld [vmem:[%s20839_s1 + $0x3c8] sm:$0xf]  ;;  %v8966_v13 = vor.u32 %v12922_v51, %v8965_v55  ;;  %v17452_v51 = vpop.f32.mrf.mxu2 }
 0x216   : > { %v12986_v38 = vld [vmem:[%s20839_s1 + $0x3d4] sm:$0xf0]  ;;  %7429 = vmatpush.bf16.msrb.mxu3 %v12706_v29  ;;  %v9094_v17 = vor.u32 %v12954_v16, %v9093_v30  ;;  %v8821_v20 = vld [vmem:[%s20839_s1 + $0xa8] sm:$0xf]  ;;  %7388 = vmatmul.bf16.vlgmr.msrb.gmra.mxu0 %v15710_v61 }
 0x217   : > { %7436 = vmatpush.bf16.msra.mxu0 %v8854_v42  ;;  %v12886_v28 = vld [vmem:[%s20839_s1 + $0xb4] sm:$0xf0]  ;;  %v8949_v48 = vld [vmem:[%s20839_s1 + $0x1a8] sm:$0xf]  ;;  %v9222_v37 = vor.u32 %v12986_v38, %v9221_v18  ;;  %7402 = vmatmul.bf16.vlgmr.msrb.gmra.mxu1 %v15725_v11  ;;  %v6706_v42 = vadd.f32 %v15785_v3, %v6692_v41  ;;  %v17463_v41 = vpop.f32.mrf.mxu3 }
 0x218   : > { %7450 = vmatpush.bf16.msra.mxu1 %v8982_v27  ;;  %v9077_v1 = vld [vmem:[%s20839_s1 + $0x2a8] sm:$0xf]  ;;  %v12950_v8 = vld [vmem:[%s20839_s1 + $0x2b4] sm:$0xf0]  ;;  %7416 = vmatmul.bf16.vlgmr.msrb.gmra.mxu2 %v15723_v10  ;;  %v8822_v27 = vor.u32 %v12886_v28, %v8821_v20  ;;  %v7179_v28 = vpop.f32.mrf.mxu1 }
 0x219   : > { %7464 = vmatpush.bf16.msra.mxu2 %v9110_v26  ;;  %v12918_v26 = vld [vmem:[%s20839_s1 + $0x1b4] sm:$0xf0]  ;;  %v9205_v23 = vld [vmem:[%s20839_s1 + $0x3a8] sm:$0xf]  ;;  %7430 = vmatmul.bf16.vlgmr.msrb.gmra.mxu3 %v15735_v15  ;;  %v9078_v56 = vor.u32 %v12950_v8, %v9077_v1 }
 0x21a   : > { %7478 = vmatpush.bf16.msra.mxu3 %v9238_v47  ;;  %v12982_v29 = vld [vmem:[%s20839_s1 + $0x3b4] sm:$0xf0]  ;;  %v8950_v19 = vor.u32 %v12918_v26, %v8949_v48  ;;  %v8805_v55 = vld [vmem:[%s20839_s1 + $0x88] sm:$0xf]  ;;  %v6720_v47 = vadd.f32 %v15934_v21, %v6706_v42 }
 0x21b   : > { %7437 = vmatpush.bf16.msra.mxu0 %v8838_v46  ;;  %v12882_v59 = vld [vmem:[%s20839_s1 + $0x94] sm:$0xf0]  ;;  %v8933_v3 = vld [vmem:[%s20839_s1 + $0x188] sm:$0xf]  ;;  %v9206_v30 = vor.u32 %v12982_v29, %v9205_v23  ;;  %v7165_v46 = vpop.f32.mrf.mxu0 }
 0x21c   : > { %7451 = vmatpush.bf16.msra.mxu1 %v8966_v13  ;;  %v12914_v16 = vld [vmem:[%s20839_s1 + $0x194] sm:$0xf0]  ;;  %v9061_v18 = vld [vmem:[%s20839_s1 + $0x288] sm:$0xf]  ;;  %v8806_v20 = vor.u32 %v12882_v59, %v8805_v55 }
 0x21d   : > { %7465 = vmatpush.bf16.msra.mxu2 %v9094_v17  ;;  %v12946_v38 = vld [vmem:[%s20839_s1 + $0x294] sm:$0xf0]  ;;  %v9189_v21 = vld [vmem:[%s20839_s1 + $0x388] sm:$0xf]  ;;  %v7166_v17 = vadd.f32 %v7165_v46, %v17306_v62  ;;  %v8934_v48 = vor.u32 %v12914_v16, %v8933_v3  ;;  %v6734_v62 = vadd.f32 %v15942_v60, %v6720_v47 }
 0x21e   : > { %7479 = vmatpush.bf16.msra.mxu3 %v9222_v37  ;;  %v12978_v13 = vld [vmem:[%s20839_s1 + $0x394] sm:$0xf0]  ;;  %v9062_v37 = vor.u32 %v12946_v38, %v9061_v18  ;;  %v8789_v26 = vld [vmem:[%s20839_s1 + $0x68] sm:$0xf]  ;;  %v7193_v38 = vpop.f32.mrf.mxu2 }
 0x21f   : > { %7438 = vmatpush.bf16.msra.mxu0 %v8822_v27  ;;  %v12878_v1 = vld [vmem:[%s20839_s1 + $0x74] sm:$0xf0]  ;;  %v8917_v8 = vld [vmem:[%s20839_s1 + $0x168] sm:$0xf]  ;;  %v9190_v23 = vor.u32 %v12978_v13, %v9189_v21  ;;  %v7180_v29 = vadd.f32 %v7179_v28, %v7166_v17  ;;  %v6748_v55 = vadd.f32 %v15981_v7, %v6734_v62 }
 0x220   : > { %7452 = vmatpush.bf16.msra.mxu1 %v8950_v19  ;;  %v12910_v42 = vld [vmem:[%s20839_s1 + $0x174] sm:$0xf0]  ;;  %v9045_v27 = vld [vmem:[%s20839_s1 + $0x268] sm:$0xf]  ;;  %v8790_v59 = vor.u32 %v12878_v1, %v8789_v26 }
 0x221   : > { %7466 = vmatpush.bf16.msra.mxu2 %v9078_v56  ;;  %v12942_v19 = vld [vmem:[%s20839_s1 + $0x274] sm:$0xf0]  ;;  %v9173_v56 = vld [vmem:[%s20839_s1 + $0x368] sm:$0xf]  ;;  %v8918_v3 = vor.u32 %v12910_v42, %v8917_v8  ;;  %v7194_v17 = vadd.f32 %v7193_v38, %v7180_v29 }
 0x222   : > { %7480 = vmatpush.bf16.msra.mxu3 %v9206_v30  ;;  %v12974_v60 = vld [vmem:[%s20839_s1 + $0x374] sm:$0xf0]  ;;  %v9046_v47 = vor.u32 %v12942_v19, %v9045_v27  ;;  %v8773_v30 = vld [vmem:[%s20839_s1 + $0x48] sm:$0xf] }
 0x223   : > { %7439 = vmatpush.bf16.msra.mxu0 %v8806_v20  ;;  %v12874_v16 = vld [vmem:[%s20839_s1 + $0x54] sm:$0xf0]  ;;  %v8901_v18 = vld [vmem:[%s20839_s1 + $0x148] sm:$0xf]  ;;  %v9174_v7 = vor.u32 %v12974_v60, %v9173_v56  ;;  %v7207_v20 = vpop.f32.mrf.mxu3 }
 0x224   : > { %7453 = vmatpush.bf16.msra.mxu1 %v8934_v48  ;;  %v12906_v46 = vld [vmem:[%s20839_s1 + $0x154] sm:$0xf0]  ;;  %v9029_v21 = vld [vmem:[%s20839_s1 + $0x248] sm:$0xf]  ;;  %v8774_v26 = vor.u32 %v12874_v16, %v8773_v30  ;;  %v17523_v1 = vadd.f32 %v7207_v20, %v7194_v17 }
 0x225   : > { %7467 = vmatpush.bf16.msra.mxu2 %v9062_v37  ;;  %v12938_v13 = vld [vmem:[%s20839_s1 + $0x254] sm:$0xf0]  ;;  %v9157_v28 = vld [vmem:[%s20839_s1 + $0x348] sm:$0xf]  ;;  %v6762_v37 = vadd.f32 %v15992_v22, %v6748_v55  ;;  %v8902_v8 = vor.u32 %v12906_v46, %v8901_v18 }
 0x226   : > { %7481 = vmatpush.bf16.msra.mxu3 %v9190_v23  ;;  %v12970_v48 = vld [vmem:[%s20839_s1 + $0x354] sm:$0xf0]  ;;  %v9030_v62 = vor.u32 %v12938_v13, %v9029_v21  ;;  %v8757_v23 = vld [vmem:[%s20839_s1 + $0x28] sm:$0xf] }
 0x227   : > { %7440 = vmatpush.bf16.msra.mxu0 %v8790_v59  ;;  %v12870_v29 = vld [vmem:[%s20839_s1 + $0x34] sm:$0xf0]  ;;  %v8885_v22 = vld [vmem:[%s20839_s1 + $0x128] sm:$0xf]  ;;  %v6776_v42 = vadd.f32 %v16141_v53, %v6762_v37  ;;  %v9158_v27 = vor.u32 %v12970_v48, %v9157_v28 }
 0x228   : > { %7454 = vmatpush.bf16.msra.mxu1 %v8918_v3  ;;  %v12902_v19 = vld [vmem:[%s20839_s1 + $0x134] sm:$0xf0]  ;;  %v9013_v56 = vld [vmem:[%s20839_s1 + $0x228] sm:$0xf]  ;;  %v8758_v59 = vor.u32 %v12870_v29, %v8757_v23 }
 0x229   : > { %7468 = vmatpush.bf16.msra.mxu2 %v9046_v47  ;;  %v12934_v60 = vld [vmem:[%s20839_s1 + $0x234] sm:$0xf0]  ;;  %v9141_v55 = vld [vmem:[%s20839_s1 + $0x328] sm:$0xf]  ;;  %v8886_v30 = vor.u32 %v12902_v19, %v8885_v22  ;;  %v6790_v46 = vadd.f32 %v16149_v58, %v6776_v42 }
 0x22a   : > { %7482 = vmatpush.bf16.msra.mxu3 %v9174_v7  ;;  %v12966_v53 = vld [vmem:[%s20839_s1 + $0x334] sm:$0xf0]  ;;  %v8741_v3 = vld [vmem:[%s20839_s1 + $0x8] sm:$0xf]  ;;  %v9014_v16 = vor.u32 %v12934_v60, %v9013_v56 }
 0x22b   : > { %7441 = vmatpush.bf16.msra.mxu0 %v8774_v26  ;;  %v12866_v47 = vld [vmem:[%s20839_s1 + $0x14] sm:$0xf0]  ;;  %v8869_v18 = vld [vmem:[%s20839_s1 + $0x108] sm:$0xf]  ;;  %v9142_v21 = vor.u32 %v12966_v53, %v9141_v55  ;;  %v6804_v37 = vadd.f32 %v16188_v6, %v6790_v46 }
 0x22c   : > { %7455 = vmatpush.bf16.msra.mxu1 %v8902_v8  ;;  %v12898_v7 = vld [vmem:[%s20839_s1 + $0x114] sm:$0xf0]  ;;  %v8997_v38 = vld [vmem:[%s20839_s1 + $0x208] sm:$0xf]  ;;  %v8742_v26 = vor.u32 %v12866_v47, %v8741_v3 }
 0x22d   : > { %7469 = vmatpush.bf16.msra.mxu2 %v9030_v62  ;;  %v12930_v13 = vld [vmem:[%s20839_s1 + $0x214] sm:$0xf0]  ;;  %v9125_v17 = vld [vmem:[%s20839_s1 + $0x308] sm:$0xf]  ;;  %v8870_v29 = vor.u32 %v12898_v7, %v8869_v18  ;;  %v6818_v3 = vadd.f32 %v16199_v12, %v6804_v37  ;;  %v17619_v7 = vpop.f32.mrf.mxu0 }
 0x22e   : > { %7483 = vmatpush.bf16.msra.mxu3 %v9158_v27  ;;  %v12962_v20 = vld [vmem:[%s20839_s1 + $0x314] sm:$0xf0]  ;;  %v9365_v28 = vld [vmem:[%s20839_s1 + $0x4e8] sm:$0xf]  ;;  %v8998_v22 = vor.u32 %v12930_v13, %v8997_v38 }
 0x22f   : > { %v13022_v58 = vld [vmem:[%s20839_s1 + $0x4f4] sm:$0xf0]  ;;  %v9493_v48 = vld [vmem:[%s20839_s1 + $0x5e8] sm:$0xf]  ;;  %7442 = vmatpush.bf16.msra.mxu0 %v8758_v59  ;;  %v9126_v27 = vor.u32 %v12962_v20, %v9125_v17  ;;  %v6832_v46 = vadd.f32 %v16348_v34, %v6818_v3 }
 0x230   : > { %v13054_v8 = vld [vmem:[%s20839_s1 + $0x5f4] sm:$0xf0]  ;;  %v9621_v62 = vld [vmem:[%s20839_s1 + $0x6e8] sm:$0xf]  ;;  %7456 = vmatpush.bf16.msra.mxu1 %v8886_v30  ;;  %v9366_v19 = vor.u32 %v13022_v58, %v9365_v28 }
 0x231   : > { %v13086_v23 = vld [vmem:[%s20839_s1 + $0x6f4] sm:$0xf0]  ;;  %7470 = vmatpush.bf16.msra.mxu2 %v9014_v16  ;;  %v9749_v6 = vld [vmem:[%s20839_s1 + $0x7e8] sm:$0xf]  ;;  %v9494_v56 = vor.u32 %v13054_v8, %v9493_v48 }
 0x232   : > { %v13118_v42 = vld [vmem:[%s20839_s1 + $0x7f4] sm:$0xf0]  ;;  %7484 = vmatpush.bf16.msra.mxu3 %v9142_v21  ;;  %v9622_v60 = vor.u32 %v13086_v23, %v9621_v62  ;;  %v9349_v55 = vld [vmem:[%s20839_s1 + $0x4c8] sm:$0xf]  ;;  %v17628_v21 = vpop.f32.mrf.mxu1 }
 0x233   : > { %v13018_v53 = vld [vmem:[%s20839_s1 + $0x4d4] sm:$0xf0]  ;;  %v9477_v59 = vld [vmem:[%s20839_s1 + $0x5c8] sm:$0xf]  ;;  %7443 = vmatpush.bf16.msra.mxu0 %v8742_v26  ;;  %v9750_v47 = vor.u32 %v13118_v42, %v9749_v6  ;;  %v6846_v6 = vadd.f32 %v16356_v24, %v6832_v46 }
 0x234   : > { %v13050_v30 = vld [vmem:[%s20839_s1 + $0x5d4] sm:$0xf0]  ;;  %v9605_v16 = vld [vmem:[%s20839_s1 + $0x6c8] sm:$0xf]  ;;  %7457 = vmatpush.bf16.msra.mxu1 %v8870_v29  ;;  %v9350_v13 = vor.u32 %v13018_v53, %v9349_v55  ;;  %v20936_v29 = vld [vmem:[#allocation2_spill] sm:$0xff] }
 0x235   : > { %v13082_v18 = vld [vmem:[%s20839_s1 + $0x6d4] sm:$0xf0]  ;;  %7471 = vmatpush.bf16.msra.mxu2 %v8998_v22  ;;  %v9733_v12 = vld [vmem:[%s20839_s1 + $0x7c8] sm:$0xf]  ;;  %v9478_v17 = vor.u32 %v13050_v30, %v9477_v59  ;;  %v6860_v53 = vadd.f32 %v16395_v25, %v6846_v6  ;;  %v17669_v59 = vpop.f32.mrf.mxu2 }
 0x236   : > { %v13114_v38 = vld [vmem:[%s20839_s1 + $0x7d4] sm:$0xf0]  ;;  %7485 = vmatpush.bf16.msra.mxu3 %v9126_v27  ;;  %v9606_v20 = vor.u32 %v13082_v18, %v9605_v16  ;;  %v9333_v28 = vld [vmem:[%s20839_s1 + $0x4a8] sm:$0xf]  ;;  %7444 = vmatmul.bf16.vlgmr.msra.gmra.mxu0 %v14249_v14  ;;  %v20938_v27 = vld [vmem:[#allocation4_spill] sm:$0xff]  ;;  %v17680_v18 = vpop.f32.mrf.mxu3 }
 0x237   : > { %7492 = vmatpush.bf16.msrb.mxu0 %v9366_v19  ;;  %v13014_v58 = vld [vmem:[%s20839_s1 + $0x4b4] sm:$0xf0]  ;;  %v9461_v34 = vld [vmem:[%s20839_s1 + $0x5a8] sm:$0xf]  ;;  %v9734_v48 = vor.u32 %v13114_v38, %v9733_v12  ;;  %v7221_v12 = vpop.f32.mrf.mxu0 }
 0x238   : > { %7506 = vmatpush.bf16.msrb.mxu1 %v9494_v56  ;;  %v13046_v37 = vld [vmem:[%s20839_s1 + $0x5b4] sm:$0xf0]  ;;  %v9589_v26 = vld [vmem:[%s20839_s1 + $0x6a8] sm:$0xf]  ;;  %7472 = vmatmul.bf16.vlgmr.msra.gmra.mxu2 %v20936_v29  ;;  %v9334_v42 = vor.u32 %v13014_v58, %v9333_v28  ;;  %v7222_v46 = vadd.f32 %v7221_v12, %v17523_v1  ;;  %v6874_v1 = vadd.f32 %v16406_v52, %v6860_v53 }
 0x239   : > { %7520 = vmatpush.bf16.msrb.mxu2 %v9622_v60  ;;  %v13078_v8 = vld [vmem:[%s20839_s1 + $0x6b4] sm:$0xf0]  ;;  %v9717_v62 = vld [vmem:[%s20839_s1 + $0x7a8] sm:$0xf]  ;;  %7486 = vmatmul.bf16.vlgmr.msra.gmra.mxu3 %v20938_v27  ;;  %v9462_v19 = vor.u32 %v13046_v37, %v9461_v34 }
 0x23a   : > { %7534 = vmatpush.bf16.msrb.mxu3 %v9750_v47  ;;  %v13110_v23 = vld [vmem:[%s20839_s1 + $0x7b4] sm:$0xf0]  ;;  %v20937_v22 = vld [vmem:[#allocation3_spill] sm:$0xff]  ;;  %v9590_v56 = vor.u32 %v13078_v8, %v9589_v26 }
 0x23b   : > { %7458 = vmatmul.bf16.vlgmr.msra.gmra.mxu1 %v20937_v22  ;;  %7493 = vmatpush.bf16.msrb.mxu0 %v9350_v13  ;;  %v9317_v60 = vld [vmem:[%s20839_s1 + $0x488] sm:$0xf]  ;;  %v13010_v55 = vld [vmem:[%s20839_s1 + $0x494] sm:$0xf0]  ;;  %v9718_v3 = vor.u32 %v13110_v23, %v9717_v62 }
 0x23c   : > { %7507 = vmatpush.bf16.msrb.mxu1 %v9478_v17  ;;  %v9445_v24 = vld [vmem:[%s20839_s1 + $0x588] sm:$0xf]  ;;  %v13042_v47 = vld [vmem:[%s20839_s1 + $0x594] sm:$0xf0]  ;;  %v9318_v13 = vor.u32 %v13010_v55, %v9317_v60  ;;  %v7235_v17 = vpop.f32.mrf.mxu1 }
 0x23d   : > { %7521 = vmatpush.bf16.msrb.mxu2 %v9606_v20  ;;  %v9573_v30 = vld [vmem:[%s20839_s1 + $0x688] sm:$0xf]  ;;  %v13074_v16 = vld [vmem:[%s20839_s1 + $0x694] sm:$0xf0]  ;;  %v9446_v20 = vor.u32 %v13042_v47, %v9445_v24  ;;  %v7236_v26 = vadd.f32 %v7235_v17, %v7222_v46  ;;  %v8332_v17 = vlaneseq }
 0x23e   : > { %7535 = vmatpush.bf16.msrb.mxu3 %v9734_v48  ;;  %v9701_v25 = vld [vmem:[%s20839_s1 + $0x788] sm:$0xf]  ;;  %v13106_v38 = vld [vmem:[%s20839_s1 + $0x794] sm:$0xf0]  ;;  %v9574_v28 = vor.u32 %v13074_v16, %v9573_v30 }
 0x23f   : > { %7494 = vmatpush.bf16.msrb.mxu0 %v9334_v42  ;;  %v9301_v58 = vld [vmem:[%s20839_s1 + $0x468] sm:$0xf]  ;;  %v13006_v34 = vld [vmem:[%s20839_s1 + $0x474] sm:$0xf0]  ;;  %v9702_v37 = vor.u32 %v13106_v38, %v9701_v25  ;;  %v6888_v42 = vadd.f32 %v16555_v45, %v6874_v1  ;;  %v7263_v25 = vpop.f32.mrf.mxu3 }
 0x240   : > { %7508 = vmatpush.bf16.msrb.mxu1 %v9462_v19  ;;  %v9429_v48 = vld [vmem:[%s20839_s1 + $0x568] sm:$0xf]  ;;  %v13038_v8 = vld [vmem:[%s20839_s1 + $0x574] sm:$0xf0]  ;;  %v9302_v19 = vor.u32 %v13006_v34, %v9301_v58 }
 0x241   : > { %7522 = vmatpush.bf16.msrb.mxu2 %v9590_v56  ;;  %v9557_v62 = vld [vmem:[%s20839_s1 + $0x668] sm:$0xf]  ;;  %v13070_v23 = vld [vmem:[%s20839_s1 + $0x674] sm:$0xf0]  ;;  %v9430_v56 = vor.u32 %v13038_v8, %v9429_v48 }
 0x242   : > { %7536 = vmatpush.bf16.msrb.mxu3 %v9718_v3  ;;  %v9685_v6 = vld [vmem:[%s20839_s1 + $0x768] sm:$0xf]  ;;  %v13102_v52 = vld [vmem:[%s20839_s1 + $0x774] sm:$0xf0]  ;;  %v9558_v60 = vor.u32 %v13070_v23, %v9557_v62  ;;  %v7249_v3 = vpop.f32.mrf.mxu2 }
 0x243   : > { %7495 = vmatpush.bf16.msrb.mxu0 %v9318_v13  ;;  %v9285_v55 = vld [vmem:[%s20839_s1 + $0x448] sm:$0xf]  ;;  %v13002_v24 = vld [vmem:[%s20839_s1 + $0x454] sm:$0xf0]  ;;  %v9686_v45 = vor.u32 %v13102_v52, %v9685_v6  ;;  %v7250_v12 = vadd.f32 %v7249_v3, %v7236_v26  ;;  %v6902_v13 = vadd.f32 %v16563_v44, %v6888_v42  ;;  %v20939_v26 = vperm.slane %v16840_v2, 1 }
 0x244   : > { %7509 = vmatpush.bf16.msrb.mxu1 %v9446_v20  ;;  %v9413_v53 = vld [vmem:[%s20839_s1 + $0x548] sm:$0xf]  ;;  %v13034_v47 = vld [vmem:[%s20839_s1 + $0x554] sm:$0xf0]  ;;  %v9286_v20 = vor.u32 %v13002_v24, %v9285_v55  ;;  %v8333_v2 = vshrl.u32 %v8332_v17, 7 }
 0x245   : > { %7523 = vmatpush.bf16.msrb.mxu2 %v9574_v28  ;;  %v9541_v30 = vld [vmem:[%s20839_s1 + $0x648] sm:$0xf]  ;;  %v13066_v16 = vld [vmem:[%s20839_s1 + $0x654] sm:$0xf0]  ;;  %v17740_v28 = vadd.f32 %v7263_v25, %v7250_v12  ;;  %v9414_v58 = vor.u32 %v13034_v47, %v9413_v53  ;;  %v7000_v8 = vadd.f32 %v16958_v5, %v20939_v26 }
 0x246   : > { %7537 = vmatpush.bf16.msrb.mxu3 %v9702_v37  ;;  %v9669_v38 = vld [vmem:[%s20839_s1 + $0x748] sm:$0xf]  ;;  %v13098_v46 = vld [vmem:[%s20839_s1 + $0x754] sm:$0xf0]  ;;  %v9542_v34 = vor.u32 %v13066_v16, %v9541_v30  ;;  %v6916_v37 = vadd.f32 %v16602_v9, %v6902_v13 }
 0x247   : > { %7496 = vmatpush.bf16.msrb.mxu0 %v9302_v19  ;;  %v9269_v48 = vld [vmem:[%s20839_s1 + $0x428] sm:$0xf]  ;;  %v12998_v1 = vld [vmem:[%s20839_s1 + $0x434] sm:$0xf0]  ;;  %v9670_v62 = vor.u32 %v13098_v46, %v9669_v38  ;;  %v7014_v47 = vadd.f32 %v16984_v49, %v7000_v8 }
 0x248   : > { %7510 = vmatpush.bf16.msrb.mxu1 %v9430_v56  ;;  %v9397_v44 = vld [vmem:[%s20839_s1 + $0x528] sm:$0xf]  ;;  %v13030_v23 = vld [vmem:[%s20839_s1 + $0x534] sm:$0xf0]  ;;  %v9270_v42 = vor.u32 %v12998_v1, %v9269_v48  ;;  %v6930_v3 = vadd.f32 %v16613_v4, %v6916_v37 }
 0x249   : > { %7524 = vmatpush.bf16.msrb.mxu2 %v9558_v60  ;;  %v9525_v6 = vld [vmem:[%s20839_s1 + $0x628] sm:$0xf]  ;;  %v13062_v52 = vld [vmem:[%s20839_s1 + $0x634] sm:$0xf0]  ;;  %v9398_v60 = vor.u32 %v13030_v23, %v9397_v44  ;;  %v8334_v44 = vadd.s32 8, %v8333_v2  ;;  %v7028_v37 = vadd.f32 %v17014_v32, %v7014_v47 }
 0x24a   : > { %7538 = vmatpush.bf16.msrb.mxu3 %v9686_v45  ;;  %v9653_v9 = vld [vmem:[%s20839_s1 + $0x728] sm:$0xf]  ;;  %v13094_v5 = vld [vmem:[%s20839_s1 + $0x734] sm:$0xf0]  ;;  %v9526_v55 = vor.u32 %v13062_v52, %v9525_v6  ;;  %v6944_v46 = vadd.f32 %v16777_v54, %v6930_v3 }
 0x24b   : > { %7497 = vmatpush.bf16.msrb.mxu0 %v9286_v20  ;;  %v9253_v19 = vld [vmem:[%s20839_s1 + $0x408] sm:$0xf]  ;;  %v12994_v56 = vld [vmem:[%s20839_s1 + $0x414] sm:$0xf0]  ;;  %v9654_v30 = vor.u32 %v13094_v5, %v9653_v9  ;;  %vm8336_vm0 = vcmp.lt.s32.totalorder %v8334_v44, 9 }
 0x24c   : > { %7511 = vmatpush.bf16.msrb.mxu1 %v9414_v58  ;;  %v9381_v24 = vld [vmem:[%s20839_s1 + $0x508] sm:$0xf]  ;;  %v13026_v53 = vld [vmem:[%s20839_s1 + $0x514] sm:$0xf0]  ;;  %v9254_v13 = vor.u32 %v12994_v56, %v9253_v19  ;;  %v6958_v5 = vadd.f32 %v16797_v31, %v6944_v46  ;;  %v17841_v56 = vpop.f32.mrf.mxu0 }
 0x24d   : > { %7525 = vmatpush.bf16.msrb.mxu2 %v9542_v34  ;;  %v9509_v45 = vld [vmem:[%s20839_s1 + $0x608] sm:$0xf]  ;;  %v13058_v16 = vld [vmem:[%s20839_s1 + $0x614] sm:$0xf0]  ;;  %v9382_v34 = vor.u32 %v13026_v53, %v9381_v24  ;;  %v7042_v53 = vadd.f32 %v17025_v50, %v7028_v37 }
 0x24e   : > { %7539 = vmatpush.bf16.msrb.mxu3 %v9670_v62  ;;  %v9637_v12 = vld [vmem:[%s20839_s1 + $0x708] sm:$0xf]  ;;  %v13090_v25 = vld [vmem:[%s20839_s1 + $0x714] sm:$0xf0]  ;;  %v9510_v48 = vor.u32 %v13058_v16, %v9509_v45  ;;  %v17851_v45 = vpop.f32.mrf.mxu1 }
 0x24f   : > { %v9877_v4 = vld [vmem:[%s20839_s1 + $0x8e8] sm:$0xf]  ;;  %v13150_v49 = vld [vmem:[%s20839_s1 + $0x8f4] sm:$0xf0]  ;;  %7498 = vmatpush.bf16.msrb.mxu0 %v9270_v42  ;;  %v9638_v26 = vor.u32 %v13090_v25, %v9637_v12  ;;  %v7056_v37 = vadd.f32 %v17186_v36, %v7042_v53 }
 0x250   : > { %v10005_v38 = vld [vmem:[%s20839_s1 + $0x9e8] sm:$0xf]  ;;  %v13182_v17 = vld [vmem:[%s20839_s1 + $0x9f4] sm:$0xf0]  ;;  %7512 = vmatpush.bf16.msrb.mxu1 %v9398_v60  ;;  %v9878_v8 = vor.u32 %v13150_v49, %v9877_v4 }
 0x251   : > { %v10133_v20 = vld [vmem:[%s20839_s1 + $0xae8] sm:$0xf]  ;;  %v13214_v58 = vld [vmem:[%s20839_s1 + $0xaf4] sm:$0xf0]  ;;  %7526 = vmatpush.bf16.msrb.mxu2 %v9526_v55  ;;  %v10006_v62 = vor.u32 %v13182_v17, %v10005_v38 }
 0x252   : > { %v10261_v54 = vld [vmem:[%s20839_s1 + $0xbe8] sm:$0xf]  ;;  %v13246_v1 = vld [vmem:[%s20839_s1 + $0xbf4] sm:$0xf0]  ;;  %7540 = vmatpush.bf16.msrb.mxu3 %v9654_v30  ;;  %v10134_v23 = vor.u32 %v13214_v58, %v10133_v20 }
 0x253   : > { %v9861_v6 = vld [vmem:[%s20839_s1 + $0x8c8] sm:$0xf]  ;;  %v13146_v52 = vld [vmem:[%s20839_s1 + $0x8d4] sm:$0xf0]  ;;  %7499 = vmatpush.bf16.msrb.mxu0 %v9254_v13  ;;  %v10262_v32 = vor.u32 %v13246_v1, %v10261_v54  ;;  %v20942_v13 = vld [vmem:[#allocation6_spill] sm:$0xff]  ;;  %v13915_v54 = vmov 0.0  }
 0x254   : > { %v9989_v9 = vld [vmem:[%s20839_s1 + $0x9c8] sm:$0xf]  ;;  %v13178_v2 = vld [vmem:[%s20839_s1 + $0x9d4] sm:$0xf0]  ;;  %7513 = vmatpush.bf16.msrb.mxu1 %v9382_v34  ;;  %v9862_v3 = vor.u32 %v13146_v52, %v9861_v6  ;;  %v20944_v34 = vld [vmem:[#allocation34_spill] sm:$0xff]  ;;  %v17884_v1 = vsel %vm8336_vm0, 1.0, %v13915_v54  ;;  %v17897_v52 = vpop.f32.mrf.mxu2 }
 0x255   : > { %v10117_v42 = vld [vmem:[%s20839_s1 + $0xac8] sm:$0xf]  ;;  %v13210_v19 = vld [vmem:[%s20839_s1 + $0xad4] sm:$0xf0]  ;;  %7527 = vmatpush.bf16.msrb.mxu2 %v9510_v48  ;;  %v9990_v47 = vor.u32 %v13178_v2, %v9989_v9 }
 0x256   : > { %v10245_v31 = vld [vmem:[%s20839_s1 + $0xbc8] sm:$0xf]  ;;  %v13242_v60 = vld [vmem:[%s20839_s1 + $0xbd4] sm:$0xf0]  ;;  %7541 = vmatpush.bf16.msrb.mxu3 %v9638_v26  ;;  %v10118_v30 = vor.u32 %v13210_v19, %v10117_v42  ;;  %v20945_v26 = vld [vmem:[#allocation8_spill] sm:$0xff]  ;;  %v17908_v42 = vpop.f32.mrf.mxu3  ;;  %v7277_v19 = vpop.f32.mrf.mxu0 }
 0x257   : > { %v20940_v55 = vld [vmem:[#allocation33_spill] sm:$0xff]  ;;  %7548 = vmatpush.bf16.msra.mxu0 %v9878_v8  ;;  %v9845_v16 = vld [vmem:[%s20839_s1 + $0x8a8] sm:$0xf]  ;;  %v10246_v4 = vor.u32 %v13242_v60, %v10245_v31  ;;  %v7278_v53 = vadd.f32 %v7277_v19, %v17740_v28 }
 0x258   : > { %v6972_v24 = vadd.f32 %v20940_v55, %v6958_v5  ;;  %7562 = vmatpush.bf16.msra.mxu1 %v10006_v62  ;;  %v13142_v12 = vld [vmem:[%s20839_s1 + $0x8b4] sm:$0xf0]  ;;  %v9973_v50 = vld [vmem:[%s20839_s1 + $0x9a8] sm:$0xf]  ;;  %7528 = vmatmul.bf16.vlgmr.msrb.gmra.mxu2 %v20942_v13 }
 0x259   : > { %7576 = vmatpush.bf16.msra.mxu2 %v10134_v23  ;;  %v20941_v25 = vld [vmem:[#allocation5_spill] sm:$0xff]  ;;  %v10101_v38 = vld [vmem:[%s20839_s1 + $0xaa8] sm:$0xf]  ;;  %7542 = vmatmul.bf16.vlgmr.msrb.gmra.mxu3 %v20945_v26  ;;  %v9846_v8 = vor.u32 %v13142_v12, %v9845_v16 }
 0x25a   : > { %7590 = vmatpush.bf16.msra.mxu3 %v10262_v32  ;;  %7500 = vmatmul.bf16.vlgmr.msrb.gmra.mxu0 %v20941_v25  ;;  %v13174_v49 = vld [vmem:[%s20839_s1 + $0x9b4] sm:$0xf0]  ;;  %v20943_v17 = vld [vmem:[#allocation7_spill] sm:$0xff]  ;;  %v17881_v48 = vadd.f32 %v20944_v34, %v6972_v24  ;;  %v7070_v24 = vadd.f32 %v17195_v40, %v7056_v37  ;;  %v20946_v34 = vld [vmem:[#allocation32_spill] sm:$0xff] }
 0x25b   : > { %v13206_v46 = vld [vmem:[%s20839_s1 + $0xab4] sm:$0xf0]  ;;  %7514 = vmatmul.bf16.vlgmr.msrb.gmra.mxu1 %v20943_v17  ;;  %v10229_v20 = vld [vmem:[%s20839_s1 + $0xba8] sm:$0xf]  ;;  %7549 = vmatpush.bf16.msra.mxu0 %v9862_v3  ;;  %v9974_v62 = vor.u32 %v13174_v49, %v9973_v50 }
 0x25c   : > { %v13238_v58 = vld [vmem:[%s20839_s1 + $0xbb4] sm:$0xf0]  ;;  %7563 = vmatpush.bf16.msra.mxu1 %v9990_v47  ;;  %v10102_v23 = vor.u32 %v13206_v46, %v10101_v38  ;;  %v9829_v6 = vld [vmem:[%s20839_s1 + $0x888] sm:$0xf]  ;;  %v8345_v55 = vmul.f32 %v17884_v1, %v17881_v48  ;;  %v7291_v47 = vpop.f32.mrf.mxu1  ;;  %v7084_v28 = vadd.f32 %v17235_v43, %v7070_v24 }
 0x25d   : > { %7577 = vmatpush.bf16.msra.mxu2 %v10118_v30  ;;  %v13138_v44 = vld [vmem:[%s20839_s1 + $0x894] sm:$0xf0]  ;;  %v9957_v36 = vld [vmem:[%s20839_s1 + $0x988] sm:$0xf]  ;;  %v10230_v9 = vor.u32 %v13238_v58, %v10229_v20  ;;  %v7292_v49 = vadd.f32 %v7291_v47, %v7278_v53 }
 0x25e   : > { %7591 = vmatpush.bf16.msra.mxu3 %v10246_v4  ;;  %v13170_v5 = vld [vmem:[%s20839_s1 + $0x994] sm:$0xf0]  ;;  %v10085_v32 = vld [vmem:[%s20839_s1 + $0xa88] sm:$0xf]  ;;  %v9830_v3 = vor.u32 %v13138_v44, %v9829_v6  ;;  %v8349_v54 = vadd.f32 %v8345_v55, %v20946_v34 }
 0x25f   : > { %v13202_v2 = vld [vmem:[%s20839_s1 + $0xa94] sm:$0xf0]  ;;  %v10213_v31 = vld [vmem:[%s20839_s1 + $0xb88] sm:$0xf]  ;;  %7550 = vmatpush.bf16.msra.mxu0 %v9846_v8  ;;  %v9958_v30 = vor.u32 %v13170_v5, %v9957_v36  ;;  %v7098_v36 = vadd.f32 %v17246_v35, %v7084_v28  ;;  %v7305_v5 = vpop.f32.mrf.mxu2 }
 0x260   : > { %v13234_v60 = vld [vmem:[%s20839_s1 + $0xb94] sm:$0xf0]  ;;  %7564 = vmatpush.bf16.msra.mxu1 %v9974_v62  ;;  %v10086_v16 = vor.u32 %v13202_v2, %v10085_v32  ;;  %v9813_v12 = vld [vmem:[%s20839_s1 + $0x868] sm:$0xf]  ;;  %v8350_v24 = vrot.slane %v8349_v54, 4 }
 0x261   : > { %7578 = vmatpush.bf16.msra.mxu2 %v10102_v23  ;;  %v13134_v50 = vld [vmem:[%s20839_s1 + $0x874] sm:$0xf0]  ;;  %v9941_v40 = vld [vmem:[%s20839_s1 + $0x968] sm:$0xf]  ;;  %v10214_v4 = vor.u32 %v13234_v60, %v10213_v31  ;;  %v7306_v31 = vadd.f32 %v7305_v5, %v7292_v49  ;;  %v7319_v60 = vpop.f32.mrf.mxu3  ;;  %v7112_v53 = vadd.f32 %v17402_v33, %v7098_v36 }
 0x262   : > { %7592 = vmatpush.bf16.msra.mxu3 %v10230_v9  ;;  %v13166_v38 = vld [vmem:[%s20839_s1 + $0x974] sm:$0xf0]  ;;  %v10069_v46 = vld [vmem:[%s20839_s1 + $0xa68] sm:$0xf]  ;;  %v9814_v37 = vor.u32 %v13134_v50, %v9813_v12 }
 0x263   : > { %v13198_v20 = vld [vmem:[%s20839_s1 + $0xa74] sm:$0xf0]  ;;  %v10197_v58 = vld [vmem:[%s20839_s1 + $0xb68] sm:$0xf]  ;;  %7551 = vmatpush.bf16.msra.mxu0 %v9830_v3  ;;  %v9942_v8 = vor.u32 %v13166_v38, %v9941_v40  ;;  %v17972_v47 = vadd.f32 %v7319_v60, %v7306_v31 }
 0x264   : > { %v13230_v43 = vld [vmem:[%s20839_s1 + $0xb74] sm:$0xf0]  ;;  %7565 = vmatpush.bf16.msra.mxu1 %v9958_v30  ;;  %v10070_v62 = vor.u32 %v13198_v20, %v10069_v46  ;;  %v9797_v23 = vld [vmem:[%s20839_s1 + $0x848] sm:$0xf]  ;;  %v7126_v20 = vadd.f32 %v17411_v39, %v7112_v53 }
 0x265   : > { %7579 = vmatpush.bf16.msra.mxu2 %v10086_v16  ;;  %v13130_v6 = vld [vmem:[%s20839_s1 + $0x854] sm:$0xf0]  ;;  %v9925_v44 = vld [vmem:[%s20839_s1 + $0x948] sm:$0xf]  ;;  %v10198_v9 = vor.u32 %v13230_v43, %v10197_v58 }
 0x266   : > { %7593 = vmatpush.bf16.msra.mxu3 %v10214_v4  ;;  %v13162_v32 = vld [vmem:[%s20839_s1 + $0x954] sm:$0xf0]  ;;  %v10053_v2 = vld [vmem:[%s20839_s1 + $0xa48] sm:$0xf]  ;;  %v9798_v3 = vor.u32 %v13130_v6, %v9797_v23  ;;  %v7140_v36 = vadd.f32 %v17452_v51, %v7126_v20 }
 0x267   : > { %v13194_v19 = vld [vmem:[%s20839_s1 + $0xa54] sm:$0xf0]  ;;  %v10181_v35 = vld [vmem:[%s20839_s1 + $0xb48] sm:$0xf]  ;;  %7552 = vmatpush.bf16.msra.mxu0 %v9814_v37  ;;  %v9926_v30 = vor.u32 %v13162_v32, %v9925_v44  ;;  %v8351_v44 = vadd.f32 %v8350_v24, %v8349_v54 }
 0x268   : > { %v13226_v55 = vld [vmem:[%s20839_s1 + $0xb54] sm:$0xf0]  ;;  %7566 = vmatpush.bf16.msra.mxu1 %v9942_v8  ;;  %v10054_v16 = vor.u32 %v13194_v19, %v10053_v2  ;;  %v9781_v12 = vld [vmem:[%s20839_s1 + $0x828] sm:$0xf] }
 0x269   : > { %7580 = vmatpush.bf16.msra.mxu2 %v10070_v62  ;;  %v13126_v50 = vld [vmem:[%s20839_s1 + $0x834] sm:$0xf0]  ;;  %v9909_v33 = vld [vmem:[%s20839_s1 + $0x928] sm:$0xf]  ;;  %v10182_v40 = vor.u32 %v13226_v55, %v10181_v35 }
 0x26a   : > { %7594 = vmatpush.bf16.msra.mxu3 %v10198_v9  ;;  %v13158_v28 = vld [vmem:[%s20839_s1 + $0x934] sm:$0xf0]  ;;  %v10037_v4 = vld [vmem:[%s20839_s1 + $0xa28] sm:$0xf]  ;;  %v9782_v58 = vor.u32 %v13126_v50, %v9781_v12  ;;  %v7154_v12 = vadd.f32 %v17463_v41, %v7140_v36 }
 0x26b   : > { %v13190_v49 = vld [vmem:[%s20839_s1 + $0xa34] sm:$0xf0]  ;;  %v10165_v38 = vld [vmem:[%s20839_s1 + $0xb28] sm:$0xf]  ;;  %7553 = vmatpush.bf16.msra.mxu0 %v9798_v3  ;;  %v9910_v8 = vor.u32 %v13158_v28, %v9909_v33 }
 0x26c   : > { %v13222_v46 = vld [vmem:[%s20839_s1 + $0xb34] sm:$0xf0]  ;;  %v9765_v43 = vld [vmem:[%s20839_s1 + $0x808] sm:$0xf]  ;;  %7567 = vmatpush.bf16.msra.mxu1 %v9926_v30  ;;  %v10038_v62 = vor.u32 %v13190_v49, %v10037_v4 }
 0x26d   : > { %v13122_v37 = vld [vmem:[%s20839_s1 + $0x814] sm:$0xf0]  ;;  %7581 = vmatpush.bf16.msra.mxu2 %v10054_v16  ;;  %v9893_v23 = vld [vmem:[%s20839_s1 + $0x908] sm:$0xf]  ;;  %v10166_v9 = vor.u32 %v13222_v46, %v10165_v38  ;;  %v8352_v16 = vrot.slane %v8351_v44, 2  ;;  %v7168_v46 = vadd.f32 %v17619_v7, %v7154_v12 }
 0x26e   : > { %v13154_v39 = vld [vmem:[%s20839_s1 + $0x914] sm:$0xf0]  ;;  %v10021_v6 = vld [vmem:[%s20839_s1 + $0xa08] sm:$0xf]  ;;  %7595 = vmatpush.bf16.msra.mxu3 %v10182_v40  ;;  %v9766_v31 = vor.u32 %v13122_v37, %v9765_v43  ;;  %v18068_v37 = vpop.f32.mrf.mxu0 }
 0x26f   : > { %v13186_v5 = vld [vmem:[%s20839_s1 + $0xa14] sm:$0xf0]  ;;  %v10149_v32 = vld [vmem:[%s20839_s1 + $0xb08] sm:$0xf]  ;;  %7554 = vmatpush.bf16.msra.mxu0 %v9782_v58  ;;  %v9894_v24 = vor.u32 %v13154_v39, %v9893_v23  ;;  %v18076_v23 = vpop.f32.mrf.mxu1 }
 0x270   : > { %v13218_v2 = vld [vmem:[%s20839_s1 + $0xb14] sm:$0xf0]  ;;  %v10389_v54 = vld [vmem:[%s20839_s1 + $0xce8] sm:$0xf]  ;;  %7568 = vmatpush.bf16.msra.mxu1 %v9910_v8  ;;  %v10022_v53 = vor.u32 %v13186_v5, %v10021_v6 }
 0x271   : > { %v13278_v51 = vld [vmem:[%s20839_s1 + $0xcf4] sm:$0xf0]  ;;  %v10517_v19 = vld [vmem:[%s20839_s1 + $0xde8] sm:$0xf]  ;;  %7582 = vmatpush.bf16.msra.mxu2 %v10038_v62  ;;  %v10150_v50 = vor.u32 %v13218_v2, %v10149_v32  ;;  %v8353_v62 = vadd.f32 %v8352_v16, %v8351_v44  ;;  %v7182_v32 = vadd.f32 %v17628_v21, %v7168_v46  ;;  %v18128_v46 = vpop.f32.mrf.mxu3 }
 0x272   : > { %v13310_v60 = vld [vmem:[%s20839_s1 + $0xdf4] sm:$0xf0]  ;;  %v10645_v35 = vld [vmem:[%s20839_s1 + $0xee8] sm:$0xf]  ;;  %7596 = vmatpush.bf16.msra.mxu3 %v10166_v9  ;;  %v10390_v33 = vor.u32 %v13278_v51, %v10389_v54 }
 0x273   : > { %v13342_v55 = vld [vmem:[%s20839_s1 + $0xef4] sm:$0xf0]  ;;  %v10773_v3 = vld [vmem:[%s20839_s1 + $0xfe8] sm:$0xf]  ;;  %v10518_v40 = vor.u32 %v13310_v60, %v10517_v19  ;;  %7555 = vmatpush.bf16.msra.mxu0 %v9766_v31  ;;  %v20948_v60 = vld [vmem:[#allocation10_spill] sm:$0xff] }
 0x274   : > { %v13374_v30 = vld [vmem:[%s20839_s1 + $0xff4] sm:$0xf0]  ;;  %v10646_v28 = vor.u32 %v13342_v55, %v10645_v35  ;;  %v10373_v4 = vld [vmem:[%s20839_s1 + $0xcc8] sm:$0xf]  ;;  %7569 = vmatpush.bf16.msra.mxu1 %v9894_v24  ;;  %v8354_v24 = vrot.slane %v8353_v62, 1 }
 0x275   : > { %v13274_v49 = vld [vmem:[%s20839_s1 + $0xcd4] sm:$0xf0]  ;;  %v10501_v38 = vld [vmem:[%s20839_s1 + $0xdc8] sm:$0xf]  ;;  %v10774_v41 = vor.u32 %v13374_v30, %v10773_v3  ;;  %7583 = vmatpush.bf16.msra.mxu2 %v10022_v53  ;;  %v7196_v53 = vadd.f32 %v17669_v59, %v7182_v32  ;;  %v20950_v3 = vld [vmem:[#allocation12_spill] sm:$0xff] }
 0x276   : > { %v13306_v20 = vld [vmem:[%s20839_s1 + $0xdd4] sm:$0xf0]  ;;  %v10629_v58 = vld [vmem:[%s20839_s1 + $0xec8] sm:$0xf]  ;;  %7597 = vmatpush.bf16.msra.mxu3 %v10150_v50  ;;  %v10374_v39 = vor.u32 %v13274_v49, %v10373_v4 }
 0x277   : > { %v13338_v43 = vld [vmem:[%s20839_s1 + $0xed4] sm:$0xf0]  ;;  %v10757_v7 = vld [vmem:[%s20839_s1 + $0xfc8] sm:$0xf]  ;;  %7604 = vmatpush.bf16.msrb.mxu0 %v10390_v33  ;;  %v10502_v6 = vor.u32 %v13306_v20, %v10501_v38 }
 0x278   : > { %v13370_v8 = vld [vmem:[%s20839_s1 + $0xfd4] sm:$0xf0]  ;;  %7618 = vmatpush.bf16.msrb.mxu1 %v10518_v40  ;;  %v10630_v36 = vor.u32 %v13338_v43, %v10629_v58  ;;  %v10357_v9 = vld [vmem:[%s20839_s1 + $0xca8] sm:$0xf]  ;;  %7584 = vmatmul.bf16.vlgmr.msra.gmra.mxu2 %v20948_v60  ;;  %v18117_v40 = vpop.f32.mrf.mxu2  ;;  %v8355_v43 = vadd.f32 %v8354_v24, %v8353_v62 }
 0x279   : > { %7632 = vmatpush.bf16.msrb.mxu2 %v10646_v28  ;;  %v13270_v5 = vld [vmem:[%s20839_s1 + $0xcb4] sm:$0xf0]  ;;  %v10485_v44 = vld [vmem:[%s20839_s1 + $0xda8] sm:$0xf]  ;;  %v10758_v54 = vor.u32 %v13370_v8, %v10757_v7  ;;  %7598 = vmatmul.bf16.vlgmr.msra.gmra.mxu3 %v20950_v3  ;;  %v7210_v7 = vadd.f32 %v17680_v18, %v7196_v53 }
 0x27a   : > { %7646 = vmatpush.bf16.msrb.mxu3 %v10774_v41  ;;  %v20947_v2 = vld [vmem:[#allocation9_spill] sm:$0xff]  ;;  %v10613_v19 = vld [vmem:[%s20839_s1 + $0xea8] sm:$0xf]  ;;  %v10358_v30 = vor.u32 %v13270_v5, %v10357_v9  ;;  %v7333_v41 = vpop.f32.mrf.mxu0 }
 0x27b   : > { %7556 = vmatmul.bf16.vlgmr.msra.gmra.mxu0 %v20947_v2  ;;  %v13302_v51 = vld [vmem:[%s20839_s1 + $0xdb4] sm:$0xf0]  ;;  %v20949_v35 = vld [vmem:[#allocation11_spill] sm:$0xff]  ;;  %v7334_v8 = vadd.f32 %v7333_v41, %v17972_v47  ;;  %v7224_v47 = vadd.f32 %v17841_v56, %v7210_v7 }
 0x27c   : > { %v13334_v31 = vld [vmem:[%s20839_s1 + $0xeb4] sm:$0xf0]  ;;  %7570 = vmatmul.bf16.vlgmr.msra.gmra.mxu1 %v20949_v35  ;;  %v10741_v21 = vld [vmem:[%s20839_s1 + $0xfa8] sm:$0xf]  ;;  %7605 = vmatpush.bf16.msrb.mxu0 %v10374_v39  ;;  %v10486_v16 = vor.u32 %v13302_v51, %v10485_v44  ;;  %v7375_v41 = vpop.f32.mrf.mxu3 }
 0x27d   : > { %v13366_v55 = vld [vmem:[%s20839_s1 + $0xfb4] sm:$0xf0]  ;;  %7619 = vmatpush.bf16.msrb.mxu1 %v10502_v6  ;;  %7633 = vmatpush.bf16.msrb.mxu2 %v10630_v36  ;;  %v10614_v12 = vor.u32 %v13334_v31, %v10613_v19  ;;  %v10341_v50 = vld [vmem:[%s20839_s1 + $0xc88] sm:$0xf]  ;;  %v7347_v6 = vpop.f32.mrf.mxu1 }
 0x27e   : > { %v13266_v33 = vld [vmem:[%s20839_s1 + $0xc94] sm:$0xf0]  ;;  %v10469_v59 = vld [vmem:[%s20839_s1 + $0xd88] sm:$0xf]  ;;  %7647 = vmatpush.bf16.msrb.mxu3 %v10758_v54  ;;  %v10742_v28 = vor.u32 %v13366_v55, %v10741_v21  ;;  %v7348_v32 = vadd.f32 %v7347_v6, %v7334_v8  ;;  %v8377_v21 = vmul.f32 0.11111111, %v8355_v43 }
 0x27f   : > { %v13298_v4 = vld [vmem:[%s20839_s1 + $0xd94] sm:$0xf0]  ;;  %v10597_v49 = vld [vmem:[%s20839_s1 + $0xe88] sm:$0xf]  ;;  %v10342_v39 = vor.u32 %v13266_v33, %v10341_v50  ;;  %v7238_v50 = vadd.f32 %v17851_v45, %v7224_v47 }
 0x280   : > { %v13330_v38 = vld [vmem:[%s20839_s1 + $0xe94] sm:$0xf0]  ;;  %v10725_v20 = vld [vmem:[%s20839_s1 + $0xf88] sm:$0xf]  ;;  %7606 = vmatpush.bf16.msrb.mxu0 %v10358_v30  ;;  %v10470_v36 = vor.u32 %v13298_v4, %v10469_v59  ;;  %v7361_v59 = vpop.f32.mrf.mxu2 }
 0x281   : > { %v13362_v58 = vld [vmem:[%s20839_s1 + $0xf94] sm:$0xf0]  ;;  %7620 = vmatpush.bf16.msrb.mxu1 %v10486_v16  ;;  %7634 = vmatpush.bf16.msrb.mxu2 %v10614_v12  ;;  %v10598_v9 = vor.u32 %v13330_v38, %v10597_v49  ;;  %v10325_v5 = vld [vmem:[%s20839_s1 + $0xc68] sm:$0xf]  ;;  %v7362_v38 = vadd.f32 %v7361_v59, %v7348_v32 }
 0x282   : > { %v13262_v44 = vld [vmem:[%s20839_s1 + $0xc74] sm:$0xf0]  ;;  %v10453_v18 = vld [vmem:[%s20839_s1 + $0xd68] sm:$0xf]  ;;  %7648 = vmatpush.bf16.msrb.mxu3 %v10742_v28  ;;  %v10726_v62 = vor.u32 %v13362_v58, %v10725_v20  ;;  %v7252_v58 = vadd.f32 %v17897_v52, %v7238_v50 }
 0x283   : > { %v13294_v54 = vld [vmem:[%s20839_s1 + $0xd74] sm:$0xf0]  ;;  %v10581_v51 = vld [vmem:[%s20839_s1 + $0xe68] sm:$0xf]  ;;  %v10326_v55 = vor.u32 %v13262_v44, %v10325_v5  ;;  %v18189_v7 = vadd.f32 %v7375_v41, %v7362_v38 }
 0x284   : > { %v13326_v19 = vld [vmem:[%s20839_s1 + $0xe74] sm:$0xf0]  ;;  %v10709_v31 = vld [vmem:[%s20839_s1 + $0xf68] sm:$0xf]  ;;  %7607 = vmatpush.bf16.msrb.mxu0 %v10342_v39  ;;  %v10454_v24 = vor.u32 %v13294_v54, %v10453_v18 }
 0x285   : > { %v13358_v56 = vld [vmem:[%s20839_s1 + $0xf74] sm:$0xf0]  ;;  %7621 = vmatpush.bf16.msrb.mxu1 %v10470_v36  ;;  %7635 = vmatpush.bf16.msrb.mxu2 %v10598_v9  ;;  %v10582_v53 = vor.u32 %v13326_v19, %v10581_v51  ;;  %v10309_v30 = vld [vmem:[%s20839_s1 + $0xc48] sm:$0xf]  ;;  %v18201_v9 = vsub.f32 %v17881_v48, %v8377_v21  ;;  %v7266_v19 = vadd.f32 %v17908_v42, %v7252_v58 }
 0x286   : > { %v13258_v16 = vld [vmem:[%s20839_s1 + $0xc54] sm:$0xf0]  ;;  %v10437_v12 = vld [vmem:[%s20839_s1 + $0xd48] sm:$0xf]  ;;  %7649 = vmatpush.bf16.msrb.mxu3 %v10726_v62  ;;  %v10710_v33 = vor.u32 %v13358_v56, %v10709_v31 }
 0x287   : > { %v13290_v28 = vld [vmem:[%s20839_s1 + $0xd54] sm:$0xf0]  ;;  %v10565_v4 = vld [vmem:[%s20839_s1 + $0xe48] sm:$0xf]  ;;  %v10310_v43 = vor.u32 %v13258_v16, %v10309_v30  ;;  %v8393_v30 = vmul.f32 %v17884_v1, %v18201_v9 }
 0x288   : > { %v13322_v49 = vld [vmem:[%s20839_s1 + $0xe54] sm:$0xf0]  ;;  %v10693_v45 = vld [vmem:[%s20839_s1 + $0xf48] sm:$0xf]  ;;  %7608 = vmatpush.bf16.msrb.mxu0 %v10326_v55  ;;  %v10438_v8 = vor.u32 %v13290_v28, %v10437_v12 }
 0x289   : > { %v13354_v20 = vld [vmem:[%s20839_s1 + $0xf54] sm:$0xf0]  ;;  %7622 = vmatpush.bf16.msrb.mxu1 %v10454_v24  ;;  %7636 = vmatpush.bf16.msrb.mxu2 %v10582_v53  ;;  %v10566_v39 = vor.u32 %v13322_v49, %v10565_v4  ;;  %v10293_v6 = vld [vmem:[%s20839_s1 + $0xc28] sm:$0xf]  ;;  %v18256_v49 = vsub.f32 %v20946_v34, %v8377_v21 }
 0x28a   : > { %v13254_v36 = vld [vmem:[%s20839_s1 + $0xc34] sm:$0xf0]  ;;  %v10421_v52 = vld [vmem:[%s20839_s1 + $0xd28] sm:$0xf]  ;;  %7650 = vmatpush.bf16.msrb.mxu3 %v10710_v33  ;;  %v10694_v5 = vor.u32 %v13354_v20, %v10693_v45  ;;  %v7280_v33 = vadd.f32 %v18068_v37, %v7266_v19 }
 0x28b   : > { %v13286_v44 = vld [vmem:[%s20839_s1 + $0xd34] sm:$0xf0]  ;;  %v10549_v18 = vld [vmem:[%s20839_s1 + $0xe28] sm:$0xf]  ;;  %v10294_v32 = vor.u32 %v13254_v36, %v10293_v6 }
 0x28c   : > { %v13318_v47 = vld [vmem:[%s20839_s1 + $0xe34] sm:$0xf0]  ;;  %v10677_v62 = vld [vmem:[%s20839_s1 + $0xf28] sm:$0xf]  ;;  %7609 = vmatpush.bf16.msrb.mxu0 %v10310_v43  ;;  %v10422_v31 = vor.u32 %v13286_v44, %v10421_v52  ;;  %v8401_v43 = vmul.f32 %v8393_v30, %v8393_v30  ;;  %v7294_v6 = vadd.f32 %v18076_v23, %v7280_v33 }
 0x28d   : > { %v13350_v48 = vld [vmem:[%s20839_s1 + $0xf34] sm:$0xf0]  ;;  %v10277_v54 = vld [vmem:[%s20839_s1 + $0xc08] sm:$0xf]  ;;  %7623 = vmatpush.bf16.msrb.mxu1 %v10438_v8  ;;  %7637 = vmatpush.bf16.msrb.mxu2 %v10566_v39  ;;  %v10550_v56 = vor.u32 %v13318_v47, %v10549_v18  ;;  %v8397_v47 = vmul.f32 %v18256_v49, %v18256_v49 }
 0x28e   : > { %v13250_v51 = vld [vmem:[%s20839_s1 + $0xc14] sm:$0xf0]  ;;  %v10405_v55 = vld [vmem:[%s20839_s1 + $0xd08] sm:$0xf]  ;;  %7651 = vmatpush.bf16.msrb.mxu3 %v10694_v5  ;;  %v10678_v42 = vor.u32 %v13350_v48, %v10677_v62 }
 0x28f   : > { %v13282_v24 = vld [vmem:[%s20839_s1 + $0xd14] sm:$0xf0]  ;;  %v10533_v53 = vld [vmem:[%s20839_s1 + $0xe08] sm:$0xf]  ;;  %v10278_v38 = vor.u32 %v13250_v51, %v10277_v54  ;;  %v7308_v54 = vadd.f32 %v18117_v40, %v7294_v6  ;;  %v7335_v51 = vpop.f32.mrf.mxu0 }
 0x290   : > { %v13314_v16 = vld [vmem:[%s20839_s1 + $0xe14] sm:$0xf0]  ;;  %v10661_v12 = vld [vmem:[%s20839_s1 + $0xf08] sm:$0xf]  ;;  %7610 = vmatpush.bf16.msrb.mxu0 %v10294_v32  ;;  %v10406_v20 = vor.u32 %v13282_v24, %v10405_v55  ;;  %v7349_v55 = vpop.f32.mrf.mxu1 }
 0x291   : > { %v13346_v50 = vld [vmem:[%s20839_s1 + $0xf14] sm:$0xf0]  ;;  %v10901_v59 = vld [vmem:[%s20839_s1 + $0x10e8] sm:$0xf]  ;;  %7624 = vmatpush.bf16.msrb.mxu1 %v10422_v31  ;;  %7638 = vmatpush.bf16.msrb.mxu2 %v10550_v56  ;;  %v10534_v58 = vor.u32 %v13314_v16, %v10533_v53  ;;  %v8405_v56 = vadd.f32 %v8401_v43, %v8397_v47  ;;  %v7377_v47 = vpop.f32.mrf.mxu3 }
 0x292   : > { %v13406_v28 = vld [vmem:[%s20839_s1 + $0x10f4] sm:$0xf0]  ;;  %v11029_v4 = vld [vmem:[%s20839_s1 + $0x11e8] sm:$0xf]  ;;  %7652 = vmatpush.bf16.msrb.mxu3 %v10678_v42  ;;  %v10662_v8 = vor.u32 %v13346_v50, %v10661_v12 }
 0x293   : > { %v13438_v37 = vld [vmem:[%s20839_s1 + $0x11f4] sm:$0xf0]  ;;  %v11157_v41 = vld [vmem:[%s20839_s1 + $0x12e8] sm:$0xf]  ;;  %v10902_v39 = vor.u32 %v13406_v28, %v10901_v59 }
 0x294   : > { %v13470_v45 = vld [vmem:[%s20839_s1 + $0x12f4] sm:$0xf0]  ;;  %v11285_v34 = vld [vmem:[%s20839_s1 + $0x13e8] sm:$0xf]  ;;  %v11030_v36 = vor.u32 %v13438_v37, %v11029_v4  ;;  %7611 = vmatpush.bf16.msrb.mxu0 %v10278_v38  ;;  %v7322_v4 = vadd.f32 %v18128_v46, %v7308_v54  ;;  %v20952_v38 = vld [vmem:[#allocation14_spill] sm:$0xff] }
 0x295   : > { %v13502_v21 = vld [vmem:[%s20839_s1 + $0x13f4] sm:$0xf0]  ;;  %v11158_v52 = vor.u32 %v13470_v45, %v11157_v41  ;;  %v10885_v5 = vld [vmem:[%s20839_s1 + $0x10c8] sm:$0xf]  ;;  %7625 = vmatpush.bf16.msrb.mxu1 %v10406_v20  ;;  %7639 = vmatpush.bf16.msrb.mxu2 %v10534_v58  ;;  %v8406_v20 = vrot.slane %v8405_v56, 4  ;;  %v20954_v58 = vld [vmem:[#allocation16_spill] sm:$0xff] }
 0x296   : > { %v13402_v44 = vld [vmem:[%s20839_s1 + $0x10d4] sm:$0xf0]  ;;  %v11013_v18 = vld [vmem:[%s20839_s1 + $0x11c8] sm:$0xf]  ;;  %v11286_v62 = vor.u32 %v13502_v21, %v11285_v34  ;;  %7653 = vmatpush.bf16.msrb.mxu3 %v10662_v8  ;;  %v7336_v21 = vadd.f32 %v7335_v51, %v7322_v4 }
 0x297   : > { %v13434_v23 = vld [vmem:[%s20839_s1 + $0x11d4] sm:$0xf0]  ;;  %v11141_v48 = vld [vmem:[%s20839_s1 + $0x12c8] sm:$0xf]  ;;  %v10886_v24 = vor.u32 %v13402_v44, %v10885_v5 }
 0x298   : > { %v13466_v32 = vld [vmem:[%s20839_s1 + $0x12d4] sm:$0xf0]  ;;  %v11269_v19 = vld [vmem:[%s20839_s1 + $0x13c8] sm:$0xf]  ;;  %7660 = vmatpush.bf16.msra.mxu0 %v10902_v39  ;;  %v11014_v53 = vor.u32 %v13434_v23, %v11013_v18  ;;  %7640 = vmatmul.bf16.vlgmr.msrb.gmra.mxu2 %v20952_v38 }
 0x299   : > { %v13498_v31 = vld [vmem:[%s20839_s1 + $0x13d4] sm:$0xf0]  ;;  %7674 = vmatpush.bf16.msra.mxu1 %v11030_v36  ;;  %7688 = vmatpush.bf16.msra.mxu2 %v11158_v52  ;;  %v11142_v40 = vor.u32 %v13466_v32, %v11141_v48  ;;  %v10869_v30 = vld [vmem:[%s20839_s1 + $0x10a8] sm:$0xf]  ;;  %v7363_v36 = vpop.f32.mrf.mxu2  ;;  %v8407_v32 = vadd.f32 %v8406_v20, %v8405_v56 }
 0x29a   : > { %v13398_v42 = vld [vmem:[%s20839_s1 + $0x10b4] sm:$0xf0]  ;;  %v10997_v16 = vld [vmem:[%s20839_s1 + $0x11a8] sm:$0xf]  ;;  %7702 = vmatpush.bf16.msra.mxu3 %v11286_v62  ;;  %v11270_v50 = vor.u32 %v13498_v31, %v11269_v19  ;;  %v7389_v62 = vpop.f32.mrf.mxu0  ;;  %v7403_v19 = vpop.f32.mrf.mxu1  ;;  %v7350_v31 = vadd.f32 %v7349_v55, %v7336_v21 }
 0x29b   : > { %v20951_v12 = vld [vmem:[#allocation13_spill] sm:$0xff]  ;;  %v11125_v59 = vld [vmem:[%s20839_s1 + $0x12a8] sm:$0xf]  ;;  %7654 = vmatmul.bf16.vlgmr.msrb.gmra.mxu3 %v20954_v58  ;;  %v10870_v34 = vor.u32 %v13398_v42, %v10869_v30  ;;  %v7390_v54 = vadd.f32 %v7389_v62, %v18189_v7  ;;  %v8408_v4 = vrot.slane %v8407_v32, 2 }
 0x29c   : > { %7612 = vmatmul.bf16.vlgmr.msrb.gmra.mxu0 %v20951_v12  ;;  %v13430_v33 = vld [vmem:[%s20839_s1 + $0x11b4] sm:$0xf0]  ;;  %v20953_v37 = vld [vmem:[#allocation15_spill] sm:$0xff] }
 0x29d   : > { %v13462_v28 = vld [vmem:[%s20839_s1 + $0x12b4] sm:$0xf0]  ;;  %7626 = vmatmul.bf16.vlgmr.msrb.gmra.mxu1 %v20953_v37  ;;  %v11253_v41 = vld [vmem:[%s20839_s1 + $0x13a8] sm:$0xf]  ;;  %7661 = vmatpush.bf16.msra.mxu0 %v10886_v24  ;;  %v10998_v46 = vor.u32 %v13430_v33, %v10997_v16  ;;  %v7404_v42 = vadd.f32 %v7403_v19, %v7390_v54  ;;  %v7364_v33 = vadd.f32 %v7363_v36, %v7350_v31 }
 0x29e   : > { %v13494_v45 = vld [vmem:[%s20839_s1 + $0x13b4] sm:$0xf0]  ;;  %7675 = vmatpush.bf16.msra.mxu1 %v11014_v53  ;;  %7689 = vmatpush.bf16.msra.mxu2 %v11142_v40  ;;  %v11126_v43 = vor.u32 %v13462_v28, %v11125_v59  ;;  %v10853_v8 = vld [vmem:[%s20839_s1 + $0x1088] sm:$0xf] }
 0x29f   : > { %v13394_v39 = vld [vmem:[%s20839_s1 + $0x1094] sm:$0xf0]  ;;  %v10981_v6 = vld [vmem:[%s20839_s1 + $0x1188] sm:$0xf]  ;;  %7703 = vmatpush.bf16.msra.mxu3 %v11270_v50  ;;  %v11254_v52 = vor.u32 %v13494_v45, %v11253_v41 }
 0x2a0   : > { %v13426_v5 = vld [vmem:[%s20839_s1 + $0x1194] sm:$0xf0]  ;;  %v11109_v44 = vld [vmem:[%s20839_s1 + $0x1288] sm:$0xf]  ;;  %v10854_v51 = vor.u32 %v13394_v39, %v10853_v8 }
 0x2a1   : > { %v13458_v18 = vld [vmem:[%s20839_s1 + $0x1294] sm:$0xf0]  ;;  %v11237_v23 = vld [vmem:[%s20839_s1 + $0x1388] sm:$0xf]  ;;  %7662 = vmatpush.bf16.msra.mxu0 %v10870_v34  ;;  %v10982_v24 = vor.u32 %v13426_v5, %v10981_v6  ;;  %v7417_v39 = vpop.f32.mrf.mxu2 }
 0x2a2   : > { %v13490_v48 = vld [vmem:[%s20839_s1 + $0x1394] sm:$0xf0]  ;;  %7676 = vmatpush.bf16.msra.mxu1 %v10998_v46  ;;  %7690 = vmatpush.bf16.msra.mxu2 %v11126_v43  ;;  %v11110_v53 = vor.u32 %v13458_v18, %v11109_v44  ;;  %v10837_v40 = vld [vmem:[%s20839_s1 + $0x1068] sm:$0xf]  ;;  %v7418_v5 = vadd.f32 %v7417_v39, %v7404_v42  ;;  %v7391_v44 = vpop.f32.mrf.mxu0  ;;  %v7431_v18 = vpop.f32.mrf.mxu3 }
 0x2a3   : > { %v13390_v30 = vld [vmem:[%s20839_s1 + $0x1074] sm:$0xf0]  ;;  %v10965_v56 = vld [vmem:[%s20839_s1 + $0x1168] sm:$0xf]  ;;  %7704 = vmatpush.bf16.msra.mxu3 %v11254_v52  ;;  %v11238_v7 = vor.u32 %v13490_v48, %v11237_v23  ;;  %v7378_v52 = vadd.f32 %v7377_v47, %v7364_v33  ;;  %v8409_v48 = vadd.f32 %v8408_v4, %v8407_v32 }
 0x2a4   : > { %v13422_v55 = vld [vmem:[%s20839_s1 + $0x1174] sm:$0xf0]  ;;  %v11093_v16 = vld [vmem:[%s20839_s1 + $0x1268] sm:$0xf]  ;;  %v10838_v41 = vor.u32 %v13390_v30, %v10837_v40  ;;  %v18403_v31 = vadd.f32 %v7431_v18, %v7418_v5  ;;  %v7405_v30 = vpop.f32.mrf.mxu1 }
 0x2a5   : > { %v13454_v50 = vld [vmem:[%s20839_s1 + $0x1274] sm:$0xf0]  ;;  %v11221_v59 = vld [vmem:[%s20839_s1 + $0x1368] sm:$0xf]  ;;  %7663 = vmatpush.bf16.msra.mxu0 %v10854_v51  ;;  %v10966_v20 = vor.u32 %v13422_v55, %v10965_v56  ;;  %v7392_v19 = vadd.f32 %v7391_v44, %v7378_v52 }
 0x2a6   : > { %v13486_v28 = vld [vmem:[%s20839_s1 + $0x1374] sm:$0xf0]  ;;  %v10821_v45 = vld [vmem:[%s20839_s1 + $0x1048] sm:$0xf]  ;;  %7677 = vmatpush.bf16.msra.mxu1 %v10982_v24  ;;  %7691 = vmatpush.bf16.msra.mxu2 %v11110_v53  ;;  %v11094_v34 = vor.u32 %v13454_v50, %v11093_v16  ;;  %v8410_v50 = vrot.slane %v8409_v48, 1 }
 0x2a7   : > { %v13386_v21 = vld [vmem:[%s20839_s1 + $0x1054] sm:$0xf0]  ;;  %v10949_v46 = vld [vmem:[%s20839_s1 + $0x1148] sm:$0xf]  ;;  %7705 = vmatpush.bf16.msra.mxu3 %v11238_v7  ;;  %v11222_v8 = vor.u32 %v13486_v28, %v11221_v59  ;;  %v7406_v4 = vadd.f32 %v7405_v30, %v7392_v19 }
 0x2a8   : > { %v13418_v43 = vld [vmem:[%s20839_s1 + $0x1154] sm:$0xf0]  ;;  %v11077_v6 = vld [vmem:[%s20839_s1 + $0x1248] sm:$0xf]  ;;  %v10822_v54 = vor.u32 %v13386_v21, %v10821_v45 }
 0x2a9   : > { %v13450_v36 = vld [vmem:[%s20839_s1 + $0x1254] sm:$0xf0]  ;;  %v11205_v62 = vld [vmem:[%s20839_s1 + $0x1348] sm:$0xf]  ;;  %7664 = vmatpush.bf16.msra.mxu0 %v10838_v41  ;;  %v10950_v51 = vor.u32 %v13418_v43, %v10949_v46  ;;  %v7419_v43 = vpop.f32.mrf.mxu2 }
 0x2aa   : > { %v13482_v23 = vld [vmem:[%s20839_s1 + $0x1354] sm:$0xf0]  ;;  %7678 = vmatpush.bf16.msra.mxu1 %v10966_v20  ;;  %7692 = vmatpush.bf16.msra.mxu2 %v11094_v34  ;;  %v11078_v47 = vor.u32 %v13450_v36, %v11077_v6  ;;  %v10805_v24 = vld [vmem:[%s20839_s1 + $0x1028] sm:$0xf]  ;;  %v7420_v36 = vadd.f32 %v7419_v43, %v7406_v4  ;;  %v7433_v52 = vpop.f32.mrf.mxu3 }
 0x2ab   : > { %v13382_v53 = vld [vmem:[%s20839_s1 + $0x1034] sm:$0xf0]  ;;  %v10933_v32 = vld [vmem:[%s20839_s1 + $0x1128] sm:$0xf]  ;;  %7706 = vmatpush.bf16.msra.mxu3 %v11222_v8  ;;  %v11206_v40 = vor.u32 %v13482_v23, %v11205_v62 }
 0x2ac   : > { %v13414_v56 = vld [vmem:[%s20839_s1 + $0x1134] sm:$0xf0]  ;;  %v11061_v7 = vld [vmem:[%s20839_s1 + $0x1228] sm:$0xf]  ;;  %v10806_v33 = vor.u32 %v13382_v53, %v10805_v24  ;;  %v18471_v19 = vadd.f32 %v7433_v52, %v7420_v36 }
 0x2ad   : > { %v13446_v42 = vld [vmem:[%s20839_s1 + $0x1234] sm:$0xf0]  ;;  %v11189_v55 = vld [vmem:[%s20839_s1 + $0x1328] sm:$0xf]  ;;  %7665 = vmatpush.bf16.msra.mxu0 %v10822_v54  ;;  %v10934_v41 = vor.u32 %v13414_v56, %v10933_v32 }
 0x2ae   : > { %v13478_v16 = vld [vmem:[%s20839_s1 + $0x1334] sm:$0xf0]  ;;  %v10789_v59 = vld [vmem:[%s20839_s1 + $0x1008] sm:$0xf]  ;;  %7679 = vmatpush.bf16.msra.mxu1 %v10950_v51  ;;  %7693 = vmatpush.bf16.msra.mxu2 %v11078_v47  ;;  %v11062_v45 = vor.u32 %v13446_v42, %v11061_v7  ;;  %v8346_v7 = vmul.f32 %v17884_v1, %v18471_v19 }
 0x2af   : > { %v13378_v28 = vld [vmem:[%s20839_s1 + $0x1014] sm:$0xf0]  ;;  %v10917_v20 = vld [vmem:[%s20839_s1 + $0x1108] sm:$0xf]  ;;  %7707 = vmatpush.bf16.msra.mxu3 %v11206_v40  ;;  %v11190_v46 = vor.u32 %v13478_v16, %v11189_v55  ;;  %v8411_v40 = vadd.f32 %v8410_v50, %v8409_v48 }
 0x2b0   : > { %v13410_v34 = vld [vmem:[%s20839_s1 + $0x1114] sm:$0xf0]  ;;  %v11045_v21 = vld [vmem:[%s20839_s1 + $0x1208] sm:$0xf]  ;;  %v10790_v62 = vor.u32 %v13378_v28, %v10789_v59 }
 0x2b1   : > { %v13442_v8 = vld [vmem:[%s20839_s1 + $0x1214] sm:$0xf0]  ;;  %v11173_v39 = vld [vmem:[%s20839_s1 + $0x1308] sm:$0xf]  ;;  %7666 = vmatpush.bf16.msra.mxu0 %v10806_v33  ;;  %v10918_v47 = vor.u32 %v13410_v34, %v10917_v20  ;;  %v8433_v34 = vmul.f32 0.11111111, %v8411_v40 }
 0x2b2   : > { %v13474_v6 = vld [vmem:[%s20839_s1 + $0x1314] sm:$0xf0]  ;;  %v11413_v5 = vld [vmem:[%s20839_s1 + $0x14e8] sm:$0xf]  ;;  %7680 = vmatpush.bf16.msra.mxu1 %v10934_v41  ;;  %7694 = vmatpush.bf16.msra.mxu2 %v11062_v45  ;;  %v11046_v24 = vor.u32 %v13442_v8, %v11045_v21  ;;  %v8356_v41 = vadd.f32 %v8346_v7, %v18403_v31 }
 0x2b3   : > { %v13534_v44 = vld [vmem:[%s20839_s1 + $0x14f4] sm:$0xf0]  ;;  %v11541_v18 = vld [vmem:[%s20839_s1 + $0x15e8] sm:$0xf]  ;;  %7708 = vmatpush.bf16.msra.mxu3 %v11190_v46  ;;  %v11174_v30 = vor.u32 %v13474_v6, %v11173_v39 }
 0x2b4   : > { %v13566_v23 = vld [vmem:[%s20839_s1 + $0x15f4] sm:$0xf0]  ;;  %v11669_v54 = vld [vmem:[%s20839_s1 + $0x16e8] sm:$0xf]  ;;  %v11414_v56 = vor.u32 %v13534_v44, %v11413_v5  ;;  %v8357_v43 = vrot.slane %v8356_v41, 4 }
 0x2b5   : > { %v13598_v51 = vld [vmem:[%s20839_s1 + $0x16f4] sm:$0xf0]  ;;  %v11797_v53 = vld [vmem:[%s20839_s1 + $0x17e8] sm:$0xf]  ;;  %v11542_v42 = vor.u32 %v13566_v23, %v11541_v18  ;;  %7667 = vmatpush.bf16.msra.mxu0 %v10790_v62 }
 0x2b6   : > { %v13630_v32 = vld [vmem:[%s20839_s1 + $0x17f4] sm:$0xf0]  ;;  %v11670_v55 = vor.u32 %v13598_v51, %v11669_v54  ;;  %v11397_v16 = vld [vmem:[%s20839_s1 + $0x14c8] sm:$0xf]  ;;  %7681 = vmatpush.bf16.msra.mxu1 %v10918_v47  ;;  %7695 = vmatpush.bf16.msra.mxu2 %v11046_v24  ;;  %v8358_v23 = vadd.f32 %v8357_v43, %v8356_v41  ;;  %v20956_v54 = vld [vmem:[#allocation18_spill] sm:$0xff] }
 0x2b7   : > { %v13530_v33 = vld [vmem:[%s20839_s1 + $0x14d4] sm:$0xf0]  ;;  %v11525_v48 = vld [vmem:[%s20839_s1 + $0x15c8] sm:$0xf]  ;;  %v11798_v50 = vor.u32 %v13630_v32, %v11797_v53  ;;  %7709 = vmatpush.bf16.msra.mxu3 %v11174_v30  ;;  %v18533_v53 = vadd.f32 1e-05, %v8433_v34 }
 0x2b8   : > { %v13562_v59 = vld [vmem:[%s20839_s1 + $0x15d4] sm:$0xf0]  ;;  %v11653_v28 = vld [vmem:[%s20839_s1 + $0x16c8] sm:$0xf]  ;;  %v11398_v21 = vor.u32 %v13530_v33, %v11397_v16  ;;  %v20958_v32 = vld [vmem:[#allocation20_spill] sm:$0xff] }
 0x2b9   : > { %v13594_v4 = vld [vmem:[%s20839_s1 + $0x16d4] sm:$0xf0]  ;;  %v11781_v45 = vld [vmem:[%s20839_s1 + $0x17c8] sm:$0xf]  ;;  %7716 = vmatpush.bf16.msrb.mxu0 %v11414_v56  ;;  %v11526_v8 = vor.u32 %v13562_v59, %v11525_v48  ;;  %7696 = vmatmul.bf16.vlgmr.msra.gmra.mxu2 %v20956_v54  ;;  %v8359_v56 = vrot.slane %v8358_v23, 2  ;;  %13896 = vrsqrt.f32 %v18533_v53  ;;  %vm8447_vm2 = vweird.f32 %v18533_v53 }
 0x2ba   : > { %v13626_v20 = vld [vmem:[%s20839_s1 + $0x17d4] sm:$0xf0]  ;;  %v11381_v46 = vld [vmem:[%s20839_s1 + $0x14a8] sm:$0xf]  ;;  %7730 = vmatpush.bf16.msrb.mxu1 %v11542_v42  ;;  %7744 = vmatpush.bf16.msrb.mxu2 %v11670_v55  ;;  %v11654_v39 = vor.u32 %v13594_v4, %v11653_v28 }
 0x2bb   : > { %v13526_v6 = vld [vmem:[%s20839_s1 + $0x14b4] sm:$0xf0]  ;;  %v11509_v36 = vld [vmem:[%s20839_s1 + $0x15a8] sm:$0xf]  ;;  %7758 = vmatpush.bf16.msrb.mxu3 %v11798_v50  ;;  %v11782_v5 = vor.u32 %v13626_v20, %v11781_v45  ;;  %v8360_v28 = vadd.f32 %v8359_v56, %v8358_v23 }
 0x2bc   : > { %v20955_v52 = vld [vmem:[#allocation17_spill] sm:$0xff]  ;;  %v11637_v18 = vld [vmem:[%s20839_s1 + $0x16a8] sm:$0xf]  ;;  %7710 = vmatmul.bf16.vlgmr.msra.gmra.mxu3 %v20958_v32  ;;  %v11382_v40 = vor.u32 %v13526_v6, %v11381_v46 }
 0x2bd   : > { %7668 = vmatmul.bf16.vlgmr.msra.gmra.mxu0 %v20955_v52  ;;  %v13558_v44 = vld [vmem:[%s20839_s1 + $0x15b4] sm:$0xf0]  ;;  %v20957_v51 = vld [vmem:[#allocation19_spill] sm:$0xff]  ;;  %v8361_v34 = vrot.slane %v8360_v28, 1 }
 0x2be   : > { %v13590_v62 = vld [vmem:[%s20839_s1 + $0x16b4] sm:$0xf0]  ;;  %7682 = vmatmul.bf16.vlgmr.msra.gmra.mxu1 %v20957_v51  ;;  %v11765_v47 = vld [vmem:[%s20839_s1 + $0x17a8] sm:$0xf]  ;;  %7717 = vmatpush.bf16.msrb.mxu0 %v11398_v21  ;;  %v11510_v7 = vor.u32 %v13558_v44, %v11509_v36 }
 0x2bf   : > { %v13622_v24 = vld [vmem:[%s20839_s1 + $0x17b4] sm:$0xf0]  ;;  %v11365_v30 = vld [vmem:[%s20839_s1 + $0x1488] sm:$0xf]  ;;  %7731 = vmatpush.bf16.msrb.mxu1 %v11526_v8  ;;  %7745 = vmatpush.bf16.msrb.mxu2 %v11654_v39  ;;  %v11638_v42 = vor.u32 %v13590_v62, %v11637_v18  ;;  %v18572_v39 = vld [vmem:[%s20840_s2] sm:$0xf]  ;;  %v7445_v62 = vpop.f32.mrf.mxu0  ;;  %v8362_v23 = vadd.f32 %v8361_v34, %v8360_v28 }
 0x2c0   : > { %v13522_v55 = vld [vmem:[%s20839_s1 + $0x1494] sm:$0xf0]  ;;  %v11493_v16 = vld [vmem:[%s20839_s1 + $0x1588] sm:$0xf]  ;;  %7759 = vmatpush.bf16.msrb.mxu3 %v11782_v5  ;;  %v11766_v33 = vor.u32 %v13622_v24, %v11765_v47  ;;  %v20894_v6 = vperm.slane %v18572_v39, 2 }
 0x2c1   : > { %v13554_v48 = vld [vmem:[%s20839_s1 + $0x1594] sm:$0xf0]  ;;  %v11621_v50 = vld [vmem:[%s20839_s1 + $0x1688] sm:$0xf]  ;;  %v11366_v45 = vor.u32 %v13522_v55, %v11365_v30 }
 0x2c2   : > { %v13586_v59 = vld [vmem:[%s20839_s1 + $0x1694] sm:$0xf0]  ;;  %v11749_v4 = vld [vmem:[%s20839_s1 + $0x1788] sm:$0xf]  ;;  %7718 = vmatpush.bf16.msrb.mxu0 %v11382_v40  ;;  %v11494_v21 = vor.u32 %v13554_v48, %v11493_v16  ;;  %v7446_v40 = vadd.f32 %v7445_v62, %v20894_v6 }
 0x2c3   : > { %v13618_v41 = vld [vmem:[%s20839_s1 + $0x1794] sm:$0xf0]  ;;  %v11349_v20 = vld [vmem:[%s20839_s1 + $0x1468] sm:$0xf]  ;;  %7732 = vmatpush.bf16.msrb.mxu1 %v11510_v7  ;;  %7746 = vmatpush.bf16.msrb.mxu2 %v11638_v42  ;;  %v11622_v46 = vor.u32 %v13586_v59, %v11621_v50  ;;  %v7459_v7 = vpop.f32.mrf.mxu1  ;;  %v8378_v42 = vmul.f32 0.11111111, %v8362_v23  ;;  %v7487_v23 = vpop.f32.mrf.mxu3 }
 0x2c4   : > { %v13518_v43 = vld [vmem:[%s20839_s1 + $0x1474] sm:$0xf0]  ;;  %v11477_v8 = vld [vmem:[%s20839_s1 + $0x1568] sm:$0xf]  ;;  %7760 = vmatpush.bf16.msrb.mxu3 %v11766_v33  ;;  %v11750_v36 = vor.u32 %v13618_v41, %v11749_v4  ;;  %v7460_v50 = vadd.f32 %v7459_v7, %v7446_v40 }
 0x2c5   : > { %v13550_v5 = vld [vmem:[%s20839_s1 + $0x1574] sm:$0xf0]  ;;  %v11605_v44 = vld [vmem:[%s20839_s1 + $0x1668] sm:$0xf]  ;;  %v11350_v30 = vor.u32 %v13518_v43, %v11349_v20  ;;  %v18615_v20 = vsub.f32 %v18471_v19, %v8378_v42  ;;  %v18623_v43 = vpop.eup %13896 }
 0x2c6   : > { %v13582_v18 = vld [vmem:[%s20839_s1 + $0x1674] sm:$0xf0]  ;;  %v11733_v47 = vld [vmem:[%s20839_s1 + $0x1768] sm:$0xf]  ;;  %7719 = vmatpush.bf16.msrb.mxu0 %v11366_v45  ;;  %v11478_v55 = vor.u32 %v13550_v5, %v11477_v8  ;;  %v18612_v45 = vsub.f32 %v18403_v31, %v8378_v42  ;;  %v8442_v7 = vmul.f32 %v18623_v43, %v18533_v53  ;;  %vm8448_vm1 = vweird.f32 %v18623_v43 }
 0x2c7   : > { %v13614_v24 = vld [vmem:[%s20839_s1 + $0x1774] sm:$0xf0]  ;;  %v11333_v56 = vld [vmem:[%s20839_s1 + $0x1448] sm:$0xf]  ;;  %7733 = vmatpush.bf16.msrb.mxu1 %v11494_v21  ;;  %7747 = vmatpush.bf16.msrb.mxu2 %v11622_v46  ;;  %v11606_v16 = vor.u32 %v13582_v18, %v11605_v44  ;;  %v7473_v46 = vpop.f32.mrf.mxu2  ;;  %v8394_v31 = vmul.f32 %v17884_v1, %v18615_v20  ;;  %vm8449_vm3 = vmor %vm8447_vm2, %vm8448_vm1 }
 0x2c8   : > { %v13514_v33 = vld [vmem:[%s20839_s1 + $0x1454] sm:$0xf0]  ;;  %v11461_v48 = vld [vmem:[%s20839_s1 + $0x1548] sm:$0xf]  ;;  %7761 = vmatpush.bf16.msrb.mxu3 %v11750_v36  ;;  %v11734_v59 = vor.u32 %v13614_v24, %v11733_v47  ;;  %v7474_v36 = vadd.f32 %v7473_v46, %v7460_v50  ;;  %v8398_v42 = vmul.f32 %v18612_v45, %v18612_v45 }
 0x2c9   : > { %v13546_v28 = vld [vmem:[%s20839_s1 + $0x1554] sm:$0xf0]  ;;  %v11589_v4 = vld [vmem:[%s20839_s1 + $0x1648] sm:$0xf]  ;;  %v11334_v8 = vor.u32 %v13514_v33, %v11333_v56 }
 0x2ca   : > { %v13578_v41 = vld [vmem:[%s20839_s1 + $0x1654] sm:$0xf0]  ;;  %v11717_v34 = vld [vmem:[%s20839_s1 + $0x1748] sm:$0xf]  ;;  %7720 = vmatpush.bf16.msrb.mxu0 %v11350_v30  ;;  %v11462_v19 = vor.u32 %v13546_v28, %v11461_v48  ;;  %v18645_v56 = vadd.f32 %v7487_v23, %v7474_v36 }
 0x2cb   : > { %v13610_v21 = vld [vmem:[%s20839_s1 + $0x1754] sm:$0xf0]  ;;  %7734 = vmatpush.bf16.msrb.mxu1 %v11478_v55  ;;  %7748 = vmatpush.bf16.msrb.mxu2 %v11606_v16  ;;  %v11590_v5 = vor.u32 %v13578_v41, %v11589_v4  ;;  %v11317_v44 = vld [vmem:[%s20839_s1 + $0x1428] sm:$0xf]  ;;  %v8402_v55 = vmul.f32 %v8394_v31, %v8394_v31 }
 0x2cc   : > { %v13510_v18 = vld [vmem:[%s20839_s1 + $0x1434] sm:$0xf0]  ;;  %v11445_v62 = vld [vmem:[%s20839_s1 + $0x1528] sm:$0xf]  ;;  %7762 = vmatpush.bf16.msrb.mxu3 %v11734_v59  ;;  %v11718_v47 = vor.u32 %v13610_v21, %v11717_v34 }
 0x2cd   : > { %v13542_v24 = vld [vmem:[%s20839_s1 + $0x1534] sm:$0xf0]  ;;  %v11573_v40 = vld [vmem:[%s20839_s1 + $0x1628] sm:$0xf]  ;;  %v11318_v48 = vor.u32 %v13510_v18, %v11317_v44  ;;  %v8412_v4 = vadd.f32 %v8402_v55, %v8398_v42  ;;  %v8443_v44 = vmul.f32 %v18623_v43, %v8442_v7 }
 0x2ce   : > { %v13574_v30 = vld [vmem:[%s20839_s1 + $0x1634] sm:$0xf0]  ;;  %v11701_v16 = vld [vmem:[%s20839_s1 + $0x1728] sm:$0xf]  ;;  %7721 = vmatpush.bf16.msrb.mxu0 %v11334_v8  ;;  %v11446_v41 = vor.u32 %v13542_v24, %v11445_v62 }
 0x2cf   : > { %v13606_v33 = vld [vmem:[%s20839_s1 + $0x1734] sm:$0xf0]  ;;  %v11301_v50 = vld [vmem:[%s20839_s1 + $0x1408] sm:$0xf]  ;;  %7735 = vmatpush.bf16.msrb.mxu1 %v11462_v19  ;;  %7749 = vmatpush.bf16.msrb.mxu2 %v11590_v5  ;;  %v11574_v34 = vor.u32 %v13574_v30, %v11573_v40  ;;  %v8413_v18 = vrot.slane %v8412_v4, 4 }
 0x2d0   : > { %v13506_v59 = vld [vmem:[%s20839_s1 + $0x1414] sm:$0xf0]  ;;  %v11429_v28 = vld [vmem:[%s20839_s1 + $0x1508] sm:$0xf]  ;;  %7763 = vmatpush.bf16.msrb.mxu3 %v11718_v47  ;;  %v11702_v36 = vor.u32 %v13606_v33, %v11701_v16 }
 0x2d1   : > { %v13538_v21 = vld [vmem:[%s20839_s1 + $0x1514] sm:$0xf0]  ;;  %v11557_v46 = vld [vmem:[%s20839_s1 + $0x1608] sm:$0xf]  ;;  %v11302_v47 = vor.u32 %v13506_v59, %v11301_v50  ;;  %v8414_v7 = vadd.f32 %v8413_v18, %v8412_v4  ;;  %v8444_v4 = vmul.f32 0.5, %v8443_v44 }
 0x2d2   : > { %v13570_v8 = vld [vmem:[%s20839_s1 + $0x1614] sm:$0xf0]  ;;  %v11685_v31 = vld [vmem:[%s20839_s1 + $0x1708] sm:$0xf]  ;;  %7722 = vmatpush.bf16.msrb.mxu0 %v11318_v48  ;;  %v11430_v42 = vor.u32 %v13538_v21, %v11429_v28  ;;  %v18709_v21 = vpop.f32.mrf.mxu0 }
 0x2d3   : > { %v13602_v19 = vld [vmem:[%s20839_s1 + $0x1714] sm:$0xf0]  ;;  %v11925_v5 = vld [vmem:[%s20839_s1 + $0x18e8] sm:$0xf]  ;;  %7736 = vmatpush.bf16.msrb.mxu1 %v11446_v41  ;;  %7750 = vmatpush.bf16.msrb.mxu2 %v11574_v34  ;;  %v11558_v55 = vor.u32 %v13570_v8, %v11557_v46  ;;  %v8415_v41 = vrot.slane %v8414_v7, 2 }
 0x2d4   : > { %v13662_v62 = vld [vmem:[%s20839_s1 + $0x18f4] sm:$0xf0]  ;;  %v12053_v23 = vld [vmem:[%s20839_s1 + $0x19e8] sm:$0xf]  ;;  %7764 = vmatpush.bf16.msrb.mxu3 %v11702_v36  ;;  %v11686_v48 = vor.u32 %v13602_v19, %v11685_v31 }
 0x2d5   : > { %v13694_v24 = vld [vmem:[%s20839_s1 + $0x19f4] sm:$0xf0]  ;;  %v12181_v40 = vld [vmem:[%s20839_s1 + $0x1ae8] sm:$0xf]  ;;  %v11926_v50 = vor.u32 %v13662_v62, %v11925_v5  ;;  %v8416_v44 = vadd.f32 %v8415_v41, %v8414_v7 }
 0x2d6   : > { %v13726_v30 = vld [vmem:[%s20839_s1 + $0x1af4] sm:$0xf0]  ;;  %v12309_v16 = vld [vmem:[%s20839_s1 + $0x1be8] sm:$0xf]  ;;  %v12054_v34 = vor.u32 %v13694_v24, %v12053_v23  ;;  %7723 = vmatpush.bf16.msrb.mxu0 %v11302_v47  ;;  %v18732_v23 = vpop.f32.mrf.mxu1 }
 0x2d7   : > { %v13758_v33 = vld [vmem:[%s20839_s1 + $0x1bf4] sm:$0xf0]  ;;  %v11909_v59 = vld [vmem:[%s20839_s1 + $0x18c8] sm:$0xf]  ;;  %v12182_v28 = vor.u32 %v13726_v30, %v12181_v40  ;;  %7737 = vmatpush.bf16.msrb.mxu1 %v11430_v42  ;;  %7751 = vmatpush.bf16.msrb.mxu2 %v11558_v55  ;;  %v8445_v40 = vsub.f32 1.5, %v8444_v4  ;;  %v8417_v30 = vrot.slane %v8416_v44, 1 }
 0x2d8   : > { %v13658_v46 = vld [vmem:[%s20839_s1 + $0x18d4] sm:$0xf0]  ;;  %v12037_v8 = vld [vmem:[%s20839_s1 + $0x19c8] sm:$0xf]  ;;  %v12310_v36 = vor.u32 %v13758_v33, %v12309_v16  ;;  %7765 = vmatpush.bf16.msrb.mxu3 %v11686_v48 }
 0x2d9   : > { %v13690_v31 = vld [vmem:[%s20839_s1 + $0x19d4] sm:$0xf0]  ;;  %v12165_v19 = vld [vmem:[%s20839_s1 + $0x1ac8] sm:$0xf]  ;;  %v11910_v47 = vor.u32 %v13658_v46, %v11909_v59  ;;  %v8418_v41 = vadd.f32 %v8417_v30, %v8416_v44  ;;  %v8446_v44 = vmul.f32 %v18623_v43, %v8445_v40 }
 0x2da   : > { %v13722_v5 = vld [vmem:[%s20839_s1 + $0x1ad4] sm:$0xf0]  ;;  %v12293_v18 = vld [vmem:[%s20839_s1 + $0x1bc8] sm:$0xf]  ;;  %7772 = vmatpush.bf16.msra.mxu0 %v11926_v50  ;;  %v12038_v7 = vor.u32 %v13690_v31, %v12037_v8 }
 0x2db   : > { %v13754_v62 = vld [vmem:[%s20839_s1 + $0x1bd4] sm:$0xf0]  ;;  %v11893_v24 = vld [vmem:[%s20839_s1 + $0x18a8] sm:$0xf]  ;;  %7786 = vmatpush.bf16.msra.mxu1 %v12054_v34  ;;  %7800 = vmatpush.bf16.msra.mxu2 %v12182_v28  ;;  %v12166_v42 = vor.u32 %v13722_v5, %v12165_v19  ;;  %v20960_v34 = vld [vmem:[#allocation22_spill] sm:$0xff]  ;;  %v18763_v19 = vpop.f32.mrf.mxu2  ;;  %v8450_v53 = vsel %vm8449_vm3, %v18623_v43, %v8446_v44 }
 0x2dc   : > { %v13654_v55 = vld [vmem:[%s20839_s1 + $0x18b4] sm:$0xf0]  ;;  %v12021_v16 = vld [vmem:[%s20839_s1 + $0x19a8] sm:$0xf]  ;;  %7814 = vmatpush.bf16.msra.mxu3 %v12310_v36  ;;  %v12294_v48 = vor.u32 %v13754_v62, %v12293_v18  ;;  %7752 = vmatmul.bf16.vlgmr.msrb.gmra.mxu2 %v20960_v34  ;;  %v20962_v36 = vld [vmem:[#allocation24_spill] sm:$0xff] }
 0x2dd   : > { %v20959_v33 = vld [vmem:[#allocation21_spill] sm:$0xff]  ;;  %v12149_v59 = vld [vmem:[%s20839_s1 + $0x1aa8] sm:$0xf]  ;;  %7766 = vmatmul.bf16.vlgmr.msrb.gmra.mxu3 %v20962_v36  ;;  %v11894_v31 = vor.u32 %v13654_v55, %v11893_v24  ;;  %v8434_v18 = vmul.f32 0.11111111, %v8418_v41  ;;  %v18775_v55 = vpop.f32.mrf.mxu3 }
 0x2de   : > { %7724 = vmatmul.bf16.vlgmr.msrb.gmra.mxu0 %v20959_v33  ;;  %v13686_v50 = vld [vmem:[%s20839_s1 + $0x19b4] sm:$0xf0]  ;;  %v20961_v28 = vld [vmem:[#allocation23_spill] sm:$0xff] }
 0x2df   : > { %v13718_v4 = vld [vmem:[%s20839_s1 + $0x1ab4] sm:$0xf0]  ;;  %7738 = vmatmul.bf16.vlgmr.msrb.gmra.mxu1 %v20961_v28  ;;  %v12277_v46 = vld [vmem:[%s20839_s1 + $0x1ba8] sm:$0xf]  ;;  %7773 = vmatpush.bf16.msra.mxu0 %v11910_v47  ;;  %v12022_v62 = vor.u32 %v13686_v50, %v12021_v16  ;;  %v18787_v16 = vadd.f32 1e-05, %v8434_v18  ;;  %v7515_v18 = vpop.f32.mrf.mxu1 }
 0x2e0   : > { %v13750_v8 = vld [vmem:[%s20839_s1 + $0x1bb4] sm:$0xf0]  ;;  %v11877_v5 = vld [vmem:[%s20839_s1 + $0x1888] sm:$0xf]  ;;  %7787 = vmatpush.bf16.msra.mxu1 %v12038_v7  ;;  %7801 = vmatpush.bf16.msra.mxu2 %v12166_v42  ;;  %v12150_v30 = vor.u32 %v13718_v4, %v12149_v59 }
 0x2e1   : > { %v13650_v6 = vld [vmem:[%s20839_s1 + $0x1894] sm:$0xf0]  ;;  %v12005_v47 = vld [vmem:[%s20839_s1 + $0x1988] sm:$0xf]  ;;  %7815 = vmatpush.bf16.msra.mxu3 %v12294_v48  ;;  %v12278_v24 = vor.u32 %v13750_v8, %v12277_v46  ;;  %v7501_v48 = vpop.f32.mrf.mxu0  ;;  %13898 = vrsqrt.f32 %v18787_v16  ;;  %vm8457_vm7 = vweird.f32 %v18787_v16 }
 0x2e2   : > { %v13682_v40 = vld [vmem:[%s20839_s1 + $0x1994] sm:$0xf0]  ;;  %v12133_v7 = vld [vmem:[%s20839_s1 + $0x1a88] sm:$0xf]  ;;  %v7502_v4 = vadd.f32 %v7501_v48, %v18645_v56  ;;  %v11878_v41 = vor.u32 %v13650_v6, %v11877_v5 }
 0x2e3   : > { %v13714_v42 = vld [vmem:[%s20839_s1 + $0x1a94] sm:$0xf0]  ;;  %v12261_v50 = vld [vmem:[%s20839_s1 + $0x1b88] sm:$0xf]  ;;  %7774 = vmatpush.bf16.msra.mxu0 %v11894_v31  ;;  %v12006_v46 = vor.u32 %v13682_v40, %v12005_v47 }
 0x2e4   : > { %v13746_v59 = vld [vmem:[%s20839_s1 + $0x1b94] sm:$0xf0]  ;;  %7788 = vmatpush.bf16.msra.mxu1 %v12022_v62  ;;  %7802 = vmatpush.bf16.msra.mxu2 %v12150_v30  ;;  %v12134_v8 = vor.u32 %v13714_v42, %v12133_v7  ;;  %v11861_v36 = vld [vmem:[%s20839_s1 + $0x1868] sm:$0xf]  ;;  %v7516_v56 = vadd.f32 %v7515_v18, %v7502_v4  ;;  %v7529_v4 = vpop.f32.mrf.mxu2 }
 0x2e5   : > { %v13646_v31 = vld [vmem:[%s20839_s1 + $0x1874] sm:$0xf0]  ;;  %v11989_v6 = vld [vmem:[%s20839_s1 + $0x1968] sm:$0xf]  ;;  %7816 = vmatpush.bf16.msra.mxu3 %v12278_v24  ;;  %v12262_v43 = vor.u32 %v13746_v59, %v12261_v50  ;;  %v18825_v24 = vmul.f32 %v8450_v53, %v18201_v9 }
 0x2e6   : > { %v13678_v5 = vld [vmem:[%s20839_s1 + $0x1974] sm:$0xf0]  ;;  %v12117_v44 = vld [vmem:[%s20839_s1 + $0x1a68] sm:$0xf]  ;;  %v11862_v40 = vor.u32 %v13646_v31, %v11861_v36  ;;  %v7530_v18 = vadd.f32 %v7529_v4, %v7516_v56 }
 0x2e7   : > { %v13710_v62 = vld [vmem:[%s20839_s1 + $0x1a74] sm:$0xf0]  ;;  %v12245_v30 = vld [vmem:[%s20839_s1 + $0x1b68] sm:$0xf]  ;;  %7775 = vmatpush.bf16.msra.mxu0 %v11878_v41  ;;  %v11990_v7 = vor.u32 %v13678_v5, %v11989_v6  ;;  %vm8493_vm4 = vcmp.ge.f32.partialorder %v18825_v24, 0.0 }
 0x2e8   : > { %v13742_v47 = vld [vmem:[%s20839_s1 + $0x1b74] sm:$0xf0]  ;;  %7789 = vmatpush.bf16.msra.mxu1 %v12006_v46  ;;  %7803 = vmatpush.bf16.msra.mxu2 %v12134_v8  ;;  %v12118_v42 = vor.u32 %v13710_v62, %v12117_v44  ;;  %v11845_v48 = vld [vmem:[%s20839_s1 + $0x1848] sm:$0xf]  ;;  %v18845_v8 = vpop.eup %13898  ;;  %v7543_v44 = vpop.f32.mrf.mxu3 }
 0x2e9   : > { %v13642_v50 = vld [vmem:[%s20839_s1 + $0x1854] sm:$0xf0]  ;;  %v11973_v59 = vld [vmem:[%s20839_s1 + $0x1948] sm:$0xf]  ;;  %7817 = vmatpush.bf16.msra.mxu3 %v12262_v43  ;;  %v12246_v9 = vor.u32 %v13742_v47, %v12245_v30  ;;  %v18854_v43 = vmul.f32 0.2, %v18825_v24  ;;  %v8452_v5 = vmul.f32 %v18845_v8, %v18787_v16  ;;  %v18858_v56 = vadd.f32 %v7543_v44, %v7530_v18 }
 0x2ea   : > { %v13674_v36 = vld [vmem:[%s20839_s1 + $0x1954] sm:$0xf0]  ;;  %v12101_v41 = vld [vmem:[%s20839_s1 + $0x1a48] sm:$0xf]  ;;  %v11846_v62 = vor.u32 %v13642_v50, %v11845_v48  ;;  %v18870_v48 = vmul.f32 %v8450_v53, %v18256_v49  ;;  %vm8458_vm5 = vweird.f32 %v18845_v8 }
 0x2eb   : > { %v13706_v46 = vld [vmem:[%s20839_s1 + $0x1a54] sm:$0xf0]  ;;  %v12229_v31 = vld [vmem:[%s20839_s1 + $0x1b48] sm:$0xf]  ;;  %7776 = vmatpush.bf16.msra.mxu0 %v11862_v40  ;;  %v11974_v30 = vor.u32 %v13674_v36, %v11973_v59  ;;  %vm8459_vm8 = vmor %vm8457_vm7, %vm8458_vm5  ;;  %vm8547_vm5 = vcmask 0  }
 0x2ec   : > { %v13738_v6 = vld [vmem:[%s20839_s1 + $0x1b54] sm:$0xf0]  ;;  %7790 = vmatpush.bf16.msra.mxu1 %v11990_v7  ;;  %7804 = vmatpush.bf16.msra.mxu2 %v12118_v42  ;;  %v12102_v47 = vor.u32 %v13706_v46, %v12101_v41  ;;  %v11829_v4 = vld [vmem:[%s20839_s1 + $0x1828] sm:$0xf]  ;;  %v8453_v7 = vmul.f32 %v18845_v8, %v8452_v5  ;;  %vm8489_vm6 = vcmp.ge.f32.partialorder %v18870_v48, 0.0 }
 0x2ed   : > { %v13638_v28 = vld [vmem:[%s20839_s1 + $0x1834] sm:$0xf0]  ;;  %v11957_v40 = vld [vmem:[%s20839_s1 + $0x1928] sm:$0xf]  ;;  %7818 = vmatpush.bf16.msra.mxu3 %v12246_v9  ;;  %v12230_v42 = vor.u32 %v13738_v6, %v12229_v31 }
 0x2ee   : > { %v13670_v50 = vld [vmem:[%s20839_s1 + $0x1934] sm:$0xf0]  ;;  %v12085_v59 = vld [vmem:[%s20839_s1 + $0x1a28] sm:$0xf]  ;;  %v8454_v41 = vmul.f32 0.5, %v8453_v7  ;;  %v11830_v46 = vor.u32 %v13638_v28, %v11829_v4 }
 0x2ef   : > { %v13702_v36 = vld [vmem:[%s20839_s1 + $0x1a34] sm:$0xf0]  ;;  %v12213_v49 = vld [vmem:[%s20839_s1 + $0x1b28] sm:$0xf]  ;;  %7777 = vmatpush.bf16.msra.mxu0 %v11846_v62  ;;  %v11958_v6 = vor.u32 %v13670_v50, %v11957_v40 }
 0x2f0   : > { %v13734_v53 = vld [vmem:[%s20839_s1 + $0x1b34] sm:$0xf0]  ;;  %v11813_v9 = vld [vmem:[%s20839_s1 + $0x1808] sm:$0xf]  ;;  %7791 = vmatpush.bf16.msra.mxu1 %v11974_v30  ;;  %7805 = vmatpush.bf16.msra.mxu2 %v12102_v47  ;;  %v12086_v5 = vor.u32 %v13702_v36, %v12085_v59  ;;  %v8455_v4 = vsub.f32 1.5, %v8454_v41 }
 0x2f1   : > { %v13634_v18 = vld [vmem:[%s20839_s1 + $0x1814] sm:$0xf0]  ;;  %v11941_v31 = vld [vmem:[%s20839_s1 + $0x1908] sm:$0xf]  ;;  %7819 = vmatpush.bf16.msra.mxu3 %v12230_v42  ;;  %v12214_v30 = vor.u32 %v13734_v53, %v12213_v49 }
 0x2f2   : > { %v13666_v44 = vld [vmem:[%s20839_s1 + $0x1914] sm:$0xf0]  ;;  %v12069_v28 = vld [vmem:[%s20839_s1 + $0x1a08] sm:$0xf]  ;;  %v8456_v59 = vmul.f32 %v18845_v8, %v8455_v4  ;;  %v11814_v36 = vor.u32 %v13634_v18, %v11813_v9  ;;  %v8497_v4 = vmul.f32 0.2, %v18870_v48 }
 0x2f3   : > { %v13698_v62 = vld [vmem:[%s20839_s1 + $0x1a14] sm:$0xf0]  ;;  %v12197_v47 = vld [vmem:[%s20839_s1 + $0x1b08] sm:$0xf]  ;;  %7778 = vmatpush.bf16.msra.mxu0 %v11830_v46  ;;  %v11942_v16 = vor.u32 %v13666_v44, %v11941_v31 }
 0x2f4   : > { %v13730_v40 = vld [vmem:[%s20839_s1 + $0x1b14] sm:$0xf0]  ;;  %v12437_v7 = vld [vmem:[%s20839_s1 + $0x1ce8] sm:$0xf]  ;;  %7792 = vmatpush.bf16.msra.mxu1 %v11958_v6  ;;  %7806 = vmatpush.bf16.msra.mxu2 %v12086_v5  ;;  %v12070_v46 = vor.u32 %v13698_v62, %v12069_v28  ;;  %v8460_v34 = vsel %vm8459_vm8, %v18845_v8, %v8456_v59  ;;  %v8509_v6 = vsel %vm8493_vm4, %v18825_v24, %v18854_v43  ;;  %v8517_v5 = vld [vmem:[%s20841_s3 + $0x20] sm:$0xff] }
 0x2f5   : > { %v13790_v50 = vld [vmem:[%s20839_s1 + $0x1cf4] sm:$0xf0]  ;;  %v12565_v42 = vld [vmem:[%s20839_s1 + $0x1de8] sm:$0xf]  ;;  %7820 = vmatpush.bf16.msra.mxu3 %v12214_v30  ;;  %v12198_v33 = vor.u32 %v13730_v40, %v12197_v47  ;;  %v8482_v44 = vmul.f32 %v8460_v34, %v18612_v45  ;;  %v8486_v8 = vmul.f32 %v8460_v34, %v18615_v20 }
 0x2f6   : > { %v13822_v49 = vld [vmem:[%s20839_s1 + $0x1df4] sm:$0xf0]  ;;  %v12693_v53 = vld [vmem:[%s20839_s1 + $0x1ee8] sm:$0xf]  ;;  %v12438_v32 = vor.u32 %v13790_v50, %v12437_v7  ;;  %v18975_v7 = vpop.f32.mrf.mxu0 }
 0x2f7   : > { %v13854_v41 = vld [vmem:[%s20839_s1 + $0x1ef4] sm:$0xf0]  ;;  %v12821_v9 = vld [vmem:[%s20839_s1 + $0x1fe8] sm:$0xf]  ;;  %v12566_v28 = vor.u32 %v13822_v49, %v12565_v42  ;;  %7779 = vmatpush.bf16.msra.mxu0 %v11814_v36  ;;  %vm8494_vm9 = vcmp.ge.f32.partialorder %v8486_v8, 0.0  ;;  %v8505_v42 = vsel %vm8489_vm6, %v18870_v48, %v8497_v4  ;;  %v18986_v36 = vpop.f32.mrf.mxu1  ;;  %vm8490_vm10 = vcmp.ge.f32.partialorder %v8482_v44, 0.0 }
 0x2f8   : > { %v13886_v18 = vld [vmem:[%s20839_s1 + $0x1ff4] sm:$0xf0]  ;;  %v12421_v31 = vld [vmem:[%s20839_s1 + $0x1cc8] sm:$0xf]  ;;  %v12694_v62 = vor.u32 %v13854_v41, %v12693_v53  ;;  %v8502_v40 = vmul.f32 0.2, %v8486_v8  ;;  %7793 = vmatpush.bf16.msra.mxu1 %v11942_v16  ;;  %7807 = vmatpush.bf16.msra.mxu2 %v12070_v46  ;;  %v8525_v48 = vmul.f32 %v8517_v5, %v8509_v6 }
 0x2f9   : > { %v13786_v30 = vld [vmem:[%s20839_s1 + $0x1cd4] sm:$0xf0]  ;;  %v12549_v47 = vld [vmem:[%s20839_s1 + $0x1dc8] sm:$0xf]  ;;  %v12822_v43 = vor.u32 %v13886_v18, %v12821_v9  ;;  %7821 = vmatpush.bf16.msra.mxu3 %v12198_v33  ;;  %v8498_v53 = vmul.f32 0.2, %v8482_v44 }
 0x2fa   : > { %v13818_v24 = vld [vmem:[%s20839_s1 + $0x1dd4] sm:$0xf0]  ;;  %v12677_v45 = vld [vmem:[%s20839_s1 + $0x1ec8] sm:$0xf]  ;;  %v12422_v49 = vor.u32 %v13786_v30, %v12421_v31  ;;  %v8513_v41 = vld [vmem:[%s20841_s3] sm:$0xff]  ;;  %v8510_v4 = vsel %vm8494_vm9, %v8486_v8, %v8502_v40  ;;  %7780 = vmatmul.bf16.vlgmr.msra.gmra.mxu0 %v15487_v57 }
 0x2fb   : > { %v13850_v20 = vld [vmem:[%s20839_s1 + $0x1ed4] sm:$0xf0]  ;;  %v12805_v34 = vld [vmem:[%s20839_s1 + $0x1fc8] sm:$0xf]  ;;  %7828 = vmatpush.bf16.msrb.mxu0 %v12438_v32  ;;  %v12550_v46 = vor.u32 %v13818_v24, %v12549_v47  ;;  %7808 = vmatmul.bf16.vlgmr.msra.gmra.mxu2 %v15500_v63  ;;  %v8521_v24 = vmul.f32 %v8513_v41, %v8505_v42 }
 0x2fc   : > { %v13882_v50 = vld [vmem:[%s20839_s1 + $0x1fd4] sm:$0xf0]  ;;  %v8518_v59 = vld [vmem:[%s20841_s3 + $0x28] sm:$0xff]  ;;  %7842 = vmatpush.bf16.msrb.mxu1 %v12566_v28  ;;  %7856 = vmatpush.bf16.msrb.mxu2 %v12694_v62  ;;  %v12678_v9 = vor.u32 %v13850_v20, %v12677_v45  ;;  %v8506_v62 = vsel %vm8490_vm10, %v8482_v44, %v8498_v53  ;;  %v19037_v53 = vpop.f32.mrf.mxu2 }
 0x2fd   : > { %v8514_v16 = vld [vmem:[%s20841_s3 + $0x8] sm:$0xff]  ;;  %v13782_v33 = vld [vmem:[%s20839_s1 + $0x1cb4] sm:$0xf0]  ;;  %7870 = vmatpush.bf16.msrb.mxu3 %v12822_v43  ;;  %v12806_v31 = vor.u32 %v13882_v50, %v12805_v34  ;;  %v8526_v30 = vmul.f32 %v8518_v59, %v8510_v4  ;;  %7794 = vmatmul.bf16.vlgmr.msra.gmra.mxu1 %v15502_v0 }
 0x2fe   : > { %v12405_v32 = vld [vmem:[%s20839_s1 + $0x1ca8] sm:$0xf]  ;;  %v13814_v6 = vld [vmem:[%s20839_s1 + $0x1db4] sm:$0xf0]  ;;  %v8522_v43 = vmul.f32 %v8514_v16, %v8506_v62 }
 0x2ff   : > { %v12533_v18 = vld [vmem:[%s20839_s1 + $0x1da8] sm:$0xf]  ;;  %v13846_v28 = vld [vmem:[%s20839_s1 + $0x1eb4] sm:$0xf0]  ;;  %7829 = vmatpush.bf16.msrb.mxu0 %v12422_v49  ;;  %v12406_v20 = vor.u32 %v13782_v33, %v12405_v32  ;;  %v19024_v44 = vadd.f32 %v8526_v30, %v8525_v48  ;;  %v7557_v32 = vpop.f32.mrf.mxu0 }
 0x300   : > { %v12661_v5 = vld [vmem:[%s20839_s1 + $0x1ea8] sm:$0xf]  ;;  %v13878_v47 = vld [vmem:[%s20839_s1 + $0x1fb4] sm:$0xf0]  ;;  %7843 = vmatpush.bf16.msrb.mxu1 %v12550_v46  ;;  %7857 = vmatpush.bf16.msrb.mxu2 %v12678_v9  ;;  %v12534_v34 = vor.u32 %v13814_v6, %v12533_v18  ;;  %v19035_v49 = vadd.f32 %v8522_v43, %v8521_v24  ;;  %v19048_v9 = vpop.f32.mrf.mxu3  ;;  %v7558_v4 = vadd.f32 %v7557_v32, %v18858_v56  ;;  %v7571_v6 = vpop.f32.mrf.mxu1 }
 0x301   : > { %v12789_v8 = vld [vmem:[%s20839_s1 + $0x1fa8] sm:$0xf]  ;;  %v20963_v45 = vld [vmem:[#allocation29_spill] sm:$0xff]  ;;  %v12662_v40 = vor.u32 %v13846_v28, %v12661_v5  ;;  %7871 = vmatpush.bf16.msrb.mxu3 %v12806_v31 }
 0x302   : > { %7822 = vmatmul.bf16.vlgmr.msra.gmra.mxu3 %v20963_v45  ;;  %v12389_v50 = vld [vmem:[%s20839_s1 + $0x1c88] sm:$0xf]  ;;  %v13778_v59 = vld [vmem:[%s20839_s1 + $0x1c94] sm:$0xf0]  ;;  %v12790_v41 = vor.u32 %v13878_v47, %v12789_v8  ;;  %v7572_v47 = vadd.f32 %v7571_v6, %v7558_v4 }
 0x303   : > { %v12517_v42 = vld [vmem:[%s20839_s1 + $0x1d88] sm:$0xf]  ;;  %v13810_v16 = vld [vmem:[%s20839_s1 + $0x1d94] sm:$0xf0]  ;;  %7830 = vmatpush.bf16.msrb.mxu0 %v12406_v20  ;;  %v12390_v31 = vor.u32 %v13778_v59, %v12389_v50 }
 0x304   : > { %v12645_v48 = vld [vmem:[%s20839_s1 + $0x1e88] sm:$0xf]  ;;  %v13842_v46 = vld [vmem:[%s20839_s1 + $0x1e94] sm:$0xf0]  ;;  %7844 = vmatpush.bf16.msrb.mxu1 %v12534_v34  ;;  %7858 = vmatpush.bf16.msrb.mxu2 %v12662_v40  ;;  %v12518_v5 = vor.u32 %v13810_v16, %v12517_v42  ;;  %v7585_v32 = vpop.f32.mrf.mxu2 }
 0x305   : > { %v12773_v33 = vld [vmem:[%s20839_s1 + $0x1f88] sm:$0xf]  ;;  %v13874_v18 = vld [vmem:[%s20839_s1 + $0x1f94] sm:$0xf0]  ;;  %v12646_v28 = vor.u32 %v13842_v46, %v12645_v48  ;;  %7872 = vmatpush.bf16.msrb.mxu3 %v12790_v41 }
 0x306   : > { %v12373_v62 = vld [vmem:[%s20839_s1 + $0x1c68] sm:$0xf]  ;;  %v13774_v30 = vld [vmem:[%s20839_s1 + $0x1c74] sm:$0xf0]  ;;  %v12774_v56 = vor.u32 %v13874_v18, %v12773_v33 }
 0x307   : > { %v12501_v8 = vld [vmem:[%s20839_s1 + $0x1d68] sm:$0xf]  ;;  %v13806_v24 = vld [vmem:[%s20839_s1 + $0x1d74] sm:$0xf0]  ;;  %7831 = vmatpush.bf16.msrb.mxu0 %v12390_v31  ;;  %v12374_v50 = vor.u32 %v13774_v30, %v12373_v62  ;;  %v7586_v31 = vadd.f32 %v7585_v32, %v7572_v47 }
 0x308   : > { %v12629_v43 = vld [vmem:[%s20839_s1 + $0x1e68] sm:$0xf]  ;;  %v13838_v20 = vld [vmem:[%s20839_s1 + $0x1e74] sm:$0xf0]  ;;  %7845 = vmatpush.bf16.msrb.mxu1 %v12518_v5  ;;  %7859 = vmatpush.bf16.msrb.mxu2 %v12646_v28  ;;  %v12502_v59 = vor.u32 %v13806_v24, %v12501_v8  ;;  %v7599_v6 = vpop.f32.mrf.mxu3 }
 0x309   : > { %v12757_v34 = vld [vmem:[%s20839_s1 + $0x1f68] sm:$0xf]  ;;  %v13870_v40 = vld [vmem:[%s20839_s1 + $0x1f74] sm:$0xf0]  ;;  %v12630_v42 = vor.u32 %v13838_v20, %v12629_v43  ;;  %7873 = vmatpush.bf16.msrb.mxu3 %v12774_v56  ;;  %v19105_v30 = vadd.f32 %v7599_v6, %v7586_v31 }
 0x30a   : > { %v12357_v41 = vld [vmem:[%s20839_s1 + $0x1c48] sm:$0xf]  ;;  %v13770_v16 = vld [vmem:[%s20839_s1 + $0x1c54] sm:$0xf0]  ;;  %v12758_v46 = vor.u32 %v13870_v40, %v12757_v34 }
 0x30b   : > { %v12485_v48 = vld [vmem:[%s20839_s1 + $0x1d48] sm:$0xf]  ;;  %v13802_v33 = vld [vmem:[%s20839_s1 + $0x1d54] sm:$0xf0]  ;;  %7832 = vmatpush.bf16.msrb.mxu0 %v12374_v50  ;;  %v12358_v62 = vor.u32 %v13770_v16, %v12357_v41 }
 0x30c   : > { %v12613_v18 = vld [vmem:[%s20839_s1 + $0x1e48] sm:$0xf]  ;;  %v13834_v4 = vld [vmem:[%s20839_s1 + $0x1e54] sm:$0xf0]  ;;  %7846 = vmatpush.bf16.msrb.mxu1 %v12502_v59  ;;  %7860 = vmatpush.bf16.msrb.mxu2 %v12630_v42  ;;  %v12486_v8 = vor.u32 %v13802_v33, %v12485_v48 }
 0x30d   : > { %v12741_v5 = vld [vmem:[%s20839_s1 + $0x1f48] sm:$0xf]  ;;  %v13866_v28 = vld [vmem:[%s20839_s1 + $0x1f54] sm:$0xf0]  ;;  %v12614_v56 = vor.u32 %v13834_v4, %v12613_v18  ;;  %7874 = vmatpush.bf16.msrb.mxu3 %v12758_v46 }
 0x30e   : > { %v12341_v47 = vld [vmem:[%s20839_s1 + $0x1c28] sm:$0xf]  ;;  %v13766_v24 = vld [vmem:[%s20839_s1 + $0x1c34] sm:$0xf0]  ;;  %v12742_v20 = vor.u32 %v13866_v28, %v12741_v5 }
 0x30f   : > { %v12469_v43 = vld [vmem:[%s20839_s1 + $0x1d28] sm:$0xf]  ;;  %v13798_v34 = vld [vmem:[%s20839_s1 + $0x1d34] sm:$0xf0]  ;;  %7833 = vmatpush.bf16.msrb.mxu0 %v12358_v62  ;;  %v12342_v41 = vor.u32 %v13766_v24, %v12341_v47  ;;  %v12892_v62 = vld [vmem:[%s20839_s1 + $0xec] sm:$0xf] }
 0x310   : > { %v12597_v40 = vld [vmem:[%s20839_s1 + $0x1e28] sm:$0xf]  ;;  %v13830_v50 = vld [vmem:[%s20839_s1 + $0x1e34] sm:$0xf0]  ;;  %7847 = vmatpush.bf16.msrb.mxu1 %v12486_v8  ;;  %7861 = vmatpush.bf16.msrb.mxu2 %v12614_v56  ;;  %v12470_v46 = vor.u32 %v13798_v34, %v12469_v43  ;;  %v8855_v8 = vld [vmem:[%s20839_s1 + $0xf8] sm:$0xf0] }
 0x311   : > { %v12725_v59 = vld [vmem:[%s20839_s1 + $0x1f28] sm:$0xf]  ;;  %v13862_v42 = vld [vmem:[%s20839_s1 + $0x1f34] sm:$0xf0]  ;;  %v12598_v32 = vor.u32 %v13830_v50, %v12597_v40  ;;  %7875 = vmatpush.bf16.msrb.mxu3 %v12742_v20  ;;  %v12924_v56 = vld [vmem:[%s20839_s1 + $0x1ec] sm:$0xf] }
 0x312   : > { %v12325_v16 = vld [vmem:[%s20839_s1 + $0x1c08] sm:$0xf]  ;;  %v13762_v48 = vld [vmem:[%s20839_s1 + $0x1c14] sm:$0xf0]  ;;  %v12726_v31 = vor.u32 %v13862_v42, %v12725_v59  ;;  %v20964_v47 = vperm.slane %v18572_v39, 2 }
 0x313   : > { %v12453_v33 = vld [vmem:[%s20839_s1 + $0x1d08] sm:$0xf]  ;;  %v13794_v18 = vld [vmem:[%s20839_s1 + $0x1d14] sm:$0xf0]  ;;  %7834 = vmatpush.bf16.msrb.mxu0 %v12342_v41  ;;  %v12326_v43 = vor.u32 %v13762_v48, %v12325_v16  ;;  %v8983_v20 = vld [vmem:[%s20839_s1 + $0x1f8] sm:$0xf0]  ;;  %v8858_v41 = vor.u32 %v12892_v62, %v8855_v8  ;;  %v19209_v8 = vpop.f32.mrf.mxu1 }
 0x314   : > { %v12581_v4 = vld [vmem:[%s20839_s1 + $0x1e08] sm:$0xf]  ;;  %v13826_v6 = vld [vmem:[%s20839_s1 + $0x1e14] sm:$0xf0]  ;;  %v7448_v24 = vadd.f32 %v18709_v21, %v20964_v47  ;;  %v12956_v34 = vld [vmem:[%s20839_s1 + $0x2ec] sm:$0xf]  ;;  %7848 = vmatpush.bf16.msrb.mxu1 %v12470_v46  ;;  %7862 = vmatpush.bf16.msrb.mxu2 %v12598_v32  ;;  %v12454_v50 = vor.u32 %v13794_v18, %v12453_v33  ;;  %v8986_v16 = vor.u32 %v12924_v56, %v8983_v20 }
 0x315   : > { %v12709_v5 = vld [vmem:[%s20839_s1 + $0x1f08] sm:$0xf]  ;;  %v13858_v28 = vld [vmem:[%s20839_s1 + $0x1f14] sm:$0xf0]  ;;  %v9111_v40 = vld [vmem:[%s20839_s1 + $0x2f8] sm:$0xf0]  ;;  %v12582_v39 = vor.u32 %v13826_v6, %v12581_v4  ;;  %7876 = vmatpush.bf16.msrb.mxu3 %v12726_v31 }
 0x316   : > { %v12988_v21 = vld [vmem:[%s20839_s1 + $0x3ec] sm:$0xf]  ;;  %v9239_v59 = vld [vmem:[%s20839_s1 + $0x3f8] sm:$0xf0]  ;;  %v12710_v42 = vor.u32 %v13858_v28, %v12709_v5  ;;  %v9114_v48 = vor.u32 %v12956_v34, %v9111_v40  ;;  %v7462_v18 = vadd.f32 %v18732_v23, %v7448_v24  ;;  %v19201_v28 = vpop.f32.mrf.mxu0 }
 0x317   : > { %v12888_v46 = vld [vmem:[%s20839_s1 + $0xcc] sm:$0xf]  ;;  %v8839_v32 = vld [vmem:[%s20839_s1 + $0xd8] sm:$0xf0]  ;;  %7835 = vmatpush.bf16.msrb.mxu0 %v12326_v43  ;;  %v9242_v4 = vor.u32 %v12988_v21, %v9239_v59 }
 0x318   : > { %v12920_v33 = vld [vmem:[%s20839_s1 + $0x1cc] sm:$0xf]  ;;  %v8967_v31 = vld [vmem:[%s20839_s1 + $0x1d8] sm:$0xf0]  ;;  %7849 = vmatpush.bf16.msrb.mxu1 %v12454_v50  ;;  %7863 = vmatpush.bf16.msrb.mxu2 %v12582_v39  ;;  %v8842_v56 = vor.u32 %v12888_v46, %v8839_v32  ;;  %v7476_v40 = vadd.f32 %v18763_v19, %v7462_v18 }
 0x319   : > { %v12952_v6 = vld [vmem:[%s20839_s1 + $0x2cc] sm:$0xf]  ;;  %v9095_v5 = vld [vmem:[%s20839_s1 + $0x2d8] sm:$0xf0]  ;;  %7877 = vmatpush.bf16.msrb.mxu3 %v12710_v42  ;;  %v8970_v47 = vor.u32 %v12920_v33, %v8967_v31 }
 0x31a   : > { %v12984_v23 = vld [vmem:[%s20839_s1 + $0x3cc] sm:$0xf]  ;;  %v9223_v62 = vld [vmem:[%s20839_s1 + $0x3d8] sm:$0xf0]  ;;  %v9098_v24 = vor.u32 %v12952_v6, %v9095_v5  ;;  %7836 = vmatmul.bf16.vlgmr.msrb.gmra.mxu0 %v15710_v61  ;;  %v7490_v18 = vadd.f32 %v18775_v55, %v7476_v40 }
 0x31b   : > { %7884 = vmatpush.bf16.msra.mxu0 %v8858_v41  ;;  %v12884_v43 = vld [vmem:[%s20839_s1 + $0xac] sm:$0xf]  ;;  %v8823_v20 = vld [vmem:[%s20839_s1 + $0xb8] sm:$0xf0]  ;;  %v9226_v50 = vor.u32 %v12984_v23, %v9223_v62  ;;  %7864 = vmatmul.bf16.vlgmr.msrb.gmra.mxu2 %v15723_v10  ;;  %v19261_v62 = vpop.f32.mrf.mxu3 }
 0x31c   : > { %7898 = vmatpush.bf16.msra.mxu1 %v8986_v16  ;;  %7912 = vmatpush.bf16.msra.mxu2 %v9114_v48  ;;  %v12916_v34 = vld [vmem:[%s20839_s1 + $0x1ac] sm:$0xf]  ;;  %v8951_v39 = vld [vmem:[%s20839_s1 + $0x1b8] sm:$0xf0]  ;;  %v8826_v41 = vor.u32 %v12884_v43, %v8823_v20  ;;  %v7627_v20 = vpop.f32.mrf.mxu1 }
 0x31d   : > { %7926 = vmatpush.bf16.msra.mxu3 %v9242_v4  ;;  %v12948_v21 = vld [vmem:[%s20839_s1 + $0x2ac] sm:$0xf]  ;;  %v9079_v59 = vld [vmem:[%s20839_s1 + $0x2b8] sm:$0xf0]  ;;  %7850 = vmatmul.bf16.vlgmr.msrb.gmra.mxu1 %v15725_v11  ;;  %v8954_v16 = vor.u32 %v12916_v34, %v8951_v39  ;;  %v19250_v4 = vpop.f32.mrf.mxu2 }
 0x31e   : > { %v12980_v19 = vld [vmem:[%s20839_s1 + $0x3ac] sm:$0xf]  ;;  %v9207_v42 = vld [vmem:[%s20839_s1 + $0x3b8] sm:$0xf0]  ;;  %7878 = vmatmul.bf16.vlgmr.msrb.gmra.mxu3 %v15735_v15  ;;  %v9082_v48 = vor.u32 %v12948_v21, %v9079_v59 }
 0x31f   : > { %7885 = vmatpush.bf16.msra.mxu0 %v8842_v56  ;;  %v12880_v46 = vld [vmem:[%s20839_s1 + $0x8c] sm:$0xf]  ;;  %v8807_v32 = vld [vmem:[%s20839_s1 + $0x98] sm:$0xf0]  ;;  %v9210_v31 = vor.u32 %v12980_v19, %v9207_v42  ;;  %v7613_v56 = vpop.f32.mrf.mxu0 }
 0x320   : > { %7899 = vmatpush.bf16.msra.mxu1 %v8970_v47  ;;  %7913 = vmatpush.bf16.msra.mxu2 %v9098_v24  ;;  %v12912_v33 = vld [vmem:[%s20839_s1 + $0x18c] sm:$0xf]  ;;  %v8935_v6 = vld [vmem:[%s20839_s1 + $0x198] sm:$0xf0]  ;;  %v7614_v24 = vadd.f32 %v7613_v56, %v19105_v30  ;;  %v8810_v43 = vor.u32 %v12880_v46, %v8807_v32  ;;  %v7504_v30 = vadd.f32 %v18975_v7, %v7490_v18 }
 0x321   : > { %7927 = vmatpush.bf16.msra.mxu3 %v9226_v50  ;;  %v12944_v5 = vld [vmem:[%s20839_s1 + $0x28c] sm:$0xf]  ;;  %v9063_v23 = vld [vmem:[%s20839_s1 + $0x298] sm:$0xf0]  ;;  %v8938_v34 = vor.u32 %v12912_v33, %v8935_v6 }
 0x322   : > { %v12976_v55 = vld [vmem:[%s20839_s1 + $0x38c] sm:$0xf]  ;;  %v9191_v47 = vld [vmem:[%s20839_s1 + $0x398] sm:$0xf0]  ;;  %v9066_v40 = vor.u32 %v12944_v5, %v9063_v23  ;;  %v7628_v19 = vadd.f32 %v7627_v20, %v7614_v24  ;;  %v7518_v5 = vadd.f32 %v18986_v36, %v7504_v30 }
 0x323   : > { %7886 = vmatpush.bf16.msra.mxu0 %v8826_v41  ;;  %v12876_v50 = vld [vmem:[%s20839_s1 + $0x6c] sm:$0xf]  ;;  %v8791_v39 = vld [vmem:[%s20839_s1 + $0x78] sm:$0xf0]  ;;  %v9194_v59 = vor.u32 %v12976_v55, %v9191_v47  ;;  %v7655_v20 = vpop.f32.mrf.mxu3 }
 0x324   : > { %7900 = vmatpush.bf16.msra.mxu1 %v8954_v16  ;;  %7914 = vmatpush.bf16.msra.mxu2 %v9082_v48  ;;  %v12908_v21 = vld [vmem:[%s20839_s1 + $0x16c] sm:$0xf]  ;;  %v8919_v42 = vld [vmem:[%s20839_s1 + $0x178] sm:$0xf0]  ;;  %v8794_v46 = vor.u32 %v12876_v50, %v8791_v39 }
 0x325   : > { %7928 = vmatpush.bf16.msra.mxu3 %v9210_v31  ;;  %v12940_v41 = vld [vmem:[%s20839_s1 + $0x26c] sm:$0xf]  ;;  %v9047_v16 = vld [vmem:[%s20839_s1 + $0x278] sm:$0xf0]  ;;  %v8922_v32 = vor.u32 %v12908_v21, %v8919_v42  ;;  %v7641_v56 = vpop.f32.mrf.mxu2 }
 0x326   : > { %v12972_v48 = vld [vmem:[%s20839_s1 + $0x36c] sm:$0xf]  ;;  %v9175_v7 = vld [vmem:[%s20839_s1 + $0x378] sm:$0xf0]  ;;  %v9050_v33 = vor.u32 %v12940_v41, %v9047_v16 }
 0x327   : > { %7887 = vmatpush.bf16.msra.mxu0 %v8810_v43  ;;  %v12872_v18 = vld [vmem:[%s20839_s1 + $0x4c] sm:$0xf]  ;;  %v8775_v31 = vld [vmem:[%s20839_s1 + $0x58] sm:$0xf0]  ;;  %v9178_v23 = vor.u32 %v12972_v48, %v9175_v7  ;;  %v7642_v43 = vadd.f32 %v7641_v56, %v7628_v19 }
 0x328   : > { %7901 = vmatpush.bf16.msra.mxu1 %v8938_v34  ;;  %7915 = vmatpush.bf16.msra.mxu2 %v9066_v40  ;;  %v12904_v6 = vld [vmem:[%s20839_s1 + $0x14c] sm:$0xf]  ;;  %v8903_v55 = vld [vmem:[%s20839_s1 + $0x158] sm:$0xf0]  ;;  %v7532_v40 = vadd.f32 %v19037_v53, %v7518_v5  ;;  %v8778_v50 = vor.u32 %v12872_v18, %v8775_v31 }
 0x329   : > { %7929 = vmatpush.bf16.msra.mxu3 %v9194_v59  ;;  %v12936_v47 = vld [vmem:[%s20839_s1 + $0x24c] sm:$0xf]  ;;  %v9031_v24 = vld [vmem:[%s20839_s1 + $0x258] sm:$0xf0]  ;;  %v19321_v39 = vadd.f32 %v7655_v20, %v7642_v43  ;;  %v8906_v21 = vor.u32 %v12904_v6, %v8903_v55 }
 0x32a   : > { %v12968_v36 = vld [vmem:[%s20839_s1 + $0x34c] sm:$0xf]  ;;  %v9159_v34 = vld [vmem:[%s20839_s1 + $0x358] sm:$0xf0]  ;;  %v9034_v30 = vor.u32 %v12936_v47, %v9031_v24 }
 0x32b   : > { %7888 = vmatpush.bf16.msra.mxu0 %v8794_v46  ;;  %v12868_v59 = vld [vmem:[%s20839_s1 + $0x2c] sm:$0xf]  ;;  %v8759_v19 = vld [vmem:[%s20839_s1 + $0x38] sm:$0xf0]  ;;  %v9162_v42 = vor.u32 %v12968_v36, %v9159_v34 }
 0x32c   : > { %7902 = vmatpush.bf16.msra.mxu1 %v8922_v32  ;;  %7916 = vmatpush.bf16.msra.mxu2 %v9050_v33  ;;  %v12900_v53 = vld [vmem:[%s20839_s1 + $0x12c] sm:$0xf]  ;;  %v8887_v41 = vld [vmem:[%s20839_s1 + $0x138] sm:$0xf0]  ;;  %v7546_v32 = vadd.f32 %v19048_v9, %v7532_v40  ;;  %v8762_v33 = vor.u32 %v12868_v59, %v8759_v19 }
 0x32d   : > { %7930 = vmatpush.bf16.msra.mxu3 %v9178_v23  ;;  %v12932_v16 = vld [vmem:[%s20839_s1 + $0x22c] sm:$0xf]  ;;  %v9015_v48 = vld [vmem:[%s20839_s1 + $0x238] sm:$0xf0]  ;;  %v8890_v6 = vor.u32 %v12900_v53, %v8887_v41 }
 0x32e   : > { %v12964_v7 = vld [vmem:[%s20839_s1 + $0x32c] sm:$0xf]  ;;  %v9143_v46 = vld [vmem:[%s20839_s1 + $0x338] sm:$0xf0]  ;;  %v9018_v5 = vor.u32 %v12932_v16, %v9015_v48  ;;  %v7560_v55 = vadd.f32 %v19201_v28, %v7546_v32 }
 0x32f   : > { %7889 = vmatpush.bf16.msra.mxu0 %v8778_v50  ;;  %v12864_v18 = vld [vmem:[%s20839_s1 + $0xc] sm:$0xf]  ;;  %v8743_v31 = vld [vmem:[%s20839_s1 + $0x18] sm:$0xf0]  ;;  %v9146_v47 = vor.u32 %v12964_v7, %v9143_v46 }
 0x330   : > { %7903 = vmatpush.bf16.msra.mxu1 %v8906_v21  ;;  %7917 = vmatpush.bf16.msra.mxu2 %v9034_v30  ;;  %v12896_v23 = vld [vmem:[%s20839_s1 + $0x10c] sm:$0xf]  ;;  %v8871_v9 = vld [vmem:[%s20839_s1 + $0x118] sm:$0xf0]  ;;  %v8746_v40 = vor.u32 %v12864_v18, %v8743_v31  ;;  %v7574_v41 = vadd.f32 %v19209_v8, %v7560_v55  ;;  %v7629_v55 = vpop.f32.mrf.mxu1 }
 0x331   : > { %v12928_v56 = vld [vmem:[%s20839_s1 + $0x20c] sm:$0xf]  ;;  %7931 = vmatpush.bf16.msra.mxu3 %v9162_v42  ;;  %v8999_v24 = vld [vmem:[%s20839_s1 + $0x218] sm:$0xf0]  ;;  %v8874_v59 = vor.u32 %v12896_v23, %v8871_v9  ;;  %v7615_v9 = vpop.f32.mrf.mxu0 }
 0x332   : > { %v12960_v43 = vld [vmem:[%s20839_s1 + $0x30c] sm:$0xf]  ;;  %v9127_v20 = vld [vmem:[%s20839_s1 + $0x318] sm:$0xf0]  ;;  %v9002_v19 = vor.u32 %v12928_v56, %v8999_v24  ;;  %v7588_v31 = vadd.f32 %v19250_v4, %v7574_v41 }
 0x333   : > { %v13020_v36 = vld [vmem:[%s20839_s1 + $0x4ec] sm:$0xf]  ;;  %v9367_v28 = vld [vmem:[%s20839_s1 + $0x4f8] sm:$0xf0]  ;;  %7890 = vmatpush.bf16.msra.mxu0 %v8762_v33  ;;  %v9130_v16 = vor.u32 %v12960_v43, %v9127_v20 }
 0x334   : > { %v13052_v34 = vld [vmem:[%s20839_s1 + $0x5ec] sm:$0xf]  ;;  %v9495_v50 = vld [vmem:[%s20839_s1 + $0x5f8] sm:$0xf0]  ;;  %7904 = vmatpush.bf16.msra.mxu1 %v8890_v6  ;;  %7918 = vmatpush.bf16.msra.mxu2 %v9018_v5  ;;  %v9370_v48 = vor.u32 %v13020_v36, %v9367_v28 }
 0x335   : > { %v13084_v21 = vld [vmem:[%s20839_s1 + $0x6ec] sm:$0xf]  ;;  %v9623_v30 = vld [vmem:[%s20839_s1 + $0x6f8] sm:$0xf0]  ;;  %7932 = vmatpush.bf16.msra.mxu3 %v9146_v47  ;;  %v9498_v7 = vor.u32 %v13052_v34, %v9495_v50  ;;  %v7602_v34 = vadd.f32 %v19261_v62, %v7588_v31 }
 0x336   : > { %v13116_v53 = vld [vmem:[%s20839_s1 + $0x7ec] sm:$0xf]  ;;  %v9751_v42 = vld [vmem:[%s20839_s1 + $0x7f8] sm:$0xf0]  ;;  %v9626_v46 = vor.u32 %v13084_v21, %v9623_v30 }
 0x337   : > { %v13016_v32 = vld [vmem:[%s20839_s1 + $0x4cc] sm:$0xf]  ;;  %v9351_v33 = vld [vmem:[%s20839_s1 + $0x4d8] sm:$0xf0]  ;;  %7891 = vmatpush.bf16.msra.mxu0 %v8746_v40  ;;  %v9754_v8 = vor.u32 %v13116_v53, %v9751_v42 }
 0x338   : > { %v13048_v18 = vld [vmem:[%s20839_s1 + $0x5cc] sm:$0xf]  ;;  %v9479_v6 = vld [vmem:[%s20839_s1 + $0x5d8] sm:$0xf0]  ;;  %7905 = vmatpush.bf16.msra.mxu1 %v8874_v59  ;;  %7919 = vmatpush.bf16.msra.mxu2 %v9002_v19  ;;  %v9354_v47 = vor.u32 %v13016_v32, %v9351_v33  ;;  %v7616_v19 = vadd.f32 %v7615_v9, %v7602_v34  ;;  %v7657_v32 = vpop.f32.mrf.mxu3 }
 0x339   : > { %v13080_v5 = vld [vmem:[%s20839_s1 + $0x6cc] sm:$0xf]  ;;  %v9607_v23 = vld [vmem:[%s20839_s1 + $0x6d8] sm:$0xf0]  ;;  %7933 = vmatpush.bf16.msra.mxu3 %v9130_v16  ;;  %v9482_v24 = vor.u32 %v13048_v18, %v9479_v6 }
 0x33a   : > { %v13112_v4 = vld [vmem:[%s20839_s1 + $0x7cc] sm:$0xf]  ;;  %v9735_v56 = vld [vmem:[%s20839_s1 + $0x7d8] sm:$0xf0]  ;;  %v9610_v43 = vor.u32 %v13080_v5, %v9607_v23  ;;  %7892 = vmatmul.bf16.vlgmr.msra.gmra.mxu0 %v14249_v14  ;;  %v7669_v33 = vpop.f32.mrf.mxu0 }
 0x33b   : > { %7940 = vmatpush.bf16.msrb.mxu0 %v9370_v48  ;;  %v13012_v20 = vld [vmem:[%s20839_s1 + $0x4ac] sm:$0xf]  ;;  %v9335_v36 = vld [vmem:[%s20839_s1 + $0x4b8] sm:$0xf0]  ;;  %v9738_v40 = vor.u32 %v13112_v4, %v9735_v56  ;;  %7920 = vmatmul.bf16.vlgmr.msra.gmra.mxu2 %v20936_v29  ;;  %v7670_v6 = vadd.f32 %v7669_v33, %v19321_v39  ;;  %v7683_v23 = vpop.f32.mrf.mxu1 }
 0x33c   : > { %7954 = vmatpush.bf16.msrb.mxu1 %v9498_v7  ;;  %7968 = vmatpush.bf16.msrb.mxu2 %v9626_v46  ;;  %v13044_v28 = vld [vmem:[%s20839_s1 + $0x5ac] sm:$0xf]  ;;  %v9463_v50 = vld [vmem:[%s20839_s1 + $0x5b8] sm:$0xf0]  ;;  %v9338_v53 = vor.u32 %v13012_v20, %v9335_v36 }
 0x33d   : > { %7982 = vmatpush.bf16.msrb.mxu3 %v9754_v8  ;;  %v13076_v21 = vld [vmem:[%s20839_s1 + $0x6ac] sm:$0xf]  ;;  %v9591_v30 = vld [vmem:[%s20839_s1 + $0x6b8] sm:$0xf0]  ;;  %7906 = vmatmul.bf16.vlgmr.msra.gmra.mxu1 %v20937_v22  ;;  %v9466_v14 = vor.u32 %v13044_v28, %v9463_v50  ;;  %v7643_v22 = vpop.f32.mrf.mxu2  ;;  %v7630_v8 = vadd.f32 %v7629_v55, %v7616_v19 }
 0x33e   : > { %v13108_v62 = vld [vmem:[%s20839_s1 + $0x7ac] sm:$0xf]  ;;  %v9719_v59 = vld [vmem:[%s20839_s1 + $0x7b8] sm:$0xf0]  ;;  %7934 = vmatmul.bf16.vlgmr.msra.gmra.mxu3 %v20938_v27  ;;  %v9594_v42 = vor.u32 %v13076_v21, %v9591_v30 }
 0x33f   : > { %7941 = vmatpush.bf16.msrb.mxu0 %v9354_v47  ;;  %v13008_v41 = vld [vmem:[%s20839_s1 + $0x48c] sm:$0xf]  ;;  %v9319_v16 = vld [vmem:[%s20839_s1 + $0x498] sm:$0xf0]  ;;  %v9722_v48 = vor.u32 %v13108_v62, %v9719_v59 }
 0x340   : > { %7955 = vmatpush.bf16.msrb.mxu1 %v9482_v24  ;;  %7969 = vmatpush.bf16.msrb.mxu2 %v9610_v43  ;;  %v13040_v29 = vld [vmem:[%s20839_s1 + $0x58c] sm:$0xf]  ;;  %v9447_v27 = vld [vmem:[%s20839_s1 + $0x598] sm:$0xf0]  ;;  %v9322_v5 = vor.u32 %v13008_v41, %v9319_v16  ;;  %v7644_v24 = vadd.f32 %v7643_v22, %v7630_v8  ;;  %v7684_v43 = vadd.f32 %v7683_v23, %v7670_v6 }
 0x341   : > { %7983 = vmatpush.bf16.msrb.mxu3 %v9738_v40  ;;  %v13072_v7 = vld [vmem:[%s20839_s1 + $0x68c] sm:$0xf]  ;;  %v9575_v46 = vld [vmem:[%s20839_s1 + $0x698] sm:$0xf0]  ;;  %v9450_v9 = vor.u32 %v13040_v29, %v9447_v27  ;;  %v7711_v27 = vpop.f32.mrf.mxu3 }
 0x342   : > { %v13104_v18 = vld [vmem:[%s20839_s1 + $0x78c] sm:$0xf]  ;;  %v9703_v31 = vld [vmem:[%s20839_s1 + $0x798] sm:$0xf0]  ;;  %v9578_v4 = vor.u32 %v13072_v7, %v9575_v46 }
 0x343   : > { %7942 = vmatpush.bf16.msrb.mxu0 %v9338_v53  ;;  %v13004_v56 = vld [vmem:[%s20839_s1 + $0x46c] sm:$0xf]  ;;  %v9303_v47 = vld [vmem:[%s20839_s1 + $0x478] sm:$0xf0]  ;;  %v9706_v39 = vor.u32 %v13104_v18, %v9703_v31  ;;  %v7658_v53 = vadd.f32 %v7657_v32, %v7644_v24  ;;  %v7685_v18 = vpop.f32.mrf.mxu1 }
 0x344   : > { %7956 = vmatpush.bf16.msrb.mxu1 %v9466_v14  ;;  %7970 = vmatpush.bf16.msrb.mxu2 %v9594_v42  ;;  %v13036_v55 = vld [vmem:[%s20839_s1 + $0x56c] sm:$0xf]  ;;  %v9431_v20 = vld [vmem:[%s20839_s1 + $0x578] sm:$0xf0]  ;;  %v9306_v50 = vor.u32 %v13004_v56, %v9303_v47 }
 0x345   : > { %7984 = vmatpush.bf16.msrb.mxu3 %v9722_v48  ;;  %v13068_v36 = vld [vmem:[%s20839_s1 + $0x66c] sm:$0xf]  ;;  %v9559_v28 = vld [vmem:[%s20839_s1 + $0x678] sm:$0xf0]  ;;  %v9434_v21 = vor.u32 %v13036_v55, %v9431_v20  ;;  %v7697_v42 = vpop.f32.mrf.mxu2  ;;  %v7671_v48 = vpop.f32.mrf.mxu0 }
 0x346   : > { %v13100_v34 = vld [vmem:[%s20839_s1 + $0x76c] sm:$0xf]  ;;  %v9687_v40 = vld [vmem:[%s20839_s1 + $0x778] sm:$0xf0]  ;;  %v9562_v30 = vor.u32 %v13068_v36, %v9559_v28  ;;  %v7698_v22 = vadd.f32 %v7697_v42, %v7684_v43  ;;  %v7672_v32 = vadd.f32 %v7671_v48, %v7658_v53 }
 0x347   : > { %7943 = vmatpush.bf16.msrb.mxu0 %v9322_v5  ;;  %v13000_v62 = vld [vmem:[%s20839_s1 + $0x44c] sm:$0xf]  ;;  %v9287_v59 = vld [vmem:[%s20839_s1 + $0x458] sm:$0xf0]  ;;  %v9690_v14 = vor.u32 %v13100_v34, %v9687_v40 }
 0x348   : > { %7957 = vmatpush.bf16.msrb.mxu1 %v9450_v9  ;;  %7971 = vmatpush.bf16.msrb.mxu2 %v9578_v4  ;;  %v13032_v19 = vld [vmem:[%s20839_s1 + $0x54c] sm:$0xf]  ;;  %v9415_v41 = vld [vmem:[%s20839_s1 + $0x558] sm:$0xf0]  ;;  %v9290_v33 = vor.u32 %v13000_v62, %v9287_v59  ;;  %v19525_v31 = vadd.f32 %v7711_v27, %v7698_v22  ;;  %v7686_v56 = vadd.f32 %v7685_v18, %v7672_v32 }
 0x349   : > { %7985 = vmatpush.bf16.msrb.mxu3 %v9706_v39  ;;  %v13064_v16 = vld [vmem:[%s20839_s1 + $0x64c] sm:$0xf]  ;;  %v9543_v29 = vld [vmem:[%s20839_s1 + $0x658] sm:$0xf0]  ;;  %v9418_v8 = vor.u32 %v13032_v19, %v9415_v41  ;;  %v7713_v41 = vpop.f32.mrf.mxu3 }
 0x34a   : > { %v13096_v7 = vld [vmem:[%s20839_s1 + $0x74c] sm:$0xf]  ;;  %v9671_v46 = vld [vmem:[%s20839_s1 + $0x758] sm:$0xf0]  ;;  %v9546_v6 = vor.u32 %v13064_v16, %v9543_v29 }
 0x34b   : > { %7944 = vmatpush.bf16.msrb.mxu0 %v9306_v50  ;;  %v12996_v5 = vld [vmem:[%s20839_s1 + $0x42c] sm:$0xf]  ;;  %v9271_v23 = vld [vmem:[%s20839_s1 + $0x438] sm:$0xf0]  ;;  %v9674_v4 = vor.u32 %v13096_v7, %v9671_v46 }
 0x34c   : > { %7958 = vmatpush.bf16.msrb.mxu1 %v9434_v21  ;;  %7972 = vmatpush.bf16.msrb.mxu2 %v9562_v30  ;;  %v13028_v9 = vld [vmem:[%s20839_s1 + $0x52c] sm:$0xf]  ;;  %v9399_v47 = vld [vmem:[%s20839_s1 + $0x538] sm:$0xf0]  ;;  %v9274_v20 = vor.u32 %v12996_v5, %v9271_v23 }
 0x34d   : > { %7986 = vmatpush.bf16.msrb.mxu3 %v9690_v14  ;;  %v13060_v55 = vld [vmem:[%s20839_s1 + $0x62c] sm:$0xf]  ;;  %v9527_v24 = vld [vmem:[%s20839_s1 + $0x638] sm:$0xf0]  ;;  %v9402_v34 = vor.u32 %v13028_v9, %v9399_v47  ;;  %v7699_v59 = vpop.f32.mrf.mxu2 }
 0x34e   : > { %v13092_v39 = vld [vmem:[%s20839_s1 + $0x72c] sm:$0xf]  ;;  %v9655_v43 = vld [vmem:[%s20839_s1 + $0x738] sm:$0xf0]  ;;  %v9530_v40 = vor.u32 %v13060_v55, %v9527_v24  ;;  %v7700_v42 = vadd.f32 %v7699_v59, %v7686_v56 }
 0x34f   : > { %7945 = vmatpush.bf16.msrb.mxu0 %v9290_v33  ;;  %v12992_v36 = vld [vmem:[%s20839_s1 + $0x40c] sm:$0xf]  ;;  %v9255_v28 = vld [vmem:[%s20839_s1 + $0x418] sm:$0xf0]  ;;  %v9658_v62 = vor.u32 %v13092_v39, %v9655_v43 }
 0x350   : > { %7959 = vmatpush.bf16.msrb.mxu1 %v9418_v8  ;;  %7973 = vmatpush.bf16.msrb.mxu2 %v9546_v6  ;;  %v13024_v50 = vld [vmem:[%s20839_s1 + $0x50c] sm:$0xf]  ;;  %v9383_v21 = vld [vmem:[%s20839_s1 + $0x518] sm:$0xf0]  ;;  %v9258_v48 = vor.u32 %v12992_v36, %v9255_v28  ;;  %v19593_v32 = vadd.f32 %v7713_v41, %v7700_v42 }
 0x351   : > { %v13056_v30 = vld [vmem:[%s20839_s1 + $0x60c] sm:$0xf]  ;;  %7987 = vmatpush.bf16.msrb.mxu3 %v9674_v4  ;;  %v9511_v19 = vld [vmem:[%s20839_s1 + $0x618] sm:$0xf0]  ;;  %v9386_v33 = vor.u32 %v13024_v50, %v9383_v21 }
 0x352   : > { %v13088_v53 = vld [vmem:[%s20839_s1 + $0x70c] sm:$0xf]  ;;  %v9639_v14 = vld [vmem:[%s20839_s1 + $0x718] sm:$0xf0]  ;;  %v9514_v18 = vor.u32 %v13056_v30, %v9511_v19 }
 0x353   : > { %v13148_v16 = vld [vmem:[%s20839_s1 + $0x8ec] sm:$0xf]  ;;  %v9879_v29 = vld [vmem:[%s20839_s1 + $0x8f8] sm:$0xf0]  ;;  %7946 = vmatpush.bf16.msrb.mxu0 %v9274_v20  ;;  %v9642_v5 = vor.u32 %v13088_v53, %v9639_v14 }
 0x354   : > { %v13180_v22 = vld [vmem:[%s20839_s1 + $0x9ec] sm:$0xf]  ;;  %v10007_v27 = vld [vmem:[%s20839_s1 + $0x9f8] sm:$0xf0]  ;;  %7960 = vmatpush.bf16.msrb.mxu1 %v9402_v34  ;;  %7974 = vmatpush.bf16.msrb.mxu2 %v9530_v40  ;;  %v9882_v23 = vor.u32 %v13148_v16, %v9879_v29 }
 0x355   : > { %v13212_v7 = vld [vmem:[%s20839_s1 + $0xaec] sm:$0xf]  ;;  %v10135_v46 = vld [vmem:[%s20839_s1 + $0xaf8] sm:$0xf0]  ;;  %7988 = vmatpush.bf16.msrb.mxu3 %v9658_v62  ;;  %v10010_v9 = vor.u32 %v13180_v22, %v10007_v27 }
 0x356   : > { %v13244_v8 = vld [vmem:[%s20839_s1 + $0xbec] sm:$0xf]  ;;  %v10263_v6 = vld [vmem:[%s20839_s1 + $0xbf8] sm:$0xf0]  ;;  %v10138_v4 = vor.u32 %v13212_v7, %v10135_v46 }
 0x357   : > { %v13144_v56 = vld [vmem:[%s20839_s1 + $0x8cc] sm:$0xf]  ;;  %v9863_v47 = vld [vmem:[%s20839_s1 + $0x8d8] sm:$0xf0]  ;;  %7947 = vmatpush.bf16.msrb.mxu0 %v9258_v48  ;;  %v10266_v24 = vor.u32 %v13244_v8, %v10263_v6 }
 0x358   : > { %v13176_v55 = vld [vmem:[%s20839_s1 + $0x9cc] sm:$0xf]  ;;  %v9991_v39 = vld [vmem:[%s20839_s1 + $0x9d8] sm:$0xf0]  ;;  %7961 = vmatpush.bf16.msrb.mxu1 %v9386_v33  ;;  %7975 = vmatpush.bf16.msrb.mxu2 %v9514_v18  ;;  %v9866_v34 = vor.u32 %v13144_v56, %v9863_v47 }
 0x359   : > { %v13208_v43 = vld [vmem:[%s20839_s1 + $0xacc] sm:$0xf]  ;;  %v10119_v20 = vld [vmem:[%s20839_s1 + $0xad8] sm:$0xf0]  ;;  %7989 = vmatpush.bf16.msrb.mxu3 %v9642_v5  ;;  %v9994_v40 = vor.u32 %v13176_v55, %v9991_v39 }
 0x35a   : > { %v13240_v36 = vld [vmem:[%s20839_s1 + $0xbcc] sm:$0xf]  ;;  %v10247_v28 = vld [vmem:[%s20839_s1 + $0xbd8] sm:$0xf0]  ;;  %v10122_v50 = vor.u32 %v13208_v43, %v10119_v20  ;;  %7948 = vmatmul.bf16.vlgmr.msrb.gmra.mxu0 %v20941_v25 }
 0x35b   : > { %7996 = vmatpush.bf16.msra.mxu0 %v9882_v23  ;;  %v13140_v21 = vld [vmem:[%s20839_s1 + $0x8ac] sm:$0xf]  ;;  %v9847_v30 = vld [vmem:[%s20839_s1 + $0x8b8] sm:$0xf0]  ;;  %v10250_v59 = vor.u32 %v13240_v36, %v10247_v28  ;;  %7976 = vmatmul.bf16.vlgmr.msrb.gmra.mxu2 %v20942_v13  ;;  %v7725_v46 = vpop.f32.mrf.mxu0 }
 0x35c   : > { %8010 = vmatpush.bf16.msra.mxu1 %v10010_v9  ;;  %8024 = vmatpush.bf16.msra.mxu2 %v10138_v4  ;;  %v13172_v62 = vld [vmem:[%s20839_s1 + $0x9ac] sm:$0xf]  ;;  %v9975_v19 = vld [vmem:[%s20839_s1 + $0x9b8] sm:$0xf0]  ;;  %v9850_v41 = vor.u32 %v13140_v21, %v9847_v30  ;;  %v7726_v8 = vadd.f32 %v7725_v46, %v19525_v31  ;;  %v7739_v5 = vpop.f32.mrf.mxu1 }
 0x35d   : > { %8038 = vmatpush.bf16.msra.mxu3 %v10266_v24  ;;  %v13204_v53 = vld [vmem:[%s20839_s1 + $0xaac] sm:$0xf]  ;;  %v10103_v14 = vld [vmem:[%s20839_s1 + $0xab8] sm:$0xf0]  ;;  %7962 = vmatmul.bf16.vlgmr.msrb.gmra.mxu1 %v20943_v17  ;;  %v9978_v16 = vor.u32 %v13172_v62, %v9975_v19 }
 0x35e   : > { %v13236_v25 = vld [vmem:[%s20839_s1 + $0xbac] sm:$0xf]  ;;  %v10231_v42 = vld [vmem:[%s20839_s1 + $0xbb8] sm:$0xf0]  ;;  %7990 = vmatmul.bf16.vlgmr.msrb.gmra.mxu3 %v20945_v26  ;;  %v10106_v29 = vor.u32 %v13204_v53, %v10103_v14  ;;  %v7740_v55 = vadd.f32 %v7739_v5, %v7726_v8 }
 0x35f   : > { %7997 = vmatpush.bf16.msra.mxu0 %v9866_v34  ;;  %v13136_v13 = vld [vmem:[%s20839_s1 + $0x88c] sm:$0xf]  ;;  %v9831_v17 = vld [vmem:[%s20839_s1 + $0x898] sm:$0xf0]  ;;  %v10234_v26 = vor.u32 %v13236_v25, %v10231_v42 }
 0x360   : > { %8011 = vmatpush.bf16.msra.mxu1 %v9994_v40  ;;  %8025 = vmatpush.bf16.msra.mxu2 %v10122_v50  ;;  %v13168_v22 = vld [vmem:[%s20839_s1 + $0x98c] sm:$0xf]  ;;  %v9959_v48 = vld [vmem:[%s20839_s1 + $0x998] sm:$0xf0]  ;;  %v9834_v6 = vor.u32 %v13136_v13, %v9831_v17 }
 0x361   : > { %8039 = vmatpush.bf16.msra.mxu3 %v10250_v59  ;;  %v13200_v27 = vld [vmem:[%s20839_s1 + $0xa8c] sm:$0xf]  ;;  %v10087_v7 = vld [vmem:[%s20839_s1 + $0xa98] sm:$0xf0]  ;;  %v9962_v23 = vor.u32 %v13168_v22, %v9959_v48  ;;  %v7753_v59 = vpop.f32.mrf.mxu2 }
 0x362   : > { %v13232_v33 = vld [vmem:[%s20839_s1 + $0xb8c] sm:$0xf]  ;;  %v10215_v18 = vld [vmem:[%s20839_s1 + $0xb98] sm:$0xf0]  ;;  %v10090_v9 = vor.u32 %v13200_v27, %v10087_v7  ;;  %v7754_v25 = vadd.f32 %v7753_v59, %v7740_v55 }
 0x363   : > { %7998 = vmatpush.bf16.msra.mxu0 %v9850_v41  ;;  %v13132_v4 = vld [vmem:[%s20839_s1 + $0x86c] sm:$0xf]  ;;  %v9815_v56 = vld [vmem:[%s20839_s1 + $0x878] sm:$0xf0]  ;;  %v10218_v31 = vor.u32 %v13232_v33, %v10215_v18  ;;  %v7727_v42 = vpop.f32.mrf.mxu0  ;;  %v7767_v41 = vpop.f32.mrf.mxu3 }
 0x364   : > { %8012 = vmatpush.bf16.msra.mxu1 %v9978_v16  ;;  %8026 = vmatpush.bf16.msra.mxu2 %v10106_v29  ;;  %v13164_v47 = vld [vmem:[%s20839_s1 + $0x96c] sm:$0xf]  ;;  %v9943_v24 = vld [vmem:[%s20839_s1 + $0x978] sm:$0xf0]  ;;  %v9818_v28 = vor.u32 %v13132_v4, %v9815_v56  ;;  %v7728_v13 = vadd.f32 %v7727_v42, %v19593_v32  ;;  %v7741_v22 = vpop.f32.mrf.mxu1 }
 0x365   : > { %8040 = vmatpush.bf16.msra.mxu3 %v10234_v26  ;;  %v13196_v39 = vld [vmem:[%s20839_s1 + $0xa6c] sm:$0xf]  ;;  %v10071_v43 = vld [vmem:[%s20839_s1 + $0xa78] sm:$0xf0]  ;;  %v9946_v34 = vor.u32 %v13164_v47, %v9943_v24  ;;  %v19727_v26 = vadd.f32 %v7767_v41, %v7754_v25 }
 0x366   : > { %v13228_v20 = vld [vmem:[%s20839_s1 + $0xb6c] sm:$0xf]  ;;  %v10199_v36 = vld [vmem:[%s20839_s1 + $0xb78] sm:$0xf0]  ;;  %v10074_v40 = vor.u32 %v13196_v39, %v10071_v43  ;;  %v7742_v18 = vadd.f32 %v7741_v22, %v7728_v13 }
 0x367   : > { %7999 = vmatpush.bf16.msra.mxu0 %v9834_v6  ;;  %v13128_v50 = vld [vmem:[%s20839_s1 + $0x84c] sm:$0xf]  ;;  %v9799_v21 = vld [vmem:[%s20839_s1 + $0x858] sm:$0xf0]  ;;  %v10202_v62 = vor.u32 %v13228_v20, %v10199_v36 }
 0x368   : > { %8013 = vmatpush.bf16.msra.mxu1 %v9962_v23  ;;  %8027 = vmatpush.bf16.msra.mxu2 %v10090_v9  ;;  %v13160_v30 = vld [vmem:[%s20839_s1 + $0x94c] sm:$0xf]  ;;  %v9927_v19 = vld [vmem:[%s20839_s1 + $0x958] sm:$0xf0]  ;;  %v9802_v17 = vor.u32 %v13128_v50, %v9799_v21 }
 0x369   : > { %8041 = vmatpush.bf16.msra.mxu3 %v10218_v31  ;;  %v13192_v53 = vld [vmem:[%s20839_s1 + $0xa4c] sm:$0xf]  ;;  %v10055_v14 = vld [vmem:[%s20839_s1 + $0xa58] sm:$0xf0]  ;;  %v9930_v48 = vor.u32 %v13160_v30, %v9927_v19  ;;  %v7755_v36 = vpop.f32.mrf.mxu2 }
 0x36a   : > { %v13224_v16 = vld [vmem:[%s20839_s1 + $0xb4c] sm:$0xf]  ;;  %v10183_v29 = vld [vmem:[%s20839_s1 + $0xb58] sm:$0xf0]  ;;  %v10058_v27 = vor.u32 %v13192_v53, %v10055_v14  ;;  %v7756_v50 = vadd.f32 %v7755_v36, %v7742_v18 }
 0x36b   : > { %8000 = vmatpush.bf16.msra.mxu0 %v9818_v28  ;;  %v13124_v7 = vld [vmem:[%s20839_s1 + $0x82c] sm:$0xf]  ;;  %v9783_v46 = vld [vmem:[%s20839_s1 + $0x838] sm:$0xf0]  ;;  %v10186_v33 = vor.u32 %v13224_v16, %v10183_v29  ;;  %v7769_v21 = vpop.f32.mrf.mxu3 }
 0x36c   : > { %8014 = vmatpush.bf16.msra.mxu1 %v9946_v34  ;;  %8028 = vmatpush.bf16.msra.mxu2 %v10074_v40  ;;  %v13156_v32 = vld [vmem:[%s20839_s1 + $0x92c] sm:$0xf]  ;;  %v9911_v8 = vld [vmem:[%s20839_s1 + $0x938] sm:$0xf0]  ;;  %v9786_v4 = vor.u32 %v13124_v7, %v9783_v46  ;;  %v19795_v42 = vadd.f32 %v7769_v21, %v7756_v50 }
 0x36d   : > { %8042 = vmatpush.bf16.msra.mxu3 %v10202_v62  ;;  %v13188_v6 = vld [vmem:[%s20839_s1 + $0xa2c] sm:$0xf]  ;;  %v10039_v5 = vld [vmem:[%s20839_s1 + $0xa38] sm:$0xf0]  ;;  %v9914_v31 = vor.u32 %v13156_v32, %v9911_v8 }
 0x36e   : > { %v13220_v23 = vld [vmem:[%s20839_s1 + $0xb2c] sm:$0xf]  ;;  %v10167_v9 = vld [vmem:[%s20839_s1 + $0xb38] sm:$0xf0]  ;;  %v10042_v55 = vor.u32 %v13188_v6, %v10039_v5 }
 0x36f   : > { %8001 = vmatpush.bf16.msra.mxu0 %v9802_v17  ;;  %v13120_v56 = vld [vmem:[%s20839_s1 + $0x80c] sm:$0xf]  ;;  %v9767_v47 = vld [vmem:[%s20839_s1 + $0x818] sm:$0xf0]  ;;  %v10170_v20 = vor.u32 %v13220_v23, %v10167_v9 }
 0x370   : > { %8015 = vmatpush.bf16.msra.mxu1 %v9930_v48  ;;  %8029 = vmatpush.bf16.msra.mxu2 %v10058_v27  ;;  %v13152_v24 = vld [vmem:[%s20839_s1 + $0x90c] sm:$0xf]  ;;  %v9895_v39 = vld [vmem:[%s20839_s1 + $0x918] sm:$0xf0]  ;;  %v9770_v19 = vor.u32 %v13120_v56, %v9767_v47 }
 0x371   : > { %v13184_v43 = vld [vmem:[%s20839_s1 + $0xa0c] sm:$0xf]  ;;  %8043 = vmatpush.bf16.msra.mxu3 %v10186_v33  ;;  %v10023_v28 = vld [vmem:[%s20839_s1 + $0xa18] sm:$0xf0]  ;;  %v9898_v41 = vor.u32 %v13152_v24, %v9895_v39 }
 0x372   : > { %v13216_v34 = vld [vmem:[%s20839_s1 + $0xb0c] sm:$0xf]  ;;  %v10151_v40 = vld [vmem:[%s20839_s1 + $0xb18] sm:$0xf0]  ;;  %v10026_v16 = vor.u32 %v13184_v43, %v10023_v28 }
 0x373   : > { %v13276_v30 = vld [vmem:[%s20839_s1 + $0xcec] sm:$0xf]  ;;  %v10391_v62 = vld [vmem:[%s20839_s1 + $0xcf8] sm:$0xf0]  ;;  %8002 = vmatpush.bf16.msra.mxu0 %v9786_v4  ;;  %v10154_v17 = vor.u32 %v13216_v34, %v10151_v40 }
 0x374   : > { %v13308_v59 = vld [vmem:[%s20839_s1 + $0xdec] sm:$0xf]  ;;  %v10519_v53 = vld [vmem:[%s20839_s1 + $0xdf8] sm:$0xf0]  ;;  %8016 = vmatpush.bf16.msra.mxu1 %v9914_v31  ;;  %8030 = vmatpush.bf16.msra.mxu2 %v10042_v55  ;;  %v10394_v22 = vor.u32 %v13276_v30, %v10391_v62 }
 0x375   : > { %v13340_v14 = vld [vmem:[%s20839_s1 + $0xeec] sm:$0xf]  ;;  %v10647_v25 = vld [vmem:[%s20839_s1 + $0xef8] sm:$0xf0]  ;;  %8044 = vmatpush.bf16.msra.mxu3 %v10170_v20  ;;  %v10522_v48 = vor.u32 %v13308_v59, %v10519_v53 }
 0x376   : > { %v13372_v29 = vld [vmem:[%s20839_s1 + $0xfec] sm:$0xf]  ;;  %v10775_v13 = vld [vmem:[%s20839_s1 + $0xff8] sm:$0xf0]  ;;  %v10650_v27 = vor.u32 %v13340_v14, %v10647_v25 }
 0x377   : > { %v13272_v7 = vld [vmem:[%s20839_s1 + $0xccc] sm:$0xf]  ;;  %v10375_v46 = vld [vmem:[%s20839_s1 + $0xcd8] sm:$0xf0]  ;;  %8003 = vmatpush.bf16.msra.mxu0 %v9770_v19  ;;  %v10778_v33 = vor.u32 %v13372_v29, %v10775_v13  ;;  %v7781_v59 = vpop.f32.mrf.mxu0 }
 0x378   : > { %v13304_v32 = vld [vmem:[%s20839_s1 + $0xdcc] sm:$0xf]  ;;  %v10503_v18 = vld [vmem:[%s20839_s1 + $0xdd8] sm:$0xf0]  ;;  %8017 = vmatpush.bf16.msra.mxu1 %v9898_v41  ;;  %8031 = vmatpush.bf16.msra.mxu2 %v10026_v16  ;;  %v10378_v9 = vor.u32 %v13272_v7, %v10375_v46  ;;  %v7782_v14 = vadd.f32 %v7781_v59, %v19727_v26 }
 0x379   : > { %v13336_v8 = vld [vmem:[%s20839_s1 + $0xecc] sm:$0xf]  ;;  %v10631_v6 = vld [vmem:[%s20839_s1 + $0xed8] sm:$0xf0]  ;;  %8045 = vmatpush.bf16.msra.mxu3 %v10154_v17  ;;  %v10506_v4 = vor.u32 %v13304_v32, %v10503_v18 }
 0x37a   : > { %v13368_v5 = vld [vmem:[%s20839_s1 + $0xfcc] sm:$0xf]  ;;  %v10759_v23 = vld [vmem:[%s20839_s1 + $0xfd8] sm:$0xf0]  ;;  %v10634_v56 = vor.u32 %v13336_v8, %v10631_v6  ;;  %8004 = vmatmul.bf16.vlgmr.msra.gmra.mxu0 %v20947_v2  ;;  %v7795_v41 = vpop.f32.mrf.mxu1 }
 0x37b   : > { %8052 = vmatpush.bf16.msrb.mxu0 %v10394_v22  ;;  %v13268_v47 = vld [vmem:[%s20839_s1 + $0xcac] sm:$0xf]  ;;  %v10359_v31 = vld [vmem:[%s20839_s1 + $0xcb8] sm:$0xf0]  ;;  %v10762_v24 = vor.u32 %v13368_v5, %v10759_v23  ;;  %8032 = vmatmul.bf16.vlgmr.msra.gmra.mxu2 %v20948_v60 }
 0x37c   : > { %8066 = vmatpush.bf16.msrb.mxu1 %v10522_v48  ;;  %8080 = vmatpush.bf16.msrb.mxu2 %v10650_v27  ;;  %v13300_v55 = vld [vmem:[%s20839_s1 + $0xdac] sm:$0xf]  ;;  %v10487_v39 = vld [vmem:[%s20839_s1 + $0xdb8] sm:$0xf0]  ;;  %v10362_v28 = vor.u32 %v13268_v47, %v10359_v31  ;;  %v7796_v48 = vadd.f32 %v7795_v41, %v7782_v14 }
 0x37d   : > { %8094 = vmatpush.bf16.msrb.mxu3 %v10778_v33  ;;  %v13332_v43 = vld [vmem:[%s20839_s1 + $0xeac] sm:$0xf]  ;;  %v10615_v20 = vld [vmem:[%s20839_s1 + $0xeb8] sm:$0xf0]  ;;  %8018 = vmatmul.bf16.vlgmr.msra.gmra.mxu1 %v20949_v35  ;;  %v10490_v34 = vor.u32 %v13300_v55, %v10487_v39 }
 0x37e   : > { %v13364_v2 = vld [vmem:[%s20839_s1 + $0xfac] sm:$0xf]  ;;  %v10743_v36 = vld [vmem:[%s20839_s1 + $0xfb8] sm:$0xf0]  ;;  %8046 = vmatmul.bf16.vlgmr.msra.gmra.mxu3 %v20950_v3  ;;  %v10618_v40 = vor.u32 %v13332_v43, %v10615_v20 }
 0x37f   : > { %8053 = vmatpush.bf16.msrb.mxu0 %v10378_v9  ;;  %v13264_v60 = vld [vmem:[%s20839_s1 + $0xc8c] sm:$0xf]  ;;  %v10343_v35 = vld [vmem:[%s20839_s1 + $0xc98] sm:$0xf0]  ;;  %v10746_v3 = vor.u32 %v13364_v2, %v10743_v36  ;;  %v7783_v39 = vpop.f32.mrf.mxu0 }
 0x380   : > { %8067 = vmatpush.bf16.msrb.mxu1 %v10506_v4  ;;  %8081 = vmatpush.bf16.msrb.mxu2 %v10634_v56  ;;  %v13296_v50 = vld [vmem:[%s20839_s1 + $0xd8c] sm:$0xf]  ;;  %v10471_v21 = vld [vmem:[%s20839_s1 + $0xd98] sm:$0xf0]  ;;  %v10346_v25 = vor.u32 %v13264_v60, %v10343_v35  ;;  %v7809_v56 = vpop.f32.mrf.mxu2  ;;  %v7784_v36 = vadd.f32 %v7783_v39, %v19795_v42 }
 0x381   : > { %8095 = vmatpush.bf16.msrb.mxu3 %v10762_v24  ;;  %v13328_v30 = vld [vmem:[%s20839_s1 + $0xe8c] sm:$0xf]  ;;  %v10599_v62 = vld [vmem:[%s20839_s1 + $0xe98] sm:$0xf0]  ;;  %v10474_v16 = vor.u32 %v13296_v50, %v10471_v21  ;;  %v7810_v24 = vadd.f32 %v7809_v56, %v7796_v48 }
 0x382   : > { %v13360_v19 = vld [vmem:[%s20839_s1 + $0xf8c] sm:$0xf]  ;;  %v10727_v53 = vld [vmem:[%s20839_s1 + $0xf98] sm:$0xf0]  ;;  %v10602_v29 = vor.u32 %v13328_v30, %v10599_v62 }
 0x383   : > { %8054 = vmatpush.bf16.msrb.mxu0 %v10362_v28  ;;  %v13260_v13 = vld [vmem:[%s20839_s1 + $0xc6c] sm:$0xf]  ;;  %v10327_v17 = vld [vmem:[%s20839_s1 + $0xc78] sm:$0xf0]  ;;  %v10730_v26 = vor.u32 %v13360_v19, %v10727_v53 }
 0x384   : > { %8068 = vmatpush.bf16.msrb.mxu1 %v10490_v34  ;;  %8082 = vmatpush.bf16.msrb.mxu2 %v10618_v40  ;;  %v13292_v22 = vld [vmem:[%s20839_s1 + $0xd6c] sm:$0xf]  ;;  %v10455_v27 = vld [vmem:[%s20839_s1 + $0xd78] sm:$0xf0]  ;;  %v10330_v18 = vor.u32 %v13260_v13, %v10327_v17  ;;  %v7797_v34 = vpop.f32.mrf.mxu1 }
 0x385   : > { %8096 = vmatpush.bf16.msrb.mxu3 %v10746_v3  ;;  %v13324_v7 = vld [vmem:[%s20839_s1 + $0xe6c] sm:$0xf]  ;;  %v10583_v46 = vld [vmem:[%s20839_s1 + $0xe78] sm:$0xf0]  ;;  %v10458_v8 = vor.u32 %v13292_v22, %v10455_v27  ;;  %v7823_v43 = vpop.f32.mrf.mxu3  ;;  %v7798_v30 = vadd.f32 %v7797_v34, %v7784_v36 }
 0x386   : > { %v13356_v32 = vld [vmem:[%s20839_s1 + $0xf6c] sm:$0xf]  ;;  %v10711_v33 = vld [vmem:[%s20839_s1 + $0xf78] sm:$0xf0]  ;;  %v10586_v6 = vor.u32 %v13324_v7, %v10583_v46  ;;  %v19929_v40 = vadd.f32 %v7823_v43, %v7810_v24 }
 0x387   : > { %8055 = vmatpush.bf16.msrb.mxu0 %v10346_v25  ;;  %v13256_v5 = vld [vmem:[%s20839_s1 + $0xc4c] sm:$0xf]  ;;  %v10311_v23 = vld [vmem:[%s20839_s1 + $0xc58] sm:$0xf0]  ;;  %v10714_v4 = vor.u32 %v13356_v32, %v10711_v33 }
 0x388   : > { %8069 = vmatpush.bf16.msrb.mxu1 %v10474_v16  ;;  %8083 = vmatpush.bf16.msrb.mxu2 %v10602_v29  ;;  %v13288_v9 = vld [vmem:[%s20839_s1 + $0xd4c] sm:$0xf]  ;;  %v10439_v47 = vld [vmem:[%s20839_s1 + $0xd58] sm:$0xf0]  ;;  %v10314_v28 = vor.u32 %v13256_v5, %v10311_v23  ;;  %v7811_v27 = vpop.f32.mrf.mxu2 }
 0x389   : > { %8097 = vmatpush.bf16.msrb.mxu3 %v10730_v26  ;;  %v13320_v31 = vld [vmem:[%s20839_s1 + $0xe4c] sm:$0xf]  ;;  %v10567_v55 = vld [vmem:[%s20839_s1 + $0xe58] sm:$0xf0]  ;;  %v10442_v60 = vor.u32 %v13288_v9, %v10439_v47  ;;  %v7812_v33 = vadd.f32 %v7811_v27, %v7798_v30 }
 0x38a   : > { %v13352_v20 = vld [vmem:[%s20839_s1 + $0xf4c] sm:$0xf]  ;;  %v10695_v2 = vld [vmem:[%s20839_s1 + $0xf58] sm:$0xf0]  ;;  %v10570_v35 = vor.u32 %v13320_v31, %v10567_v55 }
 0x38b   : > { %8056 = vmatpush.bf16.msrb.mxu0 %v10330_v18  ;;  %v13252_v50 = vld [vmem:[%s20839_s1 + $0xc2c] sm:$0xf]  ;;  %v10295_v3 = vld [vmem:[%s20839_s1 + $0xc38] sm:$0xf0]  ;;  %v10698_v21 = vor.u32 %v13352_v20, %v10695_v2 }
 0x38c   : > { %8070 = vmatpush.bf16.msrb.mxu1 %v10458_v8  ;;  %8084 = vmatpush.bf16.msrb.mxu2 %v10586_v6  ;;  %v13284_v42 = vld [vmem:[%s20839_s1 + $0xd2c] sm:$0xf]  ;;  %v10423_v62 = vld [vmem:[%s20839_s1 + $0xd38] sm:$0xf0]  ;;  %v10298_v25 = vor.u32 %v13252_v50, %v10295_v3 }
 0x38d   : > { %8098 = vmatpush.bf16.msrb.mxu3 %v10714_v4  ;;  %v13316_v59 = vld [vmem:[%s20839_s1 + $0xe2c] sm:$0xf]  ;;  %v10551_v19 = vld [vmem:[%s20839_s1 + $0xe38] sm:$0xf0]  ;;  %v10426_v29 = vor.u32 %v13284_v42, %v10423_v62  ;;  %v7825_v18 = vpop.f32.mrf.mxu3 }
 0x38e   : > { %v13348_v53 = vld [vmem:[%s20839_s1 + $0xf2c] sm:$0xf]  ;;  %v10679_v14 = vld [vmem:[%s20839_s1 + $0xf38] sm:$0xf0]  ;;  %v10554_v13 = vor.u32 %v13316_v59, %v10551_v19  ;;  %v19997_v47 = vadd.f32 %v7825_v18, %v7812_v33 }
 0x38f   : > { %8057 = vmatpush.bf16.msrb.mxu0 %v10314_v28  ;;  %v13248_v41 = vld [vmem:[%s20839_s1 + $0xc0c] sm:$0xf]  ;;  %v10279_v16 = vld [vmem:[%s20839_s1 + $0xc18] sm:$0xf0]  ;;  %v10682_v48 = vor.u32 %v13348_v53, %v10679_v14 }
 0x390   : > { %8071 = vmatpush.bf16.msrb.mxu1 %v10442_v60  ;;  %8085 = vmatpush.bf16.msrb.mxu2 %v10570_v35  ;;  %v13280_v17 = vld [vmem:[%s20839_s1 + $0xd0c] sm:$0xf]  ;;  %v10407_v22 = vld [vmem:[%s20839_s1 + $0xd18] sm:$0xf0]  ;;  %v10282_v23 = vor.u32 %v13248_v41, %v10279_v16 }
 0x391   : > { %v13312_v26 = vld [vmem:[%s20839_s1 + $0xe0c] sm:$0xf]  ;;  %8099 = vmatpush.bf16.msrb.mxu3 %v10698_v21  ;;  %v10535_v7 = vld [vmem:[%s20839_s1 + $0xe18] sm:$0xf0]  ;;  %v10410_v31 = vor.u32 %v13280_v17, %v10407_v22 }
 0x392   : > { %v13344_v46 = vld [vmem:[%s20839_s1 + $0xf0c] sm:$0xf]  ;;  %v10663_v32 = vld [vmem:[%s20839_s1 + $0xf18] sm:$0xf0]  ;;  %v10538_v55 = vor.u32 %v13312_v26, %v10535_v7 }
 0x393   : > { %v13404_v8 = vld [vmem:[%s20839_s1 + $0x10ec] sm:$0xf]  ;;  %v10903_v6 = vld [vmem:[%s20839_s1 + $0x10f8] sm:$0xf0]  ;;  %8058 = vmatpush.bf16.msrb.mxu0 %v10298_v25  ;;  %v10666_v43 = vor.u32 %v13344_v46, %v10663_v32 }
 0x394   : > { %v13436_v5 = vld [vmem:[%s20839_s1 + $0x11ec] sm:$0xf]  ;;  %v11031_v9 = vld [vmem:[%s20839_s1 + $0x11f8] sm:$0xf0]  ;;  %8072 = vmatpush.bf16.msrb.mxu1 %v10426_v29  ;;  %8086 = vmatpush.bf16.msrb.mxu2 %v10554_v13  ;;  %v10906_v20 = vor.u32 %v13404_v8, %v10903_v6 }
 0x395   : > { %v13468_v4 = vld [vmem:[%s20839_s1 + $0x12ec] sm:$0xf]  ;;  %v11159_v56 = vld [vmem:[%s20839_s1 + $0x12f8] sm:$0xf0]  ;;  %8100 = vmatpush.bf16.msrb.mxu3 %v10682_v48  ;;  %v11034_v2 = vor.u32 %v13436_v5, %v11031_v9 }
 0x396   : > { %v13500_v24 = vld [vmem:[%s20839_s1 + $0x13ec] sm:$0xf]  ;;  %v11287_v39 = vld [vmem:[%s20839_s1 + $0x13f8] sm:$0xf0]  ;;  %v11162_v36 = vor.u32 %v13468_v4, %v11159_v56 }
 0x397   : > { %v13400_v28 = vld [vmem:[%s20839_s1 + $0x10cc] sm:$0xf]  ;;  %v10887_v34 = vld [vmem:[%s20839_s1 + $0x10d8] sm:$0xf0]  ;;  %8059 = vmatpush.bf16.msrb.mxu0 %v10282_v23  ;;  %v11290_v35 = vor.u32 %v13500_v24, %v11287_v39  ;;  %v7837_v33 = vpop.f32.mrf.mxu0 }
 0x398   : > { %v13432_v60 = vld [vmem:[%s20839_s1 + $0x11cc] sm:$0xf]  ;;  %v11015_v50 = vld [vmem:[%s20839_s1 + $0x11d8] sm:$0xf0]  ;;  %8073 = vmatpush.bf16.msrb.mxu1 %v10410_v31  ;;  %8087 = vmatpush.bf16.msrb.mxu2 %v10538_v55  ;;  %v10890_v62 = vor.u32 %v13400_v28, %v10887_v34  ;;  %v7838_v6 = vadd.f32 %v7837_v33, %v19929_v40 }
 0x399   : > { %v13464_v3 = vld [vmem:[%s20839_s1 + $0x12cc] sm:$0xf]  ;;  %v11143_v42 = vld [vmem:[%s20839_s1 + $0x12d8] sm:$0xf0]  ;;  %8101 = vmatpush.bf16.msrb.mxu3 %v10666_v43  ;;  %v11018_v59 = vor.u32 %v13432_v60, %v11015_v50 }
 0x39a   : > { %v13496_v21 = vld [vmem:[%s20839_s1 + $0x13cc] sm:$0xf]  ;;  %v11271_v30 = vld [vmem:[%s20839_s1 + $0x13d8] sm:$0xf0]  ;;  %v11146_v19 = vor.u32 %v13464_v3, %v11143_v42  ;;  %8060 = vmatmul.bf16.vlgmr.msrb.gmra.mxu0 %v20951_v12  ;;  %v7851_v23 = vpop.f32.mrf.mxu1 }
 0x39b   : > { %8108 = vmatpush.bf16.msra.mxu0 %v10906_v20  ;;  %v13396_v53 = vld [vmem:[%s20839_s1 + $0x10ac] sm:$0xf]  ;;  %v10871_v14 = vld [vmem:[%s20839_s1 + $0x10b8] sm:$0xf0]  ;;  %v11274_v41 = vor.u32 %v13496_v21, %v11271_v30  ;;  %8088 = vmatmul.bf16.vlgmr.msrb.gmra.mxu2 %v20952_v38  ;;  %v7852_v24 = vadd.f32 %v7851_v23, %v7838_v6 }
 0x39c   : > { %8122 = vmatpush.bf16.msra.mxu1 %v11034_v2  ;;  %8136 = vmatpush.bf16.msra.mxu2 %v11162_v36  ;;  %v13428_v25 = vld [vmem:[%s20839_s1 + $0x11ac] sm:$0xf]  ;;  %v10999_v16 = vld [vmem:[%s20839_s1 + $0x11b8] sm:$0xf0]  ;;  %v10874_v22 = vor.u32 %v13396_v53, %v10871_v14 }
 0x39d   : > { %8150 = vmatpush.bf16.msra.mxu3 %v11290_v35  ;;  %v13460_v29 = vld [vmem:[%s20839_s1 + $0x12ac] sm:$0xf]  ;;  %v11127_v13 = vld [vmem:[%s20839_s1 + $0x12b8] sm:$0xf0]  ;;  %8074 = vmatmul.bf16.vlgmr.msrb.gmra.mxu1 %v20953_v37  ;;  %v11002_v26 = vor.u32 %v13428_v25, %v10999_v16 }
 0x39e   : > { %v13492_v12 = vld [vmem:[%s20839_s1 + $0x13ac] sm:$0xf]  ;;  %v11255_v17 = vld [vmem:[%s20839_s1 + $0x13b8] sm:$0xf0]  ;;  %8102 = vmatmul.bf16.vlgmr.msrb.gmra.mxu3 %v20954_v58  ;;  %v11130_v48 = vor.u32 %v13460_v29, %v11127_v13  ;;  %v7865_v21 = vpop.f32.mrf.mxu2 }
 0x39f   : > { %8109 = vmatpush.bf16.msra.mxu0 %v10890_v62  ;;  %v13392_v38 = vld [vmem:[%s20839_s1 + $0x108c] sm:$0xf]  ;;  %v10855_v37 = vld [vmem:[%s20839_s1 + $0x1098] sm:$0xf0]  ;;  %v11258_v58 = vor.u32 %v13492_v12, %v11255_v17  ;;  %v7839_v53 = vpop.f32.mrf.mxu0 }
 0x3a0   : > { %8123 = vmatpush.bf16.msra.mxu1 %v11018_v59  ;;  %8137 = vmatpush.bf16.msra.mxu2 %v11146_v19  ;;  %v13424_v27 = vld [vmem:[%s20839_s1 + $0x118c] sm:$0xf]  ;;  %v10983_v7 = vld [vmem:[%s20839_s1 + $0x1198] sm:$0xf0]  ;;  %v10858_v5 = vor.u32 %v13392_v38, %v10855_v37  ;;  %v7866_v19 = vadd.f32 %v7865_v21, %v7852_v24  ;;  %v7840_v16 = vadd.f32 %v7839_v53, %v19997_v47 }
 0x3a1   : > { %8151 = vmatpush.bf16.msra.mxu3 %v11274_v41  ;;  %v13456_v46 = vld [vmem:[%s20839_s1 + $0x128c] sm:$0xf]  ;;  %v11111_v32 = vld [vmem:[%s20839_s1 + $0x1298] sm:$0xf0]  ;;  %v10986_v9 = vor.u32 %v13424_v27, %v10983_v7  ;;  %v7879_v14 = vpop.f32.mrf.mxu3 }
 0x3a2   : > { %v13488_v18 = vld [vmem:[%s20839_s1 + $0x138c] sm:$0xf]  ;;  %v11239_v8 = vld [vmem:[%s20839_s1 + $0x1398] sm:$0xf0]  ;;  %v11114_v4 = vor.u32 %v13456_v46, %v11111_v32  ;;  %v7853_v13 = vpop.f32.mrf.mxu1  ;;  %v20131_v12 = vadd.f32 %v7879_v14, %v7866_v19 }
 0x3a3   : > { %8110 = vmatpush.bf16.msra.mxu0 %v10874_v22  ;;  %v13388_v56 = vld [vmem:[%s20839_s1 + $0x106c] sm:$0xf]  ;;  %v10839_v31 = vld [vmem:[%s20839_s1 + $0x1078] sm:$0xf0]  ;;  %v11242_v40 = vor.u32 %v13488_v18, %v11239_v8  ;;  %v7854_v37 = vadd.f32 %v7853_v13, %v7840_v16 }
 0x3a4   : > { %8124 = vmatpush.bf16.msra.mxu1 %v11002_v26  ;;  %8138 = vmatpush.bf16.msra.mxu2 %v11130_v48  ;;  %v13420_v55 = vld [vmem:[%s20839_s1 + $0x116c] sm:$0xf]  ;;  %v10967_v39 = vld [vmem:[%s20839_s1 + $0x1178] sm:$0xf0]  ;;  %v10842_v28 = vor.u32 %v13388_v56, %v10839_v31 }
 0x3a5   : > { %8152 = vmatpush.bf16.msra.mxu3 %v11258_v58  ;;  %v13452_v43 = vld [vmem:[%s20839_s1 + $0x126c] sm:$0xf]  ;;  %v11095_v20 = vld [vmem:[%s20839_s1 + $0x1278] sm:$0xf0]  ;;  %v10970_v34 = vor.u32 %v13420_v55, %v10967_v39 }
 0x3a6   : > { %v13484_v2 = vld [vmem:[%s20839_s1 + $0x136c] sm:$0xf]  ;;  %v11223_v36 = vld [vmem:[%s20839_s1 + $0x1378] sm:$0xf0]  ;;  %v11098_v60 = vor.u32 %v13452_v43, %v11095_v20  ;;  %v7867_v31 = vpop.f32.mrf.mxu2 }
 0x3a7   : > { %8111 = vmatpush.bf16.msra.mxu0 %v10858_v5  ;;  %v13384_v35 = vld [vmem:[%s20839_s1 + $0x104c] sm:$0xf]  ;;  %v10823_v50 = vld [vmem:[%s20839_s1 + $0x1058] sm:$0xf0]  ;;  %v11226_v42 = vor.u32 %v13484_v2, %v11223_v36  ;;  %v7868_v39 = vadd.f32 %v7867_v31, %v7854_v37 }
 0x3a8   : > { %8125 = vmatpush.bf16.msra.mxu1 %v10986_v9  ;;  %8139 = vmatpush.bf16.msra.mxu2 %v11114_v4  ;;  %v13416_v3 = vld [vmem:[%s20839_s1 + $0x114c] sm:$0xf]  ;;  %v10951_v30 = vld [vmem:[%s20839_s1 + $0x1158] sm:$0xf0]  ;;  %v10826_v29 = vor.u32 %v13384_v35, %v10823_v50 }
 0x3a9   : > { %8153 = vmatpush.bf16.msra.mxu3 %v11242_v40  ;;  %v13448_v62 = vld [vmem:[%s20839_s1 + $0x124c] sm:$0xf]  ;;  %v11079_v59 = vld [vmem:[%s20839_s1 + $0x1258] sm:$0xf0]  ;;  %v10954_v17 = vor.u32 %v13416_v3, %v10951_v30  ;;  %v7881_v43 = vpop.f32.mrf.mxu3 }
 0x3aa   : > { %v13480_v25 = vld [vmem:[%s20839_s1 + $0x134c] sm:$0xf]  ;;  %v11207_v41 = vld [vmem:[%s20839_s1 + $0x1358] sm:$0xf0]  ;;  %v11082_v22 = vor.u32 %v13448_v62, %v11079_v59  ;;  %v20199_v50 = vadd.f32 %v7881_v43, %v7868_v39 }
 0x3ab   : > { %8112 = vmatpush.bf16.msra.mxu0 %v10842_v28  ;;  %v13380_v26 = vld [vmem:[%s20839_s1 + $0x102c] sm:$0xf]  ;;  %v10807_v48 = vld [vmem:[%s20839_s1 + $0x1038] sm:$0xf0]  ;;  %v11210_v38 = vor.u32 %v13480_v25, %v11207_v41 }
 0x3ac   : > { %8126 = vmatpush.bf16.msra.mxu1 %v10970_v34  ;;  %8140 = vmatpush.bf16.msra.mxu2 %v11098_v60  ;;  %v13412_v47 = vld [vmem:[%s20839_s1 + $0x112c] sm:$0xf]  ;;  %v10935_v27 = vld [vmem:[%s20839_s1 + $0x1138] sm:$0xf0]  ;;  %v10810_v33 = vor.u32 %v13380_v26, %v10807_v48  ;;  %v8347_v19 = vmul.f32 %v17884_v1, %v20199_v50 }
 0x3ad   : > { %8154 = vmatpush.bf16.msra.mxu3 %v11226_v42  ;;  %v13444_v58 = vld [vmem:[%s20839_s1 + $0x122c] sm:$0xf]  ;;  %v11063_v7 = vld [vmem:[%s20839_s1 + $0x1238] sm:$0xf0]  ;;  %v10938_v6 = vor.u32 %v13412_v47, %v10935_v27 }
 0x3ae   : > { %v13476_v46 = vld [vmem:[%s20839_s1 + $0x132c] sm:$0xf]  ;;  %v11191_v32 = vld [vmem:[%s20839_s1 + $0x1338] sm:$0xf0]  ;;  %v11066_v5 = vor.u32 %v13444_v58, %v11063_v7  ;;  %v8363_v26 = vadd.f32 %v8347_v19, %v20131_v12 }
 0x3af   : > { %8113 = vmatpush.bf16.msra.mxu0 %v10826_v29  ;;  %v13376_v18 = vld [vmem:[%s20839_s1 + $0x100c] sm:$0xf]  ;;  %v10791_v8 = vld [vmem:[%s20839_s1 + $0x1018] sm:$0xf0]  ;;  %v11194_v56 = vor.u32 %v13476_v46, %v11191_v32 }
 0x3b0   : > { %8127 = vmatpush.bf16.msra.mxu1 %v10954_v17  ;;  %8141 = vmatpush.bf16.msra.mxu2 %v11082_v22  ;;  %v13408_v23 = vld [vmem:[%s20839_s1 + $0x110c] sm:$0xf]  ;;  %v10919_v9 = vld [vmem:[%s20839_s1 + $0x1118] sm:$0xf0]  ;;  %v10794_v28 = vor.u32 %v13376_v18, %v10791_v8  ;;  %v8364_v27 = vrot.slane %v8363_v26, 4 }
 0x3b1   : > { %v13440_v4 = vld [vmem:[%s20839_s1 + $0x120c] sm:$0xf]  ;;  %8155 = vmatpush.bf16.msra.mxu3 %v11210_v38  ;;  %v11047_v55 = vld [vmem:[%s20839_s1 + $0x1218] sm:$0xf0]  ;;  %v10922_v3 = vor.u32 %v13408_v23, %v10919_v9  ;;  %v20965_v9 = vld [vmem:[#allocation20_spill] sm:$0xff] }
 0x3b2   : > { %v13472_v40 = vld [vmem:[%s20839_s1 + $0x130c] sm:$0xf]  ;;  %v11175_v24 = vld [vmem:[%s20839_s1 + $0x1318] sm:$0xf0]  ;;  %v11050_v42 = vor.u32 %v13440_v4, %v11047_v55 }
 0x3b3   : > { %v13532_v20 = vld [vmem:[%s20839_s1 + $0x14ec] sm:$0xf]  ;;  %v11415_v2 = vld [vmem:[%s20839_s1 + $0x14f8] sm:$0xf0]  ;;  %8114 = vmatpush.bf16.msra.mxu0 %v10810_v33  ;;  %v11178_v62 = vor.u32 %v13472_v40, %v11175_v24 }
 0x3b4   : > { %v13564_v36 = vld [vmem:[%s20839_s1 + $0x15ec] sm:$0xf]  ;;  %v11543_v34 = vld [vmem:[%s20839_s1 + $0x15f8] sm:$0xf0]  ;;  %8128 = vmatpush.bf16.msra.mxu1 %v10938_v6  ;;  %8142 = vmatpush.bf16.msra.mxu2 %v11066_v5  ;;  %v11418_v59 = vor.u32 %v13532_v20, %v11415_v2  ;;  %v8365_v5 = vadd.f32 %v8364_v27, %v8363_v26 }
 0x3b5   : > { %v13596_v60 = vld [vmem:[%s20839_s1 + $0x16ec] sm:$0xf]  ;;  %v11671_v35 = vld [vmem:[%s20839_s1 + $0x16f8] sm:$0xf0]  ;;  %8156 = vmatpush.bf16.msra.mxu3 %v11194_v56  ;;  %v11546_v53 = vor.u32 %v13564_v36, %v11543_v34 }
 0x3b6   : > { %v13628_v21 = vld [vmem:[%s20839_s1 + $0x17ec] sm:$0xf]  ;;  %v11799_v30 = vld [vmem:[%s20839_s1 + $0x17f8] sm:$0xf0]  ;;  %v11674_v14 = vor.u32 %v13596_v60, %v11671_v35  ;;  %v8366_v31 = vrot.slane %v8365_v5, 2 }
 0x3b7   : > { %v13528_v25 = vld [vmem:[%s20839_s1 + $0x14cc] sm:$0xf]  ;;  %v11399_v41 = vld [vmem:[%s20839_s1 + $0x14d8] sm:$0xf0]  ;;  %8115 = vmatpush.bf16.msra.mxu0 %v10794_v28  ;;  %v11802_v29 = vor.u32 %v13628_v21, %v11799_v30 }
 0x3b8   : > { %v13560_v16 = vld [vmem:[%s20839_s1 + $0x15cc] sm:$0xf]  ;;  %v11527_v13 = vld [vmem:[%s20839_s1 + $0x15d8] sm:$0xf0]  ;;  %8129 = vmatpush.bf16.msra.mxu1 %v10922_v3  ;;  %8143 = vmatpush.bf16.msra.mxu2 %v11050_v42  ;;  %v11402_v38 = vor.u32 %v13528_v25, %v11399_v41  ;;  %v8367_v2 = vadd.f32 %v8366_v31, %v8365_v5  ;;  %v7893_v41 = vpop.f32.mrf.mxu0 }
 0x3b9   : > { %v13592_v17 = vld [vmem:[%s20839_s1 + $0x16cc] sm:$0xf]  ;;  %v11655_v22 = vld [vmem:[%s20839_s1 + $0x16d8] sm:$0xf0]  ;;  %8157 = vmatpush.bf16.msra.mxu3 %v11178_v62  ;;  %v11530_v58 = vor.u32 %v13560_v16, %v11527_v13  ;;  %v20298_v62 = vld [vmem:[%s20840_s2] sm:$0xf] }
 0x3ba   : > { %v13624_v48 = vld [vmem:[%s20839_s1 + $0x17cc] sm:$0xf]  ;;  %v11783_v47 = vld [vmem:[%s20839_s1 + $0x17d8] sm:$0xf0]  ;;  %v11658_v7 = vor.u32 %v13592_v17, %v11655_v22  ;;  %8116 = vmatmul.bf16.vlgmr.msra.gmra.mxu0 %v20955_v52  ;;  %v8368_v35 = vrot.slane %v8367_v2, 1 }
 0x3bb   : > { %8164 = vmatpush.bf16.msrb.mxu0 %v11418_v59  ;;  %v13524_v37 = vld [vmem:[%s20839_s1 + $0x14ac] sm:$0xf]  ;;  %v11383_v46 = vld [vmem:[%s20839_s1 + $0x14b8] sm:$0xf0]  ;;  %v11786_v33 = vor.u32 %v13624_v48, %v11783_v47  ;;  %8144 = vmatmul.bf16.vlgmr.msra.gmra.mxu2 %v20956_v54  ;;  %v1255_v59 = vperm.slane %v20298_v62, 3  ;;  %v7907_v48 = vpop.f32.mrf.mxu1 }
 0x3bc   : > { %8178 = vmatpush.bf16.msrb.mxu1 %v11546_v53  ;;  %8192 = vmatpush.bf16.msrb.mxu2 %v11674_v14  ;;  %v13556_v32 = vld [vmem:[%s20839_s1 + $0x15ac] sm:$0xf]  ;;  %v11511_v18 = vld [vmem:[%s20839_s1 + $0x15b8] sm:$0xf0]  ;;  %v11386_v4 = vor.u32 %v13524_v37, %v11383_v46  ;;  %v8369_v16 = vadd.f32 %v8368_v35, %v8367_v2 }
 0x3bd   : > { %8206 = vmatpush.bf16.msrb.mxu3 %v11802_v29  ;;  %v13588_v8 = vld [vmem:[%s20839_s1 + $0x16ac] sm:$0xf]  ;;  %v11639_v6 = vld [vmem:[%s20839_s1 + $0x16b8] sm:$0xf0]  ;;  %8130 = vmatmul.bf16.vlgmr.msra.gmra.mxu1 %v20957_v51  ;;  %v11514_v54 = vor.u32 %v13556_v32, %v11511_v18  ;;  %v7894_v17 = vadd.f32 %v7893_v41, %v1255_v59 }
 0x3be   : > { %v13620_v52 = vld [vmem:[%s20839_s1 + $0x17ac] sm:$0xf]  ;;  %v11767_v23 = vld [vmem:[%s20839_s1 + $0x17b8] sm:$0xf0]  ;;  %8158 = vmatmul.bf16.vlgmr.msra.gmra.mxu3 %v20965_v9  ;;  %v11642_v51 = vor.u32 %v13588_v8, %v11639_v6  ;;  %v8379_v47 = vmul.f32 0.11111111, %v8369_v16 }
 0x3bf   : > { %8165 = vmatpush.bf16.msrb.mxu0 %v11402_v38  ;;  %v13520_v56 = vld [vmem:[%s20839_s1 + $0x148c] sm:$0xf]  ;;  %v11367_v55 = vld [vmem:[%s20839_s1 + $0x1498] sm:$0xf0]  ;;  %v11770_v24 = vor.u32 %v13620_v52, %v11767_v23  ;;  %v7921_v23 = vpop.f32.mrf.mxu2 }
 0x3c0   : > { %8179 = vmatpush.bf16.msrb.mxu1 %v11530_v58  ;;  %8193 = vmatpush.bf16.msrb.mxu2 %v11658_v7  ;;  %v13552_v40 = vld [vmem:[%s20839_s1 + $0x158c] sm:$0xf]  ;;  %v11495_v39 = vld [vmem:[%s20839_s1 + $0x1598] sm:$0xf0]  ;;  %v11370_v34 = vor.u32 %v13520_v56, %v11367_v55  ;;  %v7908_v7 = vadd.f32 %v7907_v48, %v7894_v17  ;;  %v20337_v8 = vsub.f32 %v20131_v12, %v8379_v47 }
 0x3c1   : > { %8207 = vmatpush.bf16.msrb.mxu3 %v11786_v33  ;;  %v13584_v43 = vld [vmem:[%s20839_s1 + $0x168c] sm:$0xf]  ;;  %v11623_v20 = vld [vmem:[%s20839_s1 + $0x1698] sm:$0xf0]  ;;  %v11498_v3 = vor.u32 %v13552_v40, %v11495_v39  ;;  %v20340_v6 = vsub.f32 %v20199_v50, %v8379_v47  ;;  %v7935_v55 = vpop.f32.mrf.mxu3 }
 0x3c2   : > { %v13616_v36 = vld [vmem:[%s20839_s1 + $0x178c] sm:$0xf]  ;;  %v11751_v28 = vld [vmem:[%s20839_s1 + $0x1798] sm:$0xf0]  ;;  %v11626_v42 = vor.u32 %v13584_v43, %v11623_v20  ;;  %v8399_v2 = vmul.f32 %v20337_v8, %v20337_v8 }
 0x3c3   : > { %8166 = vmatpush.bf16.msrb.mxu0 %v11386_v4  ;;  %v13516_v60 = vld [vmem:[%s20839_s1 + $0x146c] sm:$0xf]  ;;  %v11351_v21 = vld [vmem:[%s20839_s1 + $0x1478] sm:$0xf0]  ;;  %v11754_v19 = vor.u32 %v13616_v36, %v11751_v28  ;;  %v7922_v4 = vadd.f32 %v7921_v23, %v7908_v7  ;;  %v8395_v56 = vmul.f32 %v17884_v1, %v20340_v6 }
 0x3c4   : > { %8180 = vmatpush.bf16.msrb.mxu1 %v11514_v54  ;;  %8194 = vmatpush.bf16.msrb.mxu2 %v11642_v51  ;;  %v13548_v30 = vld [vmem:[%s20839_s1 + $0x156c] sm:$0xf]  ;;  %v11479_v53 = vld [vmem:[%s20839_s1 + $0x1578] sm:$0xf0]  ;;  %v11354_v22 = vor.u32 %v13516_v60, %v11351_v21 }
 0x3c5   : > { %8208 = vmatpush.bf16.msrb.mxu3 %v11770_v24  ;;  %v13580_v14 = vld [vmem:[%s20839_s1 + $0x166c] sm:$0xf]  ;;  %v11607_v25 = vld [vmem:[%s20839_s1 + $0x1678] sm:$0xf0]  ;;  %v11482_v38 = vor.u32 %v13548_v30, %v11479_v53  ;;  %v20368_v20 = vadd.f32 %v7935_v55, %v7922_v4  ;;  %v8403_v36 = vmul.f32 %v8395_v56, %v8395_v56 }
 0x3c6   : > { %v13612_v29 = vld [vmem:[%s20839_s1 + $0x176c] sm:$0xf]  ;;  %v11735_v13 = vld [vmem:[%s20839_s1 + $0x1778] sm:$0xf0]  ;;  %v11610_v37 = vor.u32 %v13580_v14, %v11607_v25 }
 0x3c7   : > { %8167 = vmatpush.bf16.msrb.mxu0 %v11370_v34  ;;  %v13512_v26 = vld [vmem:[%s20839_s1 + $0x144c] sm:$0xf]  ;;  %v11335_v27 = vld [vmem:[%s20839_s1 + $0x1458] sm:$0xf0]  ;;  %v11738_v46 = vor.u32 %v13612_v29, %v11735_v13  ;;  %v8419_v21 = vadd.f32 %v8403_v36, %v8399_v2 }
 0x3c8   : > { %8181 = vmatpush.bf16.msrb.mxu1 %v11498_v3  ;;  %8195 = vmatpush.bf16.msrb.mxu2 %v11626_v42  ;;  %v13544_v58 = vld [vmem:[%s20839_s1 + $0x154c] sm:$0xf]  ;;  %v11463_v32 = vld [vmem:[%s20839_s1 + $0x1558] sm:$0xf0]  ;;  %v11338_v9 = vor.u32 %v13512_v26, %v11335_v27 }
 0x3c9   : > { %8209 = vmatpush.bf16.msrb.mxu3 %v11754_v19  ;;  %v13576_v33 = vld [vmem:[%s20839_s1 + $0x164c] sm:$0xf]  ;;  %v11591_v18 = vld [vmem:[%s20839_s1 + $0x1658] sm:$0xf0]  ;;  %v11466_v12 = vor.u32 %v13544_v58, %v11463_v32  ;;  %v8420_v17 = vrot.slane %v8419_v21, 4 }
 0x3ca   : > { %v13608_v5 = vld [vmem:[%s20839_s1 + $0x174c] sm:$0xf]  ;;  %v11719_v52 = vld [vmem:[%s20839_s1 + $0x1758] sm:$0xf0]  ;;  %v11594_v50 = vor.u32 %v13576_v33, %v11591_v18 }
 0x3cb   : > { %8168 = vmatpush.bf16.msrb.mxu0 %v11354_v22  ;;  %v13508_v31 = vld [vmem:[%s20839_s1 + $0x142c] sm:$0xf]  ;;  %v11319_v54 = vld [vmem:[%s20839_s1 + $0x1438] sm:$0xf0]  ;;  %v11722_v40 = vor.u32 %v13608_v5, %v11719_v52  ;;  %v8421_v27 = vadd.f32 %v8420_v17, %v8419_v21 }
 0x3cc   : > { %8182 = vmatpush.bf16.msrb.mxu1 %v11482_v38  ;;  %8196 = vmatpush.bf16.msrb.mxu2 %v11610_v37  ;;  %v13540_v51 = vld [vmem:[%s20839_s1 + $0x152c] sm:$0xf]  ;;  %v11447_v24 = vld [vmem:[%s20839_s1 + $0x1538] sm:$0xf0]  ;;  %v11322_v60 = vor.u32 %v13508_v31, %v11319_v54 }
 0x3cd   : > { %8210 = vmatpush.bf16.msrb.mxu3 %v11738_v46  ;;  %v13572_v39 = vld [vmem:[%s20839_s1 + $0x162c] sm:$0xf]  ;;  %v11575_v43 = vld [vmem:[%s20839_s1 + $0x1638] sm:$0xf0]  ;;  %v11450_v30 = vor.u32 %v13540_v51, %v11447_v24  ;;  %v8422_v52 = vrot.slane %v8421_v27, 2 }
 0x3ce   : > { %v13604_v28 = vld [vmem:[%s20839_s1 + $0x172c] sm:$0xf]  ;;  %v11703_v34 = vld [vmem:[%s20839_s1 + $0x1738] sm:$0xf0]  ;;  %v11578_v19 = vor.u32 %v13572_v39, %v11575_v43 }
 0x3cf   : > { %8169 = vmatpush.bf16.msrb.mxu0 %v11338_v9  ;;  %v13504_v35 = vld [vmem:[%s20839_s1 + $0x140c] sm:$0xf]  ;;  %v11303_v3 = vld [vmem:[%s20839_s1 + $0x1418] sm:$0xf0]  ;;  %v11706_v41 = vor.u32 %v13604_v28, %v11703_v34  ;;  %v8423_v51 = vadd.f32 %v8422_v52, %v8421_v27 }
 0x3d0   : > { %v13536_v42 = vld [vmem:[%s20839_s1 + $0x150c] sm:$0xf]  ;;  %8183 = vmatpush.bf16.msrb.mxu1 %v11466_v12  ;;  %8197 = vmatpush.bf16.msrb.mxu2 %v11594_v50  ;;  %v11431_v53 = vld [vmem:[%s20839_s1 + $0x1518] sm:$0xf0]  ;;  %v11306_v48 = vor.u32 %v13504_v35, %v11303_v3 }
 0x3d1   : > { %v13568_v14 = vld [vmem:[%s20839_s1 + $0x160c] sm:$0xf]  ;;  %v11559_v25 = vld [vmem:[%s20839_s1 + $0x1618] sm:$0xf0]  ;;  %8211 = vmatpush.bf16.msrb.mxu3 %v11722_v40  ;;  %v11434_v58 = vor.u32 %v13536_v42, %v11431_v53  ;;  %v8424_v43 = vrot.slane %v8423_v51, 1 }
 0x3d2   : > { %v13600_v16 = vld [vmem:[%s20839_s1 + $0x170c] sm:$0xf]  ;;  %v11687_v29 = vld [vmem:[%s20839_s1 + $0x1718] sm:$0xf0]  ;;  %v11562_v7 = vor.u32 %v13568_v14, %v11559_v25 }
 0x3d3   : > { %v13660_v13 = vld [vmem:[%s20839_s1 + $0x18ec] sm:$0xf]  ;;  %v11927_v22 = vld [vmem:[%s20839_s1 + $0x18f8] sm:$0xf0]  ;;  %8170 = vmatpush.bf16.msrb.mxu0 %v11322_v60  ;;  %v11690_v33 = vor.u32 %v13600_v16, %v11687_v29 }
 0x3d4   : > { %v13692_v26 = vld [vmem:[%s20839_s1 + $0x19ec] sm:$0xf]  ;;  %v12055_v47 = vld [vmem:[%s20839_s1 + $0x19f8] sm:$0xf0]  ;;  %8184 = vmatpush.bf16.msrb.mxu1 %v11450_v30  ;;  %8198 = vmatpush.bf16.msrb.mxu2 %v11578_v19  ;;  %v11930_v18 = vor.u32 %v13660_v13, %v11927_v22  ;;  %v8425_v30 = vadd.f32 %v8424_v43, %v8423_v51  ;;  %v20967_v19 = vld [vmem:[#allocation22_spill] sm:$0xff] }
 0x3d5   : > { %v13724_v38 = vld [vmem:[%s20839_s1 + $0x1aec] sm:$0xf]  ;;  %v12183_v37 = vld [vmem:[%s20839_s1 + $0x1af8] sm:$0xf0]  ;;  %8212 = vmatpush.bf16.msrb.mxu3 %v11706_v41  ;;  %v12058_v23 = vor.u32 %v13692_v26, %v12055_v47  ;;  %v20969_v41 = vld [vmem:[#allocation24_spill] sm:$0xff] }
 0x3d6   : > { %v13756_v46 = vld [vmem:[%s20839_s1 + $0x1bec] sm:$0xf]  ;;  %v12311_v32 = vld [vmem:[%s20839_s1 + $0x1bf8] sm:$0xf0]  ;;  %v12186_v9 = vor.u32 %v13724_v38, %v12183_v37  ;;  %v8435_v13 = vmul.f32 0.11111111, %v8425_v30 }
 0x3d7   : > { %v13656_v5 = vld [vmem:[%s20839_s1 + $0x18cc] sm:$0xf]  ;;  %v11911_v4 = vld [vmem:[%s20839_s1 + $0x18d8] sm:$0xf0]  ;;  %8171 = vmatpush.bf16.msrb.mxu0 %v11306_v48  ;;  %v12314_v12 = vor.u32 %v13756_v46, %v12311_v32 }
 0x3d8   : > { %v13688_v56 = vld [vmem:[%s20839_s1 + $0x19cc] sm:$0xf]  ;;  %v12039_v50 = vld [vmem:[%s20839_s1 + $0x19d8] sm:$0xf0]  ;;  %8185 = vmatpush.bf16.msrb.mxu1 %v11434_v58  ;;  %8199 = vmatpush.bf16.msrb.mxu2 %v11562_v7  ;;  %v11914_v24 = vor.u32 %v13656_v5, %v11911_v4  ;;  %v20496_v58 = vadd.f32 1e-05, %v8435_v13 }
 0x3d9   : > { %v13720_v31 = vld [vmem:[%s20839_s1 + $0x1acc] sm:$0xf]  ;;  %v12167_v54 = vld [vmem:[%s20839_s1 + $0x1ad8] sm:$0xf0]  ;;  %8213 = vmatpush.bf16.msrb.mxu3 %v11690_v33  ;;  %v12042_v2 = vor.u32 %v13688_v56, %v12039_v50 }
 0x3da   : > { %v13752_v55 = vld [vmem:[%s20839_s1 + $0x1bcc] sm:$0xf]  ;;  %v12295_v40 = vld [vmem:[%s20839_s1 + $0x1bd8] sm:$0xf0]  ;;  %v12170_v36 = vor.u32 %v13720_v31, %v12167_v54  ;;  %13900 = vrsqrt.f32 %v20496_v58  ;;  %vm8467_vm12 = vweird.f32 %v20496_v58 }
 0x3db   : > { %8220 = vmatpush.bf16.msra.mxu0 %v11930_v18  ;;  %v13652_v39 = vld [vmem:[%s20839_s1 + $0x18ac] sm:$0xf]  ;;  %v11895_v28 = vld [vmem:[%s20839_s1 + $0x18b8] sm:$0xf0]  ;;  %v12298_v35 = vor.u32 %v13752_v55, %v12295_v40  ;;  %8200 = vmatmul.bf16.vlgmr.msrb.gmra.mxu2 %v20967_v19 }
 0x3dc   : > { %8234 = vmatpush.bf16.msra.mxu1 %v12058_v23  ;;  %8248 = vmatpush.bf16.msra.mxu2 %v12186_v9  ;;  %v13684_v34 = vld [vmem:[%s20839_s1 + $0x19ac] sm:$0xf]  ;;  %v20966_v60 = vld [vmem:[#allocation21_spill] sm:$0xff]  ;;  %v11898_v16 = vor.u32 %v13652_v39, %v11895_v28 }
 0x3dd   : > { %8262 = vmatpush.bf16.msra.mxu3 %v12314_v12  ;;  %8172 = vmatmul.bf16.vlgmr.msrb.gmra.mxu0 %v20966_v60  ;;  %v12023_v3 = vld [vmem:[%s20839_s1 + $0x19b8] sm:$0xf0]  ;;  %v13716_v42 = vld [vmem:[%s20839_s1 + $0x1aac] sm:$0xf] }
 0x3de   : > { %v12151_v21 = vld [vmem:[%s20839_s1 + $0x1ab8] sm:$0xf0]  ;;  %v20968_v53 = vld [vmem:[#allocation23_spill] sm:$0xff]  ;;  %8214 = vmatmul.bf16.vlgmr.msrb.gmra.mxu3 %v20969_v41  ;;  %v12026_v17 = vor.u32 %v13684_v34, %v12023_v3 }
 0x3df   : > { %8186 = vmatmul.bf16.vlgmr.msrb.gmra.mxu1 %v20968_v53  ;;  %v13748_v14 = vld [vmem:[%s20839_s1 + $0x1bac] sm:$0xf]  ;;  %v12279_v25 = vld [vmem:[%s20839_s1 + $0x1bb8] sm:$0xf0]  ;;  %8221 = vmatpush.bf16.msra.mxu0 %v11914_v24  ;;  %v12154_v22 = vor.u32 %v13716_v42, %v12151_v21 }
 0x3e0   : > { %v13648_v29 = vld [vmem:[%s20839_s1 + $0x188c] sm:$0xf]  ;;  %8235 = vmatpush.bf16.msra.mxu1 %v12042_v2  ;;  %8249 = vmatpush.bf16.msra.mxu2 %v12170_v36  ;;  %v11879_v26 = vld [vmem:[%s20839_s1 + $0x1898] sm:$0xf0]  ;;  %v12282_v47 = vor.u32 %v13748_v14, %v12279_v25  ;;  %v13901_v34 = vpop.eup %13900 }
 0x3e1   : > { %v13680_v48 = vld [vmem:[%s20839_s1 + $0x198c] sm:$0xf]  ;;  %8263 = vmatpush.bf16.msra.mxu3 %v12298_v35  ;;  %v12007_v38 = vld [vmem:[%s20839_s1 + $0x1998] sm:$0xf0]  ;;  %v11882_v32 = vor.u32 %v13648_v29, %v11879_v26  ;;  %v8462_v3 = vmul.f32 %v13901_v34, %v20496_v58  ;;  %vm8468_vm11 = vweird.f32 %v13901_v34 }
 0x3e2   : > { %v13712_v37 = vld [vmem:[%s20839_s1 + $0x1a8c] sm:$0xf]  ;;  %v12135_v27 = vld [vmem:[%s20839_s1 + $0x1a98] sm:$0xf0]  ;;  %v12010_v33 = vor.u32 %v13680_v48, %v12007_v38  ;;  %vm8469_vm13 = vmor %vm8467_vm12, %vm8468_vm11 }
 0x3e3   : > { %v13744_v7 = vld [vmem:[%s20839_s1 + $0x1b8c] sm:$0xf]  ;;  %v12263_v46 = vld [vmem:[%s20839_s1 + $0x1b98] sm:$0xf0]  ;;  %8222 = vmatpush.bf16.msra.mxu0 %v11898_v16  ;;  %v12138_v18 = vor.u32 %v13712_v37, %v12135_v27  ;;  %v8463_v41 = vmul.f32 %v13901_v34, %v8462_v3 }
 0x3e4   : > { %8236 = vmatpush.bf16.msra.mxu1 %v12026_v17  ;;  %8250 = vmatpush.bf16.msra.mxu2 %v12154_v22  ;;  %v13644_v5 = vld [vmem:[%s20839_s1 + $0x186c] sm:$0xf]  ;;  %v11863_v52 = vld [vmem:[%s20839_s1 + $0x1878] sm:$0xf0]  ;;  %v12266_v9 = vor.u32 %v13744_v7, %v12263_v46 }
 0x3e5   : > { %v13676_v23 = vld [vmem:[%s20839_s1 + $0x196c] sm:$0xf]  ;;  %8264 = vmatpush.bf16.msra.mxu3 %v12282_v47  ;;  %v11991_v4 = vld [vmem:[%s20839_s1 + $0x1978] sm:$0xf0]  ;;  %v11866_v54 = vor.u32 %v13644_v5, %v11863_v52  ;;  %v8464_v47 = vmul.f32 0.5, %v8463_v41 }
 0x3e6   : > { %v13708_v56 = vld [vmem:[%s20839_s1 + $0x1a6c] sm:$0xf]  ;;  %v12119_v12 = vld [vmem:[%s20839_s1 + $0x1a78] sm:$0xf0]  ;;  %v11994_v51 = vor.u32 %v13676_v23, %v11991_v4 }
 0x3e7   : > { %v13740_v50 = vld [vmem:[%s20839_s1 + $0x1b6c] sm:$0xf]  ;;  %v12247_v31 = vld [vmem:[%s20839_s1 + $0x1b78] sm:$0xf0]  ;;  %8223 = vmatpush.bf16.msra.mxu0 %v11882_v32  ;;  %v12122_v55 = vor.u32 %v13708_v56, %v12119_v12  ;;  %v8465_v5 = vsub.f32 1.5, %v8464_v47 }
 0x3e8   : > { %8237 = vmatpush.bf16.msra.mxu1 %v12010_v33  ;;  %8251 = vmatpush.bf16.msra.mxu2 %v12138_v18  ;;  %v13640_v40 = vld [vmem:[%s20839_s1 + $0x184c] sm:$0xf]  ;;  %v11847_v24 = vld [vmem:[%s20839_s1 + $0x1858] sm:$0xf0]  ;;  %v12250_v43 = vor.u32 %v13740_v50, %v12247_v31 }
 0x3e9   : > { %v13672_v39 = vld [vmem:[%s20839_s1 + $0x194c] sm:$0xf]  ;;  %8265 = vmatpush.bf16.msra.mxu3 %v12266_v9  ;;  %v11975_v2 = vld [vmem:[%s20839_s1 + $0x1958] sm:$0xf0]  ;;  %v11850_v42 = vor.u32 %v13640_v40, %v11847_v24  ;;  %v8466_v50 = vmul.f32 %v13901_v34, %v8465_v5 }
 0x3ea   : > { %v13704_v36 = vld [vmem:[%s20839_s1 + $0x1a4c] sm:$0xf]  ;;  %v12103_v28 = vld [vmem:[%s20839_s1 + $0x1a58] sm:$0xf0]  ;;  %v11978_v30 = vor.u32 %v13672_v39, %v11975_v2 }
 0x3eb   : > { %v13736_v60 = vld [vmem:[%s20839_s1 + $0x1b4c] sm:$0xf]  ;;  %v12231_v35 = vld [vmem:[%s20839_s1 + $0x1b58] sm:$0xf0]  ;;  %8224 = vmatpush.bf16.msra.mxu0 %v11866_v54  ;;  %v12106_v19 = vor.u32 %v13704_v36, %v12103_v28 }
 0x3ec   : > { %v13636_v21 = vld [vmem:[%s20839_s1 + $0x182c] sm:$0xf]  ;;  %8238 = vmatpush.bf16.msra.mxu1 %v11994_v51  ;;  %8252 = vmatpush.bf16.msra.mxu2 %v12122_v55  ;;  %v11831_v53 = vld [vmem:[%s20839_s1 + $0x1838] sm:$0xf0]  ;;  %v12234_v16 = vor.u32 %v13736_v60, %v12231_v35 }
 0x3ed   : > { %v13668_v14 = vld [vmem:[%s20839_s1 + $0x192c] sm:$0xf]  ;;  %v11959_v25 = vld [vmem:[%s20839_s1 + $0x1938] sm:$0xf0]  ;;  %8266 = vmatpush.bf16.msra.mxu3 %v12250_v43  ;;  %v11834_v38 = vor.u32 %v13636_v21, %v11831_v53  ;;  %v8470_v43 = vsel %vm8469_vm13, %v13901_v34, %v8466_v50 }
 0x3ee   : > { %v13700_v29 = vld [vmem:[%s20839_s1 + $0x1a2c] sm:$0xf]  ;;  %v12087_v13 = vld [vmem:[%s20839_s1 + $0x1a38] sm:$0xf0]  ;;  %v11962_v7 = vor.u32 %v13668_v14, %v11959_v25  ;;  %v8483_v3 = vmul.f32 %v8470_v43, %v20337_v8  ;;  %v8519_v25 = vld [vmem:[%s20841_s3 + $0x30] sm:$0xff] }
 0x3ef   : > { %v13732_v17 = vld [vmem:[%s20839_s1 + $0x1b2c] sm:$0xf]  ;;  %v12215_v22 = vld [vmem:[%s20839_s1 + $0x1b38] sm:$0xf0]  ;;  %8225 = vmatpush.bf16.msra.mxu0 %v11850_v42  ;;  %v12090_v46 = vor.u32 %v13700_v29, %v12087_v13  ;;  %v8487_v42 = vmul.f32 %v8470_v43, %v20340_v6  ;;  %v8515_v6 = vld [vmem:[%s20841_s3 + $0x10] sm:$0xff] }
 0x3f0   : > { %v13632_v26 = vld [vmem:[%s20839_s1 + $0x180c] sm:$0xf]  ;;  %v11815_v48 = vld [vmem:[%s20839_s1 + $0x1818] sm:$0xf0]  ;;  %8239 = vmatpush.bf16.msra.mxu1 %v11978_v30  ;;  %8253 = vmatpush.bf16.msra.mxu2 %v12106_v19  ;;  %v12218_v52 = vor.u32 %v13732_v17, %v12215_v22  ;;  %vm8491_vm14 = vcmp.ge.f32.partialorder %v8483_v3, 0.0 }
 0x3f1   : > { %v13664_v37 = vld [vmem:[%s20839_s1 + $0x190c] sm:$0xf]  ;;  %v11943_v27 = vld [vmem:[%s20839_s1 + $0x1918] sm:$0xf0]  ;;  %8267 = vmatpush.bf16.msra.mxu3 %v12234_v16  ;;  %v11818_v31 = vor.u32 %v13632_v26, %v11815_v48  ;;  %v8503_v41 = vmul.f32 0.2, %v8487_v42 }
 0x3f2   : > { %v13696_v32 = vld [vmem:[%s20839_s1 + $0x1a0c] sm:$0xf]  ;;  %v12071_v33 = vld [vmem:[%s20839_s1 + $0x1a18] sm:$0xf0]  ;;  %v11946_v40 = vor.u32 %v13664_v37, %v11943_v27  ;;  %v8499_v16 = vmul.f32 0.2, %v8483_v3 }
 0x3f3   : > { %v13728_v18 = vld [vmem:[%s20839_s1 + $0x1b0c] sm:$0xf]  ;;  %v12199_v23 = vld [vmem:[%s20839_s1 + $0x1b18] sm:$0xf0]  ;;  %8226 = vmatpush.bf16.msra.mxu0 %v11834_v38  ;;  %v12074_v58 = vor.u32 %v13696_v32, %v12071_v33  ;;  %vm8495_vm15 = vcmp.ge.f32.partialorder %v8487_v42, 0.0 }
 0x3f4   : > { %v13788_v9 = vld [vmem:[%s20839_s1 + $0x1cec] sm:$0xf]  ;;  %v12439_v4 = vld [vmem:[%s20839_s1 + $0x1cf8] sm:$0xf0]  ;;  %8240 = vmatpush.bf16.msra.mxu1 %v11962_v7  ;;  %8254 = vmatpush.bf16.msra.mxu2 %v12090_v46  ;;  %v12202_v2 = vor.u32 %v13728_v18, %v12199_v23  ;;  %v8507_v47 = vsel %vm8491_vm14, %v8483_v3, %v8499_v16  ;;  %v8511_v38 = vsel %vm8495_vm15, %v8487_v42, %v8503_v41 }
 0x3f5   : > { %v13820_v56 = vld [vmem:[%s20839_s1 + $0x1dec] sm:$0xf]  ;;  %v12567_v12 = vld [vmem:[%s20839_s1 + $0x1df8] sm:$0xf0]  ;;  %8268 = vmatpush.bf16.msra.mxu3 %v12218_v52  ;;  %v12442_v36 = vor.u32 %v13788_v9, %v12439_v4  ;;  %v8523_v32 = vmul.f32 %v8515_v6, %v8507_v47  ;;  %v8527_v33 = vmul.f32 %v8519_v25, %v8511_v38 }
 0x3f6   : > { %v13852_v54 = vld [vmem:[%s20839_s1 + $0x1eec] sm:$0xf]  ;;  %v12695_v51 = vld [vmem:[%s20839_s1 + $0x1ef8] sm:$0xf0]  ;;  %v12570_v34 = vor.u32 %v13820_v56, %v12567_v12 }
 0x3f7   : > { %v13884_v55 = vld [vmem:[%s20839_s1 + $0x1fec] sm:$0xf]  ;;  %v12823_v24 = vld [vmem:[%s20839_s1 + $0x1ff8] sm:$0xf0]  ;;  %v12698_v21 = vor.u32 %v13852_v54, %v12695_v51  ;;  %8227 = vmatpush.bf16.msra.mxu0 %v11818_v31  ;;  %v20689_v52 = vadd.f32 %v19035_v49, %v8523_v32  ;;  %v20692_v23 = vadd.f32 %v19024_v44, %v8527_v33 }
 0x3f8   : > { %v13784_v39 = vld [vmem:[%s20839_s1 + $0x1ccc] sm:$0xf]  ;;  %v12423_v28 = vld [vmem:[%s20839_s1 + $0x1cd8] sm:$0xf0]  ;;  %v12826_v14 = vor.u32 %v13884_v55, %v12823_v24  ;;  %8241 = vmatpush.bf16.msra.mxu1 %v11946_v40  ;;  %8255 = vmatpush.bf16.msra.mxu2 %v12074_v58 }
 0x3f9   : > { %v13816_v60 = vld [vmem:[%s20839_s1 + $0x1dcc] sm:$0xf]  ;;  %v12551_v35 = vld [vmem:[%s20839_s1 + $0x1dd8] sm:$0xf0]  ;;  %8269 = vmatpush.bf16.msra.mxu3 %v12202_v2  ;;  %v12426_v29 = vor.u32 %v13784_v39, %v12423_v28 }
 0x3fa   : > { %v13848_v30 = vld [vmem:[%s20839_s1 + $0x1ecc] sm:$0xf]  ;;  %v12679_v19 = vld [vmem:[%s20839_s1 + $0x1ed8] sm:$0xf0]  ;;  %v12554_v13 = vor.u32 %v13816_v60, %v12551_v35  ;;  %8228 = vmatmul.bf16.vlgmr.msra.gmra.mxu0 %v15487_v57 }
 0x3fb   : > { %v13880_v53 = vld [vmem:[%s20839_s1 + $0x1fcc] sm:$0xf]  ;;  %v12807_v8 = vld [vmem:[%s20839_s1 + $0x1fd8] sm:$0xf0]  ;;  %8276 = vmatpush.bf16.msrb.mxu0 %v12442_v36  ;;  %v12682_v17 = vor.u32 %v13848_v30, %v12679_v19  ;;  %8256 = vmatmul.bf16.vlgmr.msra.gmra.mxu2 %v15500_v63 }
 0x3fc   : > { %8290 = vmatpush.bf16.msrb.mxu1 %v12570_v34  ;;  %8304 = vmatpush.bf16.msrb.mxu2 %v12698_v21  ;;  %v13780_v22 = vld [vmem:[%s20839_s1 + $0x1cac] sm:$0xf]  ;;  %v12407_v26 = vld [vmem:[%s20839_s1 + $0x1cb8] sm:$0xf0]  ;;  %v12810_v37 = vor.u32 %v13880_v53, %v12807_v8 }
 0x3fd   : > { %v13812_v48 = vld [vmem:[%s20839_s1 + $0x1dac] sm:$0xf]  ;;  %8318 = vmatpush.bf16.msrb.mxu3 %v12826_v14  ;;  %v12535_v27 = vld [vmem:[%s20839_s1 + $0x1db8] sm:$0xf0]  ;;  %8242 = vmatmul.bf16.vlgmr.msra.gmra.mxu1 %v15502_v0  ;;  %v12410_v5 = vor.u32 %v13780_v22, %v12407_v26 }
 0x3fe   : > { %v13844_v7 = vld [vmem:[%s20839_s1 + $0x1eac] sm:$0xf]  ;;  %v12663_v46 = vld [vmem:[%s20839_s1 + $0x1eb8] sm:$0xf0]  ;;  %8270 = vmatmul.bf16.vlgmr.msra.gmra.mxu3 %v20963_v45  ;;  %v12538_v63 = vor.u32 %v13812_v48, %v12535_v27 }
 0x3ff   : > { %v13876_v57 = vld [vmem:[%s20839_s1 + $0x1fac] sm:$0xf]  ;;  %v12791_v18 = vld [vmem:[%s20839_s1 + $0x1fb8] sm:$0xf0]  ;;  %8277 = vmatpush.bf16.msrb.mxu0 %v12426_v29  ;;  %v12666_v0 = vor.u32 %v13844_v7, %v12663_v46 }
 0x400   : > { %8291 = vmatpush.bf16.msrb.mxu1 %v12554_v13  ;;  %8305 = vmatpush.bf16.msrb.mxu2 %v12682_v17  ;;  %v13776_v9 = vld [vmem:[%s20839_s1 + $0x1c8c] sm:$0xf]  ;;  %v12391_v45 = vld [vmem:[%s20839_s1 + $0x1c98] sm:$0xf0]  ;;  %v12794_v4 = vor.u32 %v13876_v57, %v12791_v18 }
 0x401   : > { %v13808_v49 = vld [vmem:[%s20839_s1 + $0x1d8c] sm:$0xf]  ;;  %8319 = vmatpush.bf16.msrb.mxu3 %v12810_v37  ;;  %v12519_v44 = vld [vmem:[%s20839_s1 + $0x1d98] sm:$0xf0]  ;;  %v12394_v54 = vor.u32 %v13776_v9, %v12391_v45 }
 0x402   : > { %v13840_v56 = vld [vmem:[%s20839_s1 + $0x1e8c] sm:$0xf]  ;;  %v12647_v12 = vld [vmem:[%s20839_s1 + $0x1e98] sm:$0xf0]  ;;  %v12522_v51 = vor.u32 %v13808_v49, %v12519_v44 }
 0x403   : > { %v13872_v50 = vld [vmem:[%s20839_s1 + $0x1f8c] sm:$0xf]  ;;  %v12775_v31 = vld [vmem:[%s20839_s1 + $0x1f98] sm:$0xf0]  ;;  %8278 = vmatpush.bf16.msrb.mxu0 %v12410_v5  ;;  %v12650_v55 = vor.u32 %v13840_v56, %v12647_v12 }
 0x404   : > { %8292 = vmatpush.bf16.msrb.mxu1 %v12538_v63  ;;  %8306 = vmatpush.bf16.msrb.mxu2 %v12666_v0  ;;  %v13772_v40 = vld [vmem:[%s20839_s1 + $0x1c6c] sm:$0xf]  ;;  %v12375_v58 = vld [vmem:[%s20839_s1 + $0x1c78] sm:$0xf0]  ;;  %v12778_v39 = vor.u32 %v13872_v50, %v12775_v31  ;;  %v7895_v50 = vpop.f32.mrf.mxu0  ;;  %v7909_v31 = vpop.f32.mrf.mxu1 }
 0x405   : > { %v13804_v24 = vld [vmem:[%s20839_s1 + $0x1d6c] sm:$0xf]  ;;  %8320 = vmatpush.bf16.msrb.mxu3 %v12794_v4  ;;  %v12503_v43 = vld [vmem:[%s20839_s1 + $0x1d78] sm:$0xf0]  ;;  %v12378_v35 = vor.u32 %v13772_v40, %v12375_v58 }
 0x406   : > { %v13836_v2 = vld [vmem:[%s20839_s1 + $0x1e6c] sm:$0xf]  ;;  %v12631_v36 = vld [vmem:[%s20839_s1 + $0x1e78] sm:$0xf0]  ;;  %v12506_v3 = vor.u32 %v13804_v24, %v12503_v43 }
 0x407   : > { %v13868_v28 = vld [vmem:[%s20839_s1 + $0x1f6c] sm:$0xf]  ;;  %v12759_v60 = vld [vmem:[%s20839_s1 + $0x1f78] sm:$0xf0]  ;;  %8279 = vmatpush.bf16.msrb.mxu0 %v12394_v54  ;;  %v12634_v42 = vor.u32 %v13836_v2, %v12631_v36  ;;  %v7923_v54 = vpop.f32.mrf.mxu2 }
 0x408   : > { %8293 = vmatpush.bf16.msrb.mxu1 %v12522_v51  ;;  %8307 = vmatpush.bf16.msrb.mxu2 %v12650_v55  ;;  %v13768_v34 = vld [vmem:[%s20839_s1 + $0x1c4c] sm:$0xf]  ;;  %v12359_v21 = vld [vmem:[%s20839_s1 + $0x1c58] sm:$0xf0]  ;;  %v12762_v19 = vor.u32 %v13868_v28, %v12759_v60  ;;  %v7937_v51 = vpop.f32.mrf.mxu3 }
 0x409   : > { %v13800_v30 = vld [vmem:[%s20839_s1 + $0x1d4c] sm:$0xf]  ;;  %8321 = vmatpush.bf16.msrb.mxu3 %v12778_v39  ;;  %v12487_v53 = vld [vmem:[%s20839_s1 + $0x1d58] sm:$0xf0]  ;;  %v12362_v41 = vor.u32 %v13768_v34, %v12359_v21 }
 0x40a   : > { %v13832_v14 = vld [vmem:[%s20839_s1 + $0x1e4c] sm:$0xf]  ;;  %v12615_v8 = vld [vmem:[%s20839_s1 + $0x1e58] sm:$0xf0]  ;;  %v12490_v16 = vor.u32 %v13800_v30, %v12487_v53 }
 0x40b   : > { %v13864_v6 = vld [vmem:[%s20839_s1 + $0x1f4c] sm:$0xf]  ;;  %v12743_v25 = vld [vmem:[%s20839_s1 + $0x1f58] sm:$0xf0]  ;;  %8280 = vmatpush.bf16.msrb.mxu0 %v12378_v35  ;;  %v12618_v29 = vor.u32 %v13832_v14, %v12615_v8 }
 0x40c   : > { %8294 = vmatpush.bf16.msrb.mxu1 %v12506_v3  ;;  %8308 = vmatpush.bf16.msrb.mxu2 %v12634_v42  ;;  %v13764_v13 = vld [vmem:[%s20839_s1 + $0x1c2c] sm:$0xf]  ;;  %v12343_v17 = vld [vmem:[%s20839_s1 + $0x1c38] sm:$0xf0]  ;;  %v12746_v26 = vor.u32 %v13864_v6, %v12743_v25  ;;  %v7949_v55 = vpop.f32.mrf.mxu0  ;;  %v7963_v40 = vpop.f32.mrf.mxu1 }
 0x40d   : > { %v13796_v22 = vld [vmem:[%s20839_s1 + $0x1d2c] sm:$0xf]  ;;  %8322 = vmatpush.bf16.msrb.mxu3 %v12762_v19  ;;  %v12471_v48 = vld [vmem:[%s20839_s1 + $0x1d38] sm:$0xf0]  ;;  %v12346_v7 = vor.u32 %v13764_v13, %v12343_v17  ;;  %v7950_v8 = vadd.f32 %v7949_v55, %v20368_v20 }
 0x40e   : > { %v13828_v47 = vld [vmem:[%s20839_s1 + $0x1e2c] sm:$0xf]  ;;  %v12599_v38 = vld [vmem:[%s20839_s1 + $0x1e38] sm:$0xf0]  ;;  %v12474_v46 = vor.u32 %v13796_v22, %v12471_v48 }
 0x40f   : > { %v13860_v37 = vld [vmem:[%s20839_s1 + $0x1f2c] sm:$0xf]  ;;  %v12727_v27 = vld [vmem:[%s20839_s1 + $0x1f38] sm:$0xf0]  ;;  %8281 = vmatpush.bf16.msrb.mxu0 %v12362_v41  ;;  %v12602_v32 = vor.u32 %v13828_v47, %v12599_v38  ;;  %v7977_v58 = vpop.f32.mrf.mxu2 }
 0x410   : > { %8295 = vmatpush.bf16.msrb.mxu1 %v12490_v16  ;;  %8309 = vmatpush.bf16.msrb.mxu2 %v12618_v29  ;;  %v13760_v33 = vld [vmem:[%s20839_s1 + $0x1c0c] sm:$0xf]  ;;  %v12327_v57 = vld [vmem:[%s20839_s1 + $0x1c18] sm:$0xf0]  ;;  %v12730_v5 = vor.u32 %v13860_v37, %v12727_v27  ;;  %v7991_v24 = vpop.f32.mrf.mxu3  ;;  %v7964_v16 = vadd.f32 %v7963_v40, %v7950_v8 }
 0x411   : > { %v13792_v18 = vld [vmem:[%s20839_s1 + $0x1d0c] sm:$0xf]  ;;  %8323 = vmatpush.bf16.msrb.mxu3 %v12746_v26  ;;  %v12455_v63 = vld [vmem:[%s20839_s1 + $0x1d18] sm:$0xf0]  ;;  %v12330_v4 = vor.u32 %v13760_v33, %v12327_v57 }
 0x412   : > { %v13824_v0 = vld [vmem:[%s20839_s1 + $0x1e0c] sm:$0xf]  ;;  %v12583_v9 = vld [vmem:[%s20839_s1 + $0x1e18] sm:$0xf0]  ;;  %v12458_v44 = vor.u32 %v13792_v18, %v12455_v63  ;;  %v7978_v17 = vadd.f32 %v7977_v58, %v7964_v16 }
 0x413   : > { %v13856_v45 = vld [vmem:[%s20839_s1 + $0x1f0c] sm:$0xf]  ;;  %v12711_v49 = vld [vmem:[%s20839_s1 + $0x1f18] sm:$0xf0]  ;;  %8282 = vmatpush.bf16.msrb.mxu0 %v12346_v7  ;;  %v12586_v56 = vor.u32 %v13824_v0, %v12583_v9 }
 0x414   : > { %8296 = vmatpush.bf16.msrb.mxu1 %v12474_v46  ;;  %8310 = vmatpush.bf16.msrb.mxu2 %v12602_v32  ;;  %v12714_v12 = vor.u32 %v13856_v45, %v12711_v49  ;;  %v7951_v39 = vpop.f32.mrf.mxu0  ;;  %v7965_v43 = vpop.f32.mrf.mxu1  ;;  %v7992_v48 = vadd.f32 %v7991_v24, %v7978_v17 }
 0x415   : > { %8324 = vmatpush.bf16.msrb.mxu3 %v12730_v5 }
 0x417   : > { %8283 = vmatpush.bf16.msrb.mxu0 %v12330_v4  ;;  %v7979_v2 = vpop.f32.mrf.mxu2 }
 0x418   : > { %8297 = vmatpush.bf16.msrb.mxu1 %v12458_v44  ;;  %8311 = vmatpush.bf16.msrb.mxu2 %v12586_v56  ;;  %v7993_v36 = vpop.f32.mrf.mxu3 }
 0x419   : > { %8325 = vmatpush.bf16.msrb.mxu3 %v12714_v12 }
 0x41a   : > { %8284 = vmatmul.bf16.vlgmr.msrb.gmra.mxu0 %v15710_v61 }
 0x41b   : > { %8298 = vmatmul.bf16.vlgmr.msrb.gmra.mxu1 %v15725_v11  ;;  %8312 = vmatmul.bf16.vlgmr.msrb.gmra.mxu2 %v15723_v10  ;;  %v7896_v10 = vadd.f32 %v7895_v50, %v1255_v59 }
 0x41c   : > { %8326 = vmatmul.bf16.vlgmr.msrb.gmra.mxu3 %v15735_v15  ;;  %v8005_v28 = vpop.f32.mrf.mxu0  ;;  %v8019_v61 = vpop.f32.mrf.mxu1 }
 0x41d   : > { %v7910_v3 = vadd.f32 %v7909_v31, %v7896_v10  ;;  %v8006_v37 = vadd.f32 %v8005_v28, %v7992_v48 }
 0x41f   : > { %v8033_v60 = vpop.f32.mrf.mxu2  ;;  %v7924_v30 = vadd.f32 %v7923_v54, %v7910_v3  ;;  %v8020_v46 = vadd.f32 %v8019_v61, %v8006_v37 }
 0x420   : > { %v8047_v11 = vpop.f32.mrf.mxu3 }
 0x421   : > { %v7938_v53 = vadd.f32 %v7937_v51, %v7924_v30  ;;  %v8034_v33 = vadd.f32 %v8033_v60, %v8020_v46 }
 0x423   : > { %v7952_v25 = vadd.f32 %v7951_v39, %v7938_v53  ;;  %v8048_v63 = vadd.f32 %v8047_v11, %v8034_v33 }
 0x424   : > { %v8007_v35 = vpop.f32.mrf.mxu0  ;;  %v8021_v15 = vpop.f32.mrf.mxu1 }
 0x425   : > { %v7966_v13 = vadd.f32 %v7965_v43, %v7952_v25 }
 0x427   : > { %v8035_v42 = vpop.f32.mrf.mxu2  ;;  %v7980_v62 = vadd.f32 %v7979_v2, %v7966_v13 }
 0x428   : > { %v8049_v34 = vpop.f32.mrf.mxu3 }
 0x429   : > { %v7994_v47 = vadd.f32 %v7993_v36, %v7980_v62 }
 0x42b   : > { %v8008_v27 = vadd.f32 %v8007_v35, %v7994_v47 }
 0x42c   : > { %v8061_v21 = vpop.f32.mrf.mxu0  ;;  %v8075_v19 = vpop.f32.mrf.mxu1 }
 0x42d   : > { %v8022_v32 = vadd.f32 %v8021_v15, %v8008_v27  ;;  %v8062_v9 = vadd.f32 %v8061_v21, %v8048_v63 }
 0x42f   : > { %v8089_v14 = vpop.f32.mrf.mxu2  ;;  %v8036_v57 = vadd.f32 %v8035_v42, %v8022_v32  ;;  %v8076_v56 = vadd.f32 %v8075_v19, %v8062_v9 }
 0x430   : > { %v8103_v6 = vpop.f32.mrf.mxu3 }
 0x431   : > { %v8050_v0 = vadd.f32 %v8049_v34, %v8036_v57  ;;  %v8090_v31 = vadd.f32 %v8089_v14, %v8076_v56 }
 0x433   : > { %v8104_v55 = vadd.f32 %v8103_v6, %v8090_v31 }
 0x434   : > { %v8063_v41 = vpop.f32.mrf.mxu0  ;;  %v8077_v29 = vpop.f32.mrf.mxu1 }
 0x435   : > { %v8064_v45 = vadd.f32 %v8063_v41, %v8050_v0 }
 0x437   : > { %v8091_v59 = vpop.f32.mrf.mxu2  ;;  %v8078_v12 = vadd.f32 %v8077_v29, %v8064_v45 }
 0x438   : > { %v8105_v22 = vpop.f32.mrf.mxu3 }
 0x439   : > { %v8092_v54 = vadd.f32 %v8091_v59, %v8078_v12 }
 0x43b   : > { %v8106_v40 = vadd.f32 %v8105_v22, %v8092_v54 }
 0x43c   : > { %v8117_v26 = vpop.f32.mrf.mxu0  ;;  %v8131_v38 = vpop.f32.mrf.mxu1 }
 0x43d   : > { %v8118_v24 = vadd.f32 %v8117_v26, %v8104_v55 }
 0x43f   : > { %v8145_v7 = vpop.f32.mrf.mxu2  ;;  %v8132_v36 = vadd.f32 %v8131_v38, %v8118_v24 }
 0x441   : > { %v8159_v20 = vpop.f32.mrf.mxu3  ;;  %v8146_v61 = vadd.f32 %v8145_v7, %v8132_v36 }
 0x443   : > { %v8160_v15 = vadd.f32 %v8159_v20, %v8146_v61 }
 0x444   : > { %v8119_v18 = vpop.f32.mrf.mxu0  ;;  %v8133_v5 = vpop.f32.mrf.mxu1 }
 0x445   : > { %v8120_v39 = vadd.f32 %v8119_v18, %v8106_v40 }
 0x447   : > { %v8147_v49 = vpop.f32.mrf.mxu2  ;;  %v8134_v28 = vadd.f32 %v8133_v5, %v8120_v39 }
 0x449   : > { %v8161_v4 = vpop.f32.mrf.mxu3  ;;  %v8148_v60 = vadd.f32 %v8147_v49, %v8134_v28 }
 0x44b   : > { %v8162_v3 = vadd.f32 %v8161_v4, %v8148_v60 }
 0x45a   : > { %v8173_v44 = vpop.f32.mrf.mxu0 }
 0x45b   : > { %v8174_v34 = vadd.f32 %v8173_v44, %v8160_v15 }
 0x45c   : > { %v8187_v50 = vpop.f32.mrf.mxu1 }
 0x45d   : > { %v8188_v19 = vadd.f32 %v8187_v50, %v8174_v34 }
 0x45e   : > { %v8201_v51 = vpop.f32.mrf.mxu2 }
 0x45f   : > { %v8202_v8 = vadd.f32 %v8201_v51, %v8188_v19 }
 0x461   : > { %v8215_v58 = vpop.f32.mrf.mxu3 }
 0x462   : > { %v8175_v43 = vpop.f32.mrf.mxu0  ;;  %v8216_v16 = vadd.f32 %v8215_v58, %v8202_v8 }
 0x463   : > { %v8176_v21 = vadd.f32 %v8175_v43, %v8162_v3 }
 0x464   : > { %v8189_v2 = vpop.f32.mrf.mxu1 }
 0x465   : > { %v8190_v53 = vadd.f32 %v8189_v2, %v8176_v21 }
 0x466   : > { %v8203_v11 = vpop.f32.mrf.mxu2 }
 0x467   : > { %v8204_v6 = vadd.f32 %v8203_v11, %v8190_v53 }
 0x469   : > { %v8217_v35 = vpop.f32.mrf.mxu3 }
 0x46a   : > { %v8218_v29 = vadd.f32 %v8217_v35, %v8204_v6 }
 0x477   : > { %v8229_v10 = vpop.f32.mrf.mxu0 }
 0x478   : > { %v8230_v13 = vadd.f32 %v8229_v10, %v8216_v16 }
 0x47a   : > { %v8243_v42 = vpop.f32.mrf.mxu1 }
 0x47b   : > { %v8244_v26 = vadd.f32 %v8243_v42, %v8230_v13 }
 0x47e   : > { %v8257_v30 = vpop.f32.mrf.mxu2 }
 0x47f   : > { %v8231_v25 = vpop.f32.mrf.mxu0  ;;  %v8258_v38 = vadd.f32 %v8257_v30, %v8244_v26 }
 0x480   : > { %v8232_v17 = vadd.f32 %v8231_v25, %v8218_v29  ;;  %v8516_v25 = vld [vmem:[%s20841_s3 + $0x18] sm:$0xff] }
 0x481   : > { %v8271_v14 = vpop.f32.mrf.mxu3 }
 0x482   : > { %v8245_v41 = vpop.f32.mrf.mxu1  ;;  %v8272_v7 = vadd.f32 %v8271_v14, %v8258_v38 }
 0x483   : > { %v8246_v48 = vadd.f32 %v8245_v41, %v8232_v17  ;;  %v8520_v41 = vld [vmem:[%s20841_s3 + $0x38] sm:$0xff] }
 0x486   : > { %v8259_v62 = vpop.f32.mrf.mxu2 }
 0x487   : > { %v8260_v37 = vadd.f32 %v8259_v62, %v8246_v48 }
 0x489   : > { %v8273_v59 = vpop.f32.mrf.mxu3 }
 0x48a   : > { %v8274_v46 = vadd.f32 %v8273_v59, %v8260_v37 }
 0x497   : > { %v8285_v22 = vpop.f32.mrf.mxu0 }
 0x498   : > { %v8299_v47 = vpop.f32.mrf.mxu1  ;;  %v8286_v33 = vadd.f32 %v8285_v22, %v8272_v7 }
 0x49a   : > { %v8300_v5 = vadd.f32 %v8299_v47, %v8286_v33 }
 0x49e   : > { %v8313_v27 = vpop.f32.mrf.mxu2 }
 0x49f   : > { %v8327_v32 = vpop.f32.mrf.mxu3  ;;  %v8287_v20 = vpop.f32.mrf.mxu0  ;;  %v8314_v9 = vadd.f32 %v8313_v27, %v8300_v5 }
 0x4a0   : > { %v8288_v57 = vadd.f32 %v8287_v20, %v8274_v46  ;;  %v8301_v18 = vpop.f32.mrf.mxu1 }
 0x4a1   : > { %v8328_v44 = vadd.f32 %v8327_v32, %v8314_v9 }
 0x4a2   : > { %v8302_v63 = vadd.f32 %v8301_v18, %v8288_v57 }
 0x4a6   : > { %v8315_v0 = vpop.f32.mrf.mxu2 }
 0x4a7   : > { %v8316_v45 = vadd.f32 %v8315_v0, %v8302_v63  ;;  %v8329_v49 = vpop.f32.mrf.mxu3 }
 0x4a9   : > { %v8330_v4 = vadd.f32 %v8329_v49, %v8316_v45 }
 0x4ab   : > { %v8348_v56 = vmul.f32 %v17884_v1, %v8330_v4 }
 0x4ad   : > { %v8370_v12 = vadd.f32 %v8348_v56, %v8328_v44 }
 0x4af   : > { %v8371_v50 = vrot.slane %v8370_v12, 4 }
 0x4b1   : > { %v8372_v31 = vadd.f32 %v8371_v50, %v8370_v12 }
 0x4b3   : > { %v8373_v54 = vrot.slane %v8372_v31, 2 }
 0x4b5   : > { %v8374_v51 = vadd.f32 %v8373_v54, %v8372_v31 }
 0x4b7   : > { %v8375_v55 = vrot.slane %v8374_v51, 1 }
 0x4b9   : > { %v8376_v40 = vadd.f32 %v8375_v55, %v8374_v51 }
 0x4bb   : > { %v8380_v58 = vmul.f32 0.11111111, %v8376_v40 }
 0x4bd   : > { %v8384_v24 = vsub.f32 %v8328_v44, %v8380_v58  ;;  %v8388_v39 = vsub.f32 %v8330_v4, %v8380_v58 }
 0x4bf   : > { %v8396_v43 = vmul.f32 %v17884_v1, %v8388_v39  ;;  %v8400_v2 = vmul.f32 %v8384_v24, %v8384_v24 }
 0x4c1   : > { %v8404_v36 = vmul.f32 %v8396_v43, %v8396_v43 }
 0x4c3   : > { %v8426_v28 = vadd.f32 %v8404_v36, %v8400_v2 }
 0x4c5   : > { %v8427_v61 = vrot.slane %v8426_v28, 4 }
 0x4c7   : > { %v8428_v60 = vadd.f32 %v8427_v61, %v8426_v28 }
 0x4c9   : > { %v8429_v11 = vrot.slane %v8428_v60, 2 }
 0x4cb   : > { %v8430_v35 = vadd.f32 %v8429_v11, %v8428_v60 }
 0x4cd   : > { %v8431_v10 = vrot.slane %v8430_v35, 1 }
 0x4cf   : > { %v8432_v15 = vadd.f32 %v8431_v10, %v8430_v35 }
 0x4d1   : > { %v8436_v3 = vmul.f32 0.11111111, %v8432_v15 }
 0x4d3   : > { %v8440_v42 = vadd.f32 1e-05, %v8436_v3 }
 0x4d5   : > { %13902 = vrsqrt.f32 %v8440_v42  ;;  %vm8477_vm1 = vweird.f32 %v8440_v42 }
 0x4db   : > { %v13903_v34 = vpop.eup %13902 }
 0x4dc   : > { %v8472_v21 = vmul.f32 %v13903_v34, %v8440_v42  ;;  %vm8478_vm0 = vweird.f32 %v13903_v34 }
 0x4dd   : > { %vm8479_vm2 = vmor %vm8477_vm1, %vm8478_vm0 }
 0x4de   : > { %v8473_v30 = vmul.f32 %v13903_v34, %v8472_v21 }
 0x4e0   : > { %v8474_v19 = vmul.f32 0.5, %v8473_v30 }
 0x4e2   : > { %v8475_v53 = vsub.f32 1.5, %v8474_v19 }
 0x4e4   : > { %v8476_v14 = vmul.f32 %v13903_v34, %v8475_v53 }
 0x4e6   : > { %v8480_v1 = vsel %vm8479_vm2, %v13903_v34, %v8476_v14 }
 0x4e7   : > { %v8484_v8 = vmul.f32 %v8480_v1, %v8384_v24  ;;  %v8488_v6 = vmul.f32 %v8480_v1, %v8388_v39 }
 0x4e9   : > { %vm8492_vm3 = vcmp.ge.f32.partialorder %v8484_v8, 0.0  ;;  %v8500_v16 = vmul.f32 0.2, %v8484_v8  ;;  %vm8496_vm4 = vcmp.ge.f32.partialorder %v8488_v6, 0.0  ;;  %v8504_v29 = vmul.f32 0.2, %v8488_v6 }
 0x4eb   : > { %v8508_v13 = vsel %vm8492_vm3, %v8484_v8, %v8500_v16  ;;  %v8512_v17 = vsel %vm8496_vm4, %v8488_v6, %v8504_v29 }
 0x4ec   : > { %v8524_v62 = vmul.f32 %v8516_v25, %v8508_v13  ;;  %v8528_v59 = vmul.f32 %v8520_v41, %v8512_v17 }
 0x4ee   : > { %v8531_v22 = vadd.f32 %v20689_v52, %v8524_v62  ;;  %v8536_v26 = vadd.f32 %v20692_v23, %v8528_v59 }
 0x4f0   : > { %8532 = vadd.xlane.f32.xlu0 %v8531_v22 }
 0x4f8   : > { %8537 = vadd.xlane.f32.xlu0 %v8536_v26 }
 0x563   : > { %v8533_v48 = vpop.xlane.xlu0 %8532 }
 0x56b   : > { %v8538_v47 = vpop.xlane.xlu0 %8537 }
 0x56c   : > { %v8539_v38 = vadd.f32 %v8538_v47, %v8533_v48 }
 0x56e   : > { %v8540_v37 = vrot.slane %v8539_v38, 4 }
 0x570   : > { %v8541_v27 = vadd.f32 %v8540_v37, %v8539_v38 }
 0x572   : > { %v8542_v7 = vrot.slane %v8541_v27, 2 }
 0x574   : > { %v8543_v46 = vadd.f32 %v8542_v7, %v8541_v27 }
 0x576   : > { %v8544_v32 = vrot.slane %v8543_v46, 1 }
 0x578   : > { %v8545_v20 = vadd.f32 %v8544_v32, %v8543_v46 }
 0x57a   : > { %v8546_v33 = vmul.f32 0.25, %v8545_v20 }
 0x57c   : > { %8548 = vst.msk [vmem:[%s193_s27] sm:$0x1] %vm8547_vm5, %v8546_v33 }
 0x57d PF: > { %s14_s15 = sadd.s32 1, %s13913_s15  }
 0x57e   : > { %p11_p4 = scmp.ge.s32.totalorder %s14_s15, 4  }
 0x580   :  { %13 = sbr.rel (!%p11_p4) target bundleno = 1 (0x1), region = 66 }

</bundles_post_ra>
